<compile_context>
chip_gen: v7x
topology: tpu7x:2x2x1
jax: 0.10.0
libtpu: 0.0.40
codegen_flags: <defaults>
</compile_context>

<pallas_src>
import numpy as np
import jax
import jax.numpy as jnp
from jax import lax
from jax.experimental import pallas as pl
from jax.experimental.pallas import tpu as pltpu

TB = 32  # batch tile (multiple of 8/16 keeps every in-kernel reshape aligned)


# -----------------------------------------------------------------------------
# Fused Pallas kernel: conv1+relu+pool -> conv2+relu+pool -> fc1+relu -> fc2
# -----------------------------------------------------------------------------
def _ocnn_kernel(p1_ref, w1_ref, b1_ref, w2_ref, b2_ref,
                 wf1_ref, bf1_ref, wf2_ref, bf2_ref, out_ref):
    """Forward pass for one batch tile of TB images.

    p1_ref : (36, TB, 36) bf16  conv1 patches: [u*6+v, b, tr*6+tc] = x[b,4u+tr,4v+tc]
    w1_ref : (36, 512)    bf16  conv1 weights; lanes = cand*128 + phase*32 + c
    b1_ref : (1, 512)     f32
    w2_ref : (512, 256)   bf16  conv2 weights on 4x4 union patches; lanes = cand*64 + cout
    b2_ref : (1, 256)     f32
    wf1_ref: (25, 64, 128)bf16  fc1 weights, row-block k = pooled2 position (i*5+j)
    bf1_ref: (1, 128)     f32
    wf2_ref: (128, 128)   bf16  fc2 weights zero-padded to 128 output lanes
    bf2_ref: (1, 128)     f32
    out_ref: (TB, 128)    f32   logits live in lanes 0..9 (lane-dense store)
    """
    # ---------------- conv1 + bias + relu + 2x2 maxpool ----------------------
    # One MXU matmul; N lanes hold 4 pool candidates x 4 phases x 32 channels.
    lhs1 = p1_ref[...].reshape(36 * TB, 36)                       # aligned leading merge
    y1 = jnp.dot(lhs1, w1_ref[...], preferred_element_type=jnp.float32)  # (36TB, 512)
    y1 = jnp.maximum(y1 + b1_ref[...], 0.0)
    # pool over the 4 candidates: 4 vreg-aligned 128-lane slabs
    p1c = jnp.maximum(jnp.maximum(y1[:, 0:128], y1[:, 128:256]),
                      jnp.maximum(y1[:, 256:384], y1[:, 384:512]))        # (36TB, 128)
    p1c = p1c.astype(jnp.bfloat16).reshape(6, 6, TB, 128)          # lanes = phase*32 + c

    # ---------------- conv2: vreg-aligned in-VMEM im2col + matmul ------------
    # Each pooled2 position (i,j) needs the 4x4 pooled1 union patch; with the
    # phase-in-lanes layout that is exactly 4 slabs of 128 lanes each.
    slabs = [p1c[ri:ri + 5, rj:rj + 5].reshape(25 * TB, 128)
             for ri in range(2) for rj in range(2)]
    lhs2 = jnp.concatenate(slabs, axis=-1)                         # (25TB, 512) bf16
    y2 = jnp.dot(lhs2, w2_ref[...], preferred_element_type=jnp.float32)   # (25TB, 256)
    y2 = jnp.maximum(y2 + b2_ref[...], 0.0)
    pooled2 = jnp.maximum(jnp.maximum(y2[:, 0:64], y2[:, 64:128]),
                          jnp.maximum(y2[:, 128:192], y2[:, 192:256]))    # (25TB, 64)
    p2 = pooled2.astype(jnp.bfloat16).reshape(25, TB, 64)          # (i*5+j, b, cout)

    # ---------------- fc1 + relu (25 accumulated matmuls, no feat concat) ----
    h = jnp.zeros((TB, 128), jnp.float32)
    for k in range(25):
        h = h + jnp.dot(p2[k], wf1_ref[k], preferred_element_type=jnp.float32)
    h = jnp.maximum(h + bf1_ref[...], 0.0)                         # (TB, 128)

    # ---------------- fc2 (bf16, zero-padded to 128 lanes) -------------------
    out_ref[...] = jnp.dot(h.astype(jnp.bfloat16), wf2_ref[...],
                           preferred_element_type=jnp.float32) + bf2_ref[...]


# -----------------------------------------------------------------------------
# Plain-JAX glue: conv1 im2col (6x6 input union patches at stride 4), bf16
# -----------------------------------------------------------------------------
def build_patches1(xh, b_pad):
    """xh: (B, 28, 28) -> (36, b_pad, 36) bf16 patches in the kernel's layout."""
    B = xh.shape[0]
    if b_pad != B:
        xh = jnp.pad(xh, ((0, b_pad - B), (0, 0), (0, 0)))
    taps = [xh[:, tr:tr + 21:4, tc:tc + 21:4]                      # (b_pad, 6, 6)
            for tr in range(6) for tc in range(6)]
    p = jnp.stack(taps, axis=-1).reshape(b_pad, 36, 36)            # (b, u*6+v, tap)
    return jnp.transpose(p, (1, 0, 2)).astype(jnp.bfloat16)        # (36, b_pad, 36)


# -----------------------------------------------------------------------------
# Forward wrapper
# -----------------------------------------------------------------------------
def ocnn_forward(x, params):
    """x: (B, 1, 28, 28) f32 NCHW -> (B, 10) logits."""
    B = x.shape[0]
    b_pad = ((B + TB - 1) // TB) * TB
    grid = (b_pad // TB,)

    p1 = build_patches1(x[:, 0, :, :], b_pad)                      # (36, b_pad, 36) bf16

    const2 = lambda g: (0, 0)
    const3 = lambda g: (0, 0, 0)
    out_full = pl.pallas_call(
        _ocnn_kernel,
        out_shape=jax.ShapeDtypeStruct((b_pad, 128), jnp.float32),
        grid=grid,
        in_specs=[
            pl.BlockSpec((36, TB, 36), lambda g: (0, g, 0)),
            pl.BlockSpec((36, 512), const2),
            pl.BlockSpec((1, 512), const2),
            pl.BlockSpec((512, 256), const2),
            pl.BlockSpec((1, 256), const2),
            pl.BlockSpec((25, 64, 128), const3),
            pl.BlockSpec((1, 128), const2),
            pl.BlockSpec((128, 128), const2),
            pl.BlockSpec((1, 128), const2),
        ],
        out_specs=pl.BlockSpec((TB, 128), lambda g: (g, 0)),
        compiler_params=pltpu.CompilerParams(
            dimension_semantics=("parallel",),
            vmem_limit_bytes=48 * 1024 * 1024),
    )(p1, params["w1"], params["b1"], params["w2"], params["b2"],
      params["wf1"], params["bf1"], params["wf2"], params["bf2"])
    return out_full[:B, :10]


# -----------------------------------------------------------------------------
# Parameter packing (pool-folded conv weights, blocked fc1, padded bf16 fc2)
# -----------------------------------------------------------------------------
def pack_params(raw):
    # conv1: w1[tr*6+tc, cand*128 + phase*32 + c] = conv1_w[c, 0, ky, kx]
    #   with tr = 2*pi + di + ky, tc = 2*pj + dj + kx, cand=(di,dj), phase=(pi,pj)
    c1 = np.asarray(raw["conv1_w"], np.float32)                     # (32,1,3,3) OIHW
    w1 = np.zeros((36, 512), np.float32)
    for pi in range(2):
        for pj in range(2):
            for di in range(2):
                for dj in range(2):
                    lane0 = (di * 2 + dj) * 128 + (pi * 2 + pj) * 32
                    for ky in range(3):
                        for kx in range(3):
                            tr, tc = 2 * pi + di + ky, 2 * pj + dj + kx
                            w1[tr * 6 + tc, lane0:lane0 + 32] = c1[:, 0, ky, kx]
    b1 = np.tile(np.asarray(raw["conv1_b"], np.float32), 16).reshape(1, 512)

    # conv2: rows = (ri*2+rj)*128 + (pi*2+pj)*32 + cin  (4x4 union tap = (2ri+pi, 2rj+pj))
    #        cols = (di*2+dj)*64 + cout  (pool candidate), tap = (di+ky, dj+kx)
    c2 = np.asarray(raw["conv2_w"], np.float32)                     # (64,32,3,3)
    w2 = np.zeros((512, 256), np.float32)
    for di in range(2):
        for dj in range(2):
            col0 = (di * 2 + dj) * 64
            for ky in range(3):
                for kx in range(3):
                    rr, cc = di + ky, dj + kx
                    ri, pi = rr // 2, rr % 2
                    rj, pj = cc // 2, cc % 2
                    row0 = (ri * 2 + rj) * 128 + (pi * 2 + pj) * 32
                    w2[row0:row0 + 32, col0:col0 + 64] = c2[:, :, ky, kx].T  # (cin,cout)
    b2 = np.tile(np.asarray(raw["conv2_b"], np.float32), 4).reshape(1, 256)

    # fc1: row-block k = pooled2 position (i*5+j), rows inside block = cout
    # (matches PyTorch's NCHW flatten index cout*25 + i*5 + j)
    f1 = np.asarray(raw["fc1_w"], np.float32).reshape(128, 64, 5, 5)  # (n, c, i, j)
    wf1 = np.transpose(f1, (2, 3, 1, 0)).reshape(25, 64, 128)
    bf1 = np.asarray(raw["fc1_b"], np.float32).reshape(1, 128)

    # fc2: zero-pad output dim to 128 for an unmasked (lane-dense) store; bf16
    wf2 = np.zeros((128, 128), np.float32)
    wf2[:, :10] = np.asarray(raw["fc2_w"], np.float32).T
    bf2 = np.zeros((1, 128), np.float32)
    bf2[0, :10] = np.asarray(raw["fc2_b"], np.float32)

    return {
        "w1": jnp.asarray(w1, jnp.bfloat16), "b1": jnp.asarray(b1),
        "w2": jnp.asarray(w2, jnp.bfloat16), "b2": jnp.asarray(b2),
        "wf1": jnp.asarray(wf1, jnp.bfloat16), "bf1": jnp.asarray(bf1),
        "wf2": jnp.asarray(wf2, jnp.bfloat16), "bf2": jnp.asarray(bf2),
    }


def init_params(key):
    ks = jax.random.split(key, 8)
    raw = {
        "conv1_w": 0.2 * jax.random.normal(ks[0], (32, 1, 3, 3), jnp.float32),   # OIHW
        "conv1_b": 0.1 * jax.random.normal(ks[1], (32,), jnp.float32),
        "conv2_w": 0.05 * jax.random.normal(ks[2], (64, 32, 3, 3), jnp.float32),  # OIHW
        "conv2_b": 0.1 * jax.random.normal(ks[3], (64,), jnp.float32),
        "fc1_w": 0.02 * jax.random.normal(ks[4], (128, 1600), jnp.float32),
        "fc1_b": 0.1 * jax.random.normal(ks[5], (128,), jnp.float32),
        "fc2_w": 0.05 * jax.random.normal(ks[6], (10, 128), jnp.float32),
        "fc2_b": 0.1 * jax.random.normal(ks[7], (10,), jnp.float32),
    }
    return raw, pack_params(raw)


# -----------------------------------------------------------------------------
# Pure-JAX reference (matches the PyTorch module)
# -----------------------------------------------------------------------------
def ocnn_reference(x, raw):
    dn = ("NCHW", "OIHW", "NCHW")
    y = lax.conv_general_dilated(x, raw["conv1_w"], (1, 1), "VALID",
                                 dimension_numbers=dn)
    y = jnp.maximum(y + raw["conv1_b"][None, :, None, None], 0.0)
    y = lax.reduce_window(y, -jnp.inf, lax.max, (1, 1, 2, 2), (1, 1, 2, 2), "VALID")
    y = lax.conv_general_dilated(y, raw["conv2_w"], (1, 1), "VALID",
                                 dimension_numbers=dn)
    y = jnp.maximum(y + raw["conv2_b"][None, :, None, None], 0.0)
    y = lax.reduce_window(y, -jnp.inf, lax.max, (1, 1, 2, 2), (1, 1, 2, 2), "VALID")
    y = y.reshape(x.shape[0], -1)
    y = jnp.maximum(y @ raw["fc1_w"].T + raw["fc1_b"], 0.0)
    return y @ raw["fc2_w"].T + raw["fc2_b"]


if __name__ == "__main__":
    key = jax.random.PRNGKey(0)
    kx_, kp = jax.random.split(key)
    raw, params = init_params(kp)

    # Input implied by fc1 (64*5*5): 28x28 single-channel images.
    # B=40 with TB=32: exercises batch padding and a 2-step "parallel" grid
    # (keeps both TensorCores busy on v7x).
    B = 40
    x = jax.random.normal(kx_, (B, 1, 28, 28), jnp.float32)

    fwd = jax.jit(ocnn_forward)
    out = jax.block_until_ready(fwd(x, params))
    ref = jax.block_until_ready(ocnn_reference(x, raw))

    assert out.shape == (B, 10)
    err = float(jnp.max(jnp.abs(out - ref)))
    assert jnp.allclose(out, ref, rtol=2e-2, atol=2e-2), f"max abs err {err}"
    print("KERNEL_OK")
</pallas_src>

<mosaic_0001>
module attributes {stable_mosaic.version = 11 : i64} {
  func.func @_ocnn_kernel(%arg0: i32, %arg1: memref<36x32x36xbf16, #tpu.memory_space<vmem>>, %arg2: memref<36x512xbf16, #tpu.memory_space<vmem>>, %arg3: memref<1x512xf32, #tpu.memory_space<vmem>>, %arg4: memref<512x256xbf16, #tpu.memory_space<vmem>>, %arg5: memref<1x256xf32, #tpu.memory_space<vmem>>, %arg6: memref<25x64x128xbf16, #tpu.memory_space<vmem>>, %arg7: memref<1x128xf32, #tpu.memory_space<vmem>>, %arg8: memref<128x128xbf16, #tpu.memory_space<vmem>>, %arg9: memref<1x128xf32, #tpu.memory_space<vmem>>, %arg10: memref<32x128xf32, #tpu.memory_space<vmem>>) attributes {dimension_semantics = [#tpu.dimension_semantics<parallel>], iteration_bounds = array<i64: 2>, scalar_prefetch = 0 : i64, scratch_operands = 0 : i64, tpu.core_type = #tpu.core_type<tc>, window_params = [{transform_indices = @transform_0, window_bounds = array<i64: 36, 32, 36>}, {pipeline_mode = #tpu.pipeline_mode<synchronous>, transform_indices = @transform_1, window_bounds = array<i64: 36, 512>}, {pipeline_mode = #tpu.pipeline_mode<synchronous>, transform_indices = @transform_2, window_bounds = array<i64: 1, 512>}, {pipeline_mode = #tpu.pipeline_mode<synchronous>, transform_indices = @transform_3, window_bounds = array<i64: 512, 256>}, {pipeline_mode = #tpu.pipeline_mode<synchronous>, transform_indices = @transform_4, window_bounds = array<i64: 1, 256>}, {pipeline_mode = #tpu.pipeline_mode<synchronous>, transform_indices = @transform_5, window_bounds = array<i64: 25, 64, 128>}, {pipeline_mode = #tpu.pipeline_mode<synchronous>, transform_indices = @transform_6, window_bounds = array<i64: 1, 128>}, {pipeline_mode = #tpu.pipeline_mode<synchronous>, transform_indices = @transform_7, window_bounds = array<i64: 128, 128>}, {pipeline_mode = #tpu.pipeline_mode<synchronous>, transform_indices = @transform_8, window_bounds = array<i64: 1, 128>}, {transform_indices = @transform_9, window_bounds = array<i64: 32, 128>}]} {
    %c0 = arith.constant 0 : index
    %c0_0 = arith.constant 0 : index
    %c0_1 = arith.constant 0 : index
    %0 = vector.load %arg1[%c0, %c0_0, %c0_1] : memref<36x32x36xbf16, #tpu.memory_space<vmem>>, vector<36x32x36xbf16>
    %1 = vector.shape_cast %0 : vector<36x32x36xbf16> to vector<1152x36xbf16>
    %c0_2 = arith.constant 0 : index
    %c0_3 = arith.constant 0 : index
    %2 = vector.load %arg2[%c0_2, %c0_3] : memref<36x512xbf16, #tpu.memory_space<vmem>>, vector<36x512xbf16>
    %cst = arith.constant dense<0.000000e+00> : vector<1152x512xf32>
    %3 = tpu.matmul %1, %2, %cst {dimension_numbers = #tpu.dot_dimension_numbers<[1], [0], [0], [1], [0, 0, 1, 1], [], []>} : vector<1152x36xbf16>, vector<36x512xbf16>, vector<1152x512xf32> -> vector<1152x512xf32>
    %c0_4 = arith.constant 0 : index
    %c0_5 = arith.constant 0 : index
    %4 = vector.load %arg3[%c0_4, %c0_5] : memref<1x512xf32, #tpu.memory_space<vmem>>, vector<1x512xf32>
    %5 = vector.broadcast %4 : vector<1x512xf32> to vector<1152x512xf32>
    %6 = arith.addf %3, %5 : vector<1152x512xf32>
    %cst_6 = arith.constant 0.000000e+00 : f32
    %7 = vector.broadcast %cst_6 : f32 to vector<1152x512xf32>
    %8 = arith.maximumf %6, %7 : vector<1152x512xf32>
    %9 = vector.extract_strided_slice %8 {offsets = [0, 0], sizes = [1152, 128], strides = [1, 1]} : vector<1152x512xf32> to vector<1152x128xf32>
    %10 = vector.extract_strided_slice %8 {offsets = [0, 128], sizes = [1152, 128], strides = [1, 1]} : vector<1152x512xf32> to vector<1152x128xf32>
    %11 = arith.maximumf %9, %10 : vector<1152x128xf32>
    %12 = vector.extract_strided_slice %8 {offsets = [0, 256], sizes = [1152, 128], strides = [1, 1]} : vector<1152x512xf32> to vector<1152x128xf32>
    %13 = vector.extract_strided_slice %8 {offsets = [0, 384], sizes = [1152, 128], strides = [1, 1]} : vector<1152x512xf32> to vector<1152x128xf32>
    %14 = arith.maximumf %12, %13 : vector<1152x128xf32>
    %15 = arith.maximumf %11, %14 : vector<1152x128xf32>
    %16 = arith.truncf %15 : vector<1152x128xf32> to vector<1152x128xbf16>
    %17 = vector.shape_cast %16 : vector<1152x128xbf16> to vector<6x6x32x128xbf16>
    %18 = vector.extract_strided_slice %17 {offsets = [0, 0, 0, 0], sizes = [5, 5, 32, 128], strides = [1, 1, 1, 1]} : vector<6x6x32x128xbf16> to vector<5x5x32x128xbf16>
    %19 = vector.shape_cast %18 : vector<5x5x32x128xbf16> to vector<800x128xbf16>
    %20 = vector.extract_strided_slice %17 {offsets = [0, 1, 0, 0], sizes = [5, 5, 32, 128], strides = [1, 1, 1, 1]} : vector<6x6x32x128xbf16> to vector<5x5x32x128xbf16>
    %21 = vector.shape_cast %20 : vector<5x5x32x128xbf16> to vector<800x128xbf16>
    %22 = vector.extract_strided_slice %17 {offsets = [1, 0, 0, 0], sizes = [5, 5, 32, 128], strides = [1, 1, 1, 1]} : vector<6x6x32x128xbf16> to vector<5x5x32x128xbf16>
    %23 = vector.shape_cast %22 : vector<5x5x32x128xbf16> to vector<800x128xbf16>
    %24 = vector.extract_strided_slice %17 {offsets = [1, 1, 0, 0], sizes = [5, 5, 32, 128], strides = [1, 1, 1, 1]} : vector<6x6x32x128xbf16> to vector<5x5x32x128xbf16>
    %25 = vector.shape_cast %24 : vector<5x5x32x128xbf16> to vector<800x128xbf16>
    %26 = tpu.concatenate %19, %21, %23, %25 in 1 : vector<800x128xbf16>, vector<800x128xbf16>, vector<800x128xbf16>, vector<800x128xbf16> -> vector<800x512xbf16>
    %c0_7 = arith.constant 0 : index
    %c0_8 = arith.constant 0 : index
    %27 = vector.load %arg4[%c0_7, %c0_8] : memref<512x256xbf16, #tpu.memory_space<vmem>>, vector<512x256xbf16>
    %cst_9 = arith.constant dense<0.000000e+00> : vector<800x256xf32>
    %28 = tpu.matmul %26, %27, %cst_9 {dimension_numbers = #tpu.dot_dimension_numbers<[1], [0], [0], [1], [0, 0, 1, 1], [], []>} : vector<800x512xbf16>, vector<512x256xbf16>, vector<800x256xf32> -> vector<800x256xf32>
    %c0_10 = arith.constant 0 : index
    %c0_11 = arith.constant 0 : index
    %29 = vector.load %arg5[%c0_10, %c0_11] : memref<1x256xf32, #tpu.memory_space<vmem>>, vector<1x256xf32>
    %30 = vector.broadcast %29 : vector<1x256xf32> to vector<800x256xf32>
    %31 = arith.addf %28, %30 : vector<800x256xf32>
    %cst_12 = arith.constant 0.000000e+00 : f32
    %32 = vector.broadcast %cst_12 : f32 to vector<800x256xf32>
    %33 = arith.maximumf %31, %32 : vector<800x256xf32>
    %34 = vector.extract_strided_slice %33 {offsets = [0, 0], sizes = [800, 64], strides = [1, 1]} : vector<800x256xf32> to vector<800x64xf32>
    %35 = vector.extract_strided_slice %33 {offsets = [0, 64], sizes = [800, 64], strides = [1, 1]} : vector<800x256xf32> to vector<800x64xf32>
    %36 = arith.maximumf %34, %35 : vector<800x64xf32>
    %37 = vector.extract_strided_slice %33 {offsets = [0, 128], sizes = [800, 64], strides = [1, 1]} : vector<800x256xf32> to vector<800x64xf32>
    %38 = vector.extract_strided_slice %33 {offsets = [0, 192], sizes = [800, 64], strides = [1, 1]} : vector<800x256xf32> to vector<800x64xf32>
    %39 = arith.maximumf %37, %38 : vector<800x64xf32>
    %40 = arith.maximumf %36, %39 : vector<800x64xf32>
    %41 = arith.truncf %40 : vector<800x64xf32> to vector<800x64xbf16>
    %42 = vector.shape_cast %41 : vector<800x64xbf16> to vector<25x32x64xbf16>
    %cst_13 = arith.constant 0.000000e+00 : f32
    %43 = vector.broadcast %cst_13 : f32 to vector<32x128xf32>
    %44 = vector.extract_strided_slice %42 {offsets = [0, 0, 0], sizes = [1, 32, 64], strides = [1, 1, 1]} : vector<25x32x64xbf16> to vector<1x32x64xbf16>
    %45 = vector.shape_cast %44 : vector<1x32x64xbf16> to vector<32x64xbf16>
    %c0_14 = arith.constant 0 : index
    %c0_15 = arith.constant 0 : index
    %c0_16 = arith.constant 0 : index
    %46 = vector.load %arg6[%c0_14, %c0_15, %c0_16] : memref<25x64x128xbf16, #tpu.memory_space<vmem>>, vector<1x64x128xbf16>
    %47 = vector.shape_cast %46 : vector<1x64x128xbf16> to vector<64x128xbf16>
    %cst_17 = arith.constant dense<0.000000e+00> : vector<32x128xf32>
    %48 = tpu.matmul %45, %47, %cst_17 {dimension_numbers = #tpu.dot_dimension_numbers<[1], [0], [0], [1], [0, 0, 1, 1], [], []>} : vector<32x64xbf16>, vector<64x128xbf16>, vector<32x128xf32> -> vector<32x128xf32>
    %49 = arith.addf %43, %48 : vector<32x128xf32>
    %50 = vector.extract_strided_slice %42 {offsets = [1, 0, 0], sizes = [1, 32, 64], strides = [1, 1, 1]} : vector<25x32x64xbf16> to vector<1x32x64xbf16>
    %51 = vector.shape_cast %50 : vector<1x32x64xbf16> to vector<32x64xbf16>
    %c1 = arith.constant 1 : index
    %c0_18 = arith.constant 0 : index
    %c0_19 = arith.constant 0 : index
    %52 = vector.load %arg6[%c1, %c0_18, %c0_19] : memref<25x64x128xbf16, #tpu.memory_space<vmem>>, vector<1x64x128xbf16>
    %53 = vector.shape_cast %52 : vector<1x64x128xbf16> to vector<64x128xbf16>
    %cst_20 = arith.constant dense<0.000000e+00> : vector<32x128xf32>
    %54 = tpu.matmul %51, %53, %cst_20 {dimension_numbers = #tpu.dot_dimension_numbers<[1], [0], [0], [1], [0, 0, 1, 1], [], []>} : vector<32x64xbf16>, vector<64x128xbf16>, vector<32x128xf32> -> vector<32x128xf32>
    %55 = arith.addf %49, %54 : vector<32x128xf32>
    %56 = vector.extract_strided_slice %42 {offsets = [2, 0, 0], sizes = [1, 32, 64], strides = [1, 1, 1]} : vector<25x32x64xbf16> to vector<1x32x64xbf16>
    %57 = vector.shape_cast %56 : vector<1x32x64xbf16> to vector<32x64xbf16>
    %c2 = arith.constant 2 : index
    %c0_21 = arith.constant 0 : index
    %c0_22 = arith.constant 0 : index
    %58 = vector.load %arg6[%c2, %c0_21, %c0_22] : memref<25x64x128xbf16, #tpu.memory_space<vmem>>, vector<1x64x128xbf16>
    %59 = vector.shape_cast %58 : vector<1x64x128xbf16> to vector<64x128xbf16>
    %cst_23 = arith.constant dense<0.000000e+00> : vector<32x128xf32>
    %60 = tpu.matmul %57, %59, %cst_23 {dimension_numbers = #tpu.dot_dimension_numbers<[1], [0], [0], [1], [0, 0, 1, 1], [], []>} : vector<32x64xbf16>, vector<64x128xbf16>, vector<32x128xf32> -> vector<32x128xf32>
    %61 = arith.addf %55, %60 : vector<32x128xf32>
    %62 = vector.extract_strided_slice %42 {offsets = [3, 0, 0], sizes = [1, 32, 64], strides = [1, 1, 1]} : vector<25x32x64xbf16> to vector<1x32x64xbf16>
    %63 = vector.shape_cast %62 : vector<1x32x64xbf16> to vector<32x64xbf16>
    %c3 = arith.constant 3 : index
    %c0_24 = arith.constant 0 : index
    %c0_25 = arith.constant 0 : index
    %64 = vector.load %arg6[%c3, %c0_24, %c0_25] : memref<25x64x128xbf16, #tpu.memory_space<vmem>>, vector<1x64x128xbf16>
    %65 = vector.shape_cast %64 : vector<1x64x128xbf16> to vector<64x128xbf16>
    %cst_26 = arith.constant dense<0.000000e+00> : vector<32x128xf32>
    %66 = tpu.matmul %63, %65, %cst_26 {dimension_numbers = #tpu.dot_dimension_numbers<[1], [0], [0], [1], [0, 0, 1, 1], [], []>} : vector<32x64xbf16>, vector<64x128xbf16>, vector<32x128xf32> -> vector<32x128xf32>
    %67 = arith.addf %61, %66 : vector<32x128xf32>
    %68 = vector.extract_strided_slice %42 {offsets = [4, 0, 0], sizes = [1, 32, 64], strides = [1, 1, 1]} : vector<25x32x64xbf16> to vector<1x32x64xbf16>
    %69 = vector.shape_cast %68 : vector<1x32x64xbf16> to vector<32x64xbf16>
    %c4 = arith.constant 4 : index
    %c0_27 = arith.constant 0 : index
    %c0_28 = arith.constant 0 : index
    %70 = vector.load %arg6[%c4, %c0_27, %c0_28] : memref<25x64x128xbf16, #tpu.memory_space<vmem>>, vector<1x64x128xbf16>
    %71 = vector.shape_cast %70 : vector<1x64x128xbf16> to vector<64x128xbf16>
    %cst_29 = arith.constant dense<0.000000e+00> : vector<32x128xf32>
    %72 = tpu.matmul %69, %71, %cst_29 {dimension_numbers = #tpu.dot_dimension_numbers<[1], [0], [0], [1], [0, 0, 1, 1], [], []>} : vector<32x64xbf16>, vector<64x128xbf16>, vector<32x128xf32> -> vector<32x128xf32>
    %73 = arith.addf %67, %72 : vector<32x128xf32>
    %74 = vector.extract_strided_slice %42 {offsets = [5, 0, 0], sizes = [1, 32, 64], strides = [1, 1, 1]} : vector<25x32x64xbf16> to vector<1x32x64xbf16>
    %75 = vector.shape_cast %74 : vector<1x32x64xbf16> to vector<32x64xbf16>
    %c5 = arith.constant 5 : index
    %c0_30 = arith.constant 0 : index
    %c0_31 = arith.constant 0 : index
    %76 = vector.load %arg6[%c5, %c0_30, %c0_31] : memref<25x64x128xbf16, #tpu.memory_space<vmem>>, vector<1x64x128xbf16>
    %77 = vector.shape_cast %76 : vector<1x64x128xbf16> to vector<64x128xbf16>
    %cst_32 = arith.constant dense<0.000000e+00> : vector<32x128xf32>
    %78 = tpu.matmul %75, %77, %cst_32 {dimension_numbers = #tpu.dot_dimension_numbers<[1], [0], [0], [1], [0, 0, 1, 1], [], []>} : vector<32x64xbf16>, vector<64x128xbf16>, vector<32x128xf32> -> vector<32x128xf32>
    %79 = arith.addf %73, %78 : vector<32x128xf32>
    %80 = vector.extract_strided_slice %42 {offsets = [6, 0, 0], sizes = [1, 32, 64], strides = [1, 1, 1]} : vector<25x32x64xbf16> to vector<1x32x64xbf16>
    %81 = vector.shape_cast %80 : vector<1x32x64xbf16> to vector<32x64xbf16>
    %c6 = arith.constant 6 : index
    %c0_33 = arith.constant 0 : index
    %c0_34 = arith.constant 0 : index
    %82 = vector.load %arg6[%c6, %c0_33, %c0_34] : memref<25x64x128xbf16, #tpu.memory_space<vmem>>, vector<1x64x128xbf16>
    %83 = vector.shape_cast %82 : vector<1x64x128xbf16> to vector<64x128xbf16>
    %cst_35 = arith.constant dense<0.000000e+00> : vector<32x128xf32>
    %84 = tpu.matmul %81, %83, %cst_35 {dimension_numbers = #tpu.dot_dimension_numbers<[1], [0], [0], [1], [0, 0, 1, 1], [], []>} : vector<32x64xbf16>, vector<64x128xbf16>, vector<32x128xf32> -> vector<32x128xf32>
    %85 = arith.addf %79, %84 : vector<32x128xf32>
    %86 = vector.extract_strided_slice %42 {offsets = [7, 0, 0], sizes = [1, 32, 64], strides = [1, 1, 1]} : vector<25x32x64xbf16> to vector<1x32x64xbf16>
    %87 = vector.shape_cast %86 : vector<1x32x64xbf16> to vector<32x64xbf16>
    %c7 = arith.constant 7 : index
    %c0_36 = arith.constant 0 : index
    %c0_37 = arith.constant 0 : index
    %88 = vector.load %arg6[%c7, %c0_36, %c0_37] : memref<25x64x128xbf16, #tpu.memory_space<vmem>>, vector<1x64x128xbf16>
    %89 = vector.shape_cast %88 : vector<1x64x128xbf16> to vector<64x128xbf16>
    %cst_38 = arith.constant dense<0.000000e+00> : vector<32x128xf32>
    %90 = tpu.matmul %87, %89, %cst_38 {dimension_numbers = #tpu.dot_dimension_numbers<[1], [0], [0], [1], [0, 0, 1, 1], [], []>} : vector<32x64xbf16>, vector<64x128xbf16>, vector<32x128xf32> -> vector<32x128xf32>
    %91 = arith.addf %85, %90 : vector<32x128xf32>
    %92 = vector.extract_strided_slice %42 {offsets = [8, 0, 0], sizes = [1, 32, 64], strides = [1, 1, 1]} : vector<25x32x64xbf16> to vector<1x32x64xbf16>
    %93 = vector.shape_cast %92 : vector<1x32x64xbf16> to vector<32x64xbf16>
    %c8 = arith.constant 8 : index
    %c0_39 = arith.constant 0 : index
    %c0_40 = arith.constant 0 : index
    %94 = vector.load %arg6[%c8, %c0_39, %c0_40] : memref<25x64x128xbf16, #tpu.memory_space<vmem>>, vector<1x64x128xbf16>
    %95 = vector.shape_cast %94 : vector<1x64x128xbf16> to vector<64x128xbf16>
    %cst_41 = arith.constant dense<0.000000e+00> : vector<32x128xf32>
    %96 = tpu.matmul %93, %95, %cst_41 {dimension_numbers = #tpu.dot_dimension_numbers<[1], [0], [0], [1], [0, 0, 1, 1], [], []>} : vector<32x64xbf16>, vector<64x128xbf16>, vector<32x128xf32> -> vector<32x128xf32>
    %97 = arith.addf %91, %96 : vector<32x128xf32>
    %98 = vector.extract_strided_slice %42 {offsets = [9, 0, 0], sizes = [1, 32, 64], strides = [1, 1, 1]} : vector<25x32x64xbf16> to vector<1x32x64xbf16>
    %99 = vector.shape_cast %98 : vector<1x32x64xbf16> to vector<32x64xbf16>
    %c9 = arith.constant 9 : index
    %c0_42 = arith.constant 0 : index
    %c0_43 = arith.constant 0 : index
    %100 = vector.load %arg6[%c9, %c0_42, %c0_43] : memref<25x64x128xbf16, #tpu.memory_space<vmem>>, vector<1x64x128xbf16>
    %101 = vector.shape_cast %100 : vector<1x64x128xbf16> to vector<64x128xbf16>
    %cst_44 = arith.constant dense<0.000000e+00> : vector<32x128xf32>
    %102 = tpu.matmul %99, %101, %cst_44 {dimension_numbers = #tpu.dot_dimension_numbers<[1], [0], [0], [1], [0, 0, 1, 1], [], []>} : vector<32x64xbf16>, vector<64x128xbf16>, vector<32x128xf32> -> vector<32x128xf32>
    %103 = arith.addf %97, %102 : vector<32x128xf32>
    %104 = vector.extract_strided_slice %42 {offsets = [10, 0, 0], sizes = [1, 32, 64], strides = [1, 1, 1]} : vector<25x32x64xbf16> to vector<1x32x64xbf16>
    %105 = vector.shape_cast %104 : vector<1x32x64xbf16> to vector<32x64xbf16>
    %c10 = arith.constant 10 : index
    %c0_45 = arith.constant 0 : index
    %c0_46 = arith.constant 0 : index
    %106 = vector.load %arg6[%c10, %c0_45, %c0_46] : memref<25x64x128xbf16, #tpu.memory_space<vmem>>, vector<1x64x128xbf16>
    %107 = vector.shape_cast %106 : vector<1x64x128xbf16> to vector<64x128xbf16>
    %cst_47 = arith.constant dense<0.000000e+00> : vector<32x128xf32>
    %108 = tpu.matmul %105, %107, %cst_47 {dimension_numbers = #tpu.dot_dimension_numbers<[1], [0], [0], [1], [0, 0, 1, 1], [], []>} : vector<32x64xbf16>, vector<64x128xbf16>, vector<32x128xf32> -> vector<32x128xf32>
    %109 = arith.addf %103, %108 : vector<32x128xf32>
    %110 = vector.extract_strided_slice %42 {offsets = [11, 0, 0], sizes = [1, 32, 64], strides = [1, 1, 1]} : vector<25x32x64xbf16> to vector<1x32x64xbf16>
    %111 = vector.shape_cast %110 : vector<1x32x64xbf16> to vector<32x64xbf16>
    %c11 = arith.constant 11 : index
    %c0_48 = arith.constant 0 : index
    %c0_49 = arith.constant 0 : index
    %112 = vector.load %arg6[%c11, %c0_48, %c0_49] : memref<25x64x128xbf16, #tpu.memory_space<vmem>>, vector<1x64x128xbf16>
    %113 = vector.shape_cast %112 : vector<1x64x128xbf16> to vector<64x128xbf16>
    %cst_50 = arith.constant dense<0.000000e+00> : vector<32x128xf32>
    %114 = tpu.matmul %111, %113, %cst_50 {dimension_numbers = #tpu.dot_dimension_numbers<[1], [0], [0], [1], [0, 0, 1, 1], [], []>} : vector<32x64xbf16>, vector<64x128xbf16>, vector<32x128xf32> -> vector<32x128xf32>
    %115 = arith.addf %109, %114 : vector<32x128xf32>
    %116 = vector.extract_strided_slice %42 {offsets = [12, 0, 0], sizes = [1, 32, 64], strides = [1, 1, 1]} : vector<25x32x64xbf16> to vector<1x32x64xbf16>
    %117 = vector.shape_cast %116 : vector<1x32x64xbf16> to vector<32x64xbf16>
    %c12 = arith.constant 12 : index
    %c0_51 = arith.constant 0 : index
    %c0_52 = arith.constant 0 : index
    %118 = vector.load %arg6[%c12, %c0_51, %c0_52] : memref<25x64x128xbf16, #tpu.memory_space<vmem>>, vector<1x64x128xbf16>
    %119 = vector.shape_cast %118 : vector<1x64x128xbf16> to vector<64x128xbf16>
    %cst_53 = arith.constant dense<0.000000e+00> : vector<32x128xf32>
    %120 = tpu.matmul %117, %119, %cst_53 {dimension_numbers = #tpu.dot_dimension_numbers<[1], [0], [0], [1], [0, 0, 1, 1], [], []>} : vector<32x64xbf16>, vector<64x128xbf16>, vector<32x128xf32> -> vector<32x128xf32>
    %121 = arith.addf %115, %120 : vector<32x128xf32>
    %122 = vector.extract_strided_slice %42 {offsets = [13, 0, 0], sizes = [1, 32, 64], strides = [1, 1, 1]} : vector<25x32x64xbf16> to vector<1x32x64xbf16>
    %123 = vector.shape_cast %122 : vector<1x32x64xbf16> to vector<32x64xbf16>
    %c13 = arith.constant 13 : index
    %c0_54 = arith.constant 0 : index
    %c0_55 = arith.constant 0 : index
    %124 = vector.load %arg6[%c13, %c0_54, %c0_55] : memref<25x64x128xbf16, #tpu.memory_space<vmem>>, vector<1x64x128xbf16>
    %125 = vector.shape_cast %124 : vector<1x64x128xbf16> to vector<64x128xbf16>
    %cst_56 = arith.constant dense<0.000000e+00> : vector<32x128xf32>
    %126 = tpu.matmul %123, %125, %cst_56 {dimension_numbers = #tpu.dot_dimension_numbers<[1], [0], [0], [1], [0, 0, 1, 1], [], []>} : vector<32x64xbf16>, vector<64x128xbf16>, vector<32x128xf32> -> vector<32x128xf32>
    %127 = arith.addf %121, %126 : vector<32x128xf32>
    %128 = vector.extract_strided_slice %42 {offsets = [14, 0, 0], sizes = [1, 32, 64], strides = [1, 1, 1]} : vector<25x32x64xbf16> to vector<1x32x64xbf16>
    %129 = vector.shape_cast %128 : vector<1x32x64xbf16> to vector<32x64xbf16>
    %c14 = arith.constant 14 : index
    %c0_57 = arith.constant 0 : index
    %c0_58 = arith.constant 0 : index
    %130 = vector.load %arg6[%c14, %c0_57, %c0_58] : memref<25x64x128xbf16, #tpu.memory_space<vmem>>, vector<1x64x128xbf16>
    %131 = vector.shape_cast %130 : vector<1x64x128xbf16> to vector<64x128xbf16>
    %cst_59 = arith.constant dense<0.000000e+00> : vector<32x128xf32>
    %132 = tpu.matmul %129, %131, %cst_59 {dimension_numbers = #tpu.dot_dimension_numbers<[1], [0], [0], [1], [0, 0, 1, 1], [], []>} : vector<32x64xbf16>, vector<64x128xbf16>, vector<32x128xf32> -> vector<32x128xf32>
    %133 = arith.addf %127, %132 : vector<32x128xf32>
    %134 = vector.extract_strided_slice %42 {offsets = [15, 0, 0], sizes = [1, 32, 64], strides = [1, 1, 1]} : vector<25x32x64xbf16> to vector<1x32x64xbf16>
    %135 = vector.shape_cast %134 : vector<1x32x64xbf16> to vector<32x64xbf16>
    %c15 = arith.constant 15 : index
    %c0_60 = arith.constant 0 : index
    %c0_61 = arith.constant 0 : index
    %136 = vector.load %arg6[%c15, %c0_60, %c0_61] : memref<25x64x128xbf16, #tpu.memory_space<vmem>>, vector<1x64x128xbf16>
    %137 = vector.shape_cast %136 : vector<1x64x128xbf16> to vector<64x128xbf16>
    %cst_62 = arith.constant dense<0.000000e+00> : vector<32x128xf32>
    %138 = tpu.matmul %135, %137, %cst_62 {dimension_numbers = #tpu.dot_dimension_numbers<[1], [0], [0], [1], [0, 0, 1, 1], [], []>} : vector<32x64xbf16>, vector<64x128xbf16>, vector<32x128xf32> -> vector<32x128xf32>
    %139 = arith.addf %133, %138 : vector<32x128xf32>
    %140 = vector.extract_strided_slice %42 {offsets = [16, 0, 0], sizes = [1, 32, 64], strides = [1, 1, 1]} : vector<25x32x64xbf16> to vector<1x32x64xbf16>
    %141 = vector.shape_cast %140 : vector<1x32x64xbf16> to vector<32x64xbf16>
    %c16 = arith.constant 16 : index
    %c0_63 = arith.constant 0 : index
    %c0_64 = arith.constant 0 : index
    %142 = vector.load %arg6[%c16, %c0_63, %c0_64] : memref<25x64x128xbf16, #tpu.memory_space<vmem>>, vector<1x64x128xbf16>
    %143 = vector.shape_cast %142 : vector<1x64x128xbf16> to vector<64x128xbf16>
    %cst_65 = arith.constant dense<0.000000e+00> : vector<32x128xf32>
    %144 = tpu.matmul %141, %143, %cst_65 {dimension_numbers = #tpu.dot_dimension_numbers<[1], [0], [0], [1], [0, 0, 1, 1], [], []>} : vector<32x64xbf16>, vector<64x128xbf16>, vector<32x128xf32> -> vector<32x128xf32>
    %145 = arith.addf %139, %144 : vector<32x128xf32>
    %146 = vector.extract_strided_slice %42 {offsets = [17, 0, 0], sizes = [1, 32, 64], strides = [1, 1, 1]} : vector<25x32x64xbf16> to vector<1x32x64xbf16>
    %147 = vector.shape_cast %146 : vector<1x32x64xbf16> to vector<32x64xbf16>
    %c17 = arith.constant 17 : index
    %c0_66 = arith.constant 0 : index
    %c0_67 = arith.constant 0 : index
    %148 = vector.load %arg6[%c17, %c0_66, %c0_67] : memref<25x64x128xbf16, #tpu.memory_space<vmem>>, vector<1x64x128xbf16>
    %149 = vector.shape_cast %148 : vector<1x64x128xbf16> to vector<64x128xbf16>
    %cst_68 = arith.constant dense<0.000000e+00> : vector<32x128xf32>
    %150 = tpu.matmul %147, %149, %cst_68 {dimension_numbers = #tpu.dot_dimension_numbers<[1], [0], [0], [1], [0, 0, 1, 1], [], []>} : vector<32x64xbf16>, vector<64x128xbf16>, vector<32x128xf32> -> vector<32x128xf32>
    %151 = arith.addf %145, %150 : vector<32x128xf32>
    %152 = vector.extract_strided_slice %42 {offsets = [18, 0, 0], sizes = [1, 32, 64], strides = [1, 1, 1]} : vector<25x32x64xbf16> to vector<1x32x64xbf16>
    %153 = vector.shape_cast %152 : vector<1x32x64xbf16> to vector<32x64xbf16>
    %c18 = arith.constant 18 : index
    %c0_69 = arith.constant 0 : index
    %c0_70 = arith.constant 0 : index
    %154 = vector.load %arg6[%c18, %c0_69, %c0_70] : memref<25x64x128xbf16, #tpu.memory_space<vmem>>, vector<1x64x128xbf16>
    %155 = vector.shape_cast %154 : vector<1x64x128xbf16> to vector<64x128xbf16>
    %cst_71 = arith.constant dense<0.000000e+00> : vector<32x128xf32>
    %156 = tpu.matmul %153, %155, %cst_71 {dimension_numbers = #tpu.dot_dimension_numbers<[1], [0], [0], [1], [0, 0, 1, 1], [], []>} : vector<32x64xbf16>, vector<64x128xbf16>, vector<32x128xf32> -> vector<32x128xf32>
    %157 = arith.addf %151, %156 : vector<32x128xf32>
    %158 = vector.extract_strided_slice %42 {offsets = [19, 0, 0], sizes = [1, 32, 64], strides = [1, 1, 1]} : vector<25x32x64xbf16> to vector<1x32x64xbf16>
    %159 = vector.shape_cast %158 : vector<1x32x64xbf16> to vector<32x64xbf16>
    %c19 = arith.constant 19 : index
    %c0_72 = arith.constant 0 : index
    %c0_73 = arith.constant 0 : index
    %160 = vector.load %arg6[%c19, %c0_72, %c0_73] : memref<25x64x128xbf16, #tpu.memory_space<vmem>>, vector<1x64x128xbf16>
    %161 = vector.shape_cast %160 : vector<1x64x128xbf16> to vector<64x128xbf16>
    %cst_74 = arith.constant dense<0.000000e+00> : vector<32x128xf32>
    %162 = tpu.matmul %159, %161, %cst_74 {dimension_numbers = #tpu.dot_dimension_numbers<[1], [0], [0], [1], [0, 0, 1, 1], [], []>} : vector<32x64xbf16>, vector<64x128xbf16>, vector<32x128xf32> -> vector<32x128xf32>
    %163 = arith.addf %157, %162 : vector<32x128xf32>
    %164 = vector.extract_strided_slice %42 {offsets = [20, 0, 0], sizes = [1, 32, 64], strides = [1, 1, 1]} : vector<25x32x64xbf16> to vector<1x32x64xbf16>
    %165 = vector.shape_cast %164 : vector<1x32x64xbf16> to vector<32x64xbf16>
    %c20 = arith.constant 20 : index
    %c0_75 = arith.constant 0 : index
    %c0_76 = arith.constant 0 : index
    %166 = vector.load %arg6[%c20, %c0_75, %c0_76] : memref<25x64x128xbf16, #tpu.memory_space<vmem>>, vector<1x64x128xbf16>
    %167 = vector.shape_cast %166 : vector<1x64x128xbf16> to vector<64x128xbf16>
    %cst_77 = arith.constant dense<0.000000e+00> : vector<32x128xf32>
    %168 = tpu.matmul %165, %167, %cst_77 {dimension_numbers = #tpu.dot_dimension_numbers<[1], [0], [0], [1], [0, 0, 1, 1], [], []>} : vector<32x64xbf16>, vector<64x128xbf16>, vector<32x128xf32> -> vector<32x128xf32>
    %169 = arith.addf %163, %168 : vector<32x128xf32>
    %170 = vector.extract_strided_slice %42 {offsets = [21, 0, 0], sizes = [1, 32, 64], strides = [1, 1, 1]} : vector<25x32x64xbf16> to vector<1x32x64xbf16>
    %171 = vector.shape_cast %170 : vector<1x32x64xbf16> to vector<32x64xbf16>
    %c21 = arith.constant 21 : index
    %c0_78 = arith.constant 0 : index
    %c0_79 = arith.constant 0 : index
    %172 = vector.load %arg6[%c21, %c0_78, %c0_79] : memref<25x64x128xbf16, #tpu.memory_space<vmem>>, vector<1x64x128xbf16>
    %173 = vector.shape_cast %172 : vector<1x64x128xbf16> to vector<64x128xbf16>
    %cst_80 = arith.constant dense<0.000000e+00> : vector<32x128xf32>
    %174 = tpu.matmul %171, %173, %cst_80 {dimension_numbers = #tpu.dot_dimension_numbers<[1], [0], [0], [1], [0, 0, 1, 1], [], []>} : vector<32x64xbf16>, vector<64x128xbf16>, vector<32x128xf32> -> vector<32x128xf32>
    %175 = arith.addf %169, %174 : vector<32x128xf32>
    %176 = vector.extract_strided_slice %42 {offsets = [22, 0, 0], sizes = [1, 32, 64], strides = [1, 1, 1]} : vector<25x32x64xbf16> to vector<1x32x64xbf16>
    %177 = vector.shape_cast %176 : vector<1x32x64xbf16> to vector<32x64xbf16>
    %c22 = arith.constant 22 : index
    %c0_81 = arith.constant 0 : index
    %c0_82 = arith.constant 0 : index
    %178 = vector.load %arg6[%c22, %c0_81, %c0_82] : memref<25x64x128xbf16, #tpu.memory_space<vmem>>, vector<1x64x128xbf16>
    %179 = vector.shape_cast %178 : vector<1x64x128xbf16> to vector<64x128xbf16>
    %cst_83 = arith.constant dense<0.000000e+00> : vector<32x128xf32>
    %180 = tpu.matmul %177, %179, %cst_83 {dimension_numbers = #tpu.dot_dimension_numbers<[1], [0], [0], [1], [0, 0, 1, 1], [], []>} : vector<32x64xbf16>, vector<64x128xbf16>, vector<32x128xf32> -> vector<32x128xf32>
    %181 = arith.addf %175, %180 : vector<32x128xf32>
    %182 = vector.extract_strided_slice %42 {offsets = [23, 0, 0], sizes = [1, 32, 64], strides = [1, 1, 1]} : vector<25x32x64xbf16> to vector<1x32x64xbf16>
    %183 = vector.shape_cast %182 : vector<1x32x64xbf16> to vector<32x64xbf16>
    %c23 = arith.constant 23 : index
    %c0_84 = arith.constant 0 : index
    %c0_85 = arith.constant 0 : index
    %184 = vector.load %arg6[%c23, %c0_84, %c0_85] : memref<25x64x128xbf16, #tpu.memory_space<vmem>>, vector<1x64x128xbf16>
    %185 = vector.shape_cast %184 : vector<1x64x128xbf16> to vector<64x128xbf16>
    %cst_86 = arith.constant dense<0.000000e+00> : vector<32x128xf32>
    %186 = tpu.matmul %183, %185, %cst_86 {dimension_numbers = #tpu.dot_dimension_numbers<[1], [0], [0], [1], [0, 0, 1, 1], [], []>} : vector<32x64xbf16>, vector<64x128xbf16>, vector<32x128xf32> -> vector<32x128xf32>
    %187 = arith.addf %181, %186 : vector<32x128xf32>
    %188 = vector.extract_strided_slice %42 {offsets = [24, 0, 0], sizes = [1, 32, 64], strides = [1, 1, 1]} : vector<25x32x64xbf16> to vector<1x32x64xbf16>
    %189 = vector.shape_cast %188 : vector<1x32x64xbf16> to vector<32x64xbf16>
    %c24 = arith.constant 24 : index
    %c0_87 = arith.constant 0 : index
    %c0_88 = arith.constant 0 : index
    %190 = vector.load %arg6[%c24, %c0_87, %c0_88] : memref<25x64x128xbf16, #tpu.memory_space<vmem>>, vector<1x64x128xbf16>
    %191 = vector.shape_cast %190 : vector<1x64x128xbf16> to vector<64x128xbf16>
    %cst_89 = arith.constant dense<0.000000e+00> : vector<32x128xf32>
    %192 = tpu.matmul %189, %191, %cst_89 {dimension_numbers = #tpu.dot_dimension_numbers<[1], [0], [0], [1], [0, 0, 1, 1], [], []>} : vector<32x64xbf16>, vector<64x128xbf16>, vector<32x128xf32> -> vector<32x128xf32>
    %193 = arith.addf %187, %192 : vector<32x128xf32>
    %c0_90 = arith.constant 0 : index
    %c0_91 = arith.constant 0 : index
    %194 = vector.load %arg7[%c0_90, %c0_91] : memref<1x128xf32, #tpu.memory_space<vmem>>, vector<1x128xf32>
    %195 = vector.broadcast %194 : vector<1x128xf32> to vector<32x128xf32>
    %196 = arith.addf %193, %195 : vector<32x128xf32>
    %cst_92 = arith.constant 0.000000e+00 : f32
    %197 = vector.broadcast %cst_92 : f32 to vector<32x128xf32>
    %198 = arith.maximumf %196, %197 : vector<32x128xf32>
    %199 = arith.truncf %198 : vector<32x128xf32> to vector<32x128xbf16>
    %c0_93 = arith.constant 0 : index
    %c0_94 = arith.constant 0 : index
    %200 = vector.load %arg8[%c0_93, %c0_94] : memref<128x128xbf16, #tpu.memory_space<vmem>>, vector<128x128xbf16>
    %cst_95 = arith.constant dense<0.000000e+00> : vector<32x128xf32>
    %201 = tpu.matmul %199, %200, %cst_95 {dimension_numbers = #tpu.dot_dimension_numbers<[1], [0], [0], [1], [0, 0, 1, 1], [], []>} : vector<32x128xbf16>, vector<128x128xbf16>, vector<32x128xf32> -> vector<32x128xf32>
    %c0_96 = arith.constant 0 : index
    %c0_97 = arith.constant 0 : index
    %202 = vector.load %arg9[%c0_96, %c0_97] : memref<1x128xf32, #tpu.memory_space<vmem>>, vector<1x128xf32>
    %203 = vector.broadcast %202 : vector<1x128xf32> to vector<32x128xf32>
    %204 = arith.addf %201, %203 : vector<32x128xf32>
    %c0_98 = arith.constant 0 : index
    %c0_99 = arith.constant 0 : index
    %205 = vector.load %arg10[%c0_98, %c0_99] : memref<32x128xf32, #tpu.memory_space<vmem>>, vector<32x128xf32>
    tpu.vector_store %arg10[%c0_98, %c0_99], %204 {strides = array<i32>} : memref<32x128xf32, #tpu.memory_space<vmem>>, vector<32x128xf32>,
    return
  }
  func.func @transform_0(%arg0: i32) -> (i32, i32, i32) {
    %c0_i32 = arith.constant 0 : i32
    %c0_i32_0 = arith.constant 0 : i32
    %c0_i32_1 = arith.constant 0 : i32
    return %c0_i32, %arg0, %c0_i32_0 : i32, i32, i32
  }
  func.func @transform_1(%arg0: i32) -> (i32, i32) {
    %c0_i32 = arith.constant 0 : i32
    %c0_i32_0 = arith.constant 0 : i32
    %c0_i32_1 = arith.constant 0 : i32
    return %c0_i32, %c0_i32_0 : i32, i32
  }
  func.func @transform_2(%arg0: i32) -> (i32, i32) {
    %c0_i32 = arith.constant 0 : i32
    %c0_i32_0 = arith.constant 0 : i32
    %c0_i32_1 = arith.constant 0 : i32
    return %c0_i32, %c0_i32_0 : i32, i32
  }
  func.func @transform_3(%arg0: i32) -> (i32, i32) {
    %c0_i32 = arith.constant 0 : i32
    %c0_i32_0 = arith.constant 0 : i32
    %c0_i32_1 = arith.constant 0 : i32
    return %c0_i32, %c0_i32_0 : i32, i32
  }
  func.func @transform_4(%arg0: i32) -> (i32, i32) {
    %c0_i32 = arith.constant 0 : i32
    %c0_i32_0 = arith.constant 0 : i32
    %c0_i32_1 = arith.constant 0 : i32
    return %c0_i32, %c0_i32_0 : i32, i32
  }
  func.func @transform_5(%arg0: i32) -> (i32, i32, i32) {
    %c0_i32 = arith.constant 0 : i32
    %c0_i32_0 = arith.constant 0 : i32
    %c0_i32_1 = arith.constant 0 : i32
    %c0_i32_2 = arith.constant 0 : i32
    return %c0_i32, %c0_i32_0, %c0_i32_1 : i32, i32, i32
  }
  func.func @transform_6(%arg0: i32) -> (i32, i32) {
    %c0_i32 = arith.constant 0 : i32
    %c0_i32_0 = arith.constant 0 : i32
    %c0_i32_1 = arith.constant 0 : i32
    return %c0_i32, %c0_i32_0 : i32, i32
  }
  func.func @transform_7(%arg0: i32) -> (i32, i32) {
    %c0_i32 = arith.constant 0 : i32
    %c0_i32_0 = arith.constant 0 : i32
    %c0_i32_1 = arith.constant 0 : i32
    return %c0_i32, %c0_i32_0 : i32, i32
  }
  func.func @transform_8(%arg0: i32) -> (i32, i32) {
    %c0_i32 = arith.constant 0 : i32
    %c0_i32_0 = arith.constant 0 : i32
    %c0_i32_1 = arith.constant 0 : i32
    return %c0_i32, %c0_i32_0 : i32, i32
  }
  func.func @transform_9(%arg0: i32) -> (i32, i32) {
    %c0_i32 = arith.constant 0 : i32
    %c0_i32_0 = arith.constant 0 : i32
    return %arg0, %c0_i32 : i32, i32
  }
}

</mosaic_0001>

<bundles_post_ra>
// kernel: ocnn_forward.1
= control target key start
LH: loop header
LB: loop body
LE: loop exit
PB: predicated region body
PF: predicated region fallthrough
CT: control target
= control target key end

     0   :  { %s12268_s30 = smov 0   ;;  %s12270_s10 = smov 0   ;;  %s16601_s0 = inlined_call_operand.vmem [shape: bf16[36,64,36], index: 0, kind: input, shape index: {}]   ;;  %s16602_s1 = inlined_call_operand.vmem [shape: bf16[36,512], index: 1, kind: input, shape index: {}]   ;;  %s16603_s2 = inlined_call_operand.vmem [shape: f32[1,512], index: 2, kind: input, shape index: {}]   ;;  %s16604_s3 = inlined_call_operand.vmem [shape: bf16[512,256], index: 3, kind: input, shape index: {}]   ;;  %s16605_s4 = inlined_call_operand.vmem [shape: f32[1,256], index: 4, kind: input, shape index: {}]   ;;  %s16606_s5 = inlined_call_operand.vmem [shape: bf16[25,64,128], index: 5, kind: input, shape index: {}]   ;;  %s16607_s6 = inlined_call_operand.vmem [shape: f32[1,128], index: 6, kind: input, shape index: {}]   ;;  %s16608_s7 = inlined_call_operand.vmem [shape: bf16[128,128], index: 7, kind: input, shape index: {}]   ;;  %s16609_s8 = inlined_call_operand.vmem [shape: f32[1,128], index: 8, kind: input, shape index: {}]   ;;  %s16610_s9 = inlined_call_operand.vmem [shape: f32[64,128], index: 9, kind: output, shape index: {}]  }
   0x1   :  { %s12272_s11 = smov 0  }
   0x2 LB: > { %s9659_s12 = sadd.s32 4294967295, %s12214_s11   ;;  %s12285_s13 = sadd.s32 1, %s12214_s11   ;;  %s12214_s11 = sphi %s12272_s11, %s17488_s11   ;;  %s12210_s10 = sphi %s12270_s10, %s17487_s10   ;;  %s12206_s30 = sphi %s12268_s30, %s17486_s30  }
   0x3   : > { %s23_s14 = ssub.s32 %s12214_s11, %s12285_s13  ;;  %s26_s15 = sadd.s32 1, %s12210_s10 }
   0x4   : > { %p24_p0 = scmp.eq.s32.totalorder %s23_s14, 0  ;;  %p33_p1 = scmp.ne.s32.totalorder %s12210_s10, %s12206_s30 }
   0x5   : > { %p34_p2 = scmp.eq.s32.totalorder %s12214_s11, 0  ;;  %p9662_p4 = scmp.ge.s32.totalorder %s12214_s11, 2 }
   0x6   : > { %s12294_s16 = scalar_select %p24_p0, %s12210_s10, %s26_s15  }
   0x7   : > { %p35_p3 = por %p34_p2, %p33_p1  ;;  %277 = sbr.rel (%p9662_p4) target bundleno = 54 (0x36), region = 48 }
   0xe   : > { %280 = sbr.rel (!%p35_p3) target bundleno = 54 (0x36), region = 52  ;;  %s282_s17 = sand.u32 (%p35_p3), 1, %s12210_s10  }
   0xf   : > { %s10316_s18 = sshll.u32 (%p35_p3), %s12214_s11, 4  ;;  %s11299_s19 = smul.u32 (%p35_p3), 576, %s282_s17 }
  0x10   : > { %s12302_s22 = scalar_lea.vmem (%p35_p3), %s16601_s0, %s10316_s18 }
  0x11   : > { %v303_v0 = vld [vmem:[%s12302_s22] sm:$0xff] (%p35_p3)   ;;  %v307_v1 = vld [vmem:[%s12302_s22 + $0x8] sm:$0xff] (%p35_p3)   ;;  %s12310_s23 = scalar_lea.vmem (%p35_p3), [#allocation2], %s11299_s19 }
  0x12   : > { %v311_v2 = vld [vmem:[%s12302_s22 + $0x20] sm:$0xff] (%p35_p3)   ;;  %v315_v3 = vld [vmem:[%s12302_s22 + $0x28] sm:$0xff] (%p35_p3)   ;;  %304 = vst [vmem:[%s12310_s23] sm:$0xff] (%p35_p3), %v303_v0   ;;  %308 = vst [vmem:[%s12310_s23 + $0x8] sm:$0xff] (%p35_p3), %v307_v1  }
  0x13   : > { %v319_v4 = vld [vmem:[%s12302_s22 + $0x40] sm:$0xff] (%p35_p3)   ;;  %v323_v5 = vld [vmem:[%s12302_s22 + $0x48] sm:$0xff] (%p35_p3)   ;;  %312 = vst [vmem:[%s12310_s23 + $0x10] sm:$0xff] (%p35_p3), %v311_v2   ;;  %316 = vst [vmem:[%s12310_s23 + $0x18] sm:$0xff] (%p35_p3), %v315_v3  }
  0x14   : > { %320 = vst [vmem:[%s12310_s23 + $0x20] sm:$0xff] (%p35_p3), %v319_v4   ;;  %324 = vst [vmem:[%s12310_s23 + $0x28] sm:$0xff] (%p35_p3), %v323_v5   ;;  %v327_v6 = vld [vmem:[%s12302_s22 + $0x60] sm:$0xff] (%p35_p3)   ;;  %v331_v7 = vld [vmem:[%s12302_s22 + $0x68] sm:$0xff] (%p35_p3)  }
  0x15   : > { %v335_v8 = vld [vmem:[%s12302_s22 + $0x80] sm:$0xff]   ;;  %328 = vst [vmem:[%s12310_s23 + $0x30] sm:$0xff] %v327_v6   ;;  %332 = vst [vmem:[%s12310_s23 + $0x38] sm:$0xff] %v331_v7   ;;  %v339_v9 = vld [vmem:[%s12302_s22 + $0x88] sm:$0xff]  }
  0x16   : > { %336 = vst [vmem:[%s12310_s23 + $0x40] sm:$0xff] %v335_v8   ;;  %v343_v10 = vld [vmem:[%s12302_s22 + $0xa0] sm:$0xff]   ;;  %v347_v11 = vld [vmem:[%s12302_s22 + $0xa8] sm:$0xff]   ;;  %340 = vst [vmem:[%s12310_s23 + $0x48] sm:$0xff] %v339_v9  }
  0x17   : > { %344 = vst [vmem:[%s12310_s23 + $0x50] sm:$0xff] %v343_v10   ;;  %348 = vst [vmem:[%s12310_s23 + $0x58] sm:$0xff] %v347_v11   ;;  %v351_v12 = vld [vmem:[%s12302_s22 + $0xc0] sm:$0xff]   ;;  %v355_v13 = vld [vmem:[%s12302_s22 + $0xc8] sm:$0xff]  }
  0x18   : > { %v359_v14 = vld [vmem:[%s12302_s22 + $0xe0] sm:$0xff]   ;;  %352 = vst [vmem:[%s12310_s23 + $0x60] sm:$0xff] %v351_v12   ;;  %356 = vst [vmem:[%s12310_s23 + $0x68] sm:$0xff] %v355_v13   ;;  %v363_v15 = vld [vmem:[%s12302_s22 + $0xe8] sm:$0xff]  }
  0x19   : > { %360 = vst [vmem:[%s12310_s23 + $0x70] sm:$0xff] %v359_v14   ;;  %v367_v16 = vld [vmem:[%s12302_s22 + $0x100] sm:$0xff]   ;;  %v371_v17 = vld [vmem:[%s12302_s22 + $0x108] sm:$0xff]   ;;  %364 = vst [vmem:[%s12310_s23 + $0x78] sm:$0xff] %v363_v15  }
  0x1a   : > { %368 = vst [vmem:[%s12310_s23 + $0x80] sm:$0xff] %v367_v16   ;;  %372 = vst [vmem:[%s12310_s23 + $0x88] sm:$0xff] %v371_v17   ;;  %v375_v18 = vld [vmem:[%s12302_s22 + $0x120] sm:$0xff]   ;;  %v379_v19 = vld [vmem:[%s12302_s22 + $0x128] sm:$0xff]  }
  0x1b   : > { %v383_v20 = vld [vmem:[%s12302_s22 + $0x140] sm:$0xff]   ;;  %376 = vst [vmem:[%s12310_s23 + $0x90] sm:$0xff] %v375_v18   ;;  %380 = vst [vmem:[%s12310_s23 + $0x98] sm:$0xff] %v379_v19   ;;  %v387_v21 = vld [vmem:[%s12302_s22 + $0x148] sm:$0xff]  }
  0x1c   : > { %384 = vst [vmem:[%s12310_s23 + $0xa0] sm:$0xff] %v383_v20   ;;  %v391_v22 = vld [vmem:[%s12302_s22 + $0x160] sm:$0xff]   ;;  %v395_v23 = vld [vmem:[%s12302_s22 + $0x168] sm:$0xff]   ;;  %388 = vst [vmem:[%s12310_s23 + $0xa8] sm:$0xff] %v387_v21  }
  0x1d   : > { %392 = vst [vmem:[%s12310_s23 + $0xb0] sm:$0xff] %v391_v22   ;;  %396 = vst [vmem:[%s12310_s23 + $0xb8] sm:$0xff] %v395_v23   ;;  %v399_v24 = vld [vmem:[%s12302_s22 + $0x180] sm:$0xff]   ;;  %v403_v25 = vld [vmem:[%s12302_s22 + $0x188] sm:$0xff]  }
  0x1e   : > { %v407_v26 = vld [vmem:[%s12302_s22 + $0x1a0] sm:$0xff]   ;;  %400 = vst [vmem:[%s12310_s23 + $0xc0] sm:$0xff] %v399_v24   ;;  %404 = vst [vmem:[%s12310_s23 + $0xc8] sm:$0xff] %v403_v25   ;;  %v411_v27 = vld [vmem:[%s12302_s22 + $0x1a8] sm:$0xff]  }
  0x1f   : > { %408 = vst [vmem:[%s12310_s23 + $0xd0] sm:$0xff] %v407_v26   ;;  %v415_v28 = vld [vmem:[%s12302_s22 + $0x1c0] sm:$0xff]   ;;  %v419_v29 = vld [vmem:[%s12302_s22 + $0x1c8] sm:$0xff]   ;;  %412 = vst [vmem:[%s12310_s23 + $0xd8] sm:$0xff] %v411_v27  }
  0x20   : > { %416 = vst [vmem:[%s12310_s23 + $0xe0] sm:$0xff] %v415_v28   ;;  %420 = vst [vmem:[%s12310_s23 + $0xe8] sm:$0xff] %v419_v29   ;;  %v423_v30 = vld [vmem:[%s12302_s22 + $0x1e0] sm:$0xff]   ;;  %v427_v31 = vld [vmem:[%s12302_s22 + $0x1e8] sm:$0xff]  }
  0x21   : > { %v431_v32 = vld [vmem:[%s12302_s22 + $0x200] sm:$0xff]   ;;  %424 = vst [vmem:[%s12310_s23 + $0xf0] sm:$0xff] %v423_v30   ;;  %428 = vst [vmem:[%s12310_s23 + $0xf8] sm:$0xff] %v427_v31   ;;  %v435_v33 = vld [vmem:[%s12302_s22 + $0x208] sm:$0xff]  }
  0x22   : > { %432 = vst [vmem:[%s12310_s23 + $0x100] sm:$0xff] %v431_v32   ;;  %v439_v34 = vld [vmem:[%s12302_s22 + $0x220] sm:$0xff]   ;;  %v443_v35 = vld [vmem:[%s12302_s22 + $0x228] sm:$0xff]   ;;  %436 = vst [vmem:[%s12310_s23 + $0x108] sm:$0xff] %v435_v33  }
  0x23   : > { %440 = vst [vmem:[%s12310_s23 + $0x110] sm:$0xff] %v439_v34   ;;  %444 = vst [vmem:[%s12310_s23 + $0x118] sm:$0xff] %v443_v35   ;;  %v447_v36 = vld [vmem:[%s12302_s22 + $0x240] sm:$0xff]   ;;  %v451_v37 = vld [vmem:[%s12302_s22 + $0x248] sm:$0xff]  }
  0x24   : > { %v455_v38 = vld [vmem:[%s12302_s22 + $0x260] sm:$0xff]   ;;  %448 = vst [vmem:[%s12310_s23 + $0x120] sm:$0xff] %v447_v36   ;;  %452 = vst [vmem:[%s12310_s23 + $0x128] sm:$0xff] %v451_v37   ;;  %v459_v39 = vld [vmem:[%s12302_s22 + $0x268] sm:$0xff]  }
  0x25   : > { %456 = vst [vmem:[%s12310_s23 + $0x130] sm:$0xff] %v455_v38   ;;  %v463_v40 = vld [vmem:[%s12302_s22 + $0x280] sm:$0xff]   ;;  %v467_v41 = vld [vmem:[%s12302_s22 + $0x288] sm:$0xff]   ;;  %460 = vst [vmem:[%s12310_s23 + $0x138] sm:$0xff] %v459_v39  }
  0x26   : > { %464 = vst [vmem:[%s12310_s23 + $0x140] sm:$0xff] %v463_v40   ;;  %468 = vst [vmem:[%s12310_s23 + $0x148] sm:$0xff] %v467_v41   ;;  %v471_v42 = vld [vmem:[%s12302_s22 + $0x2a0] sm:$0xff]   ;;  %v475_v43 = vld [vmem:[%s12302_s22 + $0x2a8] sm:$0xff]  }
  0x27   : > { %v479_v44 = vld [vmem:[%s12302_s22 + $0x2c0] sm:$0xff]   ;;  %472 = vst [vmem:[%s12310_s23 + $0x150] sm:$0xff] %v471_v42   ;;  %476 = vst [vmem:[%s12310_s23 + $0x158] sm:$0xff] %v475_v43   ;;  %v483_v45 = vld [vmem:[%s12302_s22 + $0x2c8] sm:$0xff]  }
  0x28   : > { %480 = vst [vmem:[%s12310_s23 + $0x160] sm:$0xff] %v479_v44   ;;  %v487_v46 = vld [vmem:[%s12302_s22 + $0x2e0] sm:$0xff]   ;;  %v491_v47 = vld [vmem:[%s12302_s22 + $0x2e8] sm:$0xff]   ;;  %484 = vst [vmem:[%s12310_s23 + $0x168] sm:$0xff] %v483_v45  }
  0x29   : > { %488 = vst [vmem:[%s12310_s23 + $0x170] sm:$0xff] %v487_v46   ;;  %492 = vst [vmem:[%s12310_s23 + $0x178] sm:$0xff] %v491_v47   ;;  %v495_v48 = vld [vmem:[%s12302_s22 + $0x300] sm:$0xff]   ;;  %v499_v49 = vld [vmem:[%s12302_s22 + $0x308] sm:$0xff]  }
  0x2a   : > { %v503_v50 = vld [vmem:[%s12302_s22 + $0x320] sm:$0xff]   ;;  %496 = vst [vmem:[%s12310_s23 + $0x180] sm:$0xff] %v495_v48   ;;  %500 = vst [vmem:[%s12310_s23 + $0x188] sm:$0xff] %v499_v49   ;;  %v507_v51 = vld [vmem:[%s12302_s22 + $0x328] sm:$0xff]  }
  0x2b   : > { %504 = vst [vmem:[%s12310_s23 + $0x190] sm:$0xff] %v503_v50   ;;  %v511_v52 = vld [vmem:[%s12302_s22 + $0x340] sm:$0xff]   ;;  %v515_v53 = vld [vmem:[%s12302_s22 + $0x348] sm:$0xff]   ;;  %508 = vst [vmem:[%s12310_s23 + $0x198] sm:$0xff] %v507_v51  }
  0x2c   : > { %512 = vst [vmem:[%s12310_s23 + $0x1a0] sm:$0xff] %v511_v52   ;;  %516 = vst [vmem:[%s12310_s23 + $0x1a8] sm:$0xff] %v515_v53   ;;  %v519_v54 = vld [vmem:[%s12302_s22 + $0x360] sm:$0xff]   ;;  %v523_v55 = vld [vmem:[%s12302_s22 + $0x368] sm:$0xff]  }
  0x2d   : > { %v527_v56 = vld [vmem:[%s12302_s22 + $0x380] sm:$0xff]   ;;  %520 = vst [vmem:[%s12310_s23 + $0x1b0] sm:$0xff] %v519_v54   ;;  %524 = vst [vmem:[%s12310_s23 + $0x1b8] sm:$0xff] %v523_v55   ;;  %v531_v57 = vld [vmem:[%s12302_s22 + $0x388] sm:$0xff]  }
  0x2e   : > { %528 = vst [vmem:[%s12310_s23 + $0x1c0] sm:$0xff] %v527_v56   ;;  %v535_v58 = vld [vmem:[%s12302_s22 + $0x3a0] sm:$0xff]   ;;  %v539_v59 = vld [vmem:[%s12302_s22 + $0x3a8] sm:$0xff]   ;;  %532 = vst [vmem:[%s12310_s23 + $0x1c8] sm:$0xff] %v531_v57  }
  0x2f   : > { %536 = vst [vmem:[%s12310_s23 + $0x1d0] sm:$0xff] %v535_v58   ;;  %540 = vst [vmem:[%s12310_s23 + $0x1d8] sm:$0xff] %v539_v59   ;;  %v543_v60 = vld [vmem:[%s12302_s22 + $0x3c0] sm:$0xff]   ;;  %v547_v61 = vld [vmem:[%s12302_s22 + $0x3c8] sm:$0xff]  }
  0x30   : > { %v551_v62 = vld [vmem:[%s12302_s22 + $0x3e0] sm:$0xff]   ;;  %544 = vst [vmem:[%s12310_s23 + $0x1e0] sm:$0xff] %v543_v60   ;;  %548 = vst [vmem:[%s12310_s23 + $0x1e8] sm:$0xff] %v547_v61   ;;  %v555_v63 = vld [vmem:[%s12302_s22 + $0x3e8] sm:$0xff]  }
  0x31   : > { %552 = vst [vmem:[%s12310_s23 + $0x1f0] sm:$0xff] %v551_v62   ;;  %v559_v0 = vld [vmem:[%s12302_s22 + $0x400] sm:$0xff]   ;;  %v563_v1 = vld [vmem:[%s12302_s22 + $0x408] sm:$0xff]   ;;  %556 = vst [vmem:[%s12310_s23 + $0x1f8] sm:$0xff] %v555_v63  }
  0x32   : > { %560 = vst [vmem:[%s12310_s23 + $0x200] sm:$0xff] %v559_v0   ;;  %564 = vst [vmem:[%s12310_s23 + $0x208] sm:$0xff] %v563_v1   ;;  %v567_v2 = vld [vmem:[%s12302_s22 + $0x420] sm:$0xff]   ;;  %v571_v3 = vld [vmem:[%s12302_s22 + $0x428] sm:$0xff]  }
  0x33   : > { %v575_v4 = vld [vmem:[%s12302_s22 + $0x440] sm:$0xff]   ;;  %568 = vst [vmem:[%s12310_s23 + $0x210] sm:$0xff] %v567_v2   ;;  %572 = vst [vmem:[%s12310_s23 + $0x218] sm:$0xff] %v571_v3   ;;  %v579_v5 = vld [vmem:[%s12302_s22 + $0x448] sm:$0xff]  }
  0x34   : > { %576 = vst [vmem:[%s12310_s23 + $0x220] sm:$0xff] %v575_v4   ;;  %v583_v6 = vld [vmem:[%s12302_s22 + $0x460] sm:$0xff]   ;;  %v587_v7 = vld [vmem:[%s12302_s22 + $0x468] sm:$0xff]   ;;  %580 = vst [vmem:[%s12310_s23 + $0x228] sm:$0xff] %v579_v5  }
  0x35   : > { %584 = vst [vmem:[%s12310_s23 + $0x230] sm:$0xff] %v583_v6   ;;  %588 = vst [vmem:[%s12310_s23 + $0x238] sm:$0xff] %v587_v7  }
  0x36 PF: > { %p9665_p5 = scmp.ge.s32.totalorder %s12214_s11, 1  ;;  %p900_p6 = scmp.lt.s32.totalorder %s12214_s11, 3 }
  0x38   : > { %p901_p7 = pnand %p9665_p5, %p900_p6 }
  0x3a   : > { %904 = sbr.rel (%p901_p7) target bundleno = 2165 (0x875), region = 93 }
  0x41   : > { %v11827_v8 = vld [vmem:[%s16602_s1 + $0x4] ss:$16 sps:$4 sm:$0xff]   ;;  %v11829_v9 = vld [vmem:[%s16602_s1] ss:$16 sps:$4 sm:$0xff]   ;;  %v16613_v10 = vmov 0   ;;  %s907_s28 = sand.u32 1, %s12206_s30  }
  0x42   : > { %2288 = vmatprep.mubr.bf16.mxu1 %v16613_v10  ;;  %1798 = vmatprep.mubr.bf16.mxu0 %v16613_v10  ;;  %v11830_v11 = vld [vmem:[%s16602_s1 + $0x24] ss:$16 sps:$4 sm:$0xff]   ;;  %v11832_v13 = vld [vmem:[%s16602_s1 + $0x20] ss:$16 sps:$4 sm:$0xff]   ;;  %s11300_s20 = smul.u32 576, %s907_s28  ;;  %vm1753_vm0 = vcmask 1041408  }
  0x43   : > { %10797 = vmatprep.subr.bf16.mxu1 %v11827_v8  ;;  %v1102_v12 = vld [vmem:[%s16602_s1 + $0x40] sm:$0x33]  ;;  %1766 = vmatprep.subr.bf16.mxu0 %v11827_v8  ;;  %v11838_v16 = vld [vmem:[%s16602_s1 + $0xc] ss:$16 sps:$4 sm:$0xff]   ;;  %v11836_v18 = vld [vmem:[%s16602_s1 + $0x8] ss:$16 sps:$4 sm:$0xff]  }
  0x44   : > { %10800 = vmatpush1.bf16.msra.mxu1 %v11829_v9  ;;  %1767 = vmatpush1.bf16.msra.mxu0 %v11829_v9  ;;  %v9749_v14 = vcombine.high %v1102_v12, %v1102_v12  ;;  %v9748_v15 = vcombine.low %v1102_v12, %v1102_v12  ;;  %s12470_s30 = scalar_lea.vmem [#allocation2], %s11300_s20  ;;  %vm1536_vm1 = vcmask 293888   ;;  %v11852_v21 = vld [vmem:[%s16602_s1 + $0x2c] ss:$16 sps:$4 sm:$0xff]   ;;  %v11850_v22 = vld [vmem:[%s16602_s1 + $0x28] ss:$16 sps:$4 sm:$0xff]  }
  0x45   : > { %10798 = vmatprep.subr.bf16.mxu1 %v11830_v11  ;;  %1768 = vmatprep.subr.bf16.mxu0 %v11830_v11  ;;  %v11835_v19 = vld [vmem:[%s12470_s30 + $0x188] sm:$0xff]   ;;  %v11843_v20 = vld [vmem:[%s12470_s30] sm:$0xff]   ;;  %v11839_v23 = vld [vmem:[%s12470_s30 + $0x190] sm:$0xff]   ;;  %s12217_s22 = smov 64   ;;  %vm7205_vm2 = vcmask 523264  }
  0x46   : > { %v1755_v17 = vsel %vm1753_vm0, %v9748_v15, 0  ;;  %v11845_v24 = vld [vmem:[%s12470_s30 + $0x8] sm:$0xff]   ;;  %v11840_v25 = vld [vmem:[%s12470_s30 + $0x198] sm:$0xff]   ;;  %v11847_v26 = vld [vmem:[%s12470_s30 + $0x10] sm:$0xff]  }
  0x47   : > { %v11863_v27 = vld [vmem:[%s16604_s3] ss:$8 sps:$4 sm:$0xff]   ;;  %v11865_v28 = vld [vmem:[%s16604_s3 + $0x4] ss:$8 sps:$4 sm:$0xff]   ;;  %v11849_v30 = vld [vmem:[%s12470_s30 + $0x18] sm:$0xff]  }
  0x48   : > { %10801 = vmatpush1.bf16.msra.mxu1 %v11832_v13  ;;  %1769 = vmatpush1.bf16.msra.mxu0 %v11832_v13  ;;  %v11841_v29 = vld [vmem:[%s12470_s30 + $0x1a0] sm:$0xff]   ;;  %v1103_v31 = vld [vmem:[%s16602_s1 + $0x48] sm:$0x33]  ;;  %v11875_v33 = vld [vmem:[%s16604_s3 + $0x14] ss:$8 sps:$4 sm:$0xff]  }
  0x49   : > { %10799 = vmatprep.subr.msk.bf16.mxu1 %vm1753_vm0, %v9749_v14  ;;  %9752 = vmatprep.subr.msk.bf16.mxu0 %vm1753_vm0, %v9749_v14  ;;  %v9751_v32 = vcombine.high %v1103_v31, %v1103_v31  ;;  %v9750_v34 = vcombine.low %v1103_v31, %v1103_v31  ;;  %v11873_v35 = vld [vmem:[%s16604_s3 + $0x10] ss:$8 sps:$4 sm:$0xff]   ;;  %v11842_v37 = vld [vmem:[%s12470_s30 + $0x1a8] sm:$0xff]   ;;  %v11854_v38 = vld [vmem:[%s12470_s30 + $0x20] sm:$0xff]  }
  0x4a   : > { %v11885_v39 = vld [vmem:[%s16604_s3 + $0x24] ss:$8 sps:$4 sm:$0xff]   ;;  %v11883_v40 = vld [vmem:[%s16604_s3 + $0x20] ss:$8 sps:$4 sm:$0xff]   ;;  %v11844_v41 = vld [vmem:[%s12470_s30 + $0x1b0] sm:$0xff]  }
  0x4b   : > { %v1761_v36 = vsel %vm1753_vm0, %v9750_v34, 0  ;;  %v11856_v42 = vld [vmem:[%s12470_s30 + $0x28] sm:$0xff]   ;;  %v11892_v43 = vld [vmem:[%s16604_s3 + $0x30] ss:$8 sps:$4 sm:$0xff]   ;;  %v11894_v44 = vld [vmem:[%s16604_s3 + $0x34] ss:$8 sps:$4 sm:$0xff]  }
  0x4c   : > { %10802 = vmatpush1.bf16.msra.mxu1 %v1755_v17  ;;  %1771 = vmatpush1.bf16.msra.mxu0 %v1755_v17  ;;  %v11846_v45 = vld [vmem:[%s12470_s30 + $0x1b8] sm:$0xff]   ;;  %v11858_v46 = vld [vmem:[%s12470_s30 + $0x30] sm:$0xff]   ;;  %v11848_v47 = vld [vmem:[%s12470_s30 + $0x1c0] sm:$0xff]  }
  0x4d   : > { %2519 = vmatprep.subr.bf16.mxu1 %v11838_v16  ;;  %4748 = vmatprep.subr.bf16.mxu0 %v11865_v28  ;;  %v11860_v48 = vld [vmem:[%s12470_s30 + $0x38] sm:$0xff]   ;;  %v11853_v49 = vld [vmem:[%s12470_s30 + $0x1c8] sm:$0xff]   ;;  %v11862_v50 = vld [vmem:[%s12470_s30 + $0x40] sm:$0xff]  }
  0x4e   : > { %v11899_v51 = vld [vmem:[%s16604_s3 + $0x40] ss:$8 sps:$4 sm:$0xff]   ;;  %v11901_v52 = vld [vmem:[%s16604_s3 + $0x44] ss:$8 sps:$4 sm:$0xff]   ;;  %v11855_v53 = vld [vmem:[%s12470_s30 + $0x1d0] sm:$0xff]  }
  0x4f   : > { %9802 = vmatmul.mubr.msk.bf16.vlgmr.msra.gmra.mrb[0].mxu1 %vm1536_vm1, %v11835_v19  ;;  %9753 = vmatmul.mubr.msk.bf16.vlgmr.msra.gmra.mrb[0].mxu0 %vm1536_vm1, %v11843_v20  ;;  %v11867_v54 = vld [vmem:[%s12470_s30 + $0x48] sm:$0xff]   ;;  %v11857_v55 = vld [vmem:[%s12470_s30 + $0x1d8] sm:$0xff]   ;;  %v11869_v56 = vld [vmem:[%s12470_s30 + $0x50] sm:$0xff]  }
  0x50   : > { %2520 = vmatpush1.bf16.msra.mxu1 %v11836_v18  ;;  %2298 = vmatprep.mubr.bf16.mxu1 %v16613_v10  ;;  %v11859_v57 = vld [vmem:[%s12470_s30 + $0x1e0] sm:$0xff]   ;;  %v11871_v58 = vld [vmem:[%s12470_s30 + $0x58] sm:$0xff]   ;;  %v11861_v59 = vld [vmem:[%s12470_s30 + $0x1e8] sm:$0xff]  }
  0x51   : > { %1808 = vmatprep.mubr.bf16.mxu0 %v16613_v10  ;;  %2521 = vmatprep.subr.bf16.mxu1 %v11852_v21  ;;  %v11878_v60 = vld [vmem:[%s12470_s30 + $0x60] sm:$0xff]   ;;  %v11905_v61 = vld [vmem:[%s16604_s3 + $0x50] ss:$8 sps:$4 sm:$0xff]   ;;  %v11907_v62 = vld [vmem:[%s16604_s3 + $0x54] ss:$8 sps:$4 sm:$0xff]  }
  0x52   : > { %4749 = vmatpush1.bf16.msra.mxu0 %v11863_v27  ;;  %v11866_v63 = vld [vmem:[%s12470_s30 + $0x1f0] sm:$0xff]   ;;  %v11880_v0 = vld [vmem:[%s12470_s30 + $0x68] sm:$0xff]   ;;  %v11868_v1 = vld [vmem:[%s12470_s30 + $0x1f8] sm:$0xff]  }
  0x53   : > { %4750 = vmatprep.subr.bf16.mxu0 %v11875_v33  ;;  %v11882_v2 = vld [vmem:[%s12470_s30 + $0x70] sm:$0xff]   ;;  %v11870_v3 = vld [vmem:[%s12470_s30 + $0x200] sm:$0xff]   ;;  %v11887_v4 = vld [vmem:[%s12470_s30 + $0x78] sm:$0xff]  }
  0x54   : > { %2522 = vmatpush1.bf16.msra.mxu1 %v11850_v22  ;;  %v11911_v5 = vld [vmem:[%s16604_s3 + $0x60] ss:$8 sps:$4 sm:$0xff]   ;;  %v11913_v6 = vld [vmem:[%s16604_s3 + $0x64] ss:$8 sps:$4 sm:$0xff]   ;;  %v11879_v9 = vld [vmem:[%s12470_s30 + $0x210] sm:$0xff]  }
  0x55   : > { %9825 = vmatprep.subr.msk.bf16.mxu1 %vm1753_vm0, %v9751_v32  ;;  %v11877_v7 = vld [vmem:[%s12470_s30 + $0x208] sm:$0xff]   ;;  %v11889_v8 = vld [vmem:[%s12470_s30 + $0x80] sm:$0xff]   ;;  %v11881_v12 = vld [vmem:[%s12470_s30 + $0x218] sm:$0xff]   ;;  %v1106_v32 = vlaneseq }
  0x56   : > { %4751 = vmatpush1.bf16.msra.mxu0 %v11873_v35  ;;  %v11891_v11 = vld [vmem:[%s12470_s30 + $0x88] sm:$0xff]   ;;  %v11896_v13 = vld [vmem:[%s12470_s30 + $0x90] sm:$0xff]   ;;  %v11886_v14 = vld [vmem:[%s12470_s30 + $0x220] sm:$0xff]  }
  0x57   : > { %9803 = vmatmul.mubr.msk.bf16.gmra.mrb[4].mxu1 %vm1536_vm1, %v11839_v23  ;;  %9754 = vmatmul.mubr.msk.bf16.gmra.mrb[4].mxu0 %vm1536_vm1, %v11845_v24  ;;  %v11897_v15 = vld [vmem:[%s12470_s30 + $0x98] sm:$0xff]   ;;  %v11888_v18 = vld [vmem:[%s12470_s30 + $0x228] sm:$0xff]   ;;  %v11898_v19 = vld [vmem:[%s12470_s30 + $0xa0] sm:$0xff]   ;;  %v12705_v35 = vshrl.u32 %v1106_v32, 7 }
  0x58   : > { %2308 = vmatprep.mubr.bf16.mxu1 %v16613_v10  ;;  %1818 = vmatprep.mubr.bf16.mxu0 %v16613_v10  ;;  %v11917_v16 = vld [vmem:[%s16604_s3 + $0x70] ss:$8 sps:$4 sm:$0xff]   ;;  %v11919_v17 = vld [vmem:[%s16604_s3 + $0x74] ss:$8 sps:$4 sm:$0xff]   ;;  %v11902_v21 = vld [vmem:[%s12470_s30 + $0xa8] sm:$0xff]  }
  0x59   : > { %2524 = vmatpush1.bf16.msra.mxu1 %v1761_v36  ;;  %4752 = vmatprep.subr.bf16.mxu0 %v11885_v39  ;;  %v11890_v20 = vld [vmem:[%s12470_s30 + $0x230] sm:$0xff]   ;;  %v11923_v22 = vld [vmem:[%s16604_s3 + $0x80] ss:$8 sps:$4 sm:$0xff]   ;;  %v11925_v23 = vld [vmem:[%s16604_s3 + $0x84] ss:$8 sps:$4 sm:$0xff]   ;;  %16932 = vst [vmem:[#allocation3_spill] sm:$0xff] %v12705_v35 }
  0x5a   : > { %4753 = vmatpush1.bf16.msra.mxu0 %v11883_v40  ;;  %v11895_v24 = vld [vmem:[%s12470_s30 + $0x238] sm:$0xff]   ;;  %v12119_v27 = vld [vmem:[%s12470_s30] sm:$0xff]   ;;  %v11909_v33 = vld [vmem:[%s12470_s30 + $0xc8] sm:$0xff]   ;;  %v16612_v36 = vsub.s32 0, %v12705_v35  ;;  %v16611_v39 = vsub.s32 1, %v12705_v35 }
  0x5b   : > { %4754 = vmatprep.subr.bf16.mxu0 %v11894_v44  ;;  %v11908_v28 = vld [vmem:[%s12470_s30 + $0xc0] sm:$0xff]   ;;  %v11931_v31 = vld [vmem:[%s16604_s3 + $0x94] ss:$8 sps:$4 sm:$0xff]  }
  0x5c   : > { %v12121_v34 = vld [vmem:[%s12470_s30 + $0x10] sm:$0xff]   ;;  %v12122_v40 = vld [vmem:[%s12470_s30 + $0x18] sm:$0xff]  }
  0x5e   : > { %4755 = vmatpush1.bf16.msra.mxu0 %v11892_v43 }
  0x5f   : > { %9804 = vmatmul.mubr.msk.bf16.gmra.mrb[8].mxu1 %vm1536_vm1, %v11840_v25  ;;  %9755 = vmatmul.mubr.msk.bf16.gmra.mrb[8].mxu0 %vm1536_vm1, %v11847_v26  ;;  %v11903_v25 = vld [vmem:[%s12470_s30 + $0xb0] sm:$0xff]   ;;  %v11904_v26 = vld [vmem:[%s12470_s30 + $0xb8] sm:$0xff]  }
  0x60   : > { %2318 = vmatprep.mubr.bf16.mxu1 %v16613_v10  ;;  %1828 = vmatprep.mubr.bf16.mxu0 %v16613_v10 }
  0x61   : > { %4756 = vmatprep.subr.bf16.mxu0 %v11901_v52 }
  0x62   : > { %4757 = vmatpush1.bf16.msra.mxu0 %v11899_v51 }
  0x63   : > { %4758 = vmatprep.subr.bf16.mxu0 %v11907_v62 }
  0x66   : > { %4759 = vmatpush1.bf16.msra.mxu0 %v11905_v61 }
  0x67   : > { %9805 = vmatmul.mubr.msk.bf16.gmra.mrb[12].mxu1 %vm1536_vm1, %v11841_v29  ;;  %9756 = vmatmul.mubr.msk.bf16.gmra.mrb[12].mxu0 %vm1536_vm1, %v11849_v30  ;;  %v12120_v29 = vld [vmem:[%s12470_s30 + $0x8] sm:$0xff]   ;;  %v11929_v30 = vld [vmem:[%s16604_s3 + $0x90] ss:$8 sps:$4 sm:$0xff]  }
  0x68   : > { %2328 = vmatprep.mubr.bf16.mxu1 %v16613_v10  ;;  %1838 = vmatprep.mubr.bf16.mxu0 %v16613_v10 }
  0x69   : > { %4760 = vmatprep.subr.bf16.mxu0 %v11913_v6 }
  0x6a   : > { %4761 = vmatpush1.bf16.msra.mxu0 %v11911_v5 }
  0x6b   : > { %4762 = vmatprep.subr.bf16.mxu0 %v11919_v17 }
  0x6e   : > { %4763 = vmatpush1.bf16.msra.mxu0 %v11917_v16  ;;  %v11915_v16 = vld [vmem:[%s12470_s30 + $0xe0] sm:$0xff]  }
  0x6f   : > { %9806 = vmatmul.mubr.msk.bf16.gmra.mrb[16].mxu1 %vm1536_vm1, %v11842_v37  ;;  %9757 = vmatmul.mubr.msk.bf16.gmra.mrb[16].mxu0 %vm1536_vm1, %v11854_v38  ;;  %v11910_v37 = vld [vmem:[%s12470_s30 + $0xd0] sm:$0xff]   ;;  %v1104_v38 = vld [vmem:[%s16603_s2] sm:$0xf] }
  0x70   : > { %2338 = vmatprep.mubr.bf16.mxu1 %v16613_v10  ;;  %1848 = vmatprep.mubr.bf16.mxu0 %v16613_v10 }
  0x71   : > { %4764 = vmatprep.subr.bf16.mxu0 %v11925_v23 }
  0x72   : > { %4765 = vmatpush1.bf16.msra.mxu0 %v11923_v22 }
  0x73   : > { %4766 = vmatprep.subr.bf16.mxu0 %v11931_v31 }
  0x76   : > { %4767 = vmatpush1.bf16.msra.mxu0 %v11929_v30 }
  0x77   : > { %9807 = vmatmul.mubr.msk.bf16.gmra.mrb[20].mxu1 %vm1536_vm1, %v11844_v41  ;;  %9758 = vmatmul.mubr.msk.bf16.gmra.mrb[20].mxu0 %vm1536_vm1, %v11856_v42  ;;  %v12720_v41 = vrot.slane %v1104_v38, %v16612_v36  ;;  %v12725_v42 = vrot.slane %v1104_v38, %v16611_v39 }
  0x78   : > { %2348 = vmatprep.mubr.bf16.mxu1 %v16613_v10  ;;  %1858 = vmatprep.mubr.bf16.mxu0 %v16613_v10 }
  0x7f   : > { %9808 = vmatmul.mubr.msk.bf16.gmra.mrb[24].mxu1 %vm1536_vm1, %v11846_v45  ;;  %9759 = vmatmul.mubr.msk.bf16.gmra.mrb[24].mxu0 %vm1536_vm1, %v11858_v46 }
  0x80   : > { %2358 = vmatprep.mubr.bf16.mxu1 %v16613_v10  ;;  %1868 = vmatprep.mubr.bf16.mxu0 %v16613_v10 }
  0x87   : > { %9809 = vmatmul.mubr.msk.bf16.gmra.mrb[28].mxu1 %vm1536_vm1, %v11848_v47  ;;  %9760 = vmatmul.mubr.msk.bf16.gmra.mrb[28].mxu0 %vm1536_vm1, %v11860_v48  ;;  %v11914_v47 = vld [vmem:[%s12470_s30 + $0xd8] sm:$0xff]  }
  0x88   : > { %2368 = vmatprep.mubr.bf16.mxu1 %v16613_v10  ;;  %1878 = vmatprep.mubr.bf16.mxu0 %v16613_v10 }
  0x8f   : > { %9810 = vmatmul.mubr.msk.bf16.gmra.mrb[32].mxu1 %vm1536_vm1, %v11853_v49  ;;  %9761 = vmatmul.mubr.msk.bf16.gmra.mrb[32].mxu0 %vm1536_vm1, %v11862_v50 }
  0x90   : > { %2378 = vmatprep.mubr.bf16.mxu1 %v16613_v10  ;;  %1888 = vmatprep.mubr.bf16.mxu0 %v16613_v10 }
  0x97   : > { %9811 = vmatmul.mubr.msk.bf16.gmra.mrb[36].mxu1 %vm1536_vm1, %v11855_v53  ;;  %9762 = vmatmul.mubr.msk.bf16.gmra.mrb[36].mxu0 %vm1536_vm1, %v11867_v54 }
  0x98   : > { %2388 = vmatprep.mubr.bf16.mxu1 %v16613_v10  ;;  %1898 = vmatprep.mubr.bf16.mxu0 %v16613_v10 }
  0x9f   : > { %9812 = vmatmul.mubr.msk.bf16.gmra.mrb[40].mxu1 %vm1536_vm1, %v11857_v55  ;;  %9763 = vmatmul.mubr.msk.bf16.gmra.mrb[40].mxu0 %vm1536_vm1, %v11869_v56 }
  0xa0   : > { %2398 = vmatprep.mubr.bf16.mxu1 %v16613_v10  ;;  %1908 = vmatprep.mubr.bf16.mxu0 %v16613_v10 }
  0xa7   : > { %9813 = vmatmul.mubr.msk.bf16.gmra.mrb[44].mxu1 %vm1536_vm1, %v11859_v57  ;;  %9764 = vmatmul.mubr.msk.bf16.gmra.mrb[44].mxu0 %vm1536_vm1, %v11871_v58 }
  0xa8   : > { %2408 = vmatprep.mubr.bf16.mxu1 %v16613_v10  ;;  %1918 = vmatprep.mubr.bf16.mxu0 %v16613_v10 }
  0xaf   : > { %9814 = vmatmul.mubr.msk.bf16.gmra.mrb[48].mxu1 %vm1536_vm1, %v11861_v59  ;;  %9765 = vmatmul.mubr.msk.bf16.gmra.mrb[48].mxu0 %vm1536_vm1, %v11878_v60 }
  0xb0   : > { %2418 = vmatprep.mubr.bf16.mxu1 %v16613_v10  ;;  %1928 = vmatprep.mubr.bf16.mxu0 %v16613_v10 }
  0xb7   : > { %9815 = vmatmul.mubr.msk.bf16.gmra.mrb[52].mxu1 %vm1536_vm1, %v11866_v63  ;;  %9766 = vmatmul.mubr.msk.bf16.gmra.mrb[52].mxu0 %vm1536_vm1, %v11880_v0 }
  0xb8   : > { %2428 = vmatprep.mubr.bf16.mxu1 %v16613_v10  ;;  %1938 = vmatprep.mubr.bf16.mxu0 %v16613_v10 }
  0xbf   : > { %9816 = vmatmul.mubr.msk.bf16.gmra.mrb[56].mxu1 %vm1536_vm1, %v11868_v1  ;;  %9767 = vmatmul.mubr.msk.bf16.gmra.mrb[56].mxu0 %vm1536_vm1, %v11882_v2  ;;  %v12123_v1 = vld [vmem:[%s12470_s30 + $0x20] sm:$0xff]  }
  0xc0   : > { %2438 = vmatprep.mubr.bf16.mxu1 %v16613_v10  ;;  %1948 = vmatprep.mubr.bf16.mxu0 %v16613_v10 }
  0xc7   : > { %9817 = vmatmul.mubr.msk.bf16.gmra.mrb[60].mxu1 %vm1536_vm1, %v11870_v3  ;;  %9768 = vmatmul.mubr.msk.bf16.gmra.mrb[60].mxu0 %vm1536_vm1, %v11887_v4 }
  0xc8   : > { %2448 = vmatprep.mubr.bf16.mxu1 %v16613_v10  ;;  %1958 = vmatprep.mubr.bf16.mxu0 %v16613_v10 }
  0xcf   : > { %9818 = vmatmul.mubr.msk.bf16.gmra.mrb[64].mxu1 %vm1536_vm1, %v11877_v7  ;;  %9769 = vmatmul.mubr.msk.bf16.gmra.mrb[64].mxu0 %vm1536_vm1, %v11889_v8 }
  0xd0   : > { %2458 = vmatprep.mubr.bf16.mxu1 %v16613_v10  ;;  %1968 = vmatprep.mubr.bf16.mxu0 %v16613_v10 }
  0xd7   : > { %9819 = vmatmul.mubr.msk.bf16.gmra.mrb[68].mxu1 %vm1536_vm1, %v11879_v9  ;;  %9770 = vmatmul.mubr.msk.bf16.gmra.mrb[68].mxu0 %vm1536_vm1, %v11891_v11 }
  0xd8   : > { %2468 = vmatprep.mubr.bf16.mxu1 %v16613_v10  ;;  %1978 = vmatprep.mubr.bf16.mxu0 %v16613_v10 }
  0xdf   : > { %9820 = vmatmul.mubr.msk.bf16.gmra.mrb[72].mxu1 %vm1536_vm1, %v11881_v12  ;;  %9771 = vmatmul.mubr.msk.bf16.gmra.mrb[72].mxu0 %vm1536_vm1, %v11896_v13  ;;  %v11935_v12 = vld [vmem:[%s16604_s3 + $0xa0] ss:$8 sps:$4 sm:$0xff]   ;;  %v11937_v13 = vld [vmem:[%s16604_s3 + $0xa4] ss:$8 sps:$4 sm:$0xff]  }
  0xe0   : > { %2478 = vmatprep.mubr.bf16.mxu1 %v16613_v10  ;;  %1988 = vmatprep.mubr.bf16.mxu0 %v16613_v10 }
  0xe1   : > { %4768 = vmatprep.subr.bf16.mxu0 %v11937_v13 }
  0xe2   : > { %4769 = vmatpush1.bf16.msra.mxu0 %v11935_v12 }
  0xe7   : > { %9821 = vmatmul.mubr.msk.bf16.gmra.mrb[76].mxu1 %vm1536_vm1, %v11886_v14  ;;  %9772 = vmatmul.mubr.msk.bf16.gmra.mrb[76].mxu0 %vm1536_vm1, %v11897_v15 }
  0xe8   : > { %2488 = vmatprep.mubr.bf16.mxu1 %v16613_v10  ;;  %1998 = vmatprep.mubr.bf16.mxu0 %v16613_v10 }
  0xef   : > { %9822 = vmatmul.mubr.msk.bf16.gmra.mrb[80].mxu1 %vm1536_vm1, %v11888_v18  ;;  %9773 = vmatmul.mubr.msk.bf16.gmra.mrb[80].mxu0 %vm1536_vm1, %v11898_v19 }
  0xf0   : > { %2498 = vmatprep.mubr.bf16.mxu1 %v16613_v10  ;;  %2008 = vmatprep.mubr.bf16.mxu0 %v16613_v10 }
  0xf7   : > { %9823 = vmatmul.mubr.msk.bf16.gmra.mrb[84].mxu1 %vm1536_vm1, %v11890_v20  ;;  %9774 = vmatmul.mubr.msk.bf16.gmra.mrb[84].mxu0 %vm1536_vm1, %v11902_v21 }
  0xf8   : > { %2508 = vmatprep.mubr.bf16.mxu1 %v16613_v10  ;;  %2018 = vmatprep.mubr.bf16.mxu0 %v16613_v10 }
  0xff   : > { %9824 = vmatmul.mubr.msk.bf16.gmra.mrb[88].mxu1 %vm1536_vm1, %v11895_v24  ;;  %9775 = vmatmul.mubr.msk.bf16.gmra.mrb[88].mxu0 %vm1536_vm1, %v11903_v25 }
 0x100   : > { %2551 = vmatprep.mubr.bf16.mxu1 %v16613_v10  ;;  %2028 = vmatprep.mubr.bf16.mxu0 %v16613_v10 }
 0x107   : > { %9826 = vmatmul.mubr.msk.bf16.vlgmr.msra.gmra.mrb[92].mxu1 %vm1536_vm1, %v12119_v27  ;;  %9776 = vmatmul.mubr.msk.bf16.gmra.mrb[92].mxu0 %vm1536_vm1, %v11904_v26 }
 0x108   : > { %2561 = vmatprep.mubr.bf16.mxu1 %v16613_v10  ;;  %2038 = vmatprep.mubr.bf16.mxu0 %v16613_v10 }
 0x10f   : > { %9827 = vmatmul.mubr.msk.bf16.gmra.mrb[96].mxu1 %vm1536_vm1, %v12120_v29  ;;  %9777 = vmatmul.mubr.msk.bf16.gmra.mrb[96].mxu0 %vm1536_vm1, %v11908_v28 }
 0x110   : > { %2571 = vmatprep.mubr.bf16.mxu1 %v16613_v10  ;;  %2048 = vmatprep.mubr.bf16.mxu0 %v16613_v10 }
 0x117   : > { %9828 = vmatmul.mubr.msk.bf16.gmra.mrb[100].mxu1 %vm1536_vm1, %v12121_v34  ;;  %9778 = vmatmul.mubr.msk.bf16.gmra.mrb[100].mxu0 %vm1536_vm1, %v11909_v33  ;;  %v12124_v34 = vld [vmem:[%s12470_s30 + $0x28] sm:$0xff]  }
 0x118   : > { %2581 = vmatprep.mubr.bf16.mxu1 %v16613_v10  ;;  %2058 = vmatprep.mubr.bf16.mxu0 %v16613_v10 }
 0x11f   : > { %9829 = vmatmul.mubr.msk.bf16.gmra.mrb[104].mxu1 %vm1536_vm1, %v12122_v40  ;;  %9779 = vmatmul.mubr.msk.bf16.gmra.mrb[104].mxu0 %vm1536_vm1, %v11910_v37 }
 0x120   : > { %2591 = vmatprep.mubr.bf16.mxu1 %v16613_v10  ;;  %2068 = vmatprep.mubr.bf16.mxu0 %v16613_v10 }
 0x122   : > { %v2290_v43 = vpop.f32.mrb[0].mxu1  ;;  %v1800_v44 = vpop.f32.mrb[0].mxu0 }
 0x123   : > { %v2291_v45 = vadd.f32 %v2290_v43, %v12720_v41  ;;  %v2292_v46 = vpop.f32.mrb[1].mxu1  ;;  %v1801_v48 = vadd.f32 %v1800_v44, %v12720_v41  ;;  %v1802_v49 = vpop.f32.mrb[1].mxu0 }
 0x124   : > { %v2293_v50 = vadd.f32 %v2292_v46, %v12725_v42  ;;  %v2294_v51 = vpop.f32.mrb[2].mxu1  ;;  %v1803_v52 = vadd.f32 %v1802_v49, %v12725_v42  ;;  %v1804_v53 = vpop.f32.mrb[2].mxu0 }
 0x125   : > { %v3664_v54 = vmax.f32 %v2291_v45, 0.0  ;;  %v2295_v55 = vadd.f32 %v2294_v51, %v12720_v41  ;;  %v2296_v56 = vpop.f32.mrb[3].mxu1  ;;  %v3272_v57 = vmax.f32 %v1801_v48, 0.0  ;;  %v1805_v58 = vadd.f32 %v1804_v53, %v12720_v41  ;;  %v1806_v59 = vpop.f32.mrb[3].mxu0  ;;  %v11916_v51 = vld [vmem:[%s12470_s30 + $0xe8] sm:$0xff]  }
 0x126   : > { %v3665_v60 = vmax.f32 %v2293_v50, 0.0  ;;  %v2297_v61 = vadd.f32 %v2296_v56, %v12725_v42  ;;  %v3273_v62 = vmax.f32 %v1803_v52, 0.0  ;;  %v1807_v63 = vadd.f32 %v1806_v59, %v12725_v42 }
 0x127   : > { %v3668_v0 = vmax.f32 %v2295_v55, 0.0  ;;  %9830 = vmatmul.mubr.msk.bf16.gmra.mrb[108].mxu1 %vm1536_vm1, %v12123_v1  ;;  %9780 = vmatmul.mubr.msk.bf16.gmra.mrb[108].mxu0 %vm1536_vm1, %v11914_v47  ;;  %v3276_v2 = vmax.f32 %v1805_v58, 0.0 }
 0x128   : > { %v12741_v3 = vmax.f32 %v3664_v54, %v3665_v60  ;;  %v3669_v4 = vmax.f32 %v2297_v61, 0.0  ;;  %2601 = vmatprep.mubr.bf16.mxu1 %v16613_v10  ;;  %2078 = vmatprep.mubr.bf16.mxu0 %v16613_v10  ;;  %v12745_v5 = vmax.f32 %v3272_v57, %v3273_v62  ;;  %v3277_v6 = vmax.f32 %v1807_v63, 0.0 }
 0x12a   : > { %16933 = vst [vmem:[#allocation4_spill] sm:$0xff] %v12741_v3  ;;  %v12747_v7 = vmax.f32 %v3668_v0, %v3669_v4  ;;  %v2300_v8 = vpop.f32.mrb[4].mxu1  ;;  %v12749_v9 = vmax.f32 %v3276_v2, %v3277_v6  ;;  %v1810_v11 = vpop.f32.mrb[4].mxu0 }
 0x12b   : > { %v2301_v14 = vadd.f32 %v2300_v8, %v12720_v41  ;;  %v2302_v15 = vpop.f32.mrb[5].mxu1  ;;  %v1811_v17 = vadd.f32 %v1810_v11, %v12720_v41  ;;  %v1812_v18 = vpop.f32.mrb[5].mxu0  ;;  %v12125_v8 = vld [vmem:[%s12470_s30 + $0x30] sm:$0xff]  }
 0x12c   : > { %16934 = vst [vmem:[#allocation5_spill] sm:$0xff] %v12747_v7  ;;  %v2303_v19 = vadd.f32 %v2302_v15, %v12725_v42  ;;  %v2304_v20 = vpop.f32.mrb[6].mxu1  ;;  %v1813_v21 = vadd.f32 %v1812_v18, %v12725_v42  ;;  %v1814_v22 = vpop.f32.mrb[6].mxu0 }
 0x12d   : > { %v3672_v23 = vmax.f32 %v2301_v14, 0.0  ;;  %v2305_v24 = vadd.f32 %v2304_v20, %v12720_v41  ;;  %v2306_v25 = vpop.f32.mrb[7].mxu1  ;;  %v3280_v26 = vmax.f32 %v1811_v17, 0.0  ;;  %v1815_v27 = vadd.f32 %v1814_v22, %v12720_v41  ;;  %v1816_v28 = vpop.f32.mrb[7].mxu0  ;;  %v11920_v22 = vld [vmem:[%s12470_s30 + $0xf0] sm:$0xff]  }
 0x12e   : > { %v3673_v29 = vmax.f32 %v2303_v19, 0.0  ;;  %v2307_v30 = vadd.f32 %v2306_v25, %v12725_v42  ;;  %v3281_v31 = vmax.f32 %v1813_v21, 0.0  ;;  %v1817_v32 = vadd.f32 %v1816_v28, %v12725_v42 }
 0x12f   : > { %v3676_v33 = vmax.f32 %v2305_v24, 0.0  ;;  %9831 = vmatmul.mubr.msk.bf16.gmra.mrb[112].mxu1 %vm1536_vm1, %v12124_v34  ;;  %9781 = vmatmul.mubr.msk.bf16.gmra.mrb[112].mxu0 %vm1536_vm1, %v11915_v16  ;;  %v3284_v37 = vmax.f32 %v1815_v27, 0.0 }
 0x130   : > { %v12769_v38 = vmax.f32 %v3672_v23, %v3673_v29  ;;  %v3677_v40 = vmax.f32 %v2307_v30, 0.0  ;;  %2611 = vmatprep.mubr.bf16.mxu1 %v16613_v10  ;;  %2088 = vmatprep.mubr.bf16.mxu0 %v16613_v10  ;;  %v3285_v43 = vmax.f32 %v1817_v32, 0.0  ;;  %v12773_v44 = vmax.f32 %v3280_v26, %v3281_v31 }
 0x132   : > { %16935 = vst [vmem:[#allocation6_spill] sm:$0xff] %v12769_v38  ;;  %v12775_v45 = vmax.f32 %v3676_v33, %v3677_v40  ;;  %v2310_v46 = vpop.f32.mrb[8].mxu1  ;;  %v1820_v47 = vpop.f32.mrb[8].mxu0  ;;  %v12777_v48 = vmax.f32 %v3284_v37, %v3285_v43  ;;  %v12142_v38 = vld [vmem:[%s12470_s30 + $0xb8] sm:$0xff]  }
 0x133   : > { %v2311_v49 = vadd.f32 %v2310_v46, %v12720_v41  ;;  %v2312_v50 = vpop.f32.mrb[9].mxu1  ;;  %v1821_v52 = vadd.f32 %v1820_v47, %v12720_v41  ;;  %v1822_v53 = vpop.f32.mrb[9].mxu0 }
 0x134   : > { %16936 = vst [vmem:[#allocation7_spill] sm:$0xff] %v12775_v45  ;;  %v2313_v54 = vadd.f32 %v2312_v50, %v12725_v42  ;;  %v2314_v55 = vpop.f32.mrb[10].mxu1  ;;  %v1823_v56 = vadd.f32 %v1822_v53, %v12725_v42  ;;  %v1824_v57 = vpop.f32.mrb[10].mxu0 }
 0x135   : > { %v3680_v58 = vmax.f32 %v2311_v49, 0.0  ;;  %v2315_v59 = vadd.f32 %v2314_v55, %v12720_v41  ;;  %v2316_v60 = vpop.f32.mrb[11].mxu1  ;;  %v3288_v61 = vmax.f32 %v1821_v52, 0.0  ;;  %v1825_v62 = vadd.f32 %v1824_v57, %v12720_v41  ;;  %v1826_v63 = vpop.f32.mrb[11].mxu0  ;;  %v12126_v49 = vld [vmem:[%s12470_s30 + $0x38] sm:$0xff]  }
 0x136   : > { %v3681_v0 = vmax.f32 %v2313_v54, 0.0  ;;  %v2317_v1 = vadd.f32 %v2316_v60, %v12725_v42  ;;  %v3289_v2 = vmax.f32 %v1823_v56, 0.0  ;;  %v1827_v4 = vadd.f32 %v1826_v63, %v12725_v42  ;;  %v11921_v63 = vld [vmem:[%s12470_s30 + $0xf8] sm:$0xff]  }
 0x137   : > { %v3684_v6 = vmax.f32 %v2315_v59, 0.0  ;;  %9832 = vmatmul.mubr.msk.bf16.gmra.mrb[116].mxu1 %vm1536_vm1, %v12125_v8  ;;  %9782 = vmatmul.mubr.msk.bf16.gmra.mrb[116].mxu0 %vm1536_vm1, %v11916_v51  ;;  %v3292_v11 = vmax.f32 %v1825_v62, 0.0  ;;  %v11943_v59 = vld [vmem:[%s16604_s3 + $0xb4] ss:$8 sps:$4 sm:$0xff]  }
 0x138   : > { %v12791_v12 = vmax.f32 %v3680_v58, %v3681_v0  ;;  %v3685_v13 = vmax.f32 %v2317_v1, 0.0  ;;  %2621 = vmatprep.mubr.bf16.mxu1 %v16613_v10  ;;  %2098 = vmatprep.mubr.bf16.mxu0 %v16613_v10  ;;  %v3293_v14 = vmax.f32 %v1827_v4, 0.0  ;;  %v12795_v15 = vmax.f32 %v3288_v61, %v3289_v2  ;;  %v11941_v58 = vld [vmem:[%s16604_s3 + $0xb0] ss:$8 sps:$4 sm:$0xff]  }
 0x139   : > { %4770 = vmatprep.subr.bf16.mxu0 %v11943_v59 }
 0x13a   : > { %16937 = vst [vmem:[#allocation8_spill] sm:$0xff] %v12791_v12  ;;  %v12797_v16 = vmax.f32 %v3684_v6, %v3685_v13  ;;  %v2320_v17 = vpop.f32.mrb[12].mxu1  ;;  %v1830_v18 = vpop.f32.mrb[12].mxu0  ;;  %v12799_v19 = vmax.f32 %v3292_v11, %v3293_v14  ;;  %4771 = vmatpush1.bf16.msra.mxu0 %v11941_v58 }
 0x13b   : > { %v2321_v20 = vadd.f32 %v2320_v17, %v12720_v41  ;;  %v2322_v21 = vpop.f32.mrb[13].mxu1  ;;  %v1831_v23 = vadd.f32 %v1830_v18, %v12720_v41  ;;  %v1832_v24 = vpop.f32.mrb[13].mxu0 }
 0x13c   : > { %16938 = vst [vmem:[#allocation9_spill] sm:$0xff] %v12797_v16  ;;  %v2323_v25 = vadd.f32 %v2322_v21, %v12725_v42  ;;  %v2324_v26 = vpop.f32.mrb[14].mxu1  ;;  %v1833_v27 = vadd.f32 %v1832_v24, %v12725_v42  ;;  %v1834_v28 = vpop.f32.mrb[14].mxu0 }
 0x13d   : > { %v3688_v29 = vmax.f32 %v2321_v20, 0.0  ;;  %v2325_v30 = vadd.f32 %v2324_v26, %v12720_v41  ;;  %v2326_v31 = vpop.f32.mrb[15].mxu1  ;;  %v3296_v32 = vmax.f32 %v1831_v23, 0.0  ;;  %v1835_v33 = vadd.f32 %v1834_v28, %v12720_v41  ;;  %v1836_v34 = vpop.f32.mrb[15].mxu0  ;;  %v12127_v26 = vld [vmem:[%s12470_s30 + $0x40] sm:$0xff]  }
 0x13e   : > { %v3689_v37 = vmax.f32 %v2323_v25, 0.0  ;;  %v2327_v40 = vadd.f32 %v2326_v31, %v12725_v42  ;;  %v3297_v43 = vmax.f32 %v1833_v27, 0.0  ;;  %v1837_v46 = vadd.f32 %v1836_v34, %v12725_v42 }
 0x13f   : > { %v3692_v47 = vmax.f32 %v2325_v30, 0.0  ;;  %9833 = vmatmul.mubr.msk.bf16.gmra.mrb[120].mxu1 %vm1536_vm1, %v12126_v49  ;;  %9783 = vmatmul.mubr.msk.bf16.gmra.mrb[120].mxu0 %vm1536_vm1, %v11920_v22  ;;  %v3300_v50 = vmax.f32 %v1835_v33, 0.0 }
 0x140   : > { %v12813_v51 = vmax.f32 %v3688_v29, %v3689_v37  ;;  %v3693_v52 = vmax.f32 %v2327_v40, 0.0  ;;  %2631 = vmatprep.mubr.bf16.mxu1 %v16613_v10  ;;  %2108 = vmatprep.mubr.bf16.mxu0 %v16613_v10  ;;  %v3301_v53 = vmax.f32 %v1837_v46, 0.0  ;;  %v12817_v54 = vmax.f32 %v3296_v32, %v3297_v43  ;;  %v11922_v46 = vld [vmem:[%s12470_s30 + $0x100] sm:$0xff]  }
 0x142   : > { %16939 = vst [vmem:[#allocation10_spill] sm:$0xff] %v12813_v51  ;;  %v12819_v55 = vmax.f32 %v3692_v47, %v3693_v52  ;;  %v2330_v56 = vpop.f32.mrb[16].mxu1  ;;  %v1840_v57 = vpop.f32.mrb[16].mxu0  ;;  %v12827_v60 = vmax.f32 %v3300_v50, %v3301_v53 }
 0x143   : > { %v2331_v61 = vadd.f32 %v2330_v56, %v12720_v41  ;;  %v2332_v62 = vpop.f32.mrb[17].mxu1  ;;  %v1841_v0 = vadd.f32 %v1840_v57, %v12720_v41  ;;  %v1842_v1 = vpop.f32.mrb[17].mxu0 }
 0x144   : > { %16940 = vst [vmem:[#allocation11_spill] sm:$0xff] %v12819_v55  ;;  %v2333_v2 = vadd.f32 %v2332_v62, %v12725_v42  ;;  %v2334_v4 = vpop.f32.mrb[18].mxu1  ;;  %v1843_v6 = vadd.f32 %v1842_v1, %v12725_v42  ;;  %v1844_v8 = vpop.f32.mrb[18].mxu0 }
 0x145   : > { %v3696_v11 = vmax.f32 %v2331_v61, 0.0  ;;  %v2335_v13 = vadd.f32 %v2334_v4, %v12720_v41  ;;  %v2336_v14 = vpop.f32.mrb[19].mxu1  ;;  %v3304_v17 = vmax.f32 %v1841_v0, 0.0  ;;  %v1845_v18 = vadd.f32 %v1844_v8, %v12720_v41  ;;  %v1846_v20 = vpop.f32.mrb[19].mxu0  ;;  %v12128_v8 = vld [vmem:[%s12470_s30 + $0x48] sm:$0xff]  }
 0x146   : > { %v3697_v21 = vmax.f32 %v2333_v2, 0.0  ;;  %v2337_v22 = vadd.f32 %v2336_v14, %v12725_v42  ;;  %v3305_v23 = vmax.f32 %v1843_v6, 0.0  ;;  %v1847_v24 = vadd.f32 %v1846_v20, %v12725_v42 }
 0x147   : > { %v3700_v25 = vmax.f32 %v2335_v13, 0.0  ;;  %9834 = vmatmul.mubr.msk.bf16.gmra.mrb[124].mxu1 %vm1536_vm1, %v12127_v26  ;;  %9784 = vmatmul.mubr.msk.bf16.gmra.mrb[124].mxu0 %vm1536_vm1, %v11921_v63  ;;  %v3308_v27 = vmax.f32 %v1845_v18, 0.0  ;;  %v11926_v26 = vld [vmem:[%s12470_s30 + $0x108] sm:$0xff]  }
 0x148   : > { %v12841_v28 = vmax.f32 %v3696_v11, %v3697_v21  ;;  %v3701_v29 = vmax.f32 %v2337_v22, 0.0  ;;  %2641 = vmatprep.mubr.bf16.mxu1 %v16613_v10  ;;  %2118 = vmatprep.mubr.bf16.mxu0 %v16613_v10  ;;  %v3309_v30 = vmax.f32 %v1847_v24, 0.0  ;;  %v12845_v31 = vmax.f32 %v3304_v17, %v3305_v23 }
 0x14a   : > { %16941 = vst [vmem:[#allocation12_spill] sm:$0xff] %v12841_v28  ;;  %v12847_v32 = vmax.f32 %v3700_v25, %v3701_v29  ;;  %v2340_v33 = vpop.f32.mrb[20].mxu1  ;;  %v1850_v34 = vpop.f32.mrb[20].mxu0  ;;  %v12849_v37 = vmax.f32 %v3308_v27, %v3309_v30 }
 0x14b   : > { %v2341_v40 = vadd.f32 %v2340_v33, %v12720_v41  ;;  %v2342_v43 = vpop.f32.mrb[21].mxu1  ;;  %v1851_v47 = vadd.f32 %v1850_v34, %v12720_v41  ;;  %v1852_v49 = vpop.f32.mrb[21].mxu0 }
 0x14c   : > { %16942 = vst [vmem:[#allocation13_spill] sm:$0xff] %v12847_v32  ;;  %v2343_v50 = vadd.f32 %v2342_v43, %v12725_v42  ;;  %v2344_v52 = vpop.f32.mrb[22].mxu1  ;;  %v1853_v53 = vadd.f32 %v1852_v49, %v12725_v42  ;;  %v1854_v56 = vpop.f32.mrb[22].mxu0 }
 0x14d   : > { %v3704_v57 = vmax.f32 %v2341_v40, 0.0  ;;  %v2345_v58 = vadd.f32 %v2344_v52, %v12720_v41  ;;  %v2346_v59 = vpop.f32.mrb[23].mxu1  ;;  %v3312_v61 = vmax.f32 %v1851_v47, 0.0  ;;  %v1855_v62 = vadd.f32 %v1854_v56, %v12720_v41  ;;  %v1856_v63 = vpop.f32.mrb[23].mxu0 }
 0x14e   : > { %v3705_v0 = vmax.f32 %v2343_v50, 0.0  ;;  %v2347_v1 = vadd.f32 %v2346_v59, %v12725_v42  ;;  %v3313_v2 = vmax.f32 %v1853_v53, 0.0  ;;  %v1857_v4 = vadd.f32 %v1856_v63, %v12725_v42 }
 0x14f   : > { %v3708_v6 = vmax.f32 %v2345_v58, 0.0  ;;  %9835 = vmatmul.mubr.msk.bf16.gmra.mrb[128].mxu1 %vm1536_vm1, %v12128_v8  ;;  %9785 = vmatmul.mubr.msk.bf16.gmra.mrb[128].mxu0 %vm1536_vm1, %v11922_v46  ;;  %v3316_v11 = vmax.f32 %v1855_v62, 0.0 }
 0x150   : > { %v12863_v13 = vmax.f32 %v3704_v57, %v3705_v0  ;;  %v3709_v14 = vmax.f32 %v2347_v1, 0.0  ;;  %2651 = vmatprep.mubr.bf16.mxu1 %v16613_v10  ;;  %2128 = vmatprep.mubr.bf16.mxu0 %v16613_v10  ;;  %v3317_v17 = vmax.f32 %v1857_v4, 0.0  ;;  %v12867_v18 = vmax.f32 %v3312_v61, %v3313_v2  ;;  %v12129_v61 = vld [vmem:[%s12470_s30 + $0x50] sm:$0xff]  }
 0x152   : > { %16943 = vst [vmem:[#allocation14_spill] sm:$0xff] %v12863_v13  ;;  %v12869_v20 = vmax.f32 %v3708_v6, %v3709_v14  ;;  %v2350_v21 = vpop.f32.mrb[24].mxu1  ;;  %v1860_v22 = vpop.f32.mrb[24].mxu0  ;;  %v12871_v23 = vmax.f32 %v3316_v11, %v3317_v17  ;;  %v11947_v11 = vld [vmem:[%s16604_s3 + $0xc0] ss:$8 sps:$4 sm:$0xff]  }
 0x153   : > { %v2351_v24 = vadd.f32 %v2350_v21, %v12720_v41  ;;  %v2352_v25 = vpop.f32.mrb[25].mxu1  ;;  %v1861_v27 = vadd.f32 %v1860_v22, %v12720_v41  ;;  %v1862_v29 = vpop.f32.mrb[25].mxu0  ;;  %v11949_v14 = vld [vmem:[%s16604_s3 + $0xc4] ss:$8 sps:$4 sm:$0xff]  }
 0x154   : > { %16944 = vst [vmem:[#allocation15_spill] sm:$0xff] %v12869_v20  ;;  %v2353_v30 = vadd.f32 %v2352_v25, %v12725_v42  ;;  %v2354_v33 = vpop.f32.mrb[26].mxu1  ;;  %v1863_v34 = vadd.f32 %v1862_v29, %v12725_v42  ;;  %v1864_v40 = vpop.f32.mrb[26].mxu0  ;;  %4772 = vmatprep.subr.bf16.mxu0 %v11949_v14 }
 0x155   : > { %v3712_v43 = vmax.f32 %v2351_v24, 0.0  ;;  %v2355_v46 = vadd.f32 %v2354_v33, %v12720_v41  ;;  %v2356_v47 = vpop.f32.mrb[27].mxu1  ;;  %v3320_v49 = vmax.f32 %v1861_v27, 0.0  ;;  %v1865_v50 = vadd.f32 %v1864_v40, %v12720_v41  ;;  %v1866_v52 = vpop.f32.mrb[27].mxu0  ;;  %v11927_v24 = vld [vmem:[%s12470_s30 + $0x110] sm:$0xff]   ;;  %4773 = vmatpush1.bf16.msra.mxu0 %v11947_v11 }
 0x156   : > { %v3713_v53 = vmax.f32 %v2353_v30, 0.0  ;;  %v2357_v56 = vadd.f32 %v2356_v47, %v12725_v42  ;;  %v3321_v57 = vmax.f32 %v1863_v34, 0.0  ;;  %v1867_v58 = vadd.f32 %v1866_v52, %v12725_v42 }
 0x157   : > { %v3716_v59 = vmax.f32 %v2355_v46, 0.0  ;;  %9836 = vmatmul.mubr.msk.bf16.gmra.mrb[132].mxu1 %vm1536_vm1, %v12129_v61  ;;  %9786 = vmatmul.mubr.msk.bf16.gmra.mrb[132].mxu0 %vm1536_vm1, %v11926_v26  ;;  %v3324_v62 = vmax.f32 %v1865_v50, 0.0 }
 0x158   : > { %v12885_v63 = vmax.f32 %v3712_v43, %v3713_v53  ;;  %v3717_v0 = vmax.f32 %v2357_v56, 0.0  ;;  %2661 = vmatprep.mubr.bf16.mxu1 %v16613_v10  ;;  %2138 = vmatprep.mubr.bf16.mxu0 %v16613_v10  ;;  %v3325_v1 = vmax.f32 %v1867_v58, 0.0  ;;  %v12889_v2 = vmax.f32 %v3320_v49, %v3321_v57  ;;  %v12130_v58 = vld [vmem:[%s12470_s30 + $0x58] sm:$0xff]  }
 0x15a   : > { %16945 = vst [vmem:[#allocation16_spill] sm:$0xff] %v12885_v63  ;;  %v12891_v4 = vmax.f32 %v3716_v59, %v3717_v0  ;;  %v2360_v6 = vpop.f32.mrb[28].mxu1  ;;  %v1870_v8 = vpop.f32.mrb[28].mxu0  ;;  %v12899_v17 = vmax.f32 %v3324_v62, %v3325_v1 }
 0x15b   : > { %v2361_v21 = vadd.f32 %v2360_v6, %v12720_v41  ;;  %v2362_v22 = vpop.f32.mrb[29].mxu1  ;;  %v1871_v25 = vadd.f32 %v1870_v8, %v12720_v41  ;;  %v1872_v26 = vpop.f32.mrb[29].mxu0 }
 0x15c   : > { %16946 = vst [vmem:[#allocation17_spill] sm:$0xff] %v12891_v4  ;;  %v2363_v27 = vadd.f32 %v2362_v22, %v12725_v42  ;;  %v2364_v29 = vpop.f32.mrb[30].mxu1  ;;  %v1873_v30 = vadd.f32 %v1872_v26, %v12725_v42  ;;  %v1874_v33 = vpop.f32.mrb[30].mxu0 }
 0x15d   : > { %v3720_v34 = vmax.f32 %v2361_v21, 0.0  ;;  %v2365_v40 = vadd.f32 %v2364_v29, %v12720_v41  ;;  %v2366_v43 = vpop.f32.mrb[31].mxu1  ;;  %v3328_v46 = vmax.f32 %v1871_v25, 0.0  ;;  %v1875_v47 = vadd.f32 %v1874_v33, %v12720_v41  ;;  %v1876_v49 = vpop.f32.mrb[31].mxu0 }
 0x15e   : > { %v3721_v50 = vmax.f32 %v2363_v27, 0.0  ;;  %v2367_v52 = vadd.f32 %v2366_v43, %v12725_v42  ;;  %v3329_v53 = vmax.f32 %v1873_v30, 0.0  ;;  %v1877_v56 = vadd.f32 %v1876_v49, %v12725_v42 }
 0x15f   : > { %v3724_v57 = vmax.f32 %v2365_v40, 0.0  ;;  %9837 = vmatmul.mubr.msk.bf16.gmra.mrb[136].mxu1 %vm1536_vm1, %v12130_v58  ;;  %9787 = vmatmul.mubr.msk.bf16.gmra.mrb[136].mxu0 %vm1536_vm1, %v11927_v24  ;;  %v3332_v59 = vmax.f32 %v1875_v47, 0.0  ;;  %v11928_v24 = vld [vmem:[%s12470_s30 + $0x118] sm:$0xff]   ;;  %v12131_v58 = vld [vmem:[%s12470_s30 + $0x60] sm:$0xff]  }
 0x160   : > { %v12913_v61 = vmax.f32 %v3720_v34, %v3721_v50  ;;  %v3725_v62 = vmax.f32 %v2367_v52, 0.0  ;;  %2671 = vmatprep.mubr.bf16.mxu1 %v16613_v10  ;;  %2148 = vmatprep.mubr.bf16.mxu0 %v16613_v10  ;;  %v3333_v0 = vmax.f32 %v1877_v56, 0.0  ;;  %v12917_v1 = vmax.f32 %v3328_v46, %v3329_v53 }
 0x162   : > { %16947 = vst [vmem:[#allocation18_spill] sm:$0xff] %v12913_v61  ;;  %v12919_v6 = vmax.f32 %v3724_v57, %v3725_v62  ;;  %v2370_v8 = vpop.f32.mrb[32].mxu1  ;;  %v1880_v11 = vpop.f32.mrb[32].mxu0  ;;  %v12921_v14 = vmax.f32 %v3332_v59, %v3333_v0 }
 0x163   : > { %v2371_v21 = vadd.f32 %v2370_v8, %v12720_v41  ;;  %v2372_v22 = vpop.f32.mrb[33].mxu1  ;;  %v1881_v25 = vadd.f32 %v1880_v11, %v12720_v41  ;;  %v1882_v26 = vpop.f32.mrb[33].mxu0 }
 0x164   : > { %16948 = vst [vmem:[#allocation19_spill] sm:$0xff] %v12919_v6  ;;  %v2373_v27 = vadd.f32 %v2372_v22, %v12725_v42  ;;  %v2374_v29 = vpop.f32.mrb[34].mxu1  ;;  %v1883_v30 = vadd.f32 %v1882_v26, %v12725_v42  ;;  %v1884_v33 = vpop.f32.mrb[34].mxu0 }
 0x165   : > { %v3728_v34 = vmax.f32 %v2371_v21, 0.0  ;;  %v2375_v40 = vadd.f32 %v2374_v29, %v12720_v41  ;;  %v2376_v43 = vpop.f32.mrb[35].mxu1  ;;  %v3336_v46 = vmax.f32 %v1881_v25, 0.0  ;;  %v1885_v47 = vadd.f32 %v1884_v33, %v12720_v41  ;;  %v1886_v49 = vpop.f32.mrb[35].mxu0  ;;  %v11932_v29 = vld [vmem:[%s12470_s30 + $0x120] sm:$0xff]  }
 0x166   : > { %v3729_v50 = vmax.f32 %v2373_v27, 0.0  ;;  %v2377_v52 = vadd.f32 %v2376_v43, %v12725_v42  ;;  %v3337_v53 = vmax.f32 %v1883_v30, 0.0  ;;  %v1887_v56 = vadd.f32 %v1886_v49, %v12725_v42  ;;  %v11953_v49 = vld [vmem:[%s16604_s3 + $0xd0] ss:$8 sps:$4 sm:$0xff]  }
 0x167   : > { %v3732_v57 = vmax.f32 %v2375_v40, 0.0  ;;  %9838 = vmatmul.mubr.msk.bf16.gmra.mrb[140].mxu1 %vm1536_vm1, %v12131_v58  ;;  %9788 = vmatmul.mubr.msk.bf16.gmra.mrb[140].mxu0 %vm1536_vm1, %v11928_v24  ;;  %v3340_v59 = vmax.f32 %v1885_v47, 0.0 }
 0x168   : > { %v12935_v62 = vmax.f32 %v3728_v34, %v3729_v50  ;;  %v3733_v0 = vmax.f32 %v2377_v52, 0.0  ;;  %2681 = vmatprep.mubr.bf16.mxu1 %v16613_v10  ;;  %2158 = vmatprep.mubr.bf16.mxu0 %v16613_v10  ;;  %v3341_v8 = vmax.f32 %v1887_v56, 0.0  ;;  %v12939_v11 = vmax.f32 %v3336_v46, %v3337_v53  ;;  %v11955_v34 = vld [vmem:[%s16604_s3 + $0xd4] ss:$8 sps:$4 sm:$0xff]  }
 0x169   : > { %4774 = vmatprep.subr.bf16.mxu0 %v11955_v34 }
 0x16a   : > { %16949 = vst [vmem:[#allocation20_spill] sm:$0xff] %v12935_v62  ;;  %v12941_v21 = vmax.f32 %v3732_v57, %v3733_v0  ;;  %v2380_v22 = vpop.f32.mrb[36].mxu1  ;;  %v1890_v25 = vpop.f32.mrb[36].mxu0  ;;  %v12943_v26 = vmax.f32 %v3340_v59, %v3341_v8  ;;  %4775 = vmatpush1.bf16.msra.mxu0 %v11953_v49 }
 0x16b   : > { %v2381_v27 = vadd.f32 %v2380_v22, %v12720_v41  ;;  %v2382_v24 = vpop.f32.mrb[37].mxu1  ;;  %v1891_v30 = vadd.f32 %v1890_v25, %v12720_v41  ;;  %v1892_v33 = vpop.f32.mrb[37].mxu0 }
 0x16c   : > { %16950 = vst [vmem:[#allocation21_spill] sm:$0xff] %v12941_v21  ;;  %v2383_v40 = vadd.f32 %v2382_v24, %v12725_v42  ;;  %v2384_v43 = vpop.f32.mrb[38].mxu1  ;;  %v1893_v46 = vadd.f32 %v1892_v33, %v12725_v42  ;;  %v1894_v47 = vpop.f32.mrb[38].mxu0  ;;  %v12132_v24 = vld [vmem:[%s12470_s30 + $0x68] sm:$0xff]  }
 0x16d   : > { %v3736_v50 = vmax.f32 %v2381_v27, 0.0  ;;  %v2385_v52 = vadd.f32 %v2384_v43, %v12720_v41  ;;  %v2386_v53 = vpop.f32.mrb[39].mxu1  ;;  %v3344_v56 = vmax.f32 %v1891_v30, 0.0  ;;  %v1895_v57 = vadd.f32 %v1894_v47, %v12720_v41  ;;  %v1896_v58 = vpop.f32.mrb[39].mxu0  ;;  %v11959_v30 = vld [vmem:[%s16604_s3 + $0xe4] ss:$8 sps:$4 sm:$0xff]  }
 0x16e   : > { %v3737_v59 = vmax.f32 %v2383_v40, 0.0  ;;  %v2387_v0 = vadd.f32 %v2386_v53, %v12725_v42  ;;  %v3345_v8 = vmax.f32 %v1893_v46, 0.0  ;;  %v1897_v22 = vadd.f32 %v1896_v58, %v12725_v42  ;;  %v11957_v43 = vld [vmem:[%s16604_s3 + $0xe0] ss:$8 sps:$4 sm:$0xff]   ;;  %4776 = vmatprep.subr.bf16.mxu0 %v11959_v30 }
 0x16f   : > { %v3740_v25 = vmax.f32 %v2385_v52, 0.0  ;;  %9839 = vmatmul.mubr.msk.bf16.gmra.mrb[144].mxu1 %vm1536_vm1, %v12132_v24  ;;  %9789 = vmatmul.mubr.msk.bf16.gmra.mrb[144].mxu0 %vm1536_vm1, %v11932_v29  ;;  %v3348_v27 = vmax.f32 %v1895_v57, 0.0  ;;  %v11933_v57 = vld [vmem:[%s12470_s30 + $0x128] sm:$0xff]   ;;  %v11960_v24 = vld [vmem:[%s16604_s3 + $0xf0] ss:$8 sps:$4 sm:$0xff]  }
 0x170   : > { %v12966_v33 = vmax.f32 %v3736_v50, %v3737_v59  ;;  %v3741_v34 = vmax.f32 %v2387_v0, 0.0  ;;  %2691 = vmatprep.mubr.bf16.mxu1 %v16613_v10  ;;  %2168 = vmatprep.mubr.bf16.mxu0 %v16613_v10  ;;  %v3349_v40 = vmax.f32 %v1897_v22, 0.0  ;;  %v12973_v46 = vmax.f32 %v3344_v56, %v3345_v8  ;;  %v11962_v56 = vld [vmem:[%s16604_s3 + $0xf4] ss:$8 sps:$4 sm:$0xff]  }
 0x171   : > { %4777 = vmatpush1.bf16.msra.mxu0 %v11957_v43  ;;  %v12133_v10 = vld [vmem:[%s12470_s30 + $0x70] sm:$0xff]  }
 0x172   : > { %16951 = vst [vmem:[#allocation22_spill] sm:$0xff] %v12966_v33  ;;  %v12975_v29 = vmax.f32 %v3740_v25, %v3741_v34  ;;  %v2390_v47 = vpop.f32.mrb[40].mxu1  ;;  %v1900_v49 = vpop.f32.mrb[40].mxu0  ;;  %v12977_v50 = vmax.f32 %v3348_v27, %v3349_v40  ;;  %4778 = vmatprep.subr.bf16.mxu0 %v11962_v56 }
 0x173   : > { %v2391_v52 = vadd.f32 %v2390_v47, %v12720_v41  ;;  %v2392_v53 = vpop.f32.mrb[41].mxu1  ;;  %v1901_v58 = vadd.f32 %v1900_v49, %v12720_v41  ;;  %v1902_v59 = vpop.f32.mrb[41].mxu0 }
 0x174   : > { %16952 = vst [vmem:[#allocation23_spill] sm:$0xff] %v12975_v29  ;;  %v2393_v0 = vadd.f32 %v2392_v53, %v12725_v42  ;;  %v2394_v8 = vpop.f32.mrb[42].mxu1  ;;  %v1903_v22 = vadd.f32 %v1902_v59, %v12725_v42  ;;  %v1904_v25 = vpop.f32.mrb[42].mxu0 }
 0x175   : > { %v3744_v27 = vmax.f32 %v2391_v52, 0.0  ;;  %v2395_v30 = vadd.f32 %v2394_v8, %v12720_v41  ;;  %v2396_v34 = vpop.f32.mrb[43].mxu1  ;;  %v3352_v40 = vmax.f32 %v1901_v58, 0.0  ;;  %v1905_v43 = vadd.f32 %v1904_v25, %v12720_v41  ;;  %v1906_v47 = vpop.f32.mrb[43].mxu0  ;;  %4779 = vmatpush1.bf16.msra.mxu0 %v11960_v24 }
 0x176   : > { %v3745_v49 = vmax.f32 %v2393_v0, 0.0  ;;  %v2397_v53 = vadd.f32 %v2396_v34, %v12725_v42  ;;  %v3353_v39 = vmax.f32 %v1903_v22, 0.0  ;;  %v1907_v59 = vadd.f32 %v1906_v47, %v12725_v42 }
 0x177   : > { %v3748_v36 = vmax.f32 %v2395_v30, 0.0  ;;  %9840 = vmatmul.mubr.msk.bf16.gmra.mrb[148].mxu1 %vm1536_vm1, %v12133_v10  ;;  %9790 = vmatmul.mubr.msk.bf16.gmra.mrb[148].mxu0 %vm1536_vm1, %v11933_v57  ;;  %v3356_v52 = vmax.f32 %v1905_v43, 0.0  ;;  %v16954_v25 = vmov 0   ;;  %v11934_v43 = vld [vmem:[%s12470_s30 + $0x130] sm:$0xff]  }
 0x178   : > { %v12997_v58 = vmax.f32 %v3744_v27, %v3745_v49  ;;  %v3749_v8 = vmax.f32 %v2397_v53, 0.0  ;;  %2701 = vmatprep.mubr.bf16.mxu1 %v16954_v25  ;;  %2178 = vmatprep.mubr.bf16.mxu0 %v16954_v25  ;;  %v3357_v56 = vmax.f32 %v1907_v59, 0.0  ;;  %v13001_v0 = vmax.f32 %v3352_v40, %v3353_v39 }
 0x17a   : > { %16953 = vst [vmem:[#allocation24_spill] sm:$0xff] %v12997_v58  ;;  %v13003_v22 = vmax.f32 %v3748_v36, %v3749_v8  ;;  %v2400_v24 = vpop.f32.mrb[44].mxu1  ;;  %v1910_v30 = vpop.f32.mrb[44].mxu0  ;;  %v13005_v34 = vmax.f32 %v3356_v52, %v3357_v56 }
 0x17b   : > { %v2401_v10 = vadd.f32 %v2400_v24, %v12720_v41  ;;  %v2402_v57 = vpop.f32.mrb[45].mxu1  ;;  %v1911_v27 = vadd.f32 %v1910_v30, %v12720_v41  ;;  %v1912_v47 = vpop.f32.mrb[45].mxu0 }
 0x17c   : > { %16955 = vst [vmem:[#allocation25_spill] sm:$0xff] %v13003_v22  ;;  %v2403_v49 = vadd.f32 %v2402_v57, %v12725_v42  ;;  %v2404_v53 = vpop.f32.mrb[46].mxu1  ;;  %v1913_v39 = vadd.f32 %v1912_v47, %v12725_v42  ;;  %v1914_v40 = vpop.f32.mrb[46].mxu0  ;;  %v12134_v57 = vld [vmem:[%s12470_s30 + $0x78] sm:$0xff]  }
 0x17d   : > { %v3752_v36 = vmax.f32 %v2401_v10, 0.0  ;;  %v2405_v59 = vadd.f32 %v2404_v53, %v12720_v41  ;;  %v2406_v8 = vpop.f32.mrb[47].mxu1  ;;  %v3360_v52 = vmax.f32 %v1911_v27, 0.0  ;;  %v1915_v56 = vadd.f32 %v1914_v40, %v12720_v41  ;;  %v1916_v24 = vpop.f32.mrb[47].mxu0 }
 0x17e   : > { %v3753_v22 = vmax.f32 %v2403_v49, 0.0  ;;  %v2407_v58 = vadd.f32 %v2406_v8, %v12725_v42  ;;  %v3361_v30 = vmax.f32 %v1913_v39, 0.0  ;;  %v1917_v29 = vadd.f32 %v1916_v24, %v12725_v42 }
 0x17f   : > { %v3756_v33 = vmax.f32 %v2405_v59, 0.0  ;;  %9841 = vmatmul.mubr.msk.bf16.gmra.mrb[152].mxu1 %vm1536_vm1, %v12134_v57  ;;  %9791 = vmatmul.mubr.msk.bf16.gmra.mrb[152].mxu0 %vm1536_vm1, %v11934_v43  ;;  %v3364_v10 = vmax.f32 %v1915_v56, 0.0  ;;  %v11938_v56 = vld [vmem:[%s12470_s30 + $0x138] sm:$0xff]  }
 0x180   : > { %v13019_v47 = vmax.f32 %v3752_v36, %v3753_v22  ;;  %v3757_v27 = vmax.f32 %v2407_v58, 0.0  ;;  %2711 = vmatprep.mubr.bf16.mxu1 %v16954_v25  ;;  %2188 = vmatprep.mubr.bf16.mxu0 %v16954_v25  ;;  %v3365_v49 = vmax.f32 %v1917_v29, 0.0  ;;  %v13023_v53 = vmax.f32 %v3360_v52, %v3361_v30 }
 0x182   : > { %16956 = vst [vmem:[#allocation26_spill] sm:$0xff] %v13019_v47  ;;  %v13025_v39 = vmax.f32 %v3756_v33, %v3757_v27  ;;  %v2410_v40 = vpop.f32.mrb[48].mxu1  ;;  %v1920_v59 = vpop.f32.mrb[48].mxu0  ;;  %v13027_v8 = vmax.f32 %v3364_v10, %v3365_v49 }
 0x183   : > { %v2411_v24 = vadd.f32 %v2410_v40, %v12720_v41  ;;  %v2412_v43 = vpop.f32.mrb[49].mxu1  ;;  %v1921_v22 = vadd.f32 %v1920_v59, %v12720_v41  ;;  %v1922_v58 = vpop.f32.mrb[49].mxu0 }
 0x184   : > { %16957 = vst [vmem:[#allocation27_spill] sm:$0xff] %v13025_v39  ;;  %v2413_v36 = vadd.f32 %v2412_v43, %v12725_v42  ;;  %v2414_v57 = vpop.f32.mrb[50].mxu1  ;;  %v1923_v29 = vadd.f32 %v1922_v58, %v12725_v42  ;;  %v1924_v52 = vpop.f32.mrb[50].mxu0  ;;  %v12135_v43 = vld [vmem:[%s12470_s30 + $0x80] sm:$0xff]  }
 0x185   : > { %v3760_v33 = vmax.f32 %v2411_v24, 0.0  ;;  %v2415_v30 = vadd.f32 %v2414_v57, %v12720_v41  ;;  %v2416_v27 = vpop.f32.mrb[51].mxu1  ;;  %v3368_v10 = vmax.f32 %v1921_v22, 0.0  ;;  %v1925_v49 = vadd.f32 %v1924_v52, %v12720_v41  ;;  %v1926_v40 = vpop.f32.mrb[51].mxu0 }
 0x186   : > { %v3761_v39 = vmax.f32 %v2413_v36, 0.0  ;;  %v2417_v47 = vadd.f32 %v2416_v27, %v12725_v42  ;;  %v3369_v59 = vmax.f32 %v1923_v29, 0.0  ;;  %v1927_v21 = vadd.f32 %v1926_v40, %v12725_v42 }
 0x187   : > { %v3764_v62 = vmax.f32 %v2415_v30, 0.0  ;;  %9842 = vmatmul.mubr.msk.bf16.gmra.mrb[156].mxu1 %vm1536_vm1, %v12135_v43  ;;  %9792 = vmatmul.mubr.msk.bf16.gmra.mrb[156].mxu0 %vm1536_vm1, %v11938_v56  ;;  %v3372_v24 = vmax.f32 %v1925_v49, 0.0  ;;  %v11939_v49 = vld [vmem:[%s12470_s30 + $0x140] sm:$0xff]  }
 0x188   : > { %v13041_v58 = vmax.f32 %v3760_v33, %v3761_v39  ;;  %v3765_v22 = vmax.f32 %v2417_v47, 0.0  ;;  %2721 = vmatprep.mubr.bf16.mxu1 %v16954_v25  ;;  %2198 = vmatprep.mubr.bf16.mxu0 %v16954_v25  ;;  %v3373_v36 = vmax.f32 %v1927_v21, 0.0  ;;  %v13045_v57 = vmax.f32 %v3368_v10, %v3369_v59 }
 0x18a   : > { %16958 = vst [vmem:[#allocation28_spill] sm:$0xff] %v13041_v58  ;;  %v13047_v29 = vmax.f32 %v3764_v62, %v3765_v22  ;;  %v2420_v52 = vpop.f32.mrb[52].mxu1  ;;  %v1930_v30 = vpop.f32.mrb[52].mxu0  ;;  %v13049_v27 = vmax.f32 %v3372_v24, %v3373_v36 }
 0x18b   : > { %v2421_v40 = vadd.f32 %v2420_v52, %v12720_v41  ;;  %v2422_v56 = vpop.f32.mrb[53].mxu1  ;;  %v1931_v39 = vadd.f32 %v1930_v30, %v12720_v41  ;;  %v1932_v47 = vpop.f32.mrb[53].mxu0 }
 0x18c   : > { %16959 = vst [vmem:[#allocation29_spill] sm:$0xff] %v13047_v29  ;;  %v2423_v33 = vadd.f32 %v2422_v56, %v12725_v42  ;;  %v2424_v43 = vpop.f32.mrb[54].mxu1  ;;  %v1933_v21 = vadd.f32 %v1932_v47, %v12725_v42  ;;  %v1934_v10 = vpop.f32.mrb[54].mxu0  ;;  %v12136_v56 = vld [vmem:[%s12470_s30 + $0x88] sm:$0xff]  }
 0x18d   : > { %v3768_v62 = vmax.f32 %v2421_v40, 0.0  ;;  %v2425_v59 = vadd.f32 %v2424_v43, %v12720_v41  ;;  %v2426_v22 = vpop.f32.mrb[55].mxu1  ;;  %v3376_v24 = vmax.f32 %v1931_v39, 0.0  ;;  %v1935_v36 = vadd.f32 %v1934_v10, %v12720_v41  ;;  %v1936_v52 = vpop.f32.mrb[55].mxu0 }
 0x18e   : > { %v3769_v29 = vmax.f32 %v2423_v33, 0.0  ;;  %v2427_v58 = vadd.f32 %v2426_v22, %v12725_v42  ;;  %v3377_v30 = vmax.f32 %v1933_v21, 0.0  ;;  %v1937_v6 = vadd.f32 %v1936_v52, %v12725_v42 }
 0x18f   : > { %v3772_v61 = vmax.f32 %v2425_v59, 0.0  ;;  %9843 = vmatmul.mubr.msk.bf16.gmra.mrb[160].mxu1 %vm1536_vm1, %v12136_v56  ;;  %9793 = vmatmul.mubr.msk.bf16.gmra.mrb[160].mxu0 %vm1536_vm1, %v11939_v49  ;;  %v3380_v40 = vmax.f32 %v1935_v36, 0.0  ;;  %v11940_v36 = vld [vmem:[%s12470_s30 + $0x148] sm:$0xff]  }
 0x190   : > { %v13063_v47 = vmax.f32 %v3768_v62, %v3769_v29  ;;  %v3773_v39 = vmax.f32 %v2427_v58, 0.0  ;;  %2731 = vmatprep.mubr.bf16.mxu1 %v16954_v25  ;;  %2208 = vmatprep.mubr.bf16.mxu0 %v16954_v25  ;;  %v3381_v33 = vmax.f32 %v1937_v6, 0.0  ;;  %v13067_v43 = vmax.f32 %v3376_v24, %v3377_v30 }
 0x192   : > { %16960 = vst [vmem:[#allocation30_spill] sm:$0xff] %v13063_v47  ;;  %v13069_v21 = vmax.f32 %v3772_v61, %v3773_v39  ;;  %v2430_v10 = vpop.f32.mrb[56].mxu1  ;;  %v1940_v59 = vpop.f32.mrb[56].mxu0  ;;  %v13071_v22 = vmax.f32 %v3380_v40, %v3381_v33 }
 0x193   : > { %v2431_v52 = vadd.f32 %v2430_v10, %v12720_v41  ;;  %v2432_v49 = vpop.f32.mrb[57].mxu1  ;;  %v1941_v29 = vadd.f32 %v1940_v59, %v12720_v41  ;;  %v1942_v58 = vpop.f32.mrb[57].mxu0 }
 0x194   : > { %16961 = vst [vmem:[#allocation31_spill] sm:$0xff] %v13069_v21  ;;  %v2433_v62 = vadd.f32 %v2432_v49, %v12725_v42  ;;  %v2434_v56 = vpop.f32.mrb[58].mxu1  ;;  %v1943_v6 = vadd.f32 %v1942_v58, %v12725_v42  ;;  %v1944_v24 = vpop.f32.mrb[58].mxu0  ;;  %v12137_v49 = vld [vmem:[%s12470_s30 + $0x90] sm:$0xff]  }
 0x195   : > { %v3776_v61 = vmax.f32 %v2431_v52, 0.0  ;;  %v2435_v30 = vadd.f32 %v2434_v56, %v12720_v41  ;;  %v2436_v39 = vpop.f32.mrb[59].mxu1  ;;  %v3384_v40 = vmax.f32 %v1941_v29, 0.0  ;;  %v1945_v33 = vadd.f32 %v1944_v24, %v12720_v41  ;;  %v1946_v10 = vpop.f32.mrb[59].mxu0 }
 0x196   : > { %v3777_v21 = vmax.f32 %v2433_v62, 0.0  ;;  %v2437_v47 = vadd.f32 %v2436_v39, %v12725_v42  ;;  %v3385_v59 = vmax.f32 %v1943_v6, 0.0  ;;  %v1947_v4 = vadd.f32 %v1946_v10, %v12725_v42 }
 0x197   : > { %v3780_v63 = vmax.f32 %v2435_v30, 0.0  ;;  %9844 = vmatmul.mubr.msk.bf16.gmra.mrb[164].mxu1 %vm1536_vm1, %v12137_v49  ;;  %9794 = vmatmul.mubr.msk.bf16.gmra.mrb[164].mxu0 %vm1536_vm1, %v11940_v36  ;;  %v3388_v52 = vmax.f32 %v1945_v33, 0.0  ;;  %v11944_v33 = vld [vmem:[%s12470_s30 + $0x150] sm:$0xff]  }
 0x198   : > { %v13085_v58 = vmax.f32 %v3776_v61, %v3777_v21  ;;  %v3781_v29 = vmax.f32 %v2437_v47, 0.0  ;;  %2741 = vmatprep.mubr.bf16.mxu1 %v16954_v25  ;;  %2218 = vmatprep.mubr.bf16.mxu0 %v16954_v25  ;;  %v3389_v62 = vmax.f32 %v1947_v4, 0.0  ;;  %v13089_v56 = vmax.f32 %v3384_v40, %v3385_v59 }
 0x19a   : > { %16962 = vst [vmem:[#allocation32_spill] sm:$0xff] %v13085_v58  ;;  %v13091_v6 = vmax.f32 %v3780_v63, %v3781_v29  ;;  %v2440_v24 = vpop.f32.mrb[60].mxu1  ;;  %v1950_v30 = vpop.f32.mrb[60].mxu0  ;;  %v13093_v39 = vmax.f32 %v3388_v52, %v3389_v62 }
 0x19b   : > { %v2441_v10 = vadd.f32 %v2440_v24, %v12720_v41  ;;  %v2442_v36 = vpop.f32.mrb[61].mxu1  ;;  %v1951_v21 = vadd.f32 %v1950_v30, %v12720_v41  ;;  %v1952_v47 = vpop.f32.mrb[61].mxu0 }
 0x19c   : > { %16963 = vst [vmem:[#allocation33_spill] sm:$0xff] %v13091_v6  ;;  %v2443_v61 = vadd.f32 %v2442_v36, %v12725_v42  ;;  %v2444_v49 = vpop.f32.mrb[62].mxu1  ;;  %v1953_v4 = vadd.f32 %v1952_v47, %v12725_v42  ;;  %v1954_v40 = vpop.f32.mrb[62].mxu0  ;;  %v12138_v36 = vld [vmem:[%s12470_s30 + $0x98] sm:$0xff]  }
 0x19d   : > { %v3784_v63 = vmax.f32 %v2441_v10, 0.0  ;;  %v2445_v59 = vadd.f32 %v2444_v49, %v12720_v41  ;;  %v2446_v29 = vpop.f32.mrb[63].mxu1  ;;  %v3392_v52 = vmax.f32 %v1951_v21, 0.0  ;;  %v1955_v62 = vadd.f32 %v1954_v40, %v12720_v41  ;;  %v1956_v24 = vpop.f32.mrb[63].mxu0 }
 0x19e   : > { %v3785_v6 = vmax.f32 %v2443_v61, 0.0  ;;  %v2447_v58 = vadd.f32 %v2446_v29, %v12725_v42  ;;  %v3393_v30 = vmax.f32 %v1953_v4, 0.0  ;;  %v1957_v20 = vadd.f32 %v1956_v24, %v12725_v42 }
 0x19f   : > { %v3788_v13 = vmax.f32 %v2445_v59, 0.0  ;;  %9845 = vmatmul.mubr.msk.bf16.gmra.mrb[168].mxu1 %vm1536_vm1, %v12138_v36  ;;  %9795 = vmatmul.mubr.msk.bf16.gmra.mrb[168].mxu0 %vm1536_vm1, %v11944_v33  ;;  %v3396_v10 = vmax.f32 %v1955_v62, 0.0  ;;  %v11945_v62 = vld [vmem:[%s12470_s30 + $0x158] sm:$0xff]  }
 0x1a0   : > { %v13107_v47 = vmax.f32 %v3784_v63, %v3785_v6  ;;  %v3789_v21 = vmax.f32 %v2447_v58, 0.0  ;;  %2751 = vmatprep.mubr.bf16.mxu1 %v16954_v25  ;;  %2228 = vmatprep.mubr.bf16.mxu0 %v16954_v25  ;;  %v3397_v61 = vmax.f32 %v1957_v20, 0.0  ;;  %v13111_v49 = vmax.f32 %v3392_v52, %v3393_v30 }
 0x1a2   : > { %16964 = vst [vmem:[#allocation34_spill] sm:$0xff] %v13107_v47  ;;  %v13113_v4 = vmax.f32 %v3788_v13, %v3789_v21  ;;  %v2450_v40 = vpop.f32.mrb[64].mxu1  ;;  %v1960_v59 = vpop.f32.mrb[64].mxu0  ;;  %v13115_v29 = vmax.f32 %v3396_v10, %v3397_v61 }
 0x1a3   : > { %v2451_v24 = vadd.f32 %v2450_v40, %v12720_v41  ;;  %v2452_v33 = vpop.f32.mrb[65].mxu1  ;;  %v1961_v6 = vadd.f32 %v1960_v59, %v12720_v41  ;;  %v1962_v58 = vpop.f32.mrb[65].mxu0 }
 0x1a4   : > { %16965 = vst [vmem:[#allocation35_spill] sm:$0xff] %v13113_v4  ;;  %v2453_v63 = vadd.f32 %v2452_v33, %v12725_v42  ;;  %v2454_v36 = vpop.f32.mrb[66].mxu1  ;;  %v1963_v20 = vadd.f32 %v1962_v58, %v12725_v42  ;;  %v1964_v52 = vpop.f32.mrb[66].mxu0  ;;  %v12139_v33 = vld [vmem:[%s12470_s30 + $0xa0] sm:$0xff]  }
 0x1a5   : > { %v3792_v13 = vmax.f32 %v2451_v24, 0.0  ;;  %v2455_v30 = vadd.f32 %v2454_v36, %v12720_v41  ;;  %v2456_v21 = vpop.f32.mrb[67].mxu1  ;;  %v3400_v10 = vmax.f32 %v1961_v6, 0.0  ;;  %v1965_v61 = vadd.f32 %v1964_v52, %v12720_v41  ;;  %v1966_v40 = vpop.f32.mrb[67].mxu0 }
 0x1a6   : > { %v3793_v4 = vmax.f32 %v2453_v63, 0.0  ;;  %v2457_v47 = vadd.f32 %v2456_v21, %v12725_v42  ;;  %v3401_v59 = vmax.f32 %v1963_v20, 0.0  ;;  %v1967_v32 = vadd.f32 %v1966_v40, %v12725_v42 }
 0x1a7   : > { %v3796_v28 = vmax.f32 %v2455_v30, 0.0  ;;  %9846 = vmatmul.mubr.msk.bf16.gmra.mrb[172].mxu1 %vm1536_vm1, %v12139_v33  ;;  %9796 = vmatmul.mubr.msk.bf16.gmra.mrb[172].mxu0 %vm1536_vm1, %v11945_v62  ;;  %v3404_v24 = vmax.f32 %v1965_v61, 0.0  ;;  %v11946_v61 = vld [vmem:[%s12470_s30 + $0x160] sm:$0xff]  }
 0x1a8   : > { %v13129_v58 = vmax.f32 %v3792_v13, %v3793_v4  ;;  %v3797_v6 = vmax.f32 %v2457_v47, 0.0  ;;  %2761 = vmatprep.mubr.bf16.mxu1 %v16954_v25  ;;  %2238 = vmatprep.mubr.bf16.mxu0 %v16954_v25  ;;  %v3405_v63 = vmax.f32 %v1967_v32, 0.0  ;;  %v13133_v36 = vmax.f32 %v3400_v10, %v3401_v59 }
 0x1aa   : > { %16966 = vst [vmem:[#allocation36_spill] sm:$0xff] %v13129_v58  ;;  %v13135_v20 = vmax.f32 %v3796_v28, %v3797_v6  ;;  %v2460_v52 = vpop.f32.mrb[68].mxu1  ;;  %v1970_v30 = vpop.f32.mrb[68].mxu0  ;;  %v13137_v21 = vmax.f32 %v3404_v24, %v3405_v63 }
 0x1ab   : > { %v2461_v40 = vadd.f32 %v2460_v52, %v12720_v41  ;;  %v2462_v62 = vpop.f32.mrb[69].mxu1  ;;  %v1971_v4 = vadd.f32 %v1970_v30, %v12720_v41  ;;  %v1972_v47 = vpop.f32.mrb[69].mxu0 }
 0x1ac   : > { %16967 = vst [vmem:[#allocation37_spill] sm:$0xff] %v13135_v20  ;;  %v2463_v13 = vadd.f32 %v2462_v62, %v12725_v42  ;;  %v2464_v33 = vpop.f32.mrb[70].mxu1  ;;  %v1973_v32 = vadd.f32 %v1972_v47, %v12725_v42  ;;  %v1974_v10 = vpop.f32.mrb[70].mxu0  ;;  %v12140_v62 = vld [vmem:[%s12470_s30 + $0xa8] sm:$0xff]  }
 0x1ad   : > { %v3800_v28 = vmax.f32 %v2461_v40, 0.0  ;;  %v2465_v59 = vadd.f32 %v2464_v33, %v12720_v41  ;;  %v2466_v6 = vpop.f32.mrb[71].mxu1  ;;  %v3408_v24 = vmax.f32 %v1971_v4, 0.0  ;;  %v1975_v63 = vadd.f32 %v1974_v10, %v12720_v41  ;;  %v1976_v52 = vpop.f32.mrb[71].mxu0 }
 0x1ae   : > { %v3801_v20 = vmax.f32 %v2463_v13, 0.0  ;;  %v2467_v58 = vadd.f32 %v2466_v6, %v12725_v42  ;;  %v3409_v30 = vmax.f32 %v1973_v32, 0.0  ;;  %v1977_v55 = vadd.f32 %v1976_v52, %v12725_v42 }
 0x1af   : > { %v3804_v51 = vmax.f32 %v2465_v59, 0.0  ;;  %9847 = vmatmul.mubr.msk.bf16.gmra.mrb[176].mxu1 %vm1536_vm1, %v12140_v62  ;;  %9797 = vmatmul.mubr.msk.bf16.gmra.mrb[176].mxu0 %vm1536_vm1, %v11946_v61  ;;  %v3412_v40 = vmax.f32 %v1975_v63, 0.0  ;;  %v11950_v63 = vld [vmem:[%s12470_s30 + $0x168] sm:$0xff]  }
 0x1b0   : > { %v13151_v47 = vmax.f32 %v3800_v28, %v3801_v20  ;;  %v3805_v4 = vmax.f32 %v2467_v58, 0.0  ;;  %2771 = vmatprep.mubr.bf16.mxu1 %v16954_v25  ;;  %2248 = vmatprep.mubr.bf16.mxu0 %v16954_v25  ;;  %v3413_v13 = vmax.f32 %v1977_v55, 0.0  ;;  %v13155_v33 = vmax.f32 %v3408_v24, %v3409_v30 }
 0x1b2   : > { %16968 = vst [vmem:[#allocation38_spill] sm:$0xff] %v13151_v47  ;;  %v13157_v32 = vmax.f32 %v3804_v51, %v3805_v4  ;;  %v2470_v10 = vpop.f32.mrb[72].mxu1  ;;  %v1980_v59 = vpop.f32.mrb[72].mxu0  ;;  %v13159_v6 = vmax.f32 %v3412_v40, %v3413_v13 }
 0x1b3   : > { %v2471_v52 = vadd.f32 %v2470_v10, %v12720_v41  ;;  %v2472_v61 = vpop.f32.mrb[73].mxu1  ;;  %v1981_v20 = vadd.f32 %v1980_v59, %v12720_v41  ;;  %v1982_v58 = vpop.f32.mrb[73].mxu0 }
 0x1b4   : > { %16969 = vst [vmem:[#allocation39_spill] sm:$0xff] %v13157_v32  ;;  %v2473_v28 = vadd.f32 %v2472_v61, %v12725_v42  ;;  %v2474_v62 = vpop.f32.mrb[74].mxu1  ;;  %v1983_v55 = vadd.f32 %v1982_v58, %v12725_v42  ;;  %v1984_v24 = vpop.f32.mrb[74].mxu0  ;;  %v12141_v61 = vld [vmem:[%s12470_s30 + $0xb0] sm:$0xff]  }
 0x1b5   : > { %v3808_v51 = vmax.f32 %v2471_v52, 0.0  ;;  %v2475_v30 = vadd.f32 %v2474_v62, %v12720_v41  ;;  %v2476_v4 = vpop.f32.mrb[75].mxu1  ;;  %v3416_v40 = vmax.f32 %v1981_v20, 0.0  ;;  %v1985_v13 = vadd.f32 %v1984_v24, %v12720_v41  ;;  %v1986_v10 = vpop.f32.mrb[75].mxu0 }
 0x1b6   : > { %v3809_v32 = vmax.f32 %v2473_v28, 0.0  ;;  %v2477_v47 = vadd.f32 %v2476_v4, %v12725_v42  ;;  %v3417_v59 = vmax.f32 %v1983_v55, 0.0  ;;  %v1987_v16 = vadd.f32 %v1986_v10, %v12725_v42 }
 0x1b7   : > { %v3812_v12 = vmax.f32 %v2475_v30, 0.0  ;;  %9848 = vmatmul.mubr.msk.bf16.gmra.mrb[180].mxu1 %vm1536_vm1, %v12141_v61  ;;  %9798 = vmatmul.mubr.msk.bf16.gmra.mrb[180].mxu0 %vm1536_vm1, %v11950_v63  ;;  %v3420_v52 = vmax.f32 %v1985_v13, 0.0  ;;  %v11951_v13 = vld [vmem:[%s12470_s30 + $0x170] sm:$0xff]  }
 0x1b8   : > { %v13173_v58 = vmax.f32 %v3808_v51, %v3809_v32  ;;  %v3813_v20 = vmax.f32 %v2477_v47, 0.0  ;;  %2781 = vmatprep.mubr.bf16.mxu1 %v16954_v25  ;;  %2258 = vmatprep.mubr.bf16.mxu0 %v16954_v25  ;;  %v3421_v28 = vmax.f32 %v1987_v16, 0.0  ;;  %v13177_v62 = vmax.f32 %v3416_v40, %v3417_v59 }
 0x1ba   : > { %16970 = vst [vmem:[#allocation40_spill] sm:$0xff] %v13173_v58  ;;  %v13179_v55 = vmax.f32 %v3812_v12, %v3813_v20  ;;  %v2480_v24 = vpop.f32.mrb[76].mxu1  ;;  %v1990_v30 = vpop.f32.mrb[76].mxu0  ;;  %v13181_v4 = vmax.f32 %v3420_v52, %v3421_v28  ;;  %v11965_v12 = vld [vmem:[%s16604_s3 + $0x104] ss:$8 sps:$4 sm:$0xff]  }
 0x1bb   : > { %v2481_v10 = vadd.f32 %v2480_v24, %v12720_v41  ;;  %v2482_v63 = vpop.f32.mrb[77].mxu1  ;;  %v1991_v32 = vadd.f32 %v1990_v30, %v12720_v41  ;;  %v1992_v47 = vpop.f32.mrb[77].mxu0  ;;  %5281 = vmatprep.subr.bf16.mxu0 %v11965_v12 }
 0x1bc   : > { %16971 = vst [vmem:[#allocation41_spill] sm:$0xff] %v13179_v55  ;;  %v2483_v51 = vadd.f32 %v2482_v63, %v12725_v42  ;;  %v2484_v61 = vpop.f32.mrb[78].mxu1  ;;  %v1993_v16 = vadd.f32 %v1992_v47, %v12725_v42  ;;  %v1994_v40 = vpop.f32.mrb[78].mxu0 }
 0x1bd   : > { %v3816_v59 = vmax.f32 %v2481_v10, 0.0  ;;  %v2485_v52 = vadd.f32 %v2484_v61, %v12720_v41  ;;  %v2486_v20 = vpop.f32.mrb[79].mxu1  ;;  %v3424_v28 = vmax.f32 %v1991_v32, 0.0  ;;  %v1995_v24 = vadd.f32 %v1994_v40, %v12720_v41  ;;  %v1996_v30 = vpop.f32.mrb[79].mxu0 }
 0x1be   : > { %v3817_v55 = vmax.f32 %v2483_v51, 0.0  ;;  %v2487_v63 = vadd.f32 %v2486_v20, %v12725_v42  ;;  %v3425_v58 = vmax.f32 %v1993_v16, 0.0  ;;  %v1997_v45 = vadd.f32 %v1996_v30, %v12725_v42 }
 0x1bf   : > { %v3820_v47 = vmax.f32 %v2485_v52, 0.0  ;;  %9849 = vmatmul.mubr.msk.bf16.gmra.mrb[184].mxu1 %vm1536_vm1, %v12142_v38  ;;  %9799 = vmatmul.mubr.msk.bf16.gmra.mrb[184].mxu0 %vm1536_vm1, %v11951_v13  ;;  %v3428_v10 = vmax.f32 %v1995_v24, 0.0  ;;  %v11952_v24 = vld [vmem:[%s12470_s30 + $0x178] sm:$0xff]  }
 0x1c0   : > { %v13198_v61 = vmax.f32 %v3816_v59, %v3817_v55  ;;  %v3821_v32 = vmax.f32 %v2487_v63, 0.0  ;;  %2791 = vmatprep.mubr.bf16.mxu1 %v16954_v25  ;;  %2268 = vmatprep.mubr.bf16.mxu0 %v16954_v25  ;;  %v3429_v51 = vmax.f32 %v1997_v45, 0.0  ;;  %v13202_v16 = vmax.f32 %v3424_v28, %v3425_v58 }
 0x1c2   : > { %16972 = vst [vmem:[#allocation42_spill] sm:$0xff] %v13198_v61  ;;  %16973 = vst [vmem:[#allocation43_spill] sm:$0xff] %v13202_v16  ;;  %v13204_v40 = vmax.f32 %v3820_v47, %v3821_v32  ;;  %v2490_v12 = vpop.f32.mrb[80].mxu1  ;;  %v2000_v52 = vpop.f32.mrb[80].mxu0  ;;  %v13206_v20 = vmax.f32 %v3428_v10, %v3429_v51 }
 0x1c3   : > { %v2491_v38 = vadd.f32 %v2490_v12, %v12720_v41  ;;  %v2492_v13 = vpop.f32.mrb[81].mxu1  ;;  %v2001_v55 = vadd.f32 %v2000_v52, %v12720_v41  ;;  %v2002_v59 = vpop.f32.mrb[81].mxu0 }
 0x1c4   : > { %16974 = vst [vmem:[#allocation44_spill] sm:$0xff] %v13204_v40  ;;  %16975 = vst [vmem:[#allocation45_spill] sm:$0xff] %v13206_v20  ;;  %v2493_v30 = vadd.f32 %v2492_v13, %v12725_v42  ;;  %v2494_v63 = vpop.f32.mrb[82].mxu1  ;;  %v2003_v45 = vadd.f32 %v2002_v59, %v12725_v42  ;;  %v2004_v58 = vpop.f32.mrb[82].mxu0  ;;  %v12143_v13 = vld [vmem:[%s12470_s30 + $0xc0] sm:$0xff]  }
 0x1c5   : > { %v3824_v28 = vmax.f32 %v2491_v38, 0.0  ;;  %v2495_v47 = vadd.f32 %v2494_v63, %v12720_v41  ;;  %v2496_v32 = vpop.f32.mrb[83].mxu1  ;;  %v3432_v10 = vmax.f32 %v2001_v55, 0.0  ;;  %v2005_v51 = vadd.f32 %v2004_v58, %v12720_v41  ;;  %v2006_v12 = vpop.f32.mrb[83].mxu0 }
 0x1c6   : > { %v3825_v40 = vmax.f32 %v2493_v30, 0.0  ;;  %v2497_v61 = vadd.f32 %v2496_v32, %v12725_v42  ;;  %v3433_v52 = vmax.f32 %v2003_v45, 0.0  ;;  %v2007_v7 = vadd.f32 %v2006_v12, %v12725_v42 }
 0x1c7   : > { %v3828_v3 = vmax.f32 %v2495_v47, 0.0  ;;  %9850 = vmatmul.mubr.msk.bf16.gmra.mrb[188].mxu1 %vm1536_vm1, %v12143_v13  ;;  %9800 = vmatmul.mubr.msk.bf16.gmra.mrb[188].mxu0 %vm1536_vm1, %v11952_v24  ;;  %v3436_v38 = vmax.f32 %v2005_v51, 0.0  ;;  %v11956_v51 = vld [vmem:[%s12470_s30 + $0x180] sm:$0xff]  }
 0x1c8   : > { %v13220_v59 = vmax.f32 %v3824_v28, %v3825_v40  ;;  %v3829_v55 = vmax.f32 %v2497_v61, 0.0  ;;  %2801 = vmatprep.mubr.bf16.mxu1 %v16954_v25  ;;  %2278 = vmatprep.mubr.bf16.mxu0 %v16954_v25  ;;  %v3437_v30 = vmax.f32 %v2007_v7, 0.0  ;;  %v13224_v63 = vmax.f32 %v3432_v10, %v3433_v52 }
 0x1ca   : > { %16976 = vst [vmem:[#allocation46_spill] sm:$0xff] %v13220_v59  ;;  %16977 = vst [vmem:[#allocation47_spill] sm:$0xff] %v13224_v63  ;;  %v13226_v45 = vmax.f32 %v3828_v3, %v3829_v55  ;;  %v2500_v58 = vpop.f32.mrb[84].mxu1  ;;  %v2010_v47 = vpop.f32.mrb[84].mxu0  ;;  %v13228_v32 = vmax.f32 %v3436_v38, %v3437_v30 }
 0x1cb   : > { %v2501_v12 = vadd.f32 %v2500_v58, %v12720_v41  ;;  %v2502_v24 = vpop.f32.mrb[85].mxu1  ;;  %v2011_v40 = vadd.f32 %v2010_v47, %v12720_v41  ;;  %v2012_v61 = vpop.f32.mrb[85].mxu0 }
 0x1cc   : > { %16978 = vst [vmem:[#allocation48_spill] sm:$0xff] %v13226_v45  ;;  %16979 = vst [vmem:[#allocation49_spill] sm:$0xff] %v13228_v32  ;;  %v2503_v28 = vadd.f32 %v2502_v24, %v12725_v42  ;;  %v2504_v13 = vpop.f32.mrb[86].mxu1  ;;  %v2013_v7 = vadd.f32 %v2012_v61, %v12725_v42  ;;  %v2014_v10 = vpop.f32.mrb[86].mxu0  ;;  %v12144_v24 = vld [vmem:[%s12470_s30 + $0xc8] sm:$0xff]  }
 0x1cd   : > { %v3832_v3 = vmax.f32 %v2501_v12, 0.0  ;;  %v2505_v52 = vadd.f32 %v2504_v13, %v12720_v41  ;;  %v2506_v55 = vpop.f32.mrb[87].mxu1  ;;  %v3440_v38 = vmax.f32 %v2011_v40, 0.0  ;;  %v2015_v30 = vadd.f32 %v2014_v10, %v12720_v41  ;;  %v2016_v58 = vpop.f32.mrb[87].mxu0 }
 0x1ce   : > { %v3833_v45 = vmax.f32 %v2503_v28, 0.0  ;;  %v2507_v59 = vadd.f32 %v2506_v55, %v12725_v42  ;;  %v3441_v47 = vmax.f32 %v2013_v7, 0.0  ;;  %v2017_v32 = vadd.f32 %v2016_v58, %v12725_v42 }
 0x1cf   : > { %v3836_v63 = vmax.f32 %v2505_v52, 0.0  ;;  %9851 = vmatmul.mubr.msk.bf16.gmra.mrb[192].mxu1 %vm1536_vm1, %v12144_v24  ;;  %9801 = vmatmul.mubr.msk.bf16.gmra.mrb[192].mxu0 %vm1536_vm1, %v11956_v51  ;;  %v3444_v12 = vmax.f32 %v2015_v30, 0.0  ;;  %v1116_v51 = vsub.s32 2, %v12705_v35 }
 0x1d0   : > { %v13242_v61 = vmax.f32 %v3832_v3, %v3833_v45  ;;  %v3837_v13 = vmax.f32 %v2507_v59, 0.0  ;;  %2811 = vmatprep.mubr.bf16.mxu1 %v16954_v25  ;;  %v3445_v40 = vmax.f32 %v2017_v32, 0.0  ;;  %v13245_v10 = vmax.f32 %v3440_v38, %v3441_v47 }
 0x1d1   : > { %v1120_v45 = vsub.s32 3, %v12705_v35 }
 0x1d2   : > { %16980 = vst [vmem:[#allocation50_spill] sm:$0xff] %v13242_v61  ;;  %16981 = vst [vmem:[#allocation51_spill] sm:$0xff] %v13245_v10  ;;  %v13247_v28 = vmax.f32 %v3836_v63, %v3837_v13  ;;  %v2510_v7 = vpop.f32.mrb[88].mxu1  ;;  %v2020_v55 = vpop.f32.mrb[88].mxu0  ;;  %v13249_v58 = vmax.f32 %v3444_v12, %v3445_v40 }
 0x1d3   : > { %v2511_v52 = vadd.f32 %v2510_v7, %v12720_v41  ;;  %v2512_v24 = vpop.f32.mrb[89].mxu1  ;;  %v2021_v59 = vadd.f32 %v2020_v55, %v12720_v41  ;;  %v2022_v3 = vpop.f32.mrb[89].mxu0 }
 0x1d4   : > { %16982 = vst [vmem:[#allocation52_spill] sm:$0xff] %v13247_v28  ;;  %16983 = vst [vmem:[#allocation53_spill] sm:$0xff] %v13249_v58  ;;  %v2513_v32 = vadd.f32 %v2512_v24, %v12725_v42  ;;  %v2514_v38 = vpop.f32.mrb[90].mxu1  ;;  %v2023_v63 = vadd.f32 %v2022_v3, %v12725_v42  ;;  %v2024_v30 = vpop.f32.mrb[90].mxu0  ;;  %v12145_v24 = vld [vmem:[%s12470_s30 + $0xd0] sm:$0xff]  }
 0x1d5   : > { %v3840_v47 = vmax.f32 %v2511_v52, 0.0  ;;  %v2515_v12 = vadd.f32 %v2514_v38, %v12720_v41  ;;  %v2516_v13 = vpop.f32.mrb[91].mxu1  ;;  %v3448_v40 = vmax.f32 %v2021_v59, 0.0  ;;  %v2025_v7 = vadd.f32 %v2024_v30, %v12720_v41  ;;  %v2026_v28 = vpop.f32.mrb[91].mxu0  ;;  %v12146_v52 = vld [vmem:[%s16603_s2] sm:$0xf] }
 0x1d6   : > { %v3841_v61 = vmax.f32 %v2513_v32, 0.0  ;;  %v2517_v35 = vadd.f32 %v2516_v13, %v12725_v42  ;;  %v3449_v55 = vmax.f32 %v2023_v63, 0.0  ;;  %v2027_v58 = vadd.f32 %v2026_v28, %v12725_v42 }
 0x1d7   : > { %v3844_v10 = vmax.f32 %v2515_v12, 0.0  ;;  %9852 = vmatmul.mubr.msk.bf16.gmra.mrb[196].mxu1 %vm1536_vm1, %v12145_v24  ;;  %v13266_v3 = vrot.slane %v12146_v52, %v1116_v51  ;;  %v13268_v59 = vrot.slane %v12146_v52, %v1120_v45  ;;  %v3452_v38 = vmax.f32 %v2025_v7, 0.0 }
 0x1d8   : > { %v13270_v30 = vmax.f32 %v3840_v47, %v3841_v61  ;;  %v3845_v32 = vmax.f32 %v2517_v35, 0.0  ;;  %2821 = vmatprep.mubr.bf16.mxu1 %v16954_v25  ;;  %v3453_v63 = vmax.f32 %v2027_v58, 0.0  ;;  %v13273_v28 = vmax.f32 %v3448_v40, %v3449_v55 }
 0x1da   : > { %16984 = vst [vmem:[#allocation54_spill] sm:$0xff] %v13270_v30  ;;  %16985 = vst [vmem:[#allocation55_spill] sm:$0xff] %v13273_v28  ;;  %v13275_v12 = vmax.f32 %v3844_v10, %v3845_v32  ;;  %v2553_v13 = vpop.f32.mrb[92].mxu1  ;;  %v2030_v24 = vpop.f32.mrb[92].mxu0  ;;  %v13277_v20 = vmax.f32 %v3452_v38, %v3453_v63 }
 0x1db   : > { %v2554_v51 = vadd.f32 %v2553_v13, %v13266_v3  ;;  %v2555_v16 = vpop.f32.mrb[93].mxu1  ;;  %v2031_v45 = vadd.f32 %v2030_v24, %v12720_v41  ;;  %v2032_v7 = vpop.f32.mrb[93].mxu0 }
 0x1dc   : > { %16986 = vst [vmem:[#allocation56_spill] sm:$0xff] %v13275_v12  ;;  %16987 = vst [vmem:[#allocation57_spill] sm:$0xff] %v13277_v20  ;;  %v2556_v35 = vadd.f32 %v2555_v16, %v13268_v59  ;;  %v2557_v61 = vpop.f32.mrb[94].mxu1  ;;  %v2033_v58 = vadd.f32 %v2032_v7, %v12725_v42  ;;  %v2034_v47 = vpop.f32.mrb[94].mxu0  ;;  %v12147_v16 = vld [vmem:[%s12470_s30 + $0xd8] sm:$0xff]  }
 0x1dd   : > { %v3274_v40 = vmax.f32 %v2554_v51, 0.0  ;;  %v2558_v10 = vadd.f32 %v2557_v61, %v13266_v3  ;;  %v2559_v55 = vpop.f32.mrb[95].mxu1  ;;  %v3456_v52 = vmax.f32 %v2031_v45, 0.0  ;;  %v2035_v38 = vadd.f32 %v2034_v47, %v12720_v41  ;;  %v2036_v32 = vpop.f32.mrb[95].mxu0 }
 0x1de   : > { %v3275_v63 = vmax.f32 %v2556_v35, 0.0  ;;  %v2560_v13 = vadd.f32 %v2559_v55, %v13268_v59  ;;  %v3457_v24 = vmax.f32 %v2033_v58, 0.0  ;;  %v2037_v12 = vadd.f32 %v2036_v32, %v12725_v42 }
 0x1df   : > { %v3278_v30 = vmax.f32 %v2558_v10, 0.0  ;;  %9853 = vmatmul.mubr.msk.bf16.gmra.mrb[200].mxu1 %vm1536_vm1, %v12147_v16  ;;  %v3460_v7 = vmax.f32 %v2035_v38, 0.0 }
 0x1e0   : > { %v3992_v20 = vmax.f32 %v3274_v40, %v3275_v63  ;;  %v3279_v51 = vmax.f32 %v2560_v13, 0.0  ;;  %2831 = vmatprep.mubr.bf16.mxu1 %v16954_v25  ;;  %v3461_v61 = vmax.f32 %v2037_v12, 0.0  ;;  %v13290_v45 = vmax.f32 %v3456_v52, %v3457_v24 }
 0x1e2   : > { %16988 = vst [vmem:[#allocation58_spill] sm:$0xff] %v13290_v45  ;;  %v4136_v47 = vmax.f32 %v12745_v5, %v3992_v20  ;;  %v3993_v35 = vmax.f32 %v3278_v30, %v3279_v51  ;;  %v2563_v28 = vpop.f32.mrb[96].mxu1  ;;  %v2040_v55 = vpop.f32.mrb[96].mxu0  ;;  %v13293_v58 = vmax.f32 %v3460_v7, %v3461_v61 }
 0x1e3   : > { %v2564_v10 = vadd.f32 %v2563_v28, %v13266_v3  ;;  %v2565_v32 = vpop.f32.mrb[97].mxu1  ;;  %v2041_v16 = vadd.f32 %v2040_v55, %v12720_v41  ;;  %v2042_v38 = vpop.f32.mrb[97].mxu0 }
 0x1e4   : > { %16989 = vst [vmem:[#allocation59_spill] sm:$0xff] %v13293_v58  ;;  %v4137_v40 = vmax.f32 %v12749_v9, %v3993_v35  ;;  %v2566_v12 = vadd.f32 %v2565_v32, %v13268_v59  ;;  %v2567_v52 = vpop.f32.mrb[98].mxu1  ;;  %v2043_v63 = vadd.f32 %v2042_v38, %v12725_v42  ;;  %v2044_v5 = vpop.f32.mrb[98].mxu0  ;;  %v12148_v32 = vld [vmem:[%s12470_s30 + $0xe0] sm:$0xff]  }
 0x1e5   : > { %v3282_v20 = vmax.f32 %v2564_v10, 0.0  ;;  %v2568_v30 = vadd.f32 %v2567_v52, %v13266_v3  ;;  %v2569_v13 = vpop.f32.mrb[99].mxu1  ;;  %v3464_v24 = vmax.f32 %v2041_v16, 0.0  ;;  %v2045_v28 = vadd.f32 %v2044_v5, %v12720_v41  ;;  %v2046_v7 = vpop.f32.mrb[99].mxu0 }
 0x1e6   : > { %v13302_v51 = vpack.c.bf16 %v4137_v40, %v4136_v47  ;;  %v3283_v61 = vmax.f32 %v2566_v12, 0.0  ;;  %v2570_v9 = vadd.f32 %v2569_v13, %v13268_v59  ;;  %v3465_v35 = vmax.f32 %v2043_v63, 0.0 }
 0x1e7   : > { %v3286_v55 = vmax.f32 %v2568_v30, 0.0  ;;  %9854 = vmatmul.mubr.msk.bf16.gmra.mrb[204].mxu1 %vm1536_vm1, %v12148_v32  ;;  %v3468_v38 = vmax.f32 %v2045_v28, 0.0  ;;  %v2047_v10 = vadd.f32 %v2046_v7, %v12725_v42 }
 0x1e8   : > { %v3994_v58 = vmax.f32 %v3282_v20, %v3283_v61  ;;  %v3287_v52 = vmax.f32 %v2570_v9, 0.0  ;;  %2841 = vmatprep.mubr.bf16.mxu1 %v16954_v25  ;;  %v13309_v16 = vmax.f32 %v3464_v24, %v3465_v35 }
 0x1e9   : > { %v3469_v5 = vmax.f32 %v2047_v10, 0.0 }
 0x1ea   : > { %v3995_v47 = vmax.f32 %v3286_v55, %v3287_v52  ;;  %v2573_v40 = vpop.f32.mrb[100].mxu1  ;;  %v4138_v12 = vmax.f32 %v12773_v44, %v3994_v58  ;;  %v2050_v13 = vpop.f32.mrb[100].mxu0 }
 0x1eb   : > { %v2574_v63 = vadd.f32 %v2573_v40, %v13266_v3  ;;  %v2575_v30 = vpop.f32.mrb[101].mxu1  ;;  %v2051_v32 = vadd.f32 %v2050_v13, %v12720_v41  ;;  %v2052_v28 = vpop.f32.mrb[101].mxu0  ;;  %v13314_v45 = vmax.f32 %v3468_v38, %v3469_v5 }
 0x1ec   : > { %v2576_v20 = vadd.f32 %v2575_v30, %v13268_v59  ;;  %v2577_v7 = vpop.f32.mrb[102].mxu1  ;;  %v4139_v24 = vmax.f32 %v12777_v48, %v3995_v47  ;;  %v2053_v61 = vadd.f32 %v2052_v28, %v12725_v42  ;;  %v2054_v9 = vpop.f32.mrb[102].mxu0 }
 0x1ed   : > { %16990 = vst [vmem:[#allocation60_spill] sm:$0xff] %v13314_v45  ;;  %v3290_v35 = vmax.f32 %v2574_v63, 0.0  ;;  %v2578_v44 = vadd.f32 %v2577_v7, %v13266_v3  ;;  %v2579_v58 = vpop.f32.mrb[103].mxu1  ;;  %v3472_v55 = vmax.f32 %v2051_v32, 0.0  ;;  %v2055_v10 = vadd.f32 %v2054_v9, %v12720_v41  ;;  %v2056_v52 = vpop.f32.mrb[103].mxu0  ;;  %v12149_v45 = vld [vmem:[%s12470_s30 + $0xe8] sm:$0xff]  }
 0x1ee   : > { %v3291_v40 = vmax.f32 %v2576_v20, 0.0  ;;  %v2580_v38 = vadd.f32 %v2579_v58, %v13268_v59  ;;  %v13322_v5 = vpack.c.bf16 %v4139_v24, %v4138_v12  ;;  %v3473_v13 = vmax.f32 %v2053_v61, 0.0 }
 0x1ef   : > { %v3294_v30 = vmax.f32 %v2578_v44, 0.0  ;;  %9855 = vmatmul.mubr.msk.bf16.gmra.mrb[208].mxu1 %vm1536_vm1, %v12149_v45  ;;  %v3476_v48 = vmax.f32 %v2055_v10, 0.0  ;;  %v2057_v47 = vadd.f32 %v2056_v52, %v12725_v42 }
 0x1f0   : > { %v3996_v63 = vmax.f32 %v3290_v35, %v3291_v40  ;;  %v3295_v28 = vmax.f32 %v2580_v38, 0.0  ;;  %2851 = vmatprep.mubr.bf16.mxu1 %v16954_v25  ;;  %v13328_v32 = vmax.f32 %v3472_v55, %v3473_v13 }
 0x1f1   : > { %v3477_v7 = vmax.f32 %v2057_v47, 0.0 }
 0x1f2   : > { %v3997_v20 = vmax.f32 %v3294_v30, %v3295_v28  ;;  %v2583_v9 = vpop.f32.mrb[104].mxu1  ;;  %v4140_v12 = vmax.f32 %v12795_v15, %v3996_v63  ;;  %v2060_v24 = vpop.f32.mrb[104].mxu0 }
 0x1f3   : > { %v2584_v61 = vadd.f32 %v2583_v9, %v13266_v3  ;;  %v2585_v44 = vpop.f32.mrb[105].mxu1  ;;  %v2061_v45 = vadd.f32 %v2060_v24, %v12720_v41  ;;  %v2062_v58 = vpop.f32.mrb[105].mxu0  ;;  %v13333_v10 = vmax.f32 %v3476_v48, %v3477_v7 }
 0x1f4   : > { %v2586_v35 = vadd.f32 %v2585_v44, %v13268_v59  ;;  %v2587_v52 = vpop.f32.mrb[106].mxu1  ;;  %v4141_v55 = vmax.f32 %v12799_v19, %v3997_v20  ;;  %v2063_v40 = vadd.f32 %v2062_v58, %v12725_v42  ;;  %v2064_v38 = vpop.f32.mrb[106].mxu0  ;;  %v11963_v19 = vld [vmem:[%s16604_s3 + $0x100] ss:$8 sps:$4 sm:$0xff]   ;;  %v12150_v44 = vld [vmem:[%s12470_s30 + $0xf0] sm:$0xff]  }
 0x1f5   : > { %v3298_v13 = vmax.f32 %v2584_v61, 0.0  ;;  %v2588_v15 = vadd.f32 %v2587_v52, %v13266_v3  ;;  %v2589_v30 = vpop.f32.mrb[107].mxu1  ;;  %v3480_v47 = vmax.f32 %v2061_v45, 0.0  ;;  %v2065_v63 = vadd.f32 %v2064_v38, %v12720_v41  ;;  %v2066_v28 = vpop.f32.mrb[107].mxu0  ;;  %v11968_v61 = vld [vmem:[%s16604_s3 + $0x114] ss:$8 sps:$4 sm:$0xff]  }
 0x1f6   : > { %v3299_v9 = vmax.f32 %v2586_v35, 0.0  ;;  %v2590_v48 = vadd.f32 %v2589_v30, %v13268_v59  ;;  %v13341_v7 = vpack.c.bf16 %v4141_v55, %v4140_v12  ;;  %v3481_v20 = vmax.f32 %v2063_v40, 0.0  ;;  %v11966_v30 = vld [vmem:[%s16604_s3 + $0x110] ss:$8 sps:$4 sm:$0xff]  }
 0x1f7   : > { %v3302_v24 = vmax.f32 %v2588_v15, 0.0  ;;  %9856 = vmatmul.mubr.msk.bf16.gmra.mrb[212].mxu1 %vm1536_vm1, %v12150_v44  ;;  %v3484_v45 = vmax.f32 %v2065_v63, 0.0  ;;  %v2067_v58 = vadd.f32 %v2066_v28, %v12725_v42 }
 0x1f8   : > { %v3998_v35 = vmax.f32 %v3298_v13, %v3299_v9  ;;  %v3303_v52 = vmax.f32 %v2590_v48, 0.0  ;;  %4780 = vmatprep.mubr.bf16.mxu0 %v13341_v7  ;;  %2861 = vmatprep.mubr.bf16.mxu1 %v16954_v25  ;;  %v13354_v12 = vmax.f32 %v3480_v47, %v3481_v20 }
 0x1f9   : > { %4781 = vmatmul.mubr.bf16.vlgmr.msra.gmra.mrb[196].mxu0 %v13302_v51  ;;  %v3485_v55 = vmax.f32 %v2067_v58, 0.0  ;;  %v11971_v51 = vld [vmem:[%s16604_s3 + $0x124] ss:$8 sps:$4 sm:$0xff]  }
 0x1fa   : > { %16991 = vst [vmem:[#allocation61_spill] sm:$0xff] %v13354_v12  ;;  %v3999_v40 = vmax.f32 %v3302_v24, %v3303_v52  ;;  %v2593_v38 = vpop.f32.mrb[108].mxu1  ;;  %v4142_v15 = vmax.f32 %v12817_v54, %v3998_v35  ;;  %5282 = vmatpush1.bf16.msra.mxu0 %v11963_v19  ;;  %v2070_v13 = vpop.f32.mrb[108].mxu0 }
 0x1fb   : > { %v2594_v63 = vadd.f32 %v2593_v38, %v13266_v3  ;;  %v2595_v28 = vpop.f32.mrb[109].mxu1  ;;  %5283 = vmatprep.subr.bf16.mxu0 %v11968_v61  ;;  %v2071_v47 = vadd.f32 %v2070_v13, %v12720_v41  ;;  %v2072_v9 = vpop.f32.mrb[109].mxu0  ;;  %v13366_v48 = vmax.f32 %v3484_v45, %v3485_v55 }
 0x1fc   : > { %v2596_v54 = vadd.f32 %v2595_v28, %v13268_v59  ;;  %v2597_v19 = vpop.f32.mrb[110].mxu1  ;;  %v4143_v20 = vmax.f32 %v12827_v60, %v3999_v40  ;;  %v2073_v24 = vadd.f32 %v2072_v9, %v12725_v42  ;;  %v2074_v44 = vpop.f32.mrb[110].mxu0  ;;  %v11969_v60 = vld [vmem:[%s16604_s3 + $0x120] ss:$8 sps:$4 sm:$0xff]  }
 0x1fd   : > { %v3306_v58 = vmax.f32 %v2594_v63, 0.0  ;;  %v2598_v61 = vadd.f32 %v2597_v19, %v13266_v3  ;;  %v2599_v35 = vpop.f32.mrb[111].mxu1  ;;  %v3488_v52 = vmax.f32 %v2071_v47, 0.0  ;;  %v2075_v38 = vadd.f32 %v2074_v44, %v12720_v41  ;;  %v2076_v13 = vpop.f32.mrb[111].mxu0  ;;  %v12151_v63 = vld [vmem:[%s12470_s30 + $0xf8] sm:$0xff]  }
 0x1fe   : > { %v3307_v12 = vmax.f32 %v2596_v54, 0.0  ;;  %v2600_v45 = vadd.f32 %v2599_v35, %v13268_v59  ;;  %v13374_v55 = vpack.c.bf16 %v4143_v20, %v4142_v15  ;;  %5284 = vmatpush1.bf16.msra.mxu0 %v11966_v30  ;;  %v3489_v28 = vmax.f32 %v2073_v24, 0.0 }
 0x1ff   : > { %v3310_v40 = vmax.f32 %v2598_v61, 0.0  ;;  %9857 = vmatmul.mubr.msk.bf16.gmra.mrb[216].mxu1 %vm1536_vm1, %v12151_v63  ;;  %v3492_v9 = vmax.f32 %v2075_v38, 0.0  ;;  %v2077_v47 = vadd.f32 %v2076_v13, %v12725_v42  ;;  %5285 = vmatprep.subr.bf16.mxu0 %v11971_v51 }
 0x200   : > { %v4000_v19 = vmax.f32 %v3306_v58, %v3307_v12  ;;  %v3311_v54 = vmax.f32 %v2600_v45, 0.0  ;;  %4790 = vmatprep.mubr.bf16.mxu0 %v13374_v55  ;;  %2871 = vmatprep.mubr.bf16.mxu1 %v16954_v25  ;;  %v13384_v15 = vmax.f32 %v3488_v52, %v3489_v28 }
 0x201   : > { %4791 = vmatmul.mubr.bf16.gmra.mrb[200].mxu0 %v13322_v5  ;;  %v3493_v30 = vmax.f32 %v2077_v47, 0.0 }
 0x202   : > { %v4001_v20 = vmax.f32 %v3310_v40, %v3311_v54  ;;  %v2603_v24 = vpop.f32.mrb[112].mxu1  ;;  %v4144_v44 = vmax.f32 %v12845_v31, %v4000_v19  ;;  %v2080_v61 = vpop.f32.mrb[112].mxu0  ;;  %5286 = vmatpush1.bf16.msra.mxu0 %v11969_v60 }
 0x203   : > { %v2604_v35 = vadd.f32 %v2603_v24, %v13266_v3  ;;  %v2605_v51 = vpop.f32.mrb[113].mxu1  ;;  %v2081_v12 = vadd.f32 %v2080_v61, %v12720_v41  ;;  %v2082_v58 = vpop.f32.mrb[113].mxu0  ;;  %v13390_v38 = vmax.f32 %v3492_v9, %v3493_v30 }
 0x204   : > { %v2606_v52 = vadd.f32 %v2605_v51, %v13268_v59  ;;  %v2607_v13 = vpop.f32.mrb[114].mxu1  ;;  %v4145_v5 = vmax.f32 %v12849_v37, %v4001_v20  ;;  %v2083_v45 = vadd.f32 %v2082_v58, %v12725_v42  ;;  %v2084_v28 = vpop.f32.mrb[114].mxu0  ;;  %v12152_v51 = vld [vmem:[%s12470_s30 + $0x100] sm:$0xff]  }
 0x205   : > { %v3314_v31 = vmax.f32 %v2604_v35, 0.0  ;;  %v2608_v60 = vadd.f32 %v2607_v13, %v13266_v3  ;;  %v2609_v40 = vpop.f32.mrb[115].mxu1  ;;  %v3496_v63 = vmax.f32 %v2081_v12, 0.0  ;;  %v2085_v47 = vadd.f32 %v2084_v28, %v12720_v41  ;;  %v2086_v19 = vpop.f32.mrb[115].mxu0  ;;  %v11972_v28 = vld [vmem:[%s16604_s3 + $0x130] ss:$8 sps:$4 sm:$0xff]  }
 0x206   : > { %v3315_v54 = vmax.f32 %v2606_v52, 0.0  ;;  %v2610_v9 = vadd.f32 %v2609_v40, %v13268_v59  ;;  %v13398_v30 = vpack.c.bf16 %v4145_v5, %v4144_v44  ;;  %v3497_v24 = vmax.f32 %v2083_v45, 0.0 }
 0x207   : > { %v3318_v61 = vmax.f32 %v2608_v60, 0.0  ;;  %9858 = vmatmul.mubr.msk.bf16.gmra.mrb[220].mxu1 %vm1536_vm1, %v12152_v51  ;;  %v3500_v37 = vmax.f32 %v2085_v47, 0.0  ;;  %v2087_v20 = vadd.f32 %v2086_v19, %v12725_v42 }
 0x208   : > { %v4002_v35 = vmax.f32 %v3314_v31, %v3315_v54  ;;  %v3319_v58 = vmax.f32 %v2610_v9, 0.0  ;;  %4800 = vmatprep.mubr.bf16.mxu0 %v13398_v30  ;;  %2881 = vmatprep.mubr.bf16.mxu1 %v16954_v25  ;;  %v13405_v12 = vmax.f32 %v3496_v63, %v3497_v24  ;;  %v11974_v31 = vld [vmem:[%s16604_s3 + $0x134] ss:$8 sps:$4 sm:$0xff]  }
 0x209   : > { %4801 = vmatmul.mubr.bf16.gmra.mrb[204].mxu0 %v13341_v7  ;;  %v3501_v44 = vmax.f32 %v2087_v20, 0.0  ;;  %5287 = vmatprep.subr.bf16.mxu0 %v11974_v31 }
 0x20a   : > { %v4003_v52 = vmax.f32 %v3318_v61, %v3319_v58  ;;  %v2613_v13 = vpop.f32.mrb[116].mxu1  ;;  %v4146_v5 = vmax.f32 %v12867_v18, %v4002_v35  ;;  %v2090_v45 = vpop.f32.mrb[116].mxu0  ;;  %5288 = vmatpush1.bf16.msra.mxu0 %v11972_v28 }
 0x20b   : > { %v2614_v60 = vadd.f32 %v2613_v13, %v13266_v3  ;;  %v2615_v40 = vpop.f32.mrb[117].mxu1  ;;  %v2091_v63 = vadd.f32 %v2090_v45, %v12720_v41  ;;  %v2092_v7 = vpop.f32.mrb[117].mxu0  ;;  %v13417_v47 = vmax.f32 %v3500_v37, %v3501_v44 }
 0x20c   : > { %v2616_v19 = vadd.f32 %v2615_v40, %v13268_v59  ;;  %v2617_v18 = vpop.f32.mrb[118].mxu1  ;;  %v4147_v54 = vmax.f32 %v12871_v23, %v4003_v52  ;;  %v2093_v9 = vadd.f32 %v2092_v7, %v12725_v42  ;;  %v2094_v24 = vpop.f32.mrb[118].mxu0  ;;  %v12153_v40 = vld [vmem:[%s12470_s30 + $0x108] sm:$0xff]  }
 0x20d   : > { %v3322_v61 = vmax.f32 %v2614_v60, 0.0  ;;  %v2618_v51 = vadd.f32 %v2617_v18, %v13266_v3  ;;  %v2619_v20 = vpop.f32.mrb[119].mxu1  ;;  %v3504_v35 = vmax.f32 %v2091_v63, 0.0  ;;  %v2095_v58 = vadd.f32 %v2094_v24, %v12720_v41  ;;  %v2096_v13 = vpop.f32.mrb[119].mxu0 }
 0x20e   : > { %v3323_v37 = vmax.f32 %v2616_v19, 0.0  ;;  %v2620_v44 = vadd.f32 %v2619_v20, %v13268_v59  ;;  %v13425_v45 = vpack.c.bf16 %v4147_v54, %v4146_v5  ;;  %v3505_v23 = vmax.f32 %v2093_v9, 0.0 }
 0x20f   : > { %v3326_v52 = vmax.f32 %v2618_v51, 0.0  ;;  %9859 = vmatmul.mubr.msk.bf16.gmra.mrb[224].mxu1 %vm1536_vm1, %v12153_v40  ;;  %v3508_v31 = vmax.f32 %v2095_v58, 0.0  ;;  %v2097_v60 = vadd.f32 %v2096_v13, %v12725_v42 }
 0x210   : > { %v4004_v7 = vmax.f32 %v3322_v61, %v3323_v37  ;;  %v3327_v18 = vmax.f32 %v2620_v44, 0.0  ;;  %4810 = vmatprep.mubr.bf16.mxu0 %v13425_v45  ;;  %2891 = vmatprep.mubr.bf16.mxu1 %v16954_v25  ;;  %v13432_v28 = vmax.f32 %v3504_v35, %v3505_v23 }
 0x211   : > { %4811 = vmatmul.mubr.bf16.gmra.mrb[208].mxu0 %v13374_v55  ;;  %v3509_v5 = vmax.f32 %v2097_v60, 0.0 }
 0x212   : > { %v4005_v63 = vmax.f32 %v3326_v52, %v3327_v18  ;;  %v2623_v19 = vpop.f32.mrb[120].mxu1  ;;  %v4148_v54 = vmax.f32 %v12889_v2, %v4004_v7  ;;  %v2100_v9 = vpop.f32.mrb[120].mxu0 }
 0x213   : > { %v2624_v24 = vadd.f32 %v2623_v19, %v13266_v3  ;;  %v2625_v51 = vpop.f32.mrb[121].mxu1  ;;  %v2101_v61 = vadd.f32 %v2100_v9, %v12720_v41  ;;  %v2102_v20 = vpop.f32.mrb[121].mxu0  ;;  %v13438_v58 = vmax.f32 %v3508_v31, %v3509_v5 }
 0x214   : > { %v2626_v13 = vadd.f32 %v2625_v51, %v13268_v59  ;;  %v2627_v35 = vpop.f32.mrb[122].mxu1  ;;  %v4149_v55 = vmax.f32 %v12899_v17, %v4005_v63  ;;  %v2103_v37 = vadd.f32 %v2102_v20, %v12725_v42  ;;  %v2104_v44 = vpop.f32.mrb[122].mxu0  ;;  %v12154_v51 = vld [vmem:[%s12470_s30 + $0x110] sm:$0xff]  }
 0x215   : > { %v3330_v23 = vmax.f32 %v2624_v24, 0.0  ;;  %v2628_v2 = vadd.f32 %v2627_v35, %v13266_v3  ;;  %v2629_v52 = vpop.f32.mrb[123].mxu1  ;;  %v3512_v40 = vmax.f32 %v2101_v61, 0.0  ;;  %v2105_v60 = vadd.f32 %v2104_v44, %v12720_v41  ;;  %v2106_v7 = vpop.f32.mrb[123].mxu0 }
 0x216   : > { %v3331_v18 = vmax.f32 %v2626_v13, 0.0  ;;  %v2630_v31 = vadd.f32 %v2629_v52, %v13268_v59  ;;  %v13446_v5 = vpack.c.bf16 %v4149_v55, %v4148_v54  ;;  %v3513_v19 = vmax.f32 %v2103_v37, 0.0 }
 0x217   : > { %v3334_v9 = vmax.f32 %v2628_v2, 0.0  ;;  %9860 = vmatmul.mubr.msk.bf16.gmra.mrb[228].mxu1 %vm1536_vm1, %v12154_v51  ;;  %v3516_v17 = vmax.f32 %v2105_v60, 0.0  ;;  %v2107_v63 = vadd.f32 %v2106_v7, %v12725_v42 }
 0x218   : > { %v4006_v24 = vmax.f32 %v3330_v23, %v3331_v18  ;;  %v3335_v20 = vmax.f32 %v2630_v31, 0.0  ;;  %4820 = vmatprep.mubr.bf16.mxu0 %v13446_v5  ;;  %2901 = vmatprep.mubr.bf16.mxu1 %v16954_v25  ;;  %v13453_v61 = vmax.f32 %v3512_v40, %v3513_v19 }
 0x219   : > { %4821 = vmatmul.mubr.bf16.gmra.mrb[212].mxu0 %v13398_v30  ;;  %v3517_v54 = vmax.f32 %v2107_v63, 0.0 }
 0x21a   : > { %v4007_v13 = vmax.f32 %v3334_v9, %v3335_v20  ;;  %v2633_v35 = vpop.f32.mrb[124].mxu1  ;;  %v4150_v55 = vmax.f32 %v12917_v1, %v4006_v24  ;;  %v2110_v37 = vpop.f32.mrb[124].mxu0 }
 0x21b   : > { %v2635_v44 = vpop.f32.mrb[125].mxu1  ;;  %v2634_v2 = vadd.f32 %v2633_v35, %v13266_v3  ;;  %v2111_v23 = vadd.f32 %v2110_v37, %v12720_v41  ;;  %v2112_v52 = vpop.f32.mrb[125].mxu0  ;;  %v13459_v60 = vmax.f32 %v3516_v17, %v3517_v54 }
 0x21c   : > { %v2637_v7 = vpop.f32.mrb[126].mxu1  ;;  %v4151_v40 = vmax.f32 %v12921_v14, %v4007_v13  ;;  %v2636_v30 = vadd.f32 %v2635_v44, %v13268_v59  ;;  %v2113_v18 = vadd.f32 %v2112_v52, %v12725_v42  ;;  %v2114_v31 = vpop.f32.mrb[126].mxu0  ;;  %v12155_v14 = vld [vmem:[%s12470_s30 + $0x118] sm:$0xff]  }
 0x21d   : > { %v2639_v19 = vpop.f32.mrb[127].mxu1  ;;  %v2638_v1 = vadd.f32 %v2637_v7, %v13266_v3  ;;  %v3338_v9 = vmax.f32 %v2634_v2, 0.0  ;;  %v3520_v51 = vmax.f32 %v2111_v23, 0.0  ;;  %v2115_v63 = vadd.f32 %v2114_v31, %v12720_v41  ;;  %v2116_v24 = vpop.f32.mrb[127].mxu0 }
 0x21e   : > { %v13466_v20 = vpack.c.bf16 %v4151_v40, %v4150_v55  ;;  %v2640_v17 = vadd.f32 %v2639_v19, %v13268_v59  ;;  %v3339_v54 = vmax.f32 %v2636_v30, 0.0  ;;  %v3521_v35 = vmax.f32 %v2113_v18, 0.0 }
 0x21f   : > { %9861 = vmatmul.mubr.msk.bf16.gmra.mrb[232].mxu1 %vm1536_vm1, %v12155_v14  ;;  %v3342_v13 = vmax.f32 %v2638_v1, 0.0  ;;  %v3524_v37 = vmax.f32 %v2115_v63, 0.0  ;;  %v2117_v44 = vadd.f32 %v2116_v24, %v12725_v42 }
 0x220   : > { %4830 = vmatprep.mubr.bf16.mxu0 %v13466_v20  ;;  %2911 = vmatprep.mubr.bf16.mxu1 %v16954_v25  ;;  %v3343_v2 = vmax.f32 %v2640_v17, 0.0  ;;  %v4008_v23 = vmax.f32 %v3338_v9, %v3339_v54  ;;  %v13474_v52 = vmax.f32 %v3520_v51, %v3521_v35 }
 0x221   : > { %4831 = vmatmul.mubr.bf16.gmra.mrb[216].mxu0 %v13425_v45  ;;  %v3525_v55 = vmax.f32 %v2117_v44, 0.0 }
 0x222   : > { %v2643_v7 = vpop.f32.mrb[128].mxu1  ;;  %v4009_v40 = vmax.f32 %v3342_v13, %v3343_v2  ;;  %v4152_v30 = vmax.f32 %v12939_v11, %v4008_v23  ;;  %v2120_v18 = vpop.f32.mrb[128].mxu0 }
 0x223   : > { %v2644_v31 = vadd.f32 %v2643_v7, %v13266_v3  ;;  %v2645_v19 = vpop.f32.mrb[129].mxu1  ;;  %v2121_v1 = vadd.f32 %v2120_v18, %v12720_v41  ;;  %v2122_v63 = vpop.f32.mrb[129].mxu0  ;;  %v13480_v24 = vmax.f32 %v3524_v37, %v3525_v55 }
 0x224   : > { %v2646_v9 = vadd.f32 %v2645_v19, %v13268_v59  ;;  %v2647_v51 = vpop.f32.mrb[130].mxu1  ;;  %v4153_v17 = vmax.f32 %v12943_v26, %v4009_v40  ;;  %v2123_v45 = vadd.f32 %v2122_v63, %v12725_v42  ;;  %v2124_v54 = vpop.f32.mrb[130].mxu0  ;;  %v11975_v26 = vld [vmem:[%s16604_s3 + $0x140] ss:$8 sps:$4 sm:$0xff]   ;;  %v11977_v40 = vld [vmem:[%s16604_s3 + $0x144] ss:$8 sps:$4 sm:$0xff]  }
 0x225   : > { %v3346_v35 = vmax.f32 %v2644_v31, 0.0  ;;  %v2648_v11 = vadd.f32 %v2647_v51, %v13266_v3  ;;  %v2649_v14 = vpop.f32.mrb[131].mxu1  ;;  %v3528_v13 = vmax.f32 %v2121_v1, 0.0  ;;  %v2125_v44 = vadd.f32 %v2124_v54, %v12720_v41  ;;  %v2126_v2 = vpop.f32.mrb[131].mxu0  ;;  %v12156_v31 = vld [vmem:[%s12470_s30 + $0x120] sm:$0xff]   ;;  %5289 = vmatprep.subr.bf16.mxu0 %v11977_v40 }
 0x226   : > { %v3347_v23 = vmax.f32 %v2646_v9, 0.0  ;;  %v2650_v37 = vadd.f32 %v2649_v14, %v13268_v59  ;;  %v13488_v55 = vpack.c.bf16 %v4153_v17, %v4152_v30  ;;  %v3529_v7 = vmax.f32 %v2123_v45, 0.0  ;;  %5290 = vmatpush1.bf16.msra.mxu0 %v11975_v26 }
 0x227   : > { %v3350_v18 = vmax.f32 %v2648_v11, 0.0  ;;  %9862 = vmatmul.mubr.msk.bf16.gmra.mrb[236].mxu1 %vm1536_vm1, %v12156_v31  ;;  %v3532_v19 = vmax.f32 %v2125_v44, 0.0  ;;  %v2127_v1 = vadd.f32 %v2126_v2, %v12725_v42 }
 0x228   : > { %v4010_v63 = vmax.f32 %v3346_v35, %v3347_v23  ;;  %v3351_v9 = vmax.f32 %v2650_v37, 0.0  ;;  %4840 = vmatprep.mubr.bf16.mxu0 %v13488_v55  ;;  %2921 = vmatprep.mubr.bf16.mxu1 %v16954_v25  ;;  %v13501_v30 = vmax.f32 %v3528_v13, %v3529_v7 }
 0x229   : > { %4841 = vmatmul.mubr.bf16.gmra.mrb[220].mxu0 %v13446_v5  ;;  %v3533_v51 = vmax.f32 %v2127_v1, 0.0 }
 0x22a   : > { %v4011_v17 = vmax.f32 %v3350_v18, %v3351_v9  ;;  %v2653_v45 = vpop.f32.mrb[132].mxu1  ;;  %v4154_v54 = vmax.f32 %v12973_v46, %v4010_v63  ;;  %v2130_v11 = vpop.f32.mrb[132].mxu0 }
 0x22b   : > { %v2654_v14 = vadd.f32 %v2653_v45, %v13266_v3  ;;  %v2655_v35 = vpop.f32.mrb[133].mxu1  ;;  %v2131_v44 = vadd.f32 %v2130_v11, %v12720_v41  ;;  %v2132_v2 = vpop.f32.mrb[133].mxu0  ;;  %v13507_v23 = vmax.f32 %v3532_v19, %v3533_v51 }
 0x22c   : > { %v2656_v13 = vadd.f32 %v2655_v35, %v13268_v59  ;;  %v2657_v5 = vpop.f32.mrb[134].mxu1  ;;  %v4155_v37 = vmax.f32 %v12977_v50, %v4011_v17  ;;  %v2133_v7 = vadd.f32 %v2132_v2, %v12725_v42  ;;  %v2134_v40 = vpop.f32.mrb[134].mxu0  ;;  %v12157_v35 = vld [vmem:[%s12470_s30 + $0x128] sm:$0xff]  }
 0x22d   : > { %v3354_v46 = vmax.f32 %v2654_v14, 0.0  ;;  %v2658_v26 = vadd.f32 %v2657_v5, %v13266_v3  ;;  %v2659_v18 = vpop.f32.mrb[135].mxu1  ;;  %v3536_v31 = vmax.f32 %v2131_v44, 0.0  ;;  %v2135_v1 = vadd.f32 %v2134_v40, %v12720_v41  ;;  %v2136_v63 = vpop.f32.mrb[135].mxu0 }
 0x22e   : > { %v3355_v9 = vmax.f32 %v2656_v13, 0.0  ;;  %v2660_v19 = vadd.f32 %v2659_v18, %v13268_v59  ;;  %v13515_v51 = vpack.c.bf16 %v4155_v37, %v4154_v54  ;;  %v3537_v45 = vmax.f32 %v2133_v7, 0.0 }
 0x22f   : > { %v3358_v11 = vmax.f32 %v2658_v26, 0.0  ;;  %9863 = vmatmul.mubr.msk.bf16.gmra.mrb[240].mxu1 %vm1536_vm1, %v12157_v35  ;;  %v3540_v50 = vmax.f32 %v2135_v1, 0.0  ;;  %v2137_v17 = vadd.f32 %v2136_v63, %v12725_v42 }
 0x230   : > { %v4012_v14 = vmax.f32 %v3354_v46, %v3355_v9  ;;  %v3359_v2 = vmax.f32 %v2660_v19, 0.0  ;;  %4850 = vmatprep.mubr.bf16.mxu0 %v13515_v51  ;;  %2931 = vmatprep.mubr.bf16.mxu1 %v16954_v25  ;;  %v13522_v44 = vmax.f32 %v3536_v31, %v3537_v45 }
 0x231   : > { %4851 = vmatmul.mubr.bf16.gmra.mrb[224].mxu0 %v13466_v20  ;;  %v3541_v54 = vmax.f32 %v2137_v17, 0.0 }
 0x232   : > { %v4156_v13 = vmax.f32 %v13001_v0, %v4012_v14  ;;  %v4013_v5 = vmax.f32 %v3358_v11, %v3359_v2  ;;  %v2663_v37 = vpop.f32.mrb[136].mxu1  ;;  %v2140_v7 = vpop.f32.mrb[136].mxu0 }
 0x233   : > { %v2664_v40 = vadd.f32 %v2663_v37, %v13266_v3  ;;  %v2665_v26 = vpop.f32.mrb[137].mxu1  ;;  %v2141_v46 = vadd.f32 %v2140_v7, %v12720_v41  ;;  %v2142_v18 = vpop.f32.mrb[137].mxu0  ;;  %v13528_v1 = vmax.f32 %v3540_v50, %v3541_v54  ;;  %v12158_v37 = vld [vmem:[%s12470_s30 + $0x130] sm:$0xff]  }
 0x234   : > { %v4157_v63 = vmax.f32 %v13005_v34, %v4013_v5  ;;  %v2666_v31 = vadd.f32 %v2665_v26, %v13268_v59  ;;  %v2667_v20 = vpop.f32.mrb[138].mxu1  ;;  %v2143_v9 = vadd.f32 %v2142_v18, %v12725_v42  ;;  %v2144_v0 = vpop.f32.mrb[138].mxu0 }
 0x235   : > { %v3362_v19 = vmax.f32 %v2664_v40, 0.0  ;;  %v2668_v45 = vadd.f32 %v2667_v20, %v13266_v3  ;;  %v2669_v11 = vpop.f32.mrb[139].mxu1  ;;  %v3544_v35 = vmax.f32 %v2141_v46, 0.0  ;;  %v2145_v17 = vadd.f32 %v2144_v0, %v12720_v41  ;;  %v2146_v14 = vpop.f32.mrb[139].mxu0 }
 0x236   : > { %v3363_v2 = vmax.f32 %v2666_v31, 0.0  ;;  %v2670_v50 = vadd.f32 %v2669_v11, %v13268_v59  ;;  %v4290_v54 = vpack.c.bf16 %v4157_v63, %v4156_v13  ;;  %v3545_v34 = vmax.f32 %v2143_v9, 0.0 }
 0x237   : > { %v3366_v5 = vmax.f32 %v2668_v45, 0.0  ;;  %9864 = vmatmul.mubr.msk.bf16.gmra.mrb[244].mxu1 %vm1536_vm1, %v12158_v37  ;;  %v3548_v7 = vmax.f32 %v2145_v17, 0.0  ;;  %v2147_v26 = vadd.f32 %v2146_v14, %v12725_v42 }
 0x238   : > { %v4014_v40 = vmax.f32 %v3362_v19, %v3363_v2  ;;  %v3367_v18 = vmax.f32 %v2670_v50, 0.0  ;;  %4860 = vmatprep.mubr.bf16.mxu0 %v4290_v54  ;;  %2941 = vmatprep.mubr.bf16.mxu1 %v16954_v25  ;;  %v13540_v46 = vmax.f32 %v3544_v35, %v3545_v34 }
 0x239   : > { %4861 = vmatmul.mubr.bf16.gmra.mrb[228].mxu0 %v13488_v55  ;;  %v3549_v31 = vmax.f32 %v2147_v26, 0.0 }
 0x23a   : > { %v4158_v13 = vmax.f32 %v13023_v53, %v4014_v40  ;;  %v4015_v63 = vmax.f32 %v3366_v5, %v3367_v18  ;;  %v2673_v20 = vpop.f32.mrb[140].mxu1  ;;  %v2150_v9 = vpop.f32.mrb[140].mxu0 }
 0x23b   : > { %v2674_v0 = vadd.f32 %v2673_v20, %v13266_v3  ;;  %v2675_v45 = vpop.f32.mrb[141].mxu1  ;;  %v2151_v11 = vadd.f32 %v2150_v9, %v12720_v41  ;;  %v2152_v19 = vpop.f32.mrb[141].mxu0  ;;  %v13546_v17 = vmax.f32 %v3548_v7, %v3549_v31  ;;  %v11978_v31 = vld [vmem:[%s16604_s3 + $0x150] ss:$8 sps:$4 sm:$0xff]  }
 0x23c   : > { %v4159_v14 = vmax.f32 %v13027_v8, %v4015_v63  ;;  %v2676_v35 = vadd.f32 %v2675_v45, %v13268_v59  ;;  %v2677_v2 = vpop.f32.mrb[142].mxu1  ;;  %v2153_v55 = vadd.f32 %v2152_v19, %v12725_v42  ;;  %v2154_v53 = vpop.f32.mrb[142].mxu0  ;;  %v11980_v63 = vld [vmem:[%s16604_s3 + $0x154] ss:$8 sps:$4 sm:$0xff]  }
 0x23d   : > { %v3370_v50 = vmax.f32 %v2674_v0, 0.0  ;;  %v2678_v54 = vadd.f32 %v2677_v2, %v13266_v3  ;;  %v2679_v34 = vpop.f32.mrb[143].mxu1  ;;  %v3552_v5 = vmax.f32 %v2151_v11, 0.0  ;;  %v2155_v37 = vadd.f32 %v2154_v53, %v12720_v41  ;;  %v2156_v26 = vpop.f32.mrb[143].mxu0  ;;  %v12159_v9 = vld [vmem:[%s12470_s30 + $0x138] sm:$0xff]   ;;  %5291 = vmatprep.subr.bf16.mxu0 %v11980_v63 }
 0x23e   : > { %v3371_v40 = vmax.f32 %v2676_v35, 0.0  ;;  %v2680_v7 = vadd.f32 %v2679_v34, %v13268_v59  ;;  %v4291_v18 = vpack.c.bf16 %v4159_v14, %v4158_v13  ;;  %v3553_v8 = vmax.f32 %v2153_v55, 0.0  ;;  %5292 = vmatpush1.bf16.msra.mxu0 %v11978_v31 }
 0x23f   : > { %v3374_v20 = vmax.f32 %v2678_v54, 0.0  ;;  %9865 = vmatmul.mubr.msk.bf16.gmra.mrb[248].mxu1 %vm1536_vm1, %v12159_v9  ;;  %v3556_v0 = vmax.f32 %v2155_v37, 0.0  ;;  %v2157_v45 = vadd.f32 %v2156_v26, %v12725_v42 }
 0x240   : > { %v4016_v11 = vmax.f32 %v3370_v50, %v3371_v40  ;;  %v3375_v19 = vmax.f32 %v2680_v7, 0.0  ;;  %4870 = vmatprep.mubr.bf16.mxu0 %v4291_v18  ;;  %2951 = vmatprep.mubr.bf16.mxu1 %v16954_v25  ;;  %v13564_v13 = vmax.f32 %v3552_v5, %v3553_v8 }
 0x241   : > { %4871 = vmatmul.mubr.bf16.gmra.mrb[232].mxu0 %v13515_v51  ;;  %v3557_v14 = vmax.f32 %v2157_v45, 0.0 }
 0x242   : > { %v4160_v35 = vmax.f32 %v13045_v57, %v4016_v11  ;;  %v4017_v2 = vmax.f32 %v3374_v20, %v3375_v19  ;;  %v2683_v55 = vpop.f32.mrb[144].mxu1  ;;  %v2160_v53 = vpop.f32.mrb[144].mxu0 }
 0x243   : > { %v2684_v54 = vadd.f32 %v2683_v55, %v13266_v3  ;;  %v2685_v34 = vpop.f32.mrb[145].mxu1  ;;  %v13569_v50 = vmax.f32 %v3556_v0, %v3557_v14  ;;  %v2161_v37 = vadd.f32 %v2160_v53, %v12720_v41  ;;  %v2162_v26 = vpop.f32.mrb[145].mxu0  ;;  %v12160_v14 = vld [vmem:[%s12470_s30 + $0x140] sm:$0xff]  }
 0x244   : > { %v4161_v5 = vmax.f32 %v13049_v27, %v4017_v2  ;;  %v2686_v51 = vadd.f32 %v2685_v34, %v13268_v59  ;;  %v2687_v40 = vpop.f32.mrb[146].mxu1  ;;  %v2163_v57 = vadd.f32 %v2162_v26, %v12725_v42  ;;  %v2164_v7 = vpop.f32.mrb[146].mxu0 }
 0x245   : > { %v3378_v18 = vmax.f32 %v2684_v54, 0.0  ;;  %v2688_v8 = vadd.f32 %v2687_v40, %v13266_v3  ;;  %v2689_v31 = vpop.f32.mrb[147].mxu1  ;;  %v3560_v63 = vmax.f32 %v2161_v37, 0.0  ;;  %v2165_v20 = vadd.f32 %v2164_v7, %v12720_v41  ;;  %v2166_v9 = vpop.f32.mrb[147].mxu0 }
 0x246   : > { %v3379_v0 = vmax.f32 %v2686_v51, 0.0  ;;  %v2690_v45 = vadd.f32 %v2689_v31, %v13268_v59  ;;  %v13578_v11 = vpack.c.bf16 %v4161_v5, %v4160_v35  ;;  %v3561_v27 = vmax.f32 %v2163_v57, 0.0 }
 0x247   : > { %v3382_v19 = vmax.f32 %v2688_v8, 0.0  ;;  %9866 = vmatmul.mubr.msk.bf16.gmra.mrb[252].mxu1 %vm1536_vm1, %v12160_v14  ;;  %v3564_v2 = vmax.f32 %v2165_v20, 0.0  ;;  %v2167_v55 = vadd.f32 %v2166_v9, %v12725_v42 }
 0x248   : > { %16992 = vst [vmem:[#allocation62_spill] sm:$0xff] %v13578_v11  ;;  %v4018_v53 = vmax.f32 %v3378_v18, %v3379_v0  ;;  %v3383_v54 = vmax.f32 %v2690_v45, 0.0  ;;  %2961 = vmatprep.mubr.bf16.mxu1 %v16954_v25  ;;  %v13584_v34 = vmax.f32 %v3560_v63, %v3561_v27 }
 0x249   : > { %v3565_v37 = vmax.f32 %v2167_v55, 0.0 }
 0x24a   : > { %v4162_v26 = vmax.f32 %v13067_v43, %v4018_v53  ;;  %v4019_v51 = vmax.f32 %v3382_v19, %v3383_v54  ;;  %v2693_v35 = vpop.f32.mrb[148].mxu1  ;;  %v2170_v5 = vpop.f32.mrb[148].mxu0 }
 0x24b   : > { %v2694_v40 = vadd.f32 %v2693_v35, %v13266_v3  ;;  %v2695_v57 = vpop.f32.mrb[149].mxu1  ;;  %v13588_v7 = vmax.f32 %v3564_v2, %v3565_v37  ;;  %v2171_v8 = vadd.f32 %v2170_v5, %v12720_v41  ;;  %v2172_v31 = vpop.f32.mrb[149].mxu0 }
 0x24c   : > { %v4163_v18 = vmax.f32 %v13071_v22, %v4019_v51  ;;  %v2696_v63 = vadd.f32 %v2695_v57, %v13268_v59  ;;  %v2697_v20 = vpop.f32.mrb[150].mxu1  ;;  %v2173_v9 = vadd.f32 %v2172_v31, %v12725_v42  ;;  %v2174_v43 = vpop.f32.mrb[150].mxu0  ;;  %v12161_v51 = vld [vmem:[%s12470_s30 + $0x148] sm:$0xff]  }
 0x24d   : > { %v3386_v0 = vmax.f32 %v2694_v40, 0.0  ;;  %v2698_v45 = vadd.f32 %v2697_v20, %v13266_v3  ;;  %v2699_v27 = vpop.f32.mrb[151].mxu1  ;;  %v3568_v19 = vmax.f32 %v2171_v8, 0.0  ;;  %v2175_v14 = vadd.f32 %v2174_v43, %v12720_v41  ;;  %v2176_v2 = vpop.f32.mrb[151].mxu0 }
 0x24e   : > { %v3387_v55 = vmax.f32 %v2696_v63, 0.0  ;;  %v2700_v53 = vadd.f32 %v2699_v27, %v13268_v59  ;;  %v13597_v54 = vpack.c.bf16 %v4163_v18, %v4162_v26  ;;  %v3569_v22 = vmax.f32 %v2173_v9, 0.0 }
 0x24f   : > { %v3390_v37 = vmax.f32 %v2698_v45, 0.0  ;;  %9867 = vmatmul.mubr.msk.bf16.gmra.mrb[0].mxu1 %vm1536_vm1, %v12161_v51  ;;  %v3572_v35 = vmax.f32 %v2175_v14, 0.0  ;;  %v2177_v5 = vadd.f32 %v2176_v2, %v12725_v42 }
 0x250   : > { %16993 = vst [vmem:[#allocation63_spill] sm:$0xff] %v13597_v54  ;;  %v4020_v40 = vmax.f32 %v3386_v0, %v3387_v55  ;;  %v3391_v57 = vmax.f32 %v2700_v53, 0.0  ;;  %2971 = vmatprep.mubr.bf16.mxu1 %v16954_v25  ;;  %v13603_v8 = vmax.f32 %v3568_v19, %v3569_v22 }
 0x251   : > { %v3573_v31 = vmax.f32 %v2177_v5, 0.0 }
 0x252   : > { %v4164_v63 = vmax.f32 %v13089_v56, %v4020_v40  ;;  %v4021_v20 = vmax.f32 %v3390_v37, %v3391_v57  ;;  %v2703_v26 = vpop.f32.mrb[152].mxu1  ;;  %v2180_v18 = vpop.f32.mrb[152].mxu0 }
 0x253   : > { %v2704_v9 = vadd.f32 %v2703_v26, %v13266_v3  ;;  %v2705_v43 = vpop.f32.mrb[153].mxu1  ;;  %v13607_v45 = vmax.f32 %v3572_v35, %v3573_v31  ;;  %v2181_v27 = vadd.f32 %v2180_v18, %v12720_v41  ;;  %v2182_v14 = vpop.f32.mrb[153].mxu0  ;;  %v11983_v26 = vld [vmem:[%s16604_s3 + $0x164] ss:$8 sps:$4 sm:$0xff]  }
 0x254   : > { %v4165_v0 = vmax.f32 %v13093_v39, %v4021_v20  ;;  %v2706_v2 = vadd.f32 %v2705_v43, %v13268_v59  ;;  %v2707_v19 = vpop.f32.mrb[154].mxu1  ;;  %v2183_v55 = vadd.f32 %v2182_v14, %v12725_v42  ;;  %v2184_v56 = vpop.f32.mrb[154].mxu0  ;;  %v11981_v20 = vld [vmem:[%s16604_s3 + $0x160] ss:$8 sps:$4 sm:$0xff]   ;;  %5293 = vmatprep.subr.bf16.mxu0 %v11983_v26 }
 0x255   : > { %v3394_v53 = vmax.f32 %v2704_v9, 0.0  ;;  %v2708_v22 = vadd.f32 %v2707_v19, %v13266_v3  ;;  %v2709_v37 = vpop.f32.mrb[155].mxu1  ;;  %v3576_v51 = vmax.f32 %v2181_v27, 0.0  ;;  %v2185_v35 = vadd.f32 %v2184_v56, %v12720_v41  ;;  %v2186_v5 = vpop.f32.mrb[155].mxu0  ;;  %v12162_v9 = vld [vmem:[%s12470_s30 + $0x150] sm:$0xff]   ;;  %5294 = vmatpush1.bf16.msra.mxu0 %v11981_v20 }
 0x256   : > { %v13615_v40 = vpack.c.bf16 %v4165_v0, %v4164_v63  ;;  %v3395_v57 = vmax.f32 %v2706_v2, 0.0  ;;  %v2710_v39 = vadd.f32 %v2709_v37, %v13268_v59  ;;  %v3577_v31 = vmax.f32 %v2183_v55, 0.0 }
 0x257   : > { %v3398_v18 = vmax.f32 %v2708_v22, 0.0  ;;  %9868 = vmatmul.mubr.msk.bf16.gmra.mrb[4].mxu1 %vm1536_vm1, %v12162_v9  ;;  %v3580_v43 = vmax.f32 %v2185_v35, 0.0  ;;  %v2187_v63 = vadd.f32 %v2186_v5, %v12725_v42 }
 0x258   : > { %16994 = vst [vmem:[#allocation64_spill] sm:$0xff] %v13615_v40  ;;  %v4022_v27 = vmax.f32 %v3394_v53, %v3395_v57  ;;  %v3399_v14 = vmax.f32 %v2710_v39, 0.0  ;;  %4880 = vmatprep.mubr.bf16.mxu0 %v13615_v40  ;;  %2981 = vmatprep.mubr.bf16.mxu1 %v16954_v25  ;;  %v13629_v0 = vmax.f32 %v3576_v51, %v3577_v31 }
 0x259   : > { %4881 = vmatmul.mubr.bf16.gmra.mrb[236].mxu0 %v13578_v11  ;;  %v3581_v2 = vmax.f32 %v2187_v63, 0.0 }
 0x25a   : > { %v4166_v19 = vmax.f32 %v13111_v49, %v4022_v27  ;;  %v4023_v55 = vmax.f32 %v3398_v18, %v3399_v14  ;;  %v2713_v56 = vpop.f32.mrb[156].mxu1  ;;  %v2190_v22 = vpop.f32.mrb[156].mxu0 }
 0x25b   : > { %v2714_v37 = vadd.f32 %v2713_v56, %v13266_v3  ;;  %v2715_v53 = vpop.f32.mrb[157].mxu1  ;;  %v13634_v35 = vmax.f32 %v3580_v43, %v3581_v2  ;;  %v2191_v5 = vadd.f32 %v2190_v22, %v12720_v41  ;;  %v2192_v57 = vpop.f32.mrb[157].mxu0  ;;  %v12163_v22 = vld [vmem:[%s12470_s30 + $0x158] sm:$0xff]  }
 0x25c   : > { %v4167_v51 = vmax.f32 %v13115_v29, %v4023_v55  ;;  %v2716_v39 = vadd.f32 %v2715_v53, %v13268_v59  ;;  %v2717_v31 = vpop.f32.mrb[158].mxu1  ;;  %v2193_v49 = vadd.f32 %v2192_v57, %v12725_v42  ;;  %v2194_v26 = vpop.f32.mrb[158].mxu0 }
 0x25d   : > { %v3402_v18 = vmax.f32 %v2714_v37, 0.0  ;;  %v2718_v20 = vadd.f32 %v2717_v31, %v13266_v3  ;;  %v2719_v9 = vpop.f32.mrb[159].mxu1  ;;  %v3584_v63 = vmax.f32 %v2191_v5, 0.0  ;;  %v2195_v43 = vadd.f32 %v2194_v26, %v12720_v41  ;;  %v2196_v27 = vpop.f32.mrb[159].mxu0 }
 0x25e   : > { %v13642_v14 = vpack.c.bf16 %v4167_v51, %v4166_v19  ;;  %v3403_v2 = vmax.f32 %v2716_v39, 0.0  ;;  %v2720_v29 = vadd.f32 %v2719_v9, %v13268_v59  ;;  %v3585_v55 = vmax.f32 %v2193_v49, 0.0 }
 0x25f   : > { %v3406_v56 = vmax.f32 %v2718_v20, 0.0  ;;  %9869 = vmatmul.mubr.msk.bf16.gmra.mrb[8].mxu1 %vm1536_vm1, %v12163_v22  ;;  %v3588_v53 = vmax.f32 %v2195_v43, 0.0  ;;  %v2197_v37 = vadd.f32 %v2196_v27, %v12725_v42 }
 0x260   : > { %16995 = vst [vmem:[#allocation65_spill] sm:$0xff] %v13642_v14  ;;  %v4024_v57 = vmax.f32 %v3402_v18, %v3403_v2  ;;  %v3407_v31 = vmax.f32 %v2720_v29, 0.0  ;;  %4890 = vmatprep.mubr.bf16.mxu0 %v13642_v14  ;;  %2991 = vmatprep.mubr.bf16.mxu1 %v16954_v25  ;;  %v13650_v5 = vmax.f32 %v3584_v63, %v3585_v55 }
 0x261   : > { %4891 = vmatmul.mubr.bf16.gmra.mrb[240].mxu0 %v13597_v54  ;;  %v3589_v19 = vmax.f32 %v2197_v37, 0.0 }
 0x262   : > { %v4168_v51 = vmax.f32 %v13133_v36, %v4024_v57  ;;  %v4025_v39 = vmax.f32 %v3406_v56, %v3407_v31  ;;  %v2723_v49 = vpop.f32.mrb[160].mxu1  ;;  %v2200_v26 = vpop.f32.mrb[160].mxu0 }
 0x263   : > { %v2724_v20 = vadd.f32 %v2723_v49, %v13266_v3  ;;  %v2725_v9 = vpop.f32.mrb[161].mxu1  ;;  %v13655_v43 = vmax.f32 %v3588_v53, %v3589_v19  ;;  %v2201_v18 = vadd.f32 %v2200_v26, %v12720_v41  ;;  %v2202_v27 = vpop.f32.mrb[161].mxu0 }
 0x264   : > { %v4169_v2 = vmax.f32 %v13137_v21, %v4025_v39  ;;  %v2726_v63 = vadd.f32 %v2725_v9, %v13268_v59  ;;  %v2727_v29 = vpop.f32.mrb[162].mxu1  ;;  %v2203_v55 = vadd.f32 %v2202_v27, %v12725_v42  ;;  %v2204_v36 = vpop.f32.mrb[162].mxu0  ;;  %v12164_v9 = vld [vmem:[%s12470_s30 + $0x160] sm:$0xff]  }
 0x265   : > { %v3410_v56 = vmax.f32 %v2724_v20, 0.0  ;;  %v2728_v22 = vadd.f32 %v2727_v29, %v13266_v3  ;;  %v2729_v37 = vpop.f32.mrb[163].mxu1  ;;  %v3592_v57 = vmax.f32 %v2201_v18, 0.0  ;;  %v2205_v53 = vadd.f32 %v2204_v36, %v12720_v41  ;;  %v2206_v31 = vpop.f32.mrb[163].mxu0 }
 0x266   : > { %v13663_v19 = vpack.c.bf16 %v4169_v2, %v4168_v51  ;;  %v3411_v49 = vmax.f32 %v2726_v63, 0.0  ;;  %v2730_v21 = vadd.f32 %v2729_v37, %v13268_v59  ;;  %v3593_v39 = vmax.f32 %v2203_v55, 0.0 }
 0x267   : > { %v3414_v26 = vmax.f32 %v2728_v22, 0.0  ;;  %9870 = vmatmul.mubr.msk.bf16.gmra.mrb[12].mxu1 %vm1536_vm1, %v12164_v9  ;;  %v3596_v27 = vmax.f32 %v2205_v53, 0.0  ;;  %v2207_v20 = vadd.f32 %v2206_v31, %v12725_v42 }
 0x268   : > { %16996 = vst [vmem:[#allocation66_spill] sm:$0xff] %v13663_v19  ;;  %v4026_v54 = vmax.f32 %v3410_v56, %v3411_v49  ;;  %v3415_v29 = vmax.f32 %v2730_v21, 0.0  ;;  %4900 = vmatprep.mubr.bf16.mxu0 %v13663_v19  ;;  %3001 = vmatprep.mubr.bf16.mxu1 %v16954_v25  ;;  %v13671_v18 = vmax.f32 %v3592_v57, %v3593_v39 }
 0x269   : > { %4901 = vmatmul.mubr.bf16.gmra.mrb[244].mxu0 %v13615_v40  ;;  %v3597_v51 = vmax.f32 %v2207_v20, 0.0 }
 0x26a   : > { %v4170_v2 = vmax.f32 %v13155_v33, %v4026_v54  ;;  %v4027_v63 = vmax.f32 %v3414_v26, %v3415_v29  ;;  %v2733_v55 = vpop.f32.mrb[164].mxu1  ;;  %v2210_v36 = vpop.f32.mrb[164].mxu0 }
 0x26b   : > { %v2734_v22 = vadd.f32 %v2733_v55, %v13266_v3  ;;  %v2735_v37 = vpop.f32.mrb[165].mxu1  ;;  %v13676_v53 = vmax.f32 %v3596_v27, %v3597_v51  ;;  %v2211_v56 = vadd.f32 %v2210_v36, %v12720_v41  ;;  %v2212_v31 = vpop.f32.mrb[165].mxu0  ;;  %v11984_v36 = vld [vmem:[%s16604_s3 + $0x170] ss:$8 sps:$4 sm:$0xff]  }
 0x26c   : > { %v4171_v49 = vmax.f32 %v13159_v6, %v4027_v63  ;;  %v2736_v57 = vadd.f32 %v2735_v37, %v13268_v59  ;;  %v2737_v21 = vpop.f32.mrb[166].mxu1  ;;  %v2213_v39 = vadd.f32 %v2212_v31, %v12725_v42  ;;  %v2214_v33 = vpop.f32.mrb[166].mxu0  ;;  %v12165_v31 = vld [vmem:[%s12470_s30 + $0x168] sm:$0xff]  }
 0x26d   : > { %v3418_v54 = vmax.f32 %v2734_v22, 0.0  ;;  %v2738_v26 = vadd.f32 %v2737_v21, %v13266_v3  ;;  %v2739_v9 = vpop.f32.mrb[167].mxu1  ;;  %v3600_v20 = vmax.f32 %v2211_v56, 0.0  ;;  %v2215_v27 = vadd.f32 %v2214_v33, %v12720_v41  ;;  %v2216_v29 = vpop.f32.mrb[167].mxu0  ;;  %v11986_v22 = vld [vmem:[%s16604_s3 + $0x174] ss:$8 sps:$4 sm:$0xff]  }
 0x26e   : > { %v13684_v51 = vpack.c.bf16 %v4171_v49, %v4170_v2  ;;  %v3419_v55 = vmax.f32 %v2736_v57, 0.0  ;;  %v2740_v6 = vadd.f32 %v2739_v9, %v13268_v59  ;;  %v3601_v63 = vmax.f32 %v2213_v39, 0.0  ;;  %5295 = vmatprep.subr.bf16.mxu0 %v11986_v22 }
 0x26f   : > { %v3422_v37 = vmax.f32 %v2738_v26, 0.0  ;;  %9871 = vmatmul.mubr.msk.bf16.gmra.mrb[16].mxu1 %vm1536_vm1, %v12165_v31  ;;  %v3604_v56 = vmax.f32 %v2215_v27, 0.0  ;;  %v2217_v2 = vadd.f32 %v2216_v29, %v12725_v42  ;;  %5296 = vmatpush1.bf16.msra.mxu0 %v11984_v36 }
 0x270   : > { %16997 = vst [vmem:[#allocation67_spill] sm:$0xff] %v13684_v51  ;;  %v4028_v49 = vmax.f32 %v3418_v54, %v3419_v55  ;;  %v3423_v57 = vmax.f32 %v2740_v6, 0.0  ;;  %4910 = vmatprep.mubr.bf16.mxu0 %v13684_v51  ;;  %3011 = vmatprep.mubr.bf16.mxu1 %v16954_v25  ;;  %v13698_v21 = vmax.f32 %v3600_v20, %v3601_v63 }
 0x271   : > { %4911 = vmatmul.mubr.bf16.gmra.mrb[248].mxu0 %v13642_v14  ;;  %v3605_v39 = vmax.f32 %v2217_v2, 0.0 }
 0x272   : > { %v4172_v33 = vmax.f32 %v13177_v62, %v4028_v49  ;;  %v4029_v26 = vmax.f32 %v3422_v37, %v3423_v57  ;;  %v2743_v9 = vpop.f32.mrb[168].mxu1  ;;  %v2220_v31 = vpop.f32.mrb[168].mxu0 }
 0x273   : > { %v2744_v27 = vadd.f32 %v2743_v9, %v13266_v3  ;;  %v2745_v54 = vpop.f32.mrb[169].mxu1  ;;  %v13703_v29 = vmax.f32 %v3604_v56, %v3605_v39  ;;  %v2221_v55 = vadd.f32 %v2220_v31, %v12720_v41  ;;  %v2222_v6 = vpop.f32.mrb[169].mxu0 }
 0x274   : > { %v4173_v20 = vmax.f32 %v13181_v4, %v4029_v26  ;;  %v2746_v63 = vadd.f32 %v2745_v54, %v13268_v59  ;;  %v2747_v22 = vpop.f32.mrb[170].mxu1  ;;  %v2223_v62 = vadd.f32 %v2222_v6, %v12725_v42  ;;  %v2224_v37 = vpop.f32.mrb[170].mxu0  ;;  %v12166_v54 = vld [vmem:[%s12470_s30 + $0x170] sm:$0xff]  }
 0x275   : > { %v3426_v2 = vmax.f32 %v2744_v27, 0.0  ;;  %v2748_v36 = vadd.f32 %v2747_v22, %v13266_v3  ;;  %v2749_v49 = vpop.f32.mrb[171].mxu1  ;;  %v3608_v57 = vmax.f32 %v2221_v55, 0.0  ;;  %v2225_v56 = vadd.f32 %v2224_v37, %v12720_v41  ;;  %v2226_v39 = vpop.f32.mrb[171].mxu0 }
 0x276   : > { %v13711_v9 = vpack.c.bf16 %v4173_v20, %v4172_v33  ;;  %v3427_v31 = vmax.f32 %v2746_v63, 0.0  ;;  %v2750_v4 = vadd.f32 %v2749_v49, %v13268_v59  ;;  %v3609_v26 = vmax.f32 %v2223_v62, 0.0  ;;  %v16999_v20 = vld [vmem:[#allocation43_spill] sm:$0xff] }
 0x277   : > { %v3430_v14 = vmax.f32 %v2748_v36, 0.0  ;;  %9872 = vmatmul.mubr.msk.bf16.gmra.mrb[20].mxu1 %vm1536_vm1, %v12166_v54  ;;  %v3612_v6 = vmax.f32 %v2225_v56, 0.0  ;;  %v2227_v27 = vadd.f32 %v2226_v39, %v12725_v42 }
 0x278   : > { %16998 = vst [vmem:[#allocation68_spill] sm:$0xff] %v13711_v9  ;;  %v4030_v11 = vmax.f32 %v3426_v2, %v3427_v31  ;;  %v3431_v22 = vmax.f32 %v2750_v4, 0.0  ;;  %4920 = vmatprep.mubr.bf16.mxu0 %v13711_v9  ;;  %3021 = vmatprep.mubr.bf16.mxu1 %v16954_v25  ;;  %v13719_v55 = vmax.f32 %v3608_v57, %v3609_v26  ;;  %v17001_v4 = vld [vmem:[#allocation45_spill] sm:$0xff] }
 0x279   : > { %4921 = vmatmul.mubr.bf16.gmra.mrb[252].mxu0 %v13663_v19  ;;  %v3613_v33 = vmax.f32 %v2227_v27, 0.0 }
 0x27a   : > { %v4174_v63 = vmax.f32 %v16999_v20, %v4030_v11  ;;  %v4031_v62 = vmax.f32 %v3430_v14, %v3431_v22  ;;  %v2753_v37 = vpop.f32.mrb[172].mxu1  ;;  %v2230_v36 = vpop.f32.mrb[172].mxu0 }
 0x27b   : > { %v2754_v49 = vadd.f32 %v2753_v37, %v13266_v3  ;;  %v2755_v56 = vpop.f32.mrb[173].mxu1  ;;  %v13724_v39 = vmax.f32 %v3612_v6, %v3613_v33  ;;  %v2231_v2 = vadd.f32 %v2230_v36, %v12720_v41  ;;  %v2232_v31 = vpop.f32.mrb[173].mxu0 }
 0x27c   : > { %v4175_v54 = vmax.f32 %v17001_v4, %v4031_v62  ;;  %v2756_v57 = vadd.f32 %v2755_v56, %v13268_v59  ;;  %v2757_v26 = vpop.f32.mrb[174].mxu1  ;;  %v2233_v27 = vadd.f32 %v2232_v31, %v12725_v42  ;;  %v2234_v11 = vpop.f32.mrb[174].mxu0  ;;  %v12167_v56 = vld [vmem:[%s12470_s30 + $0x178] sm:$0xff]  }
 0x27d   : > { %17000 = vst [vmem:[#allocation43_spill] sm:$0xff] %v13724_v39  ;;  %v3434_v14 = vmax.f32 %v2754_v49, 0.0  ;;  %v2758_v22 = vadd.f32 %v2757_v26, %v13266_v3  ;;  %v2759_v20 = vpop.f32.mrb[175].mxu1  ;;  %v3616_v37 = vmax.f32 %v2231_v2, 0.0  ;;  %v2235_v6 = vadd.f32 %v2234_v11, %v12720_v41  ;;  %v2236_v33 = vpop.f32.mrb[175].mxu0 }
 0x27e   : > { %v13732_v19 = vpack.c.bf16 %v4175_v54, %v4174_v63  ;;  %v3435_v36 = vmax.f32 %v2756_v57, 0.0  ;;  %v2760_v62 = vadd.f32 %v2759_v20, %v13268_v59  ;;  %v3617_v4 = vmax.f32 %v2233_v27, 0.0  ;;  %v17004_v54 = vld [vmem:[#allocation47_spill] sm:$0xff] }
 0x27f   : > { %v3438_v40 = vmax.f32 %v2758_v22, 0.0  ;;  %9873 = vmatmul.mubr.msk.bf16.gmra.mrb[24].mxu1 %vm1536_vm1, %v12167_v56  ;;  %v3620_v31 = vmax.f32 %v2235_v6, 0.0  ;;  %v2237_v49 = vadd.f32 %v2236_v33, %v12725_v42  ;;  %v11987_v20 = vld [vmem:[%s16606_s5 + $0x20] sm:$0xff]  }
 0x280   : > { %17002 = vst [vmem:[#allocation45_spill] sm:$0xff] %v13732_v19  ;;  %v4032_v39 = vmax.f32 %v3434_v14, %v3435_v36  ;;  %v3439_v26 = vmax.f32 %v2760_v62, 0.0  ;;  %4930 = vmatprep.mubr.bf16.mxu0 %v13732_v19  ;;  %3031 = vmatprep.mubr.bf16.mxu1 %v16954_v25  ;;  %v13740_v2 = vmax.f32 %v3616_v37, %v3617_v4  ;;  %v17006_v62 = vld [vmem:[#allocation49_spill] sm:$0xff] }
 0x281   : > { %4931 = vmatmul.mubr.bf16.gmra.mrb[0].mxu0 %v13684_v51  ;;  %v3621_v63 = vmax.f32 %v2237_v49, 0.0  ;;  %10477 = vmatprep.subr.bf16.mxu1 %v11987_v20 }
 0x282   : > { %17003 = vst [vmem:[#allocation69_spill] sm:$0xff] %v13740_v2  ;;  %v4176_v57 = vmax.f32 %v17004_v54, %v4032_v39  ;;  %v4033_v27 = vmax.f32 %v3438_v40, %v3439_v26  ;;  %v2763_v11 = vpop.f32.mrb[176].mxu1  ;;  %v2240_v22 = vpop.f32.mrb[176].mxu0  ;;  %10478 = vmatpush3.bf16.msra.mxu1 %v11987_v20 }
 0x283   : > { %v2764_v14 = vadd.f32 %v2763_v11, %v13266_v3  ;;  %v2765_v6 = vpop.f32.mrb[177].mxu1  ;;  %v13748_v33 = vmax.f32 %v3620_v31, %v3621_v63  ;;  %v2241_v37 = vadd.f32 %v2240_v22, %v12720_v41  ;;  %v2242_v36 = vpop.f32.mrb[177].mxu0 }
 0x284   : > { %v4177_v4 = vmax.f32 %v17006_v62, %v4033_v27  ;;  %v2766_v56 = vadd.f32 %v2765_v6, %v13268_v59  ;;  %v2767_v39 = vpop.f32.mrb[178].mxu1  ;;  %v2243_v40 = vadd.f32 %v2242_v36, %v12725_v42  ;;  %v2244_v49 = vpop.f32.mrb[178].mxu0  ;;  %v11988_v36 = vld [vmem:[%s16604_s3 + $0x180] ss:$8 sps:$4 sm:$0xff]  }
 0x285   : > { %17005 = vst [vmem:[#allocation47_spill] sm:$0xff] %v13748_v33  ;;  %v3442_v26 = vmax.f32 %v2764_v14, 0.0  ;;  %v2768_v54 = vadd.f32 %v2767_v39, %v13266_v3  ;;  %v2769_v11 = vpop.f32.mrb[179].mxu1  ;;  %v3624_v51 = vmax.f32 %v2241_v37, 0.0  ;;  %v2245_v31 = vadd.f32 %v2244_v49, %v12720_v41  ;;  %v2246_v63 = vpop.f32.mrb[179].mxu0  ;;  %v12168_v37 = vld [vmem:[%s12470_s30 + $0x180] sm:$0xff]  }
 0x286   : > { %v13756_v22 = vpack.c.bf16 %v4177_v4, %v4176_v57  ;;  %v3443_v27 = vmax.f32 %v2766_v56, 0.0  ;;  %v2770_v6 = vadd.f32 %v2769_v11, %v13268_v59  ;;  %v3625_v62 = vmax.f32 %v2243_v40, 0.0  ;;  %v11990_v14 = vld [vmem:[%s16604_s3 + $0x184] ss:$8 sps:$4 sm:$0xff]  }
 0x287   : > { %v3446_v39 = vmax.f32 %v2768_v54, 0.0  ;;  %9874 = vmatmul.mubr.msk.bf16.gmra.mrb[28].mxu1 %vm1536_vm1, %v12168_v37  ;;  %v3628_v49 = vmax.f32 %v2245_v31, 0.0  ;;  %v2247_v57 = vadd.f32 %v2246_v63, %v12725_v42  ;;  %5297 = vmatprep.subr.bf16.mxu0 %v11990_v14  ;;  %v17009_v11 = vld [vmem:[#allocation51_spill] sm:$0xff] }
 0x288   : > { %17007 = vst [vmem:[#allocation49_spill] sm:$0xff] %v13756_v22  ;;  %v4034_v20 = vmax.f32 %v3442_v26, %v3443_v27  ;;  %v3447_v4 = vmax.f32 %v2770_v6, 0.0  ;;  %4940 = vmatprep.mubr.bf16.mxu0 %v13756_v22  ;;  %3041 = vmatprep.mubr.bf16.mxu1 %v16954_v25  ;;  %v13770_v56 = vmax.f32 %v3624_v51, %v3625_v62  ;;  %v17011_v51 = vld [vmem:[#allocation53_spill] sm:$0xff] }
 0x289   : > { %4941 = vmatmul.mubr.bf16.gmra.mrb[4].mxu0 %v13711_v9  ;;  %v3629_v40 = vmax.f32 %v2247_v57, 0.0 }
 0x28a   : > { %17008 = vst [vmem:[#allocation70_spill] sm:$0xff] %v13770_v56  ;;  %v4178_v54 = vmax.f32 %v17009_v11, %v4034_v20  ;;  %v4035_v33 = vmax.f32 %v3446_v39, %v3447_v4  ;;  %v2773_v2 = vpop.f32.mrb[180].mxu1  ;;  %v2250_v37 = vpop.f32.mrb[180].mxu0  ;;  %5298 = vmatpush1.bf16.msra.mxu0 %v11988_v36 }
 0x28b   : > { %v2774_v31 = vadd.f32 %v2773_v2, %v13266_v3  ;;  %v2775_v26 = vpop.f32.mrb[181].mxu1  ;;  %v13775_v63 = vmax.f32 %v3628_v49, %v3629_v40  ;;  %v2251_v27 = vadd.f32 %v2250_v37, %v12720_v41  ;;  %v2252_v6 = vpop.f32.mrb[181].mxu0 }
 0x28c   : > { %v4179_v62 = vmax.f32 %v17011_v51, %v4035_v33  ;;  %v2776_v57 = vadd.f32 %v2775_v26, %v13268_v59  ;;  %v2777_v14 = vpop.f32.mrb[182].mxu1  ;;  %v2253_v20 = vadd.f32 %v2252_v6, %v12725_v42  ;;  %v2254_v39 = vpop.f32.mrb[182].mxu0  ;;  %v12169_v26 = vld [vmem:[%s12470_s30 + $0x188] sm:$0xff]  }
 0x28d   : > { %17010 = vst [vmem:[#allocation51_spill] sm:$0xff] %v13775_v63  ;;  %v3450_v4 = vmax.f32 %v2774_v31, 0.0  ;;  %v2778_v36 = vadd.f32 %v2777_v14, %v13266_v3  ;;  %v2779_v11 = vpop.f32.mrb[183].mxu1  ;;  %v3632_v2 = vmax.f32 %v2251_v27, 0.0  ;;  %v2255_v49 = vadd.f32 %v2254_v39, %v12720_v41  ;;  %v2256_v40 = vpop.f32.mrb[183].mxu0 }
 0x28e   : > { %v13783_v9 = vpack.c.bf16 %v4179_v62, %v4178_v54  ;;  %v3451_v37 = vmax.f32 %v2776_v57, 0.0  ;;  %v2780_v33 = vadd.f32 %v2779_v11, %v13268_v59  ;;  %v3633_v51 = vmax.f32 %v2253_v20, 0.0  ;;  %v17014_v62 = vld [vmem:[#allocation55_spill] sm:$0xff] }
 0x28f   : > { %v3454_v63 = vmax.f32 %v2778_v36, 0.0  ;;  %9875 = vmatmul.mubr.msk.bf16.gmra.mrb[32].mxu1 %vm1536_vm1, %v12169_v26  ;;  %v3636_v6 = vmax.f32 %v2255_v49, 0.0  ;;  %v2257_v31 = vadd.f32 %v2256_v40, %v12725_v42 }
 0x290   : > { %17012 = vst [vmem:[#allocation53_spill] sm:$0xff] %v13783_v9  ;;  %v4036_v56 = vmax.f32 %v3450_v4, %v3451_v37  ;;  %v3455_v14 = vmax.f32 %v2780_v33, 0.0  ;;  %4950 = vmatprep.mubr.bf16.mxu0 %v13783_v9  ;;  %3051 = vmatprep.mubr.bf16.mxu1 %v16954_v25  ;;  %v13791_v27 = vmax.f32 %v3632_v2, %v3633_v51  ;;  %v17016_v33 = vld [vmem:[#allocation57_spill] sm:$0xff] }
 0x291   : > { %4951 = vmatmul.mubr.bf16.gmra.mrb[8].mxu0 %v13732_v19  ;;  %v3637_v54 = vmax.f32 %v2257_v31, 0.0 }
 0x292   : > { %17013 = vst [vmem:[#allocation71_spill] sm:$0xff] %v13791_v27  ;;  %v4180_v57 = vmax.f32 %v17014_v62, %v4036_v56  ;;  %v4037_v20 = vmax.f32 %v3454_v63, %v3455_v14  ;;  %v2783_v39 = vpop.f32.mrb[184].mxu1  ;;  %v2260_v36 = vpop.f32.mrb[184].mxu0 }
 0x293   : > { %v2784_v11 = vadd.f32 %v2783_v39, %v13266_v3  ;;  %v2785_v49 = vpop.f32.mrb[185].mxu1  ;;  %v13796_v40 = vmax.f32 %v3636_v6, %v3637_v54  ;;  %v2261_v4 = vadd.f32 %v2260_v36, %v12720_v41  ;;  %v2262_v37 = vpop.f32.mrb[185].mxu0 }
 0x294   : > { %v4181_v26 = vmax.f32 %v17016_v33, %v4037_v20  ;;  %v2786_v2 = vadd.f32 %v2785_v49, %v13268_v59  ;;  %v2787_v51 = vpop.f32.mrb[186].mxu1  ;;  %v2263_v31 = vadd.f32 %v2262_v37, %v12725_v42  ;;  %v2264_v56 = vpop.f32.mrb[186].mxu0  ;;  %v12170_v49 = vld [vmem:[%s12470_s30 + $0x190] sm:$0xff]  }
 0x295   : > { %17015 = vst [vmem:[#allocation55_spill] sm:$0xff] %v13796_v40  ;;  %v3458_v63 = vmax.f32 %v2784_v11, 0.0  ;;  %v2788_v14 = vadd.f32 %v2787_v51, %v13266_v3  ;;  %v2789_v62 = vpop.f32.mrb[187].mxu1  ;;  %v3640_v39 = vmax.f32 %v2261_v4, 0.0  ;;  %v2265_v6 = vadd.f32 %v2264_v56, %v12720_v41  ;;  %v2266_v54 = vpop.f32.mrb[187].mxu0 }
 0x296   : > { %v3459_v19 = vmax.f32 %v2786_v2, 0.0  ;;  %v2790_v36 = vadd.f32 %v2789_v62, %v13268_v59  ;;  %v13805_v40 = vpack.c.bf16 %v4181_v26, %v4180_v57  ;;  %v3641_v20 = vmax.f32 %v2263_v31, 0.0  ;;  %v17018_v26 = vld [vmem:[#allocation58_spill] sm:$0xff] }
 0x297   : > { %v3462_v33 = vmax.f32 %v2788_v14, 0.0  ;;  %9876 = vmatmul.mubr.msk.bf16.gmra.mrb[36].mxu1 %vm1536_vm1, %v12170_v49  ;;  %v3644_v37 = vmax.f32 %v2265_v6, 0.0  ;;  %v2267_v11 = vadd.f32 %v2266_v54, %v12725_v42 }
 0x298   : > { %17017 = vst [vmem:[#allocation57_spill] sm:$0xff] %v13805_v40  ;;  %v4038_v27 = vmax.f32 %v3458_v63, %v3459_v19  ;;  %v3463_v51 = vmax.f32 %v2790_v36, 0.0  ;;  %4960 = vmatprep.mubr.bf16.mxu0 %v13805_v40  ;;  %3061 = vmatprep.mubr.bf16.mxu1 %v16954_v25  ;;  %v13812_v4 = vmax.f32 %v3640_v39, %v3641_v20  ;;  %v17019_v36 = vld [vmem:[#allocation59_spill] sm:$0xff] }
 0x299   : > { %4961 = vmatmul.mubr.bf16.gmra.mrb[12].mxu0 %v13756_v22  ;;  %v3645_v57 = vmax.f32 %v2267_v11, 0.0 }
 0x29a   : > { %v4182_v2 = vmax.f32 %v17018_v26, %v4038_v27  ;;  %v4039_v31 = vmax.f32 %v3462_v33, %v3463_v51  ;;  %v2793_v56 = vpop.f32.mrb[188].mxu1  ;;  %v2270_v14 = vpop.f32.mrb[188].mxu0 }
 0x29b   : > { %v2794_v62 = vadd.f32 %v2793_v56, %v13266_v3  ;;  %v2795_v6 = vpop.f32.mrb[189].mxu1  ;;  %v13817_v54 = vmax.f32 %v3644_v37, %v3645_v57  ;;  %v2271_v19 = vadd.f32 %v2270_v14, %v12720_v41  ;;  %v2272_v63 = vpop.f32.mrb[189].mxu0 }
 0x29c   : > { %v4183_v49 = vmax.f32 %v17019_v36, %v4039_v31  ;;  %v2796_v39 = vadd.f32 %v2795_v6, %v13268_v59  ;;  %v2797_v20 = vpop.f32.mrb[190].mxu1  ;;  %v2273_v11 = vadd.f32 %v2272_v63, %v12725_v42  ;;  %v2274_v27 = vpop.f32.mrb[190].mxu0  ;;  %v11991_v6 = vld [vmem:[%s16604_s3 + $0x190] ss:$8 sps:$4 sm:$0xff]  }
 0x29d   : > { %v3466_v33 = vmax.f32 %v2794_v62, 0.0  ;;  %v2798_v51 = vadd.f32 %v2797_v20, %v13266_v3  ;;  %v2799_v26 = vpop.f32.mrb[191].mxu1  ;;  %v3648_v56 = vmax.f32 %v2271_v19, 0.0  ;;  %v2275_v37 = vadd.f32 %v2274_v27, %v12720_v41  ;;  %v2276_v57 = vpop.f32.mrb[191].mxu0  ;;  %v11993_v62 = vld [vmem:[%s16604_s3 + $0x194] ss:$8 sps:$4 sm:$0xff]  }
 0x29e   : > { %v3467_v40 = vmax.f32 %v2796_v39, 0.0  ;;  %v2800_v14 = vadd.f32 %v2799_v26, %v13268_v59  ;;  %v13826_v22 = vpack.c.bf16 %v4183_v49, %v4182_v2  ;;  %v3649_v31 = vmax.f32 %v2273_v11, 0.0  ;;  %v12171_v36 = vld [vmem:[%s12470_s30 + $0x198] sm:$0xff]   ;;  %5299 = vmatprep.subr.bf16.mxu0 %v11993_v62 }
 0x29f   : > { %v3470_v63 = vmax.f32 %v2798_v51, 0.0  ;;  %9877 = vmatmul.mubr.msk.bf16.gmra.mrb[40].mxu1 %vm1536_vm1, %v12171_v36  ;;  %v3652_v19 = vmax.f32 %v2275_v37, 0.0  ;;  %v2277_v39 = vadd.f32 %v2276_v57, %v12725_v42  ;;  %5300 = vmatpush1.bf16.msra.mxu0 %v11991_v6 }
 0x2a0   : > { %17020 = vst [vmem:[#allocation58_spill] sm:$0xff] %v13826_v22  ;;  %v4040_v20 = vmax.f32 %v3466_v33, %v3467_v40  ;;  %v3471_v27 = vmax.f32 %v2800_v14, 0.0  ;;  %4970 = vmatprep.mubr.bf16.mxu0 %v13826_v22  ;;  %3071 = vmatprep.mubr.bf16.mxu1 %v16954_v25  ;;  %v13839_v2 = vmax.f32 %v3648_v56, %v3649_v31  ;;  %v17022_v56 = vld [vmem:[#allocation60_spill] sm:$0xff] }
 0x2a1   : > { %4971 = vmatmul.mubr.bf16.gmra.mrb[16].mxu0 %v13783_v9  ;;  %v3653_v49 = vmax.f32 %v2277_v39, 0.0 }
 0x2a2   : > { %v4184_v11 = vmax.f32 %v13309_v16, %v4040_v20  ;;  %v4041_v51 = vmax.f32 %v3470_v63, %v3471_v27  ;;  %v2803_v26 = vpop.f32.mrb[192].mxu1  ;;  %v2280_v36 = vpop.f32.mrb[192].mxu0 }
 0x2a3   : > { %v2804_v37 = vadd.f32 %v2803_v26, %v13266_v3  ;;  %v2805_v40 = vpop.f32.mrb[193].mxu1  ;;  %v13844_v33 = vmax.f32 %v3652_v19, %v3653_v49  ;;  %v2281_v57 = vadd.f32 %v2280_v36, %v12720_v41  ;;  %v2282_v14 = vpop.f32.mrb[193].mxu0 }
 0x2a4   : > { %v4185_v31 = vmax.f32 %v17022_v56, %v4041_v51  ;;  %v2806_v39 = vadd.f32 %v2805_v40, %v13268_v59  ;;  %v2807_v62 = vpop.f32.mrb[194].mxu1  ;;  %v2283_v16 = vadd.f32 %v2282_v14, %v12725_v42  ;;  %v2284_v63 = vpop.f32.mrb[194].mxu0  ;;  %v12172_v40 = vld [vmem:[%s12470_s30 + $0x1a0] sm:$0xff]  }
 0x2a5   : > { %17021 = vst [vmem:[#allocation59_spill] sm:$0xff] %v13844_v33  ;;  %v3474_v20 = vmax.f32 %v2804_v37, 0.0  ;;  %v2808_v6 = vadd.f32 %v2807_v62, %v13266_v3  ;;  %v2809_v27 = vpop.f32.mrb[195].mxu1  ;;  %v3656_v26 = vmax.f32 %v2281_v57, 0.0  ;;  %v2285_v19 = vadd.f32 %v2284_v63, %v12720_v41  ;;  %v2286_v49 = vpop.f32.mrb[195].mxu0 }
 0x2a6   : > { %v13852_v22 = vpack.c.bf16 %v4185_v31, %v4184_v11  ;;  %v3475_v36 = vmax.f32 %v2806_v39, 0.0  ;;  %v2810_v51 = vadd.f32 %v2809_v27, %v13268_v59  ;;  %v3657_v56 = vmax.f32 %v2283_v16, 0.0 }
 0x2a7   : > { %v3478_v9 = vmax.f32 %v2808_v6, 0.0  ;;  %9878 = vmatmul.mubr.msk.bf16.gmra.mrb[44].mxu1 %vm1536_vm1, %v12172_v40  ;;  %v3660_v14 = vmax.f32 %v2285_v19, 0.0  ;;  %v2287_v37 = vadd.f32 %v2286_v49, %v12725_v42 }
 0x2a8   : > { %v4042_v33 = vmax.f32 %v3474_v20, %v3475_v36  ;;  %v3479_v62 = vmax.f32 %v2810_v51, 0.0  ;;  %3081 = vmatprep.mubr.bf16.mxu1 %v16954_v25  ;;  %v13859_v57 = vmax.f32 %v3656_v26, %v3657_v56  ;;  %v12173_v51 = vld [vmem:[%s12470_s30 + $0x1a8] sm:$0xff]  }
 0x2a9   : > { %v3661_v41 = vmax.f32 %v2287_v37, 0.0 }
 0x2aa   : > { %v4186_v11 = vmax.f32 %v13328_v32, %v4042_v33  ;;  %v4043_v31 = vmax.f32 %v3478_v9, %v3479_v62  ;;  %v2813_v39 = vpop.f32.mrb[196].mxu1 }
 0x2ab   : > { %v2814_v16 = vadd.f32 %v2813_v39, %v13266_v3  ;;  %v2815_v63 = vpop.f32.mrb[197].mxu1  ;;  %v13863_v6 = vmax.f32 %v3660_v14, %v3661_v41 }
 0x2ac   : > { %v4187_v27 = vmax.f32 %v13333_v10, %v4043_v31  ;;  %v2816_v42 = vadd.f32 %v2815_v63, %v13268_v59  ;;  %v2817_v20 = vpop.f32.mrb[198].mxu1  ;;  %v17023_v10 = vld [vmem:[#allocation61_spill] sm:$0xff] }
 0x2ad   : > { %v3482_v19 = vmax.f32 %v2814_v16, 0.0  ;;  %v2818_v26 = vadd.f32 %v2817_v20, %v13266_v3  ;;  %v2819_v49 = vpop.f32.mrb[199].mxu1 }
 0x2ae   : > { %v13868_v36 = vpack.c.bf16 %v4187_v27, %v4186_v11  ;;  %v3483_v32 = vmax.f32 %v2816_v42, 0.0  ;;  %v2820_v9 = vadd.f32 %v2819_v49, %v13268_v59 }
 0x2af   : > { %v3486_v33 = vmax.f32 %v2818_v26, 0.0  ;;  %9879 = vmatmul.mubr.msk.bf16.gmra.mrb[48].mxu1 %vm1536_vm1, %v12173_v51 }
 0x2b0   : > { %v4044_v56 = vmax.f32 %v3482_v19, %v3483_v32  ;;  %v3487_v40 = vmax.f32 %v2820_v9, 0.0  ;;  %3091 = vmatprep.mubr.bf16.mxu1 %v16954_v25  ;;  %v12174_v32 = vld [vmem:[%s12470_s30 + $0x1b0] sm:$0xff]  }
 0x2b2   : > { %v4188_v14 = vmax.f32 %v17023_v10, %v4044_v56  ;;  %v4045_v37 = vmax.f32 %v3486_v33, %v3487_v40  ;;  %v2823_v62 = vpop.f32.mrb[200].mxu1  ;;  %v11994_v40 = vld [vmem:[%s16604_s3 + $0x1a0] ss:$8 sps:$4 sm:$0xff]   ;;  %v11996_v10 = vld [vmem:[%s16604_s3 + $0x1a4] ss:$8 sps:$4 sm:$0xff]  }
 0x2b3   : > { %v2824_v41 = vadd.f32 %v2823_v62, %v13266_v3  ;;  %v2825_v11 = vpop.f32.mrb[201].mxu1  ;;  %5301 = vmatprep.subr.bf16.mxu0 %v11996_v10 }
 0x2b4   : > { %v4189_v31 = vmax.f32 %v13366_v48, %v4045_v37  ;;  %v2826_v39 = vadd.f32 %v2825_v11, %v13268_v59  ;;  %v2827_v16 = vpop.f32.mrb[202].mxu1  ;;  %5302 = vmatpush1.bf16.msra.mxu0 %v11994_v40 }
 0x2b5   : > { %v3490_v63 = vmax.f32 %v2824_v41, 0.0  ;;  %v2828_v27 = vadd.f32 %v2827_v16, %v13266_v3  ;;  %v2829_v42 = vpop.f32.mrb[203].mxu1 }
 0x2b6   : > { %v13879_v20 = vpack.c.bf16 %v4189_v31, %v4188_v14  ;;  %v3491_v19 = vmax.f32 %v2826_v39, 0.0  ;;  %v2830_v26 = vadd.f32 %v2829_v42, %v13268_v59 }
 0x2b7   : > { %v3494_v49 = vmax.f32 %v2828_v27, 0.0  ;;  %9880 = vmatmul.mubr.msk.bf16.gmra.mrb[52].mxu1 %vm1536_vm1, %v12174_v32 }
 0x2b8   : > { %v4046_v9 = vmax.f32 %v3490_v63, %v3491_v19  ;;  %v3495_v33 = vmax.f32 %v2830_v26, 0.0  ;;  %4980 = vmatprep.mubr.bf16.mxu0 %v13879_v20  ;;  %3101 = vmatprep.mubr.bf16.mxu1 %v16954_v25  ;;  %v12175_v19 = vld [vmem:[%s12470_s30 + $0x1b8] sm:$0xff]  }
 0x2b9   : > { %4981 = vmatmul.mubr.bf16.gmra.mrb[20].mxu0 %v13852_v22 }
 0x2ba   : > { %v4190_v48 = vmax.f32 %v13384_v15, %v4046_v9  ;;  %v4047_v51 = vmax.f32 %v3494_v49, %v3495_v33  ;;  %v2833_v56 = vpop.f32.mrb[204].mxu1 }
 0x2bb   : > { %v2834_v14 = vadd.f32 %v2833_v56, %v13266_v3  ;;  %v2835_v37 = vpop.f32.mrb[205].mxu1 }
 0x2bc   : > { %v4191_v62 = vmax.f32 %v13390_v38, %v4047_v51  ;;  %v2836_v41 = vadd.f32 %v2835_v37, %v13268_v59  ;;  %v2837_v11 = vpop.f32.mrb[206].mxu1 }
 0x2bd   : > { %v3498_v15 = vmax.f32 %v2834_v14, 0.0  ;;  %v2838_v31 = vadd.f32 %v2837_v11, %v13266_v3  ;;  %v2839_v39 = vpop.f32.mrb[207].mxu1 }
 0x2be   : > { %v13898_v16 = vpack.c.bf16 %v4191_v62, %v4190_v48  ;;  %v3499_v63 = vmax.f32 %v2836_v41, 0.0  ;;  %v2840_v27 = vadd.f32 %v2839_v39, %v13268_v59 }
 0x2bf   : > { %v3502_v42 = vmax.f32 %v2838_v31, 0.0  ;;  %9881 = vmatmul.mubr.msk.bf16.gmra.mrb[56].mxu1 %vm1536_vm1, %v12175_v19 }
 0x2c0   : > { %v4048_v26 = vmax.f32 %v3498_v15, %v3499_v63  ;;  %v3503_v38 = vmax.f32 %v2840_v27, 0.0  ;;  %4990 = vmatprep.mubr.bf16.mxu0 %v13898_v16  ;;  %3111 = vmatprep.mubr.bf16.mxu1 %v16954_v25  ;;  %v12176_v15 = vld [vmem:[%s12470_s30 + $0x1c0] sm:$0xff]  }
 0x2c1   : > { %4991 = vmatmul.mubr.bf16.gmra.mrb[24].mxu0 %v13868_v36 }
 0x2c2   : > { %v4192_v49 = vmax.f32 %v13405_v12, %v4048_v26  ;;  %v4049_v32 = vmax.f32 %v3502_v42, %v3503_v38  ;;  %v2843_v9 = vpop.f32.mrb[208].mxu1 }
 0x2c3   : > { %v2844_v33 = vadd.f32 %v2843_v9, %v13266_v3  ;;  %v2845_v48 = vpop.f32.mrb[209].mxu1 }
 0x2c4   : > { %v4193_v51 = vmax.f32 %v13417_v47, %v4049_v32  ;;  %v2846_v56 = vadd.f32 %v2845_v48, %v13268_v59  ;;  %v2847_v40 = vpop.f32.mrb[210].mxu1 }
 0x2c5   : > { %v3506_v10 = vmax.f32 %v2844_v33, 0.0  ;;  %v2848_v14 = vadd.f32 %v2847_v40, %v13266_v3  ;;  %v2849_v37 = vpop.f32.mrb[211].mxu1  ;;  %v12177_v40 = vld [vmem:[%s12470_s30 + $0x1c8] sm:$0xff]  }
 0x2c6   : > { %v13911_v62 = vpack.c.bf16 %v4193_v51, %v4192_v49  ;;  %v3507_v41 = vmax.f32 %v2846_v56, 0.0  ;;  %v2850_v11 = vadd.f32 %v2849_v37, %v13268_v59 }
 0x2c7   : > { %v3510_v12 = vmax.f32 %v2848_v14, 0.0  ;;  %9882 = vmatmul.mubr.msk.bf16.gmra.mrb[60].mxu1 %vm1536_vm1, %v12176_v15 }
 0x2c8   : > { %v4050_v31 = vmax.f32 %v3506_v10, %v3507_v41  ;;  %v3511_v39 = vmax.f32 %v2850_v11, 0.0  ;;  %5000 = vmatprep.mubr.bf16.mxu0 %v13911_v62  ;;  %3121 = vmatprep.mubr.bf16.mxu1 %v16954_v25  ;;  %v11997_v11 = vld [vmem:[%s16604_s3 + $0x1b0] ss:$8 sps:$4 sm:$0xff]  }
 0x2c9   : > { %5001 = vmatmul.mubr.bf16.gmra.mrb[28].mxu0 %v13879_v20 }
 0x2ca   : > { %v4194_v47 = vmax.f32 %v13432_v28, %v4050_v31  ;;  %v4051_v63 = vmax.f32 %v3510_v12, %v3511_v39  ;;  %v2853_v27 = vpop.f32.mrb[212].mxu1  ;;  %v11999_v12 = vld [vmem:[%s16604_s3 + $0x1b4] ss:$8 sps:$4 sm:$0xff]  }
 0x2cb   : > { %v2854_v42 = vadd.f32 %v2853_v27, %v13266_v3  ;;  %v2855_v19 = vpop.f32.mrb[213].mxu1  ;;  %5303 = vmatprep.subr.bf16.mxu0 %v11999_v12 }
 0x2cc   : > { %v4195_v26 = vmax.f32 %v13438_v58, %v4051_v63  ;;  %v2856_v38 = vadd.f32 %v2855_v19, %v13268_v59  ;;  %v2857_v49 = vpop.f32.mrb[214].mxu1  ;;  %5304 = vmatpush1.bf16.msra.mxu0 %v11997_v11 }
 0x2cd   : > { %v3514_v32 = vmax.f32 %v2854_v42, 0.0  ;;  %v2858_v9 = vadd.f32 %v2857_v49, %v13266_v3  ;;  %v2859_v33 = vpop.f32.mrb[215].mxu1 }
 0x2ce   : > { %v13924_v48 = vpack.c.bf16 %v4195_v26, %v4194_v47  ;;  %v3515_v51 = vmax.f32 %v2856_v38, 0.0  ;;  %v2860_v56 = vadd.f32 %v2859_v33, %v13268_v59 }
 0x2cf   : > { %v3518_v28 = vmax.f32 %v2858_v9, 0.0  ;;  %9883 = vmatmul.mubr.msk.bf16.gmra.mrb[64].mxu1 %vm1536_vm1, %v12177_v40 }
 0x2d0   : > { %v4052_v10 = vmax.f32 %v3514_v32, %v3515_v51  ;;  %v3519_v14 = vmax.f32 %v2860_v56, 0.0  ;;  %5010 = vmatprep.mubr.bf16.mxu0 %v13924_v48  ;;  %3131 = vmatprep.mubr.bf16.mxu1 %v16954_v25  ;;  %v12178_v32 = vld [vmem:[%s12470_s30 + $0x1d0] sm:$0xff]  }
 0x2d1   : > { %5011 = vmatmul.mubr.bf16.gmra.mrb[32].mxu0 %v13898_v16 }
 0x2d2   : > { %v4196_v58 = vmax.f32 %v13453_v61, %v4052_v10  ;;  %v4053_v37 = vmax.f32 %v3518_v28, %v3519_v14  ;;  %v2863_v41 = vpop.f32.mrb[216].mxu1 }
 0x2d3   : > { %v2864_v15 = vadd.f32 %v2863_v41, %v13266_v3  ;;  %v2865_v31 = vpop.f32.mrb[217].mxu1 }
 0x2d4   : > { %v4197_v39 = vmax.f32 %v13459_v60, %v4053_v37  ;;  %v2866_v47 = vadd.f32 %v2865_v31, %v13268_v59  ;;  %v2867_v63 = vpop.f32.mrb[218].mxu1 }
 0x2d5   : > { %v3522_v61 = vmax.f32 %v2864_v15, 0.0  ;;  %v2868_v27 = vadd.f32 %v2867_v63, %v13266_v3  ;;  %v2869_v42 = vpop.f32.mrb[219].mxu1 }
 0x2d6   : > { %v13943_v19 = vpack.c.bf16 %v4197_v39, %v4196_v58  ;;  %v3523_v26 = vmax.f32 %v2866_v47, 0.0  ;;  %v2870_v38 = vadd.f32 %v2869_v42, %v13268_v59  ;;  %v12179_v39 = vld [vmem:[%s12470_s30 + $0x1d8] sm:$0xff]  }
 0x2d7   : > { %v3526_v49 = vmax.f32 %v2868_v27, 0.0  ;;  %9884 = vmatmul.mubr.msk.bf16.gmra.mrb[68].mxu1 %vm1536_vm1, %v12178_v32 }
 0x2d8   : > { %v4054_v9 = vmax.f32 %v3522_v61, %v3523_v26  ;;  %v3527_v60 = vmax.f32 %v2870_v38, 0.0  ;;  %5020 = vmatprep.mubr.bf16.mxu0 %v13943_v19  ;;  %3141 = vmatprep.mubr.bf16.mxu1 %v16954_v25 }
 0x2d9   : > { %5021 = vmatmul.mubr.bf16.gmra.mrb[36].mxu0 %v13911_v62 }
 0x2da   : > { %v4198_v33 = vmax.f32 %v13474_v52, %v4054_v9  ;;  %v4055_v51 = vmax.f32 %v3526_v49, %v3527_v60  ;;  %v2873_v56 = vpop.f32.mrb[220].mxu1 }
 0x2db   : > { %v2874_v28 = vadd.f32 %v2873_v56, %v13266_v3  ;;  %v2875_v40 = vpop.f32.mrb[221].mxu1 }
 0x2dc   : > { %v4199_v10 = vmax.f32 %v13480_v24, %v4055_v51  ;;  %v2876_v14 = vadd.f32 %v2875_v40, %v13268_v59  ;;  %v2877_v58 = vpop.f32.mrb[222].mxu1  ;;  %v12180_v40 = vld [vmem:[%s12470_s30 + $0x1e0] sm:$0xff]  }
 0x2dd   : > { %v3530_v37 = vmax.f32 %v2874_v28, 0.0  ;;  %v2878_v41 = vadd.f32 %v2877_v58, %v13266_v3  ;;  %v2879_v11 = vpop.f32.mrb[223].mxu1 }
 0x2de   : > { %v13956_v12 = vpack.c.bf16 %v4199_v10, %v4198_v33  ;;  %v3531_v15 = vmax.f32 %v2876_v14, 0.0  ;;  %v2880_v31 = vadd.f32 %v2879_v11, %v13268_v59 }
 0x2df   : > { %v3534_v52 = vmax.f32 %v2878_v41, 0.0  ;;  %9885 = vmatmul.mubr.msk.bf16.gmra.mrb[72].mxu1 %vm1536_vm1, %v12179_v39 }
 0x2e0   : > { %v4056_v47 = vmax.f32 %v3530_v37, %v3531_v15  ;;  %v3535_v63 = vmax.f32 %v2880_v31, 0.0  ;;  %5030 = vmatprep.mubr.bf16.mxu0 %v13956_v12  ;;  %3151 = vmatprep.mubr.bf16.mxu1 %v16954_v25 }
 0x2e1   : > { %5031 = vmatmul.mubr.bf16.gmra.mrb[40].mxu0 %v13924_v48 }
 0x2e2   : > { %v4200_v24 = vmax.f32 %v13501_v30, %v4056_v47  ;;  %v4057_v61 = vmax.f32 %v3534_v52, %v3535_v63  ;;  %v2883_v27 = vpop.f32.mrb[224].mxu1 }
 0x2e3   : > { %v2884_v42 = vadd.f32 %v2883_v27, %v13266_v3  ;;  %v2885_v26 = vpop.f32.mrb[225].mxu1  ;;  %v12000_v27 = vld [vmem:[%s16604_s3 + $0x1c0] ss:$8 sps:$4 sm:$0xff]  }
 0x2e4   : > { %v4201_v38 = vmax.f32 %v13507_v23, %v4057_v61  ;;  %v2886_v49 = vadd.f32 %v2885_v26, %v13268_v59  ;;  %v2887_v32 = vpop.f32.mrb[226].mxu1  ;;  %v12181_v26 = vld [vmem:[%s12470_s30 + $0x1e8] sm:$0xff]  }
 0x2e5   : > { %v3538_v9 = vmax.f32 %v2884_v42, 0.0  ;;  %v2888_v60 = vadd.f32 %v2887_v32, %v13266_v3  ;;  %v2889_v33 = vpop.f32.mrb[227].mxu1 }
 0x2e6   : > { %v13969_v51 = vpack.c.bf16 %v4201_v38, %v4200_v24  ;;  %v3539_v56 = vmax.f32 %v2886_v49, 0.0  ;;  %v2890_v28 = vadd.f32 %v2889_v33, %v13268_v59 }
 0x2e7   : > { %v3542_v30 = vmax.f32 %v2888_v60, 0.0  ;;  %9886 = vmatmul.mubr.msk.bf16.gmra.mrb[76].mxu1 %vm1536_vm1, %v12180_v40 }
 0x2e8   : > { %v4058_v10 = vmax.f32 %v3538_v9, %v3539_v56  ;;  %v3543_v14 = vmax.f32 %v2890_v28, 0.0  ;;  %5040 = vmatprep.mubr.bf16.mxu0 %v13969_v51  ;;  %3161 = vmatprep.mubr.bf16.mxu1 %v16954_v25 }
 0x2e9   : > { %5041 = vmatmul.mubr.bf16.gmra.mrb[44].mxu0 %v13943_v19 }
 0x2ea   : > { %v4202_v23 = vmax.f32 %v13522_v44, %v4058_v10  ;;  %v4059_v58 = vmax.f32 %v3542_v30, %v3543_v14  ;;  %v2893_v37 = vpop.f32.mrb[228].mxu1 }
 0x2eb   : > { %v2894_v41 = vadd.f32 %v2893_v37, %v13266_v3  ;;  %v2895_v11 = vpop.f32.mrb[229].mxu1 }
 0x2ec   : > { %v4203_v15 = vmax.f32 %v13528_v1, %v4059_v58  ;;  %v2896_v31 = vadd.f32 %v2895_v11, %v13268_v59  ;;  %v2897_v52 = vpop.f32.mrb[230].mxu1  ;;  %v12002_v1 = vld [vmem:[%s16604_s3 + $0x1c4] ss:$8 sps:$4 sm:$0xff]   ;;  %v12182_v11 = vld [vmem:[%s12470_s30 + $0x1f0] sm:$0xff]  }
 0x2ed   : > { %v3546_v39 = vmax.f32 %v2894_v41, 0.0  ;;  %v2898_v47 = vadd.f32 %v2897_v52, %v13266_v3  ;;  %v2899_v63 = vpop.f32.mrb[231].mxu1  ;;  %5305 = vmatprep.subr.bf16.mxu0 %v12002_v1 }
 0x2ee   : > { %v13982_v24 = vpack.c.bf16 %v4203_v15, %v4202_v23  ;;  %v3547_v61 = vmax.f32 %v2896_v31, 0.0  ;;  %v2900_v44 = vadd.f32 %v2899_v63, %v13268_v59  ;;  %5306 = vmatpush1.bf16.msra.mxu0 %v12000_v27 }
 0x2ef   : > { %v3550_v42 = vmax.f32 %v2898_v47, 0.0  ;;  %9887 = vmatmul.mubr.msk.bf16.gmra.mrb[80].mxu1 %vm1536_vm1, %v12181_v26 }
 0x2f0   : > { %v4060_v38 = vmax.f32 %v3546_v39, %v3547_v61  ;;  %v3551_v49 = vmax.f32 %v2900_v44, 0.0  ;;  %5050 = vmatprep.mubr.bf16.mxu0 %v13982_v24  ;;  %3171 = vmatprep.mubr.bf16.mxu1 %v16954_v25 }
 0x2f1   : > { %5051 = vmatmul.mubr.bf16.gmra.mrb[48].mxu0 %v13956_v12 }
 0x2f2   : > { %v4204_v32 = vmax.f32 %v13540_v46, %v4060_v38  ;;  %v4061_v9 = vmax.f32 %v3550_v42, %v3551_v49  ;;  %v2903_v60 = vpop.f32.mrb[232].mxu1 }
 0x2f3   : > { %v2904_v33 = vadd.f32 %v2903_v60, %v13266_v3  ;;  %v2905_v56 = vpop.f32.mrb[233].mxu1 }
 0x2f4   : > { %v4205_v28 = vmax.f32 %v13546_v17, %v4061_v9  ;;  %v2906_v30 = vadd.f32 %v2905_v56, %v13268_v59  ;;  %v2907_v40 = vpop.f32.mrb[234].mxu1  ;;  %v12183_v9 = vld [vmem:[%s12470_s30 + $0x1f8] sm:$0xff]  }
 0x2f5   : > { %v3554_v10 = vmax.f32 %v2904_v33, 0.0  ;;  %v2908_v14 = vadd.f32 %v2907_v40, %v13266_v3  ;;  %v2909_v23 = vpop.f32.mrb[235].mxu1 }
 0x2f6   : > { %v3555_v58 = vmax.f32 %v2906_v30, 0.0  ;;  %v2910_v37 = vadd.f32 %v2909_v23, %v13268_v59  ;;  %v14002_v46 = vpack.c.bf16 %v4205_v28, %v4204_v32 }
 0x2f7   : > { %v3558_v41 = vmax.f32 %v2908_v14, 0.0  ;;  %9888 = vmatmul.mubr.msk.bf16.gmra.mrb[84].mxu1 %vm1536_vm1, %v12182_v11 }
 0x2f8   : > { %v4062_v15 = vmax.f32 %v3554_v10, %v3555_v58  ;;  %v3559_v31 = vmax.f32 %v2910_v37, 0.0  ;;  %5060 = vmatprep.mubr.bf16.mxu0 %v14002_v46  ;;  %3181 = vmatprep.mubr.bf16.mxu1 %v16954_v25 }
 0x2f9   : > { %5061 = vmatmul.mubr.bf16.gmra.mrb[52].mxu0 %v13969_v51 }
 0x2fa   : > { %v4206_v17 = vmax.f32 %v13564_v13, %v4062_v15  ;;  %v4063_v52 = vmax.f32 %v3558_v41, %v3559_v31  ;;  %v2913_v39 = vpop.f32.mrb[236].mxu1  ;;  %v12003_v31 = vld [vmem:[%s16604_s3 + $0x1d0] ss:$8 sps:$4 sm:$0xff]  }
 0x2fb   : > { %v2914_v47 = vadd.f32 %v2913_v39, %v13266_v3  ;;  %v2915_v63 = vpop.f32.mrb[237].mxu1 }
 0x2fc   : > { %v4207_v61 = vmax.f32 %v13569_v50, %v4063_v52  ;;  %v2916_v44 = vadd.f32 %v2915_v63, %v13268_v59  ;;  %v2917_v27 = vpop.f32.mrb[238].mxu1  ;;  %v12184_v52 = vld [vmem:[%s12470_s30 + $0x200] sm:$0xff]  }
 0x2fd   : > { %v3562_v1 = vmax.f32 %v2914_v47, 0.0  ;;  %v2918_v42 = vadd.f32 %v2917_v27, %v13266_v3  ;;  %v2919_v26 = vpop.f32.mrb[239].mxu1 }
 0x2fe   : > { %v3563_v38 = vmax.f32 %v2916_v44, 0.0  ;;  %v2920_v49 = vadd.f32 %v2919_v26, %v13268_v59  ;;  %v14015_v32 = vpack.c.bf16 %v4207_v61, %v4206_v17 }
 0x2ff   : > { %v3566_v13 = vmax.f32 %v2918_v42, 0.0  ;;  %9889 = vmatmul.mubr.msk.bf16.gmra.mrb[88].mxu1 %vm1536_vm1, %v12183_v9 }
 0x300   : > { %v4064_v60 = vmax.f32 %v3562_v1, %v3563_v38  ;;  %v3567_v33 = vmax.f32 %v2920_v49, 0.0  ;;  %5070 = vmatprep.mubr.bf16.mxu0 %v14015_v32  ;;  %3191 = vmatprep.mubr.bf16.mxu1 %v16954_v25 }
 0x301   : > { %5071 = vmatmul.mubr.bf16.gmra.mrb[56].mxu0 %v13982_v24 }
 0x302   : > { %v4208_v50 = vmax.f32 %v13584_v34, %v4064_v60  ;;  %v4065_v56 = vmax.f32 %v3566_v13, %v3567_v33  ;;  %v2923_v28 = vpop.f32.mrb[240].mxu1 }
 0x303   : > { %v2924_v30 = vadd.f32 %v2923_v28, %v13266_v3  ;;  %v2925_v40 = vpop.f32.mrb[241].mxu1 }
 0x304   : > { %v4209_v10 = vmax.f32 %v13588_v7, %v4065_v56  ;;  %v2926_v14 = vadd.f32 %v2925_v40, %v13268_v59  ;;  %v2927_v23 = vpop.f32.mrb[242].mxu1  ;;  %v12005_v7 = vld [vmem:[%s16604_s3 + $0x1d4] ss:$8 sps:$4 sm:$0xff]   ;;  %v12185_v56 = vld [vmem:[%s12470_s30 + $0x208] sm:$0xff]  }
 0x305   : > { %v3570_v58 = vmax.f32 %v2924_v30, 0.0  ;;  %v2928_v37 = vadd.f32 %v2927_v23, %v13266_v3  ;;  %v2929_v41 = vpop.f32.mrb[243].mxu1  ;;  %5307 = vmatprep.subr.bf16.mxu0 %v12005_v7 }
 0x306   : > { %v14027_v11 = vpack.c.bf16 %v4209_v10, %v4208_v50  ;;  %v3571_v15 = vmax.f32 %v2926_v14, 0.0  ;;  %v2930_v34 = vadd.f32 %v2929_v41, %v13268_v59  ;;  %5308 = vmatpush1.bf16.msra.mxu0 %v12003_v31  ;;  %v12006_v14 = vld [vmem:[%s16606_s5 + $0x28] sm:$0xff]  }
 0x307   : > { %v3574_v17 = vmax.f32 %v2928_v37, 0.0  ;;  %9890 = vmatmul.mubr.msk.bf16.gmra.mrb[92].mxu1 %vm1536_vm1, %v12184_v52  ;;  %10479 = vmatprep.subr.bf16.mxu1 %v12006_v14 }
 0x308   : > { %v4066_v39 = vmax.f32 %v3570_v58, %v3571_v15  ;;  %v3575_v47 = vmax.f32 %v2930_v34, 0.0  ;;  %3201 = vmatprep.mubr.bf16.mxu1 %v16954_v25  ;;  %10480 = vmatpush3.bf16.msra.mxu1 %v12006_v14 }
 0x30a   : > { %v4210_v63 = vmax.f32 %v13603_v8, %v4066_v39  ;;  %v4067_v61 = vmax.f32 %v3574_v17, %v3575_v47  ;;  %v2933_v44 = vpop.f32.mrb[244].mxu1  ;;  %v12186_v47 = vld [vmem:[%s12470_s30 + $0x210] sm:$0xff]  }
 0x30b   : > { %v2934_v27 = vadd.f32 %v2933_v44, %v13266_v3  ;;  %v2935_v1 = vpop.f32.mrb[245].mxu1 }
 0x30c   : > { %v4211_v42 = vmax.f32 %v13607_v45, %v4067_v61  ;;  %v2936_v26 = vadd.f32 %v2935_v1, %v13268_v59  ;;  %v2937_v38 = vpop.f32.mrb[246].mxu1 }
 0x30d   : > { %v3578_v49 = vmax.f32 %v2934_v27, 0.0  ;;  %v2938_v13 = vadd.f32 %v2937_v38, %v13266_v3  ;;  %v2939_v9 = vpop.f32.mrb[247].mxu1 }
 0x30e   : > { %v14044_v60 = vpack.c.bf16 %v4211_v42, %v4210_v63  ;;  %v3579_v33 = vmax.f32 %v2936_v26, 0.0  ;;  %v2940_v50 = vadd.f32 %v2939_v9, %v13268_v59 }
 0x30f   : > { %v3582_v8 = vmax.f32 %v2938_v13, 0.0  ;;  %9891 = vmatmul.mubr.msk.bf16.gmra.mrb[96].mxu1 %vm1536_vm1, %v12185_v56  ;;  %v12007_v56 = vld [vmem:[%s16604_s3 + $0x1e0] ss:$8 sps:$4 sm:$0xff]  }
 0x310   : > { %v4068_v28 = vmax.f32 %v3578_v49, %v3579_v33  ;;  %v3583_v30 = vmax.f32 %v2940_v50, 0.0  ;;  %3211 = vmatprep.mubr.bf16.mxu1 %v16954_v25 }
 0x312   : > { %v4212_v45 = vmax.f32 %v13629_v0, %v4068_v28  ;;  %v4069_v40 = vmax.f32 %v3582_v8, %v3583_v30  ;;  %v2943_v10 = vpop.f32.mrb[248].mxu1  ;;  %v12187_v30 = vld [vmem:[%s12470_s30 + $0x218] sm:$0xff]  }
 0x313   : > { %v2944_v23 = vadd.f32 %v2943_v10, %v13266_v3  ;;  %v2945_v58 = vpop.f32.mrb[249].mxu1 }
 0x314   : > { %v4213_v37 = vmax.f32 %v13634_v35, %v4069_v40  ;;  %v2946_v41 = vadd.f32 %v2945_v58, %v13268_v59  ;;  %v2947_v15 = vpop.f32.mrb[250].mxu1 }
 0x315   : > { %v3586_v34 = vmax.f32 %v2944_v23, 0.0  ;;  %v2948_v31 = vadd.f32 %v2947_v15, %v13266_v3  ;;  %v2949_v0 = vpop.f32.mrb[251].mxu1 }
 0x316   : > { %v14058_v7 = vpack.c.bf16 %v4213_v37, %v4212_v45  ;;  %v3587_v17 = vmax.f32 %v2946_v41, 0.0  ;;  %v2950_v52 = vadd.f32 %v2949_v0, %v13268_v59 }
 0x317   : > { %v3590_v39 = vmax.f32 %v2948_v31, 0.0  ;;  %9892 = vmatmul.mubr.msk.bf16.gmra.mrb[100].mxu1 %vm1536_vm1, %v12186_v47 }
 0x318   : > { %v4070_v63 = vmax.f32 %v3586_v34, %v3587_v17  ;;  %v3591_v35 = vmax.f32 %v2950_v52, 0.0  ;;  %5080 = vmatprep.mubr.bf16.mxu0 %v14058_v7  ;;  %3221 = vmatprep.mubr.bf16.mxu1 %v16954_v25 }
 0x319   : > { %5081 = vmatmul.mubr.bf16.gmra.mrb[60].mxu0 %v14027_v11 }
 0x31a   : > { %v4214_v61 = vmax.f32 %v13650_v5, %v4070_v63  ;;  %v4071_v44 = vmax.f32 %v3590_v39, %v3591_v35  ;;  %v2953_v27 = vpop.f32.mrb[252].mxu1  ;;  %v12188_v63 = vld [vmem:[%s12470_s30 + $0x220] sm:$0xff]  }
 0x31b   : > { %v2954_v1 = vadd.f32 %v2953_v27, %v13266_v3  ;;  %v2955_v42 = vpop.f32.mrb[253].mxu1 }
 0x31c   : > { %v4215_v26 = vmax.f32 %v13655_v43, %v4071_v44  ;;  %v2956_v38 = vadd.f32 %v2955_v42, %v13268_v59  ;;  %v2957_v49 = vpop.f32.mrb[254].mxu1  ;;  %v12009_v43 = vld [vmem:[%s16604_s3 + $0x1e4] ss:$8 sps:$4 sm:$0xff]  }
 0x31d   : > { %v3594_v13 = vmax.f32 %v2954_v1, 0.0  ;;  %v2958_v9 = vadd.f32 %v2957_v49, %v13266_v3  ;;  %v2959_v33 = vpop.f32.mrb[255].mxu1  ;;  %5309 = vmatprep.subr.bf16.mxu0 %v12009_v43  ;;  %v12189_v43 = vld [vmem:[%s12470_s30 + $0x228] sm:$0xff]  }
 0x31e   : > { %v14071_v50 = vpack.c.bf16 %v4215_v26, %v4214_v61  ;;  %v3595_v8 = vmax.f32 %v2956_v38, 0.0  ;;  %v2960_v5 = vadd.f32 %v2959_v33, %v13268_v59  ;;  %5310 = vmatpush1.bf16.msra.mxu0 %v12007_v56 }
 0x31f   : > { %v3598_v28 = vmax.f32 %v2958_v9, 0.0  ;;  %9893 = vmatmul.mubr.msk.bf16.gmra.mrb[104].mxu1 %vm1536_vm1, %v12187_v30 }
 0x320   : > { %v4072_v45 = vmax.f32 %v3594_v13, %v3595_v8  ;;  %v3599_v40 = vmax.f32 %v2960_v5, 0.0  ;;  %5090 = vmatprep.mubr.bf16.mxu0 %v14071_v50  ;;  %3231 = vmatprep.mubr.bf16.mxu1 %v16954_v25 }
 0x321   : > { %5091 = vmatmul.mubr.bf16.gmra.mrb[64].mxu0 %v14044_v60 }
 0x322   : > { %v4216_v10 = vmax.f32 %v13671_v18, %v4072_v45  ;;  %v4073_v14 = vmax.f32 %v3598_v28, %v3599_v40  ;;  %v2963_v23 = vpop.f32.mrb[0].mxu1 }
 0x323   : > { %v2964_v58 = vadd.f32 %v2963_v23, %v13266_v3  ;;  %v2965_v37 = vpop.f32.mrb[1].mxu1  ;;  %v17024_v23 = vld [vmem:[#allocation43_spill] sm:$0xff] }
 0x324   : > { %v4217_v41 = vmax.f32 %v13676_v53, %v4073_v14  ;;  %v2966_v15 = vadd.f32 %v2965_v37, %v13268_v59  ;;  %v2967_v34 = vpop.f32.mrb[2].mxu1 }
 0x325   : > { %v3602_v31 = vmax.f32 %v2964_v58, 0.0  ;;  %v2968_v0 = vadd.f32 %v2967_v34, %v13266_v3  ;;  %v2969_v17 = vpop.f32.mrb[3].mxu1  ;;  %v12012_v34 = vld [vmem:[%s16604_s3 + $0x1f4] ss:$8 sps:$4 sm:$0xff]  }
 0x326   : > { %v14090_v52 = vpack.c.bf16 %v4217_v41, %v4216_v10  ;;  %v3603_v39 = vmax.f32 %v2966_v15, 0.0  ;;  %v2970_v18 = vadd.f32 %v2969_v17, %v13268_v59  ;;  %v12010_v15 = vld [vmem:[%s16604_s3 + $0x1f0] ss:$8 sps:$4 sm:$0xff]   ;;  %5311 = vmatprep.subr.bf16.mxu0 %v12012_v34 }
 0x327   : > { %v3606_v47 = vmax.f32 %v2968_v0, 0.0  ;;  %9894 = vmatmul.mubr.msk.bf16.gmra.mrb[108].mxu1 %vm1536_vm1, %v12188_v63  ;;  %v12190_v63 = vld [vmem:[%s12470_s30 + $0x230] sm:$0xff]   ;;  %5312 = vmatpush1.bf16.msra.mxu0 %v12010_v15 }
 0x328   : > { %v4074_v35 = vmax.f32 %v3602_v31, %v3603_v39  ;;  %v3607_v61 = vmax.f32 %v2970_v18, 0.0  ;;  %5100 = vmatprep.mubr.bf16.mxu0 %v14090_v52  ;;  %3241 = vmatprep.mubr.bf16.mxu1 %v16954_v25 }
 0x329   : > { %5101 = vmatmul.mubr.bf16.gmra.mrb[68].mxu0 %v14058_v7 }
 0x32a   : > { %v4218_v53 = vmax.f32 %v13698_v21, %v4074_v35  ;;  %v4075_v44 = vmax.f32 %v3606_v47, %v3607_v61  ;;  %v2973_v27 = vpop.f32.mrb[4].mxu1 }
 0x32b   : > { %v2974_v1 = vadd.f32 %v2973_v27, %v13266_v3  ;;  %v2975_v42 = vpop.f32.mrb[5].mxu1 }
 0x32c   : > { %v4219_v26 = vmax.f32 %v13703_v29, %v4075_v44  ;;  %v2976_v38 = vadd.f32 %v2975_v42, %v13268_v59  ;;  %v2977_v49 = vpop.f32.mrb[6].mxu1 }
 0x32d   : > { %v3610_v13 = vmax.f32 %v2974_v1, 0.0  ;;  %v2978_v9 = vadd.f32 %v2977_v49, %v13266_v3  ;;  %v2979_v33 = vpop.f32.mrb[7].mxu1 }
 0x32e   : > { %v14103_v8 = vpack.c.bf16 %v4219_v26, %v4218_v53  ;;  %v3611_v5 = vmax.f32 %v2976_v38, 0.0  ;;  %v2980_v56 = vadd.f32 %v2979_v33, %v13268_v59  ;;  %v17025_v53 = vld [vmem:[#allocation69_spill] sm:$0xff]  ;;  %v17026_v38 = vld [vmem:[#allocation47_spill] sm:$0xff] }
 0x32f   : > { %v3614_v21 = vmax.f32 %v2978_v9, 0.0  ;;  %9895 = vmatmul.mubr.msk.bf16.gmra.mrb[112].mxu1 %vm1536_vm1, %v12189_v43 }
 0x330   : > { %v4076_v28 = vmax.f32 %v3610_v13, %v3611_v5  ;;  %v3615_v30 = vmax.f32 %v2980_v56, 0.0  ;;  %5110 = vmatprep.mubr.bf16.mxu0 %v14103_v8  ;;  %3251 = vmatprep.mubr.bf16.mxu1 %v16954_v25 }
 0x331   : > { %5111 = vmatmul.mubr.bf16.gmra.mrb[72].mxu0 %v14071_v50 }
 0x332   : > { %v4220_v29 = vmax.f32 %v13719_v55, %v4076_v28  ;;  %v4077_v45 = vmax.f32 %v3614_v21, %v3615_v30  ;;  %v2983_v40 = vpop.f32.mrb[8].mxu1  ;;  %v12191_v30 = vld [vmem:[%s12470_s30 + $0x238] sm:$0xff]   ;;  %s9666_s30 = sshll.u32 %s9659_s12, 2 }
 0x333   : > { %v2984_v10 = vadd.f32 %v2983_v40, %v13266_v3  ;;  %v2985_v14 = vpop.f32.mrb[9].mxu1  ;;  %v17027_v40 = vld [vmem:[#allocation70_spill] sm:$0xff]  ;;  %p944_p8 = scmp.lt.s32.totalorder %s9666_s30, 7 }
 0x334   : > { %v4221_v58 = vmax.f32 %v17024_v23, %v4077_v45  ;;  %v2986_v37 = vadd.f32 %v2985_v14, %v13268_v59  ;;  %v2987_v41 = vpop.f32.mrb[10].mxu1 }
 0x335   : > { %v3618_v55 = vmax.f32 %v2984_v10, 0.0  ;;  %v2988_v31 = vadd.f32 %v2987_v41, %v13266_v3  ;;  %v2989_v0 = vpop.f32.mrb[11].mxu1  ;;  %v17028_v41 = vld [vmem:[#allocation51_spill] sm:$0xff]  ;;  %s17490_s30 = smov (!%p944_p8, %s9666_s30), 7 }
 0x336   : > { %v14122_v17 = vpack.c.bf16 %v4221_v58, %v4220_v29  ;;  %v3619_v39 = vmax.f32 %v2986_v37, 0.0  ;;  %v2990_v18 = vadd.f32 %v2989_v0, %v13268_v59  ;;  %s9667_s17 = sshll.u32 %s17490_s30, 3 }
 0x337   : > { %v3622_v47 = vmax.f32 %v2988_v31, 0.0  ;;  %9896 = vmatmul.mubr.msk.bf16.gmra.mrb[116].mxu1 %vm1536_vm1, %v12190_v63  ;;  %s947_s23 = scalar_lea.vmem %s16610_s9, %s9667_s17 }
 0x338   : > { %v4078_v35 = vmax.f32 %v3618_v55, %v3619_v39  ;;  %v3623_v61 = vmax.f32 %v2990_v18, 0.0  ;;  %5120 = vmatprep.mubr.bf16.mxu0 %v14122_v17  ;;  %3261 = vmatprep.mubr.bf16.mxu1 %v16954_v25 }
 0x339   : > { %5121 = vmatmul.mubr.bf16.gmra.mrb[76].mxu0 %v14090_v52 }
 0x33a   : > { %v4222_v44 = vmax.f32 %v17025_v53, %v4078_v35  ;;  %v4079_v27 = vmax.f32 %v3622_v47, %v3623_v61  ;;  %v2993_v1 = vpop.f32.mrb[12].mxu1 }
 0x33b   : > { %v2994_v42 = vadd.f32 %v2993_v1, %v13266_v3  ;;  %v2995_v26 = vpop.f32.mrb[13].mxu1 }
 0x33c   : > { %v4223_v49 = vmax.f32 %v17026_v38, %v4079_v27  ;;  %v2996_v13 = vadd.f32 %v2995_v26, %v13268_v59  ;;  %v2997_v9 = vpop.f32.mrb[14].mxu1 }
 0x33d   : > { %v3626_v33 = vmax.f32 %v2994_v42, 0.0  ;;  %v2998_v5 = vadd.f32 %v2997_v9, %v13266_v3  ;;  %v2999_v56 = vpop.f32.mrb[15].mxu1 }
 0x33e   : > { %v14135_v25 = vpack.c.bf16 %v4223_v49, %v4222_v44  ;;  %v3627_v21 = vmax.f32 %v2996_v13, 0.0  ;;  %v3000_v43 = vadd.f32 %v2999_v56, %v13268_v59  ;;  %v17029_v44 = vld [vmem:[#allocation71_spill] sm:$0xff] }
 0x33f   : > { %v3630_v28 = vmax.f32 %v2998_v5, 0.0  ;;  %9897 = vmatmul.mubr.msk.bf16.gmra.mrb[120].mxu1 %vm1536_vm1, %v12191_v30  ;;  %v17030_v49 = vld [vmem:[#allocation55_spill] sm:$0xff] }
 0x340   : > { %v4080_v29 = vmax.f32 %v3626_v33, %v3627_v21  ;;  %v3631_v45 = vmax.f32 %v3000_v43, 0.0  ;;  %5130 = vmatprep.mubr.bf16.mxu0 %v14135_v25 }
 0x341   : > { %5131 = vmatmul.mubr.bf16.gmra.mrb[80].mxu0 %v14103_v8 }
 0x342   : > { %v4224_v10 = vmax.f32 %v17027_v40, %v4080_v29  ;;  %v4081_v14 = vmax.f32 %v3630_v28, %v3631_v45  ;;  %v3003_v23 = vpop.f32.mrb[16].mxu1 }
 0x343   : > { %v3004_v58 = vadd.f32 %v3003_v23, %v13266_v3  ;;  %v3005_v37 = vpop.f32.mrb[17].mxu1 }
 0x344   : > { %v4225_v15 = vmax.f32 %v17028_v41, %v4081_v14  ;;  %v3006_v34 = vadd.f32 %v3005_v37, %v13268_v59  ;;  %v3007_v55 = vpop.f32.mrb[18].mxu1 }
 0x345   : > { %v3634_v31 = vmax.f32 %v3004_v58, 0.0  ;;  %v3008_v0 = vadd.f32 %v3007_v55, %v13266_v3  ;;  %v3009_v39 = vpop.f32.mrb[19].mxu1 }
 0x346   : > { %v14147_v18 = vpack.c.bf16 %v4225_v15, %v4224_v10  ;;  %v3635_v47 = vmax.f32 %v3006_v34, 0.0  ;;  %v3010_v63 = vadd.f32 %v3009_v39, %v13268_v59 }
 0x347   : > { %v3638_v35 = vmax.f32 %v3008_v0, 0.0 }
 0x348   : > { %v4082_v61 = vmax.f32 %v3634_v31, %v3635_v47  ;;  %v3639_v53 = vmax.f32 %v3010_v63, 0.0  ;;  %5140 = vmatprep.mubr.bf16.mxu0 %v14147_v18 }
 0x349   : > { %5141 = vmatmul.mubr.bf16.gmra.mrb[84].mxu0 %v14122_v17 }
 0x34a   : > { %v4226_v27 = vmax.f32 %v17029_v44, %v4082_v61  ;;  %v4083_v1 = vmax.f32 %v3638_v35, %v3639_v53  ;;  %v3013_v42 = vpop.f32.mrb[20].mxu1 }
 0x34b   : > { %v3014_v26 = vadd.f32 %v3013_v42, %v13266_v3  ;;  %v3015_v38 = vpop.f32.mrb[21].mxu1  ;;  %v17031_v42 = vld [vmem:[#allocation59_spill] sm:$0xff] }
 0x34c   : > { %v4227_v13 = vmax.f32 %v17030_v49, %v4083_v1  ;;  %v3016_v9 = vadd.f32 %v3015_v38, %v13268_v59  ;;  %v3017_v33 = vpop.f32.mrb[22].mxu1 }
 0x34d   : > { %v3642_v5 = vmax.f32 %v3014_v26, 0.0  ;;  %v3018_v56 = vadd.f32 %v3017_v33, %v13266_v3  ;;  %v3019_v21 = vpop.f32.mrb[23].mxu1 }
 0x34e   : > { %v14157_v43 = vpack.c.bf16 %v4227_v13, %v4226_v27  ;;  %v3643_v28 = vmax.f32 %v3016_v9, 0.0  ;;  %v3020_v30 = vadd.f32 %v3019_v21, %v13268_v59 }
 0x34f   : > { %v3646_v29 = vmax.f32 %v3018_v56, 0.0 }
 0x350   : > { %v4084_v45 = vmax.f32 %v3642_v5, %v3643_v28  ;;  %v3647_v40 = vmax.f32 %v3020_v30, 0.0  ;;  %5150 = vmatprep.mubr.bf16.mxu0 %v14157_v43 }
 0x351   : > { %5151 = vmatmul.mubr.bf16.gmra.mrb[88].mxu0 %v14135_v25 }
 0x352   : > { %v4228_v10 = vmax.f32 %v13812_v4, %v4084_v45  ;;  %v4085_v14 = vmax.f32 %v3646_v29, %v3647_v40  ;;  %v3023_v23 = vpop.f32.mrb[24].mxu1 }
 0x353   : > { %v3024_v58 = vadd.f32 %v3023_v23, %v13266_v3  ;;  %v3025_v37 = vpop.f32.mrb[25].mxu1 }
 0x354   : > { %v4229_v41 = vmax.f32 %v13817_v54, %v4085_v14  ;;  %v3026_v15 = vadd.f32 %v3025_v37, %v13268_v59  ;;  %v3027_v34 = vpop.f32.mrb[26].mxu1 }
 0x355   : > { %v3650_v55 = vmax.f32 %v3024_v58, 0.0  ;;  %v3028_v31 = vadd.f32 %v3027_v34, %v13266_v3  ;;  %v3029_v0 = vpop.f32.mrb[27].mxu1 }
 0x356   : > { %v3651_v39 = vmax.f32 %v3026_v15, 0.0  ;;  %v3030_v47 = vadd.f32 %v3029_v0, %v13268_v59  ;;  %v14168_v63 = vpack.c.bf16 %v4229_v41, %v4228_v10 }
 0x357   : > { %v3654_v4 = vmax.f32 %v3028_v31, 0.0 }
 0x358   : > { %v4086_v35 = vmax.f32 %v3650_v55, %v3651_v39  ;;  %v3655_v61 = vmax.f32 %v3030_v47, 0.0  ;;  %5160 = vmatprep.mubr.bf16.mxu0 %v14168_v63 }
 0x359   : > { %5161 = vmatmul.mubr.bf16.gmra.mrb[92].mxu0 %v14147_v18 }
 0x35a   : > { %v4230_v54 = vmax.f32 %v13839_v2, %v4086_v35  ;;  %v4087_v53 = vmax.f32 %v3654_v4, %v3655_v61  ;;  %v3033_v44 = vpop.f32.mrb[28].mxu1  ;;  %v17032_v4 = vld [vmem:[#allocation4_spill] sm:$0xff] }
 0x35b   : > { %v3034_v27 = vadd.f32 %v3033_v44, %v13266_v3  ;;  %v3035_v1 = vpop.f32.mrb[29].mxu1  ;;  %v17033_v44 = vld [vmem:[#allocation5_spill] sm:$0xff] }
 0x35c   : > { %v4231_v26 = vmax.f32 %v17031_v42, %v4087_v53  ;;  %v3036_v38 = vadd.f32 %v3035_v1, %v13268_v59  ;;  %v3037_v49 = vpop.f32.mrb[30].mxu1 }
 0x35d   : > { %v3658_v13 = vmax.f32 %v3034_v27, 0.0  ;;  %v3038_v9 = vadd.f32 %v3037_v49, %v13266_v3  ;;  %v3039_v33 = vpop.f32.mrb[31].mxu1 }
 0x35e   : > { %v3659_v5 = vmax.f32 %v3036_v38, 0.0  ;;  %v3040_v56 = vadd.f32 %v3039_v33, %v13268_v59  ;;  %v14178_v21 = vpack.c.bf16 %v4231_v26, %v4230_v54 }
 0x35f   : > { %v3662_v2 = vmax.f32 %v3038_v9, 0.0 }
 0x360   : > { %v4088_v28 = vmax.f32 %v3658_v13, %v3659_v5  ;;  %v3663_v30 = vmax.f32 %v3040_v56, 0.0  ;;  %5170 = vmatprep.mubr.bf16.mxu0 %v14178_v21 }
 0x361   : > { %5171 = vmatmul.mubr.bf16.gmra.mrb[96].mxu0 %v14157_v43 }
 0x362   : > { %v4232_v29 = vmax.f32 %v13859_v57, %v4088_v28  ;;  %v4089_v45 = vmax.f32 %v3662_v2, %v3663_v30  ;;  %v3043_v40 = vpop.f32.mrb[32].mxu1  ;;  %v17034_v28 = vld [vmem:[#allocation6_spill] sm:$0xff] }
 0x363   : > { %v3044_v10 = vadd.f32 %v3043_v40, %v13266_v3  ;;  %v3045_v14 = vpop.f32.mrb[33].mxu1 }
 0x364   : > { %v4233_v23 = vmax.f32 %v13863_v6, %v4089_v45  ;;  %v3046_v58 = vadd.f32 %v3045_v14, %v13268_v59  ;;  %v3047_v37 = vpop.f32.mrb[34].mxu1  ;;  %v17035_v14 = vld [vmem:[#allocation7_spill] sm:$0xff] }
 0x365   : > { %v3666_v41 = vmax.f32 %v3044_v10, 0.0  ;;  %v3048_v15 = vadd.f32 %v3047_v37, %v13266_v3  ;;  %v3049_v34 = vpop.f32.mrb[35].mxu1 }
 0x366   : > { %v14187_v55 = vpack.c.bf16 %v4233_v23, %v4232_v29  ;;  %v3667_v31 = vmax.f32 %v3046_v58, 0.0  ;;  %v3050_v0 = vadd.f32 %v3049_v34, %v13268_v59 }
 0x367   : > { %v3670_v57 = vmax.f32 %v3048_v15, 0.0 }
 0x368   : > { %v4090_v39 = vmax.f32 %v3666_v41, %v3667_v31  ;;  %v3671_v47 = vmax.f32 %v3050_v0, 0.0 }
 0x36a   : > { %v4234_v35 = vmax.f32 %v17032_v4, %v4090_v39  ;;  %v4091_v61 = vmax.f32 %v3670_v57, %v3671_v47  ;;  %v3053_v54 = vpop.f32.mrb[36].mxu1 }
 0x36b   : > { %v3054_v6 = vadd.f32 %v3053_v54, %v13266_v3  ;;  %v3055_v53 = vpop.f32.mrb[37].mxu1 }
 0x36c   : > { %v4235_v27 = vmax.f32 %v17033_v44, %v4091_v61  ;;  %v3056_v1 = vadd.f32 %v3055_v53, %v13268_v59  ;;  %v3057_v42 = vpop.f32.mrb[38].mxu1 }
 0x36d   : > { %v3674_v26 = vmax.f32 %v3054_v6, 0.0  ;;  %v3058_v38 = vadd.f32 %v3057_v42, %v13266_v3  ;;  %v3059_v49 = vpop.f32.mrb[39].mxu1 }
 0x36e   : > { %v14195_v13 = vpack.c.bf16 %v4235_v27, %v4234_v35  ;;  %v3675_v9 = vmax.f32 %v3056_v1, 0.0  ;;  %v3060_v33 = vadd.f32 %v3059_v49, %v13268_v59  ;;  %v17036_v35 = vld [vmem:[#allocation8_spill] sm:$0xff]  ;;  %v17037_v27 = vld [vmem:[#allocation9_spill] sm:$0xff] }
 0x36f   : > { %v3678_v5 = vmax.f32 %v3058_v38, 0.0 }
 0x370   : > { %v4092_v56 = vmax.f32 %v3674_v26, %v3675_v9  ;;  %v3679_v2 = vmax.f32 %v3060_v33, 0.0 }
 0x372   : > { %v4236_v30 = vmax.f32 %v17034_v28, %v4092_v56  ;;  %v4093_v29 = vmax.f32 %v3678_v5, %v3679_v2  ;;  %v3063_v45 = vpop.f32.mrb[40].mxu1 }
 0x373   : > { %v3064_v40 = vadd.f32 %v3063_v45, %v13266_v3  ;;  %v3065_v10 = vpop.f32.mrb[41].mxu1 }
 0x374   : > { %v4237_v23 = vmax.f32 %v17035_v14, %v4093_v29  ;;  %v3066_v58 = vadd.f32 %v3065_v10, %v13268_v59  ;;  %v3067_v37 = vpop.f32.mrb[42].mxu1  ;;  %v17038_v29 = vld [vmem:[#allocation10_spill] sm:$0xff] }
 0x375   : > { %v3682_v41 = vmax.f32 %v3064_v40, 0.0  ;;  %v3068_v15 = vadd.f32 %v3067_v37, %v13266_v3  ;;  %v3069_v34 = vpop.f32.mrb[43].mxu1 }
 0x376   : > { %v14203_v31 = vpack.c.bf16 %v4237_v23, %v4236_v30  ;;  %v3683_v0 = vmax.f32 %v3066_v58, 0.0  ;;  %v3070_v57 = vadd.f32 %v3069_v34, %v13268_v59  ;;  %v17039_v58 = vld [vmem:[#allocation11_spill] sm:$0xff] }
 0x377   : > { %v3686_v39 = vmax.f32 %v3068_v15, 0.0 }
 0x378   : > { %v4094_v47 = vmax.f32 %v3682_v41, %v3683_v0  ;;  %v3687_v4 = vmax.f32 %v3070_v57, 0.0  ;;  %5180 = vmatprep.mubr.bf16.mxu0 %v14203_v31 }
 0x379   : > { %5181 = vmatmul.mubr.bf16.gmra.mrb[100].mxu0 %v14187_v55 }
 0x37a   : > { %v4238_v61 = vmax.f32 %v17036_v35, %v4094_v47  ;;  %v4095_v54 = vmax.f32 %v3686_v39, %v3687_v4  ;;  %v3073_v6 = vpop.f32.mrb[44].mxu1 }
 0x37b   : > { %v3074_v53 = vadd.f32 %v3073_v6, %v13266_v3  ;;  %v3075_v44 = vpop.f32.mrb[45].mxu1  ;;  %v17040_v6 = vld [vmem:[#allocation12_spill] sm:$0xff] }
 0x37c   : > { %v4239_v1 = vmax.f32 %v17037_v27, %v4095_v54  ;;  %v3076_v42 = vadd.f32 %v3075_v44, %v13268_v59  ;;  %v3077_v26 = vpop.f32.mrb[46].mxu1 }
 0x37d   : > { %v3690_v38 = vmax.f32 %v3074_v53, 0.0  ;;  %v3078_v49 = vadd.f32 %v3077_v26, %v13266_v3  ;;  %v3079_v9 = vpop.f32.mrb[47].mxu1  ;;  %v17041_v26 = vld [vmem:[#allocation13_spill] sm:$0xff] }
 0x37e   : > { %v14213_v33 = vpack.c.bf16 %v4239_v1, %v4238_v61  ;;  %v3691_v5 = vmax.f32 %v3076_v42, 0.0  ;;  %v3080_v56 = vadd.f32 %v3079_v9, %v13268_v59 }
 0x37f   : > { %v3694_v2 = vmax.f32 %v3078_v49, 0.0 }
 0x380   : > { %v4096_v28 = vmax.f32 %v3690_v38, %v3691_v5  ;;  %v3695_v30 = vmax.f32 %v3080_v56, 0.0  ;;  %5190 = vmatprep.mubr.bf16.mxu0 %v14213_v33 }
 0x381   : > { %5191 = vmatmul.mubr.bf16.gmra.mrb[104].mxu0 %v14195_v13 }
 0x382   : > { %v4240_v45 = vmax.f32 %v17038_v29, %v4096_v28  ;;  %v4097_v40 = vmax.f32 %v3694_v2, %v3695_v30  ;;  %v3083_v10 = vpop.f32.mrb[48].mxu1 }
 0x383   : > { %v3084_v14 = vadd.f32 %v3083_v10, %v13266_v3  ;;  %v3085_v23 = vpop.f32.mrb[49].mxu1 }
 0x384   : > { %v4241_v37 = vmax.f32 %v17039_v58, %v4097_v40  ;;  %v3086_v41 = vadd.f32 %v3085_v23, %v13268_v59  ;;  %v3087_v15 = vpop.f32.mrb[50].mxu1 }
 0x385   : > { %v3698_v34 = vmax.f32 %v3084_v14, 0.0  ;;  %v3088_v0 = vadd.f32 %v3087_v15, %v13266_v3  ;;  %v3089_v57 = vpop.f32.mrb[51].mxu1  ;;  %v17042_v14 = vld [vmem:[#allocation14_spill] sm:$0xff] }
 0x386   : > { %v14223_v39 = vpack.c.bf16 %v4241_v37, %v4240_v45  ;;  %v3699_v47 = vmax.f32 %v3086_v41, 0.0  ;;  %v3090_v4 = vadd.f32 %v3089_v57, %v13268_v59 }
 0x387   : > { %v3702_v35 = vmax.f32 %v3088_v0, 0.0 }
 0x388   : > { %v4098_v61 = vmax.f32 %v3698_v34, %v3699_v47  ;;  %v3703_v54 = vmax.f32 %v3090_v4, 0.0  ;;  %5200 = vmatprep.mubr.bf16.mxu0 %v14223_v39  ;;  %v17043_v34 = vld [vmem:[#allocation15_spill] sm:$0xff] }
 0x389   : > { %5201 = vmatmul.mubr.bf16.gmra.mrb[108].mxu0 %v14203_v31 }
 0x38a   : > { %v4242_v53 = vmax.f32 %v17040_v6, %v4098_v61  ;;  %v4099_v44 = vmax.f32 %v3702_v35, %v3703_v54  ;;  %v3093_v27 = vpop.f32.mrb[52].mxu1 }
 0x38b   : > { %v3094_v1 = vadd.f32 %v3093_v27, %v13266_v3  ;;  %v3095_v42 = vpop.f32.mrb[53].mxu1 }
 0x38c   : > { %v4243_v38 = vmax.f32 %v17041_v26, %v4099_v44  ;;  %v3096_v49 = vadd.f32 %v3095_v42, %v13268_v59  ;;  %v3097_v9 = vpop.f32.mrb[54].mxu1  ;;  %v17044_v42 = vld [vmem:[#allocation16_spill] sm:$0xff] }
 0x38d   : > { %v3706_v5 = vmax.f32 %v3094_v1, 0.0  ;;  %v3098_v56 = vadd.f32 %v3097_v9, %v13266_v3  ;;  %v3099_v2 = vpop.f32.mrb[55].mxu1 }
 0x38e   : > { %v14233_v28 = vpack.c.bf16 %v4243_v38, %v4242_v53  ;;  %v3707_v30 = vmax.f32 %v3096_v49, 0.0  ;;  %v3100_v29 = vadd.f32 %v3099_v2, %v13268_v59 }
 0x38f   : > { %v3710_v45 = vmax.f32 %v3098_v56, 0.0  ;;  %v17045_v56 = vld [vmem:[#allocation17_spill] sm:$0xff] }
 0x390   : > { %v4100_v40 = vmax.f32 %v3706_v5, %v3707_v30  ;;  %v3711_v10 = vmax.f32 %v3100_v29, 0.0  ;;  %5210 = vmatprep.mubr.bf16.mxu0 %v14233_v28 }
 0x391   : > { %5211 = vmatmul.mubr.bf16.gmra.mrb[112].mxu0 %v14213_v33 }
 0x392   : > { %v4244_v23 = vmax.f32 %v17042_v14, %v4100_v40  ;;  %v4101_v58 = vmax.f32 %v3710_v45, %v3711_v10  ;;  %v3103_v37 = vpop.f32.mrb[56].mxu1  ;;  %v12013_v45 = vld [vmem:[%s16606_s5 + $0x30] sm:$0xff]  }
 0x393   : > { %v3104_v41 = vadd.f32 %v3103_v37, %v13266_v3  ;;  %v3105_v15 = vpop.f32.mrb[57].mxu1  ;;  %10481 = vmatprep.subr.bf16.mxu1 %v12013_v45 }
 0x394   : > { %v4245_v0 = vmax.f32 %v17043_v34, %v4101_v58  ;;  %v3106_v57 = vadd.f32 %v3105_v15, %v13268_v59  ;;  %v3107_v47 = vpop.f32.mrb[58].mxu1  ;;  %10482 = vmatpush3.bf16.msra.mxu1 %v12013_v45 }
 0x395   : > { %v3714_v4 = vmax.f32 %v3104_v41, 0.0  ;;  %v3108_v35 = vadd.f32 %v3107_v47, %v13266_v3  ;;  %v3109_v61 = vpop.f32.mrb[59].mxu1 }
 0x396   : > { %v14243_v54 = vpack.c.bf16 %v4245_v0, %v4244_v23  ;;  %v3715_v6 = vmax.f32 %v3106_v57, 0.0  ;;  %v3110_v53 = vadd.f32 %v3109_v61, %v13268_v59  ;;  %v17046_v0 = vld [vmem:[#allocation18_spill] sm:$0xff] }
 0x397   : > { %v3718_v44 = vmax.f32 %v3108_v35, 0.0 }
 0x398   : > { %v4102_v27 = vmax.f32 %v3714_v4, %v3715_v6  ;;  %v3719_v1 = vmax.f32 %v3110_v53, 0.0  ;;  %5220 = vmatprep.mubr.bf16.mxu0 %v14243_v54  ;;  %v17047_v6 = vld [vmem:[#allocation19_spill] sm:$0xff] }
 0x399   : > { %5221 = vmatmul.mubr.bf16.gmra.mrb[116].mxu0 %v14223_v39 }
 0x39a   : > { %v4246_v26 = vmax.f32 %v17044_v42, %v4102_v27  ;;  %v4103_v38 = vmax.f32 %v3718_v44, %v3719_v1  ;;  %v3113_v49 = vpop.f32.mrb[60].mxu1 }
 0x39b   : > { %v3114_v9 = vadd.f32 %v3113_v49, %v13266_v3  ;;  %v3115_v5 = vpop.f32.mrb[61].mxu1 }
 0x39c   : > { %v4247_v2 = vmax.f32 %v17045_v56, %v4103_v38  ;;  %v3116_v30 = vadd.f32 %v3115_v5, %v13268_v59  ;;  %v3117_v29 = vpop.f32.mrb[62].mxu1 }
 0x39d   : > { %v3722_v40 = vmax.f32 %v3114_v9, 0.0  ;;  %v3118_v10 = vadd.f32 %v3117_v29, %v13266_v3  ;;  %v3119_v14 = vpop.f32.mrb[63].mxu1 }
 0x39e   : > { %v14256_v23 = vpack.c.bf16 %v4247_v2, %v4246_v26  ;;  %v3723_v58 = vmax.f32 %v3116_v30, 0.0  ;;  %v3120_v37 = vadd.f32 %v3119_v14, %v13268_v59  ;;  %v17048_v30 = vld [vmem:[#allocation20_spill] sm:$0xff] }
 0x39f   : > { %v3726_v41 = vmax.f32 %v3118_v10, 0.0 }
 0x3a0   : > { %v4104_v15 = vmax.f32 %v3722_v40, %v3723_v58  ;;  %v3727_v34 = vmax.f32 %v3120_v37, 0.0  ;;  %5230 = vmatprep.mubr.bf16.mxu0 %v14256_v23  ;;  %v17049_v58 = vld [vmem:[#allocation21_spill] sm:$0xff] }
 0x3a1   : > { %5231 = vmatmul.mubr.bf16.gmra.mrb[120].mxu0 %v14233_v28 }
 0x3a2   : > { %v4248_v57 = vmax.f32 %v17046_v0, %v4104_v15  ;;  %v4105_v47 = vmax.f32 %v3726_v41, %v3727_v34  ;;  %v3123_v4 = vpop.f32.mrb[64].mxu1 }
 0x3a3   : > { %v3124_v35 = vadd.f32 %v3123_v4, %v13266_v3  ;;  %v3125_v61 = vpop.f32.mrb[65].mxu1 }
 0x3a4   : > { %v4249_v53 = vmax.f32 %v17047_v6, %v4105_v47  ;;  %v3126_v44 = vadd.f32 %v3125_v61, %v13268_v59  ;;  %v3127_v27 = vpop.f32.mrb[66].mxu1 }
 0x3a5   : > { %v3730_v1 = vmax.f32 %v3124_v35, 0.0  ;;  %v3128_v42 = vadd.f32 %v3127_v27, %v13266_v3  ;;  %v3129_v26 = vpop.f32.mrb[67].mxu1 }
 0x3a6   : > { %v14266_v38 = vpack.c.bf16 %v4249_v53, %v4248_v57  ;;  %v3731_v49 = vmax.f32 %v3126_v44, 0.0  ;;  %v3130_v9 = vadd.f32 %v3129_v26, %v13268_v59  ;;  %v17050_v44 = vld [vmem:[#allocation22_spill] sm:$0xff] }
 0x3a7   : > { %v3734_v5 = vmax.f32 %v3128_v42, 0.0 }
 0x3a8   : > { %v4106_v56 = vmax.f32 %v3730_v1, %v3731_v49  ;;  %v3735_v2 = vmax.f32 %v3130_v9, 0.0  ;;  %5240 = vmatprep.mubr.bf16.mxu0 %v14266_v38  ;;  %v17051_v9 = vld [vmem:[#allocation23_spill] sm:$0xff] }
 0x3a9   : > { %5241 = vmatmul.mubr.bf16.gmra.mrb[124].mxu0 %v14243_v54 }
 0x3aa   : > { %v4250_v29 = vmax.f32 %v17048_v30, %v4106_v56  ;;  %v4107_v45 = vmax.f32 %v3734_v5, %v3735_v2  ;;  %v3133_v40 = vpop.f32.mrb[68].mxu1 }
 0x3ab   : > { %v3134_v10 = vadd.f32 %v3133_v40, %v13266_v3  ;;  %v3135_v14 = vpop.f32.mrb[69].mxu1 }
 0x3ac   : > { %v4251_v37 = vmax.f32 %v17049_v58, %v4107_v45  ;;  %v3136_v41 = vadd.f32 %v3135_v14, %v13268_v59  ;;  %v3137_v15 = vpop.f32.mrb[70].mxu1 }
 0x3ad   : > { %v3738_v34 = vmax.f32 %v3134_v10, 0.0  ;;  %v3138_v0 = vadd.f32 %v3137_v15, %v13266_v3  ;;  %v3139_v57 = vpop.f32.mrb[71].mxu1  ;;  %v17052_v15 = vld [vmem:[#allocation24_spill] sm:$0xff] }
 0x3ae   : > { %v14276_v47 = vpack.c.bf16 %v4251_v37, %v4250_v29  ;;  %v3739_v4 = vmax.f32 %v3136_v41, 0.0  ;;  %v3140_v35 = vadd.f32 %v3139_v57, %v13268_v59 }
 0x3af   : > { %v3742_v61 = vmax.f32 %v3138_v0, 0.0 }
 0x3b0   : > { %v4108_v6 = vmax.f32 %v3738_v34, %v3739_v4  ;;  %v3743_v53 = vmax.f32 %v3140_v35, 0.0  ;;  %5250 = vmatprep.mubr.bf16.mxu0 %v14276_v47 }
 0x3b1   : > { %5251 = vmatmul.mubr.bf16.gmra.mrb[128].mxu0 %v14256_v23 }
 0x3b2   : > { %v4252_v27 = vmax.f32 %v17050_v44, %v4108_v6  ;;  %v4109_v1 = vmax.f32 %v3742_v61, %v3743_v53  ;;  %v3143_v42 = vpop.f32.mrb[72].mxu1  ;;  %v17053_v61 = vld [vmem:[#allocation25_spill] sm:$0xff] }
 0x3b3   : > { %v3144_v26 = vadd.f32 %v3143_v42, %v13266_v3  ;;  %v3145_v49 = vpop.f32.mrb[73].mxu1 }
 0x3b4   : > { %v4253_v5 = vmax.f32 %v17051_v9, %v4109_v1  ;;  %v3146_v56 = vadd.f32 %v3145_v49, %v13268_v59  ;;  %v3147_v2 = vpop.f32.mrb[74].mxu1 }
 0x3b5   : > { %v3746_v30 = vmax.f32 %v3144_v26, 0.0  ;;  %v3148_v29 = vadd.f32 %v3147_v2, %v13266_v3  ;;  %v3149_v45 = vpop.f32.mrb[75].mxu1 }
 0x3b6   : > { %v3747_v40 = vmax.f32 %v3146_v56, 0.0  ;;  %v3150_v10 = vadd.f32 %v3149_v45, %v13268_v59  ;;  %v14287_v14 = vpack.c.bf16 %v4253_v5, %v4252_v27 }
 0x3b7   : > { %v3750_v58 = vmax.f32 %v3148_v29, 0.0 }
 0x3b8   : > { %v4110_v37 = vmax.f32 %v3746_v30, %v3747_v40  ;;  %v3751_v41 = vmax.f32 %v3150_v10, 0.0  ;;  %5260 = vmatprep.mubr.bf16.mxu0 %v14287_v14  ;;  %v17054_v30 = vld [vmem:[#allocation26_spill] sm:$0xff]  ;;  %v17055_v10 = vld [vmem:[#allocation64_spill] sm:$0xff] }
 0x3b9   : > { %5261 = vmatmul.mubr.bf16.gmra.mrb[132].mxu0 %v14266_v38 }
 0x3ba   : > { %v4254_v34 = vmax.f32 %v17052_v15, %v4110_v37  ;;  %v4111_v0 = vmax.f32 %v3750_v58, %v3751_v41  ;;  %v3153_v57 = vpop.f32.mrb[76].mxu1  ;;  %v17056_v41 = vld [vmem:[#allocation27_spill] sm:$0xff] }
 0x3bb   : > { %v3154_v4 = vadd.f32 %v3153_v57, %v13266_v3  ;;  %v3155_v35 = vpop.f32.mrb[77].mxu1 }
 0x3bc   : > { %v4255_v6 = vmax.f32 %v17053_v61, %v4111_v0  ;;  %v3156_v53 = vadd.f32 %v3155_v35, %v13268_v59  ;;  %v3157_v44 = vpop.f32.mrb[78].mxu1 }
 0x3bd   : > { %v3754_v27 = vmax.f32 %v3154_v4, 0.0  ;;  %v3158_v1 = vadd.f32 %v3157_v44, %v13266_v3  ;;  %v3159_v42 = vpop.f32.mrb[79].mxu1 }
 0x3be   : > { %v3755_v26 = vmax.f32 %v3156_v53, 0.0  ;;  %v3160_v49 = vadd.f32 %v3159_v42, %v13268_v59  ;;  %v14297_v9 = vpack.c.bf16 %v4255_v6, %v4254_v34  ;;  %v17057_v42 = vld [vmem:[#allocation62_spill] sm:$0xff] }
 0x3bf   : > { %v3758_v5 = vmax.f32 %v3158_v1, 0.0 }
 0x3c0   : > { %v4112_v56 = vmax.f32 %v3754_v27, %v3755_v26  ;;  %v3759_v2 = vmax.f32 %v3160_v49, 0.0  ;;  %5270 = vmatprep.mubr.bf16.mxu0 %v14297_v9  ;;  %v17058_v26 = vld [vmem:[#allocation28_spill] sm:$0xff] }
 0x3c1   : > { %5271 = vmatmul.mubr.bf16.gmra.mrb[136].mxu0 %v14276_v47 }
 0x3c2   : > { %v4256_v29 = vmax.f32 %v17054_v30, %v4112_v56  ;;  %v4113_v45 = vmax.f32 %v3758_v5, %v3759_v2  ;;  %v3163_v40 = vpop.f32.mrb[80].mxu1  ;;  %5313 = vmatprep.mubr.bf16.mxu0 %v17055_v10  ;;  %v17059_v2 = vld [vmem:[#allocation65_spill] sm:$0xff] }
 0x3c3   : > { %v3164_v58 = vadd.f32 %v3163_v40, %v13266_v3  ;;  %v3165_v37 = vpop.f32.mrb[81].mxu1  ;;  %v17060_v40 = vld [vmem:[#allocation29_spill] sm:$0xff] }
 0x3c4   : > { %v4257_v15 = vmax.f32 %v17056_v41, %v4113_v45  ;;  %v3166_v34 = vadd.f32 %v3165_v37, %v13268_v59  ;;  %v3167_v0 = vpop.f32.mrb[82].mxu1 }
 0x3c5   : > { %v3762_v57 = vmax.f32 %v3164_v58, 0.0  ;;  %v3168_v4 = vadd.f32 %v3167_v0, %v13266_v3  ;;  %v3169_v35 = vpop.f32.mrb[83].mxu1 }
 0x3c6   : > { %v14307_v61 = vpack.c.bf16 %v4257_v15, %v4256_v29  ;;  %v3763_v6 = vmax.f32 %v3166_v34, 0.0  ;;  %v3170_v53 = vadd.f32 %v3169_v35, %v13268_v59 }
 0x3c7   : > { %v3766_v44 = vmax.f32 %v3168_v4, 0.0 }
 0x3c8   : > { %v4114_v27 = vmax.f32 %v3762_v57, %v3763_v6  ;;  %v3767_v1 = vmax.f32 %v3170_v53, 0.0 }
 0x3c9   : > { %5314 = vmatmul.mubr.bf16.vlgmr.msra.gmra.mrb[196].mxu0 %v17057_v42 }
 0x3ca   : > { %v4258_v49 = vmax.f32 %v17058_v26, %v4114_v27  ;;  %v4115_v5 = vmax.f32 %v3766_v44, %v3767_v1  ;;  %v3173_v56 = vpop.f32.mrb[84].mxu1  ;;  %5323 = vmatprep.mubr.bf16.mxu0 %v17059_v2  ;;  %v17062_v44 = vld [vmem:[#allocation63_spill] sm:$0xff]  ;;  %v17063_v27 = vld [vmem:[#allocation30_spill] sm:$0xff] }
 0x3cb   : > { %v3174_v30 = vadd.f32 %v3173_v56, %v13266_v3  ;;  %v3175_v45 = vpop.f32.mrb[85].mxu1 }
 0x3cc   : > { %v4259_v29 = vmax.f32 %v17060_v40, %v4115_v5  ;;  %v3176_v58 = vadd.f32 %v3175_v45, %v13268_v59  ;;  %v3177_v37 = vpop.f32.mrb[86].mxu1  ;;  %v17064_v5 = vld [vmem:[#allocation66_spill] sm:$0xff]  ;;  %v17065_v45 = vld [vmem:[#allocation31_spill] sm:$0xff] }
 0x3cd   : > { %v3770_v41 = vmax.f32 %v3174_v30, 0.0  ;;  %v3178_v15 = vadd.f32 %v3177_v37, %v13266_v3  ;;  %v3179_v34 = vpop.f32.mrb[87].mxu1 }
 0x3ce   : > { %v14317_v0 = vpack.c.bf16 %v4259_v29, %v4258_v49  ;;  %v3771_v57 = vmax.f32 %v3176_v58, 0.0  ;;  %v3180_v4 = vadd.f32 %v3179_v34, %v13268_v59 }
 0x3cf   : > { %v3774_v35 = vmax.f32 %v3178_v15, 0.0 }
 0x3d0   : > { %17061 = vst [vmem:[#allocation60_spill] sm:$0xff] %v14317_v0  ;;  %v4116_v6 = vmax.f32 %v3770_v41, %v3771_v57  ;;  %v3775_v53 = vmax.f32 %v3180_v4, 0.0  ;;  %v17075_v0 = vld [vmem:[#allocation37_spill] sm:$0xff] }
 0x3d1   : > { %5324 = vmatmul.mubr.bf16.gmra.mrb[200].mxu0 %v17062_v44 }
 0x3d2   : > { %v4260_v1 = vmax.f32 %v17063_v27, %v4116_v6  ;;  %v4117_v42 = vmax.f32 %v3774_v35, %v3775_v53  ;;  %v3183_v26 = vpop.f32.mrb[88].mxu1  ;;  %5333 = vmatprep.mubr.bf16.mxu0 %v17064_v5  ;;  %v17066_v53 = vld [vmem:[#allocation32_spill] sm:$0xff] }
 0x3d3   : > { %v3184_v56 = vadd.f32 %v3183_v26, %v13266_v3  ;;  %v3185_v30 = vpop.f32.mrb[89].mxu1  ;;  %v17067_v26 = vld [vmem:[#allocation67_spill] sm:$0xff] }
 0x3d4   : > { %v4261_v49 = vmax.f32 %v17065_v45, %v4117_v42  ;;  %v3186_v40 = vadd.f32 %v3185_v30, %v13268_v59  ;;  %v3187_v29 = vpop.f32.mrb[90].mxu1  ;;  %v17068_v45 = vld [vmem:[#allocation33_spill] sm:$0xff] }
 0x3d5   : > { %v3778_v58 = vmax.f32 %v3184_v56, 0.0  ;;  %v3188_v37 = vadd.f32 %v3187_v29, %v13266_v3  ;;  %v3189_v41 = vpop.f32.mrb[91].mxu1 }
 0x3d6   : > { %v3779_v15 = vmax.f32 %v3186_v40, 0.0  ;;  %v3190_v34 = vadd.f32 %v3189_v41, %v13268_v59  ;;  %v14328_v57 = vpack.c.bf16 %v4261_v49, %v4260_v1 }
 0x3d7   : > { %v3782_v4 = vmax.f32 %v3188_v37, 0.0 }
 0x3d8   : > { %v4118_v35 = vmax.f32 %v3778_v58, %v3779_v15  ;;  %v3783_v6 = vmax.f32 %v3190_v34, 0.0 }
 0x3d9   : > { %5334 = vmatmul.mubr.bf16.gmra.mrb[204].mxu0 %v17055_v10 }
 0x3da   : > { %v4262_v44 = vmax.f32 %v17066_v53, %v4118_v35  ;;  %v4119_v27 = vmax.f32 %v3782_v4, %v3783_v6  ;;  %v3193_v42 = vpop.f32.mrb[92].mxu1  ;;  %5343 = vmatprep.mubr.bf16.mxu0 %v17067_v26  ;;  %v17069_v6 = vld [vmem:[#allocation34_spill] sm:$0xff] }
 0x3db   : > { %v3194_v56 = vadd.f32 %v3193_v42, %v13266_v3  ;;  %v3195_v30 = vpop.f32.mrb[93].mxu1 }
 0x3dc   : > { %v4263_v40 = vmax.f32 %v17068_v45, %v4119_v27  ;;  %v3196_v29 = vadd.f32 %v3195_v30, %v13268_v59  ;;  %v3197_v1 = vpop.f32.mrb[94].mxu1  ;;  %v17070_v30 = vld [vmem:[#allocation68_spill] sm:$0xff] }
 0x3dd   : > { %v3786_v49 = vmax.f32 %v3194_v56, 0.0  ;;  %v3198_v58 = vadd.f32 %v3197_v1, %v13266_v3  ;;  %v3199_v37 = vpop.f32.mrb[95].mxu1  ;;  %v17071_v1 = vld [vmem:[#allocation35_spill] sm:$0xff] }
 0x3de   : > { %v3787_v41 = vmax.f32 %v3196_v29, 0.0  ;;  %v3200_v10 = vadd.f32 %v3199_v37, %v13268_v59  ;;  %v14338_v15 = vpack.c.bf16 %v4263_v40, %v4262_v44 }
 0x3df   : > { %v3790_v34 = vmax.f32 %v3198_v58, 0.0 }
 0x3e0   : > { %v4120_v4 = vmax.f32 %v3786_v49, %v3787_v41  ;;  %v3791_v35 = vmax.f32 %v3200_v10, 0.0 }
 0x3e1   : > { %5344 = vmatmul.mubr.bf16.gmra.mrb[208].mxu0 %v17059_v2 }
 0x3e2   : > { %v4264_v53 = vmax.f32 %v17069_v6, %v4120_v4  ;;  %v4121_v27 = vmax.f32 %v3790_v34, %v3791_v35  ;;  %v3203_v42 = vpop.f32.mrb[96].mxu1  ;;  %5353 = vmatprep.mubr.bf16.mxu0 %v17070_v30  ;;  %v17073_v6 = vld [vmem:[#allocation36_spill] sm:$0xff] }
 0x3e3   : > { %v3204_v56 = vadd.f32 %v3203_v42, %v13266_v3  ;;  %v3205_v45 = vpop.f32.mrb[97].mxu1 }
 0x3e4   : > { %v4265_v29 = vmax.f32 %v17071_v1, %v4121_v27  ;;  %v3206_v37 = vadd.f32 %v3205_v45, %v13268_v59  ;;  %v3207_v44 = vpop.f32.mrb[98].mxu1  ;;  %v17074_v45 = vld [vmem:[#allocation45_spill] sm:$0xff] }
 0x3e5   : > { %v3794_v40 = vmax.f32 %v3204_v56, 0.0  ;;  %v3208_v49 = vadd.f32 %v3207_v44, %v13266_v3  ;;  %v3209_v58 = vpop.f32.mrb[99].mxu1 }
 0x3e6   : > { %v3795_v41 = vmax.f32 %v3206_v37, 0.0  ;;  %v3210_v2 = vadd.f32 %v3209_v58, %v13268_v59  ;;  %v14348_v10 = vpack.c.bf16 %v4265_v29, %v4264_v53 }
 0x3e7   : > { %v3798_v34 = vmax.f32 %v3208_v49, 0.0 }
 0x3e8   : > { %17072 = vst [vmem:[#allocation61_spill] sm:$0xff] %v14348_v10  ;;  %v4122_v4 = vmax.f32 %v3794_v40, %v3795_v41  ;;  %v3799_v35 = vmax.f32 %v3210_v2, 0.0  ;;  %v17079_v10 = vld [vmem:[#allocation39_spill] sm:$0xff] }
 0x3e9   : > { %5354 = vmatmul.mubr.bf16.gmra.mrb[212].mxu0 %v17064_v5 }
 0x3ea   : > { %v4266_v42 = vmax.f32 %v17073_v6, %v4122_v4  ;;  %v4123_v27 = vmax.f32 %v3798_v34, %v3799_v35  ;;  %v3213_v1 = vpop.f32.mrb[100].mxu1  ;;  %5363 = vmatprep.mubr.bf16.mxu0 %v17074_v45  ;;  %v17077_v6 = vld [vmem:[#allocation38_spill] sm:$0xff] }
 0x3eb   : > { %v3214_v56 = vadd.f32 %v3213_v1, %v13266_v3  ;;  %v3215_v44 = vpop.f32.mrb[101].mxu1 }
 0x3ec   : > { %v4267_v37 = vmax.f32 %v17075_v0, %v4123_v27  ;;  %v3216_v58 = vadd.f32 %v3215_v44, %v13268_v59  ;;  %v3217_v53 = vpop.f32.mrb[102].mxu1  ;;  %v17078_v44 = vld [vmem:[#allocation49_spill] sm:$0xff] }
 0x3ed   : > { %v3802_v29 = vmax.f32 %v3214_v56, 0.0  ;;  %v3218_v40 = vadd.f32 %v3217_v53, %v13266_v3  ;;  %v3219_v49 = vpop.f32.mrb[103].mxu1 }
 0x3ee   : > { %v3803_v41 = vmax.f32 %v3216_v58, 0.0  ;;  %v3220_v5 = vadd.f32 %v3219_v49, %v13268_v59  ;;  %v14358_v2 = vpack.c.bf16 %v4267_v37, %v4266_v42 }
 0x3ef   : > { %v3806_v34 = vmax.f32 %v3218_v40, 0.0 }
 0x3f0   : > { %17076 = vst [vmem:[#allocation43_spill] sm:$0xff] %v14358_v2  ;;  %v4124_v4 = vmax.f32 %v3802_v29, %v3803_v41  ;;  %v3807_v35 = vmax.f32 %v3220_v5, 0.0  ;;  %v17083_v2 = vld [vmem:[#allocation41_spill] sm:$0xff] }
 0x3f1   : > { %5364 = vmatmul.mubr.bf16.gmra.mrb[216].mxu0 %v17067_v26 }
 0x3f2   : > { %v4268_v1 = vmax.f32 %v17077_v6, %v4124_v4  ;;  %v4125_v0 = vmax.f32 %v3806_v34, %v3807_v35  ;;  %v3223_v27 = vpop.f32.mrb[104].mxu1  ;;  %5373 = vmatprep.mubr.bf16.mxu0 %v17078_v44  ;;  %v17081_v6 = vld [vmem:[#allocation40_spill] sm:$0xff] }
 0x3f3   : > { %v3224_v56 = vadd.f32 %v3223_v27, %v13266_v3  ;;  %v3225_v53 = vpop.f32.mrb[105].mxu1 }
 0x3f4   : > { %v4269_v58 = vmax.f32 %v17079_v10, %v4125_v0  ;;  %v3226_v49 = vadd.f32 %v3225_v53, %v13268_v59  ;;  %v3227_v42 = vpop.f32.mrb[106].mxu1  ;;  %v17082_v53 = vld [vmem:[#allocation53_spill] sm:$0xff] }
 0x3f5   : > { %v3810_v37 = vmax.f32 %v3224_v56, 0.0  ;;  %v3228_v29 = vadd.f32 %v3227_v42, %v13266_v3  ;;  %v3229_v40 = vpop.f32.mrb[107].mxu1 }
 0x3f6   : > { %v3811_v41 = vmax.f32 %v3226_v49, 0.0  ;;  %v3230_v26 = vadd.f32 %v3229_v40, %v13268_v59  ;;  %v14368_v5 = vpack.c.bf16 %v4269_v58, %v4268_v1 }
 0x3f7   : > { %v3814_v34 = vmax.f32 %v3228_v29, 0.0 }
 0x3f8   : > { %17080 = vst [vmem:[#allocation69_spill] sm:$0xff] %v14368_v5  ;;  %v4126_v4 = vmax.f32 %v3810_v37, %v3811_v41  ;;  %v3815_v35 = vmax.f32 %v3230_v26, 0.0  ;;  %v17086_v5 = vld [vmem:[#allocation44_spill] sm:$0xff] }
 0x3f9   : > { %5374 = vmatmul.mubr.bf16.gmra.mrb[220].mxu0 %v17070_v30 }
 0x3fa   : > { %v4270_v27 = vmax.f32 %v17081_v6, %v4126_v4  ;;  %v4127_v10 = vmax.f32 %v3814_v34, %v3815_v35  ;;  %v3233_v0 = vpop.f32.mrb[108].mxu1  ;;  %5383 = vmatprep.mubr.bf16.mxu0 %v17082_v53  ;;  %v17084_v6 = vld [vmem:[#allocation42_spill] sm:$0xff] }
 0x3fb   : > { %v3234_v56 = vadd.f32 %v3233_v0, %v13266_v3  ;;  %v3235_v42 = vpop.f32.mrb[109].mxu1 }
 0x3fc   : > { %v4271_v49 = vmax.f32 %v17083_v2, %v4127_v10  ;;  %v3236_v40 = vadd.f32 %v3235_v42, %v13268_v59  ;;  %v3237_v1 = vpop.f32.mrb[110].mxu1  ;;  %v17085_v42 = vld [vmem:[#allocation57_spill] sm:$0xff] }
 0x3fd   : > { %v3818_v58 = vmax.f32 %v3234_v56, 0.0  ;;  %v3238_v37 = vadd.f32 %v3237_v1, %v13266_v3  ;;  %v3239_v29 = vpop.f32.mrb[111].mxu1 }
 0x3fe   : > { %v3819_v41 = vmax.f32 %v3236_v40, 0.0  ;;  %v3240_v30 = vadd.f32 %v3239_v29, %v13268_v59  ;;  %v14378_v26 = vpack.c.bf16 %v4271_v49, %v4270_v27 }
 0x3ff   : > { %v3822_v34 = vmax.f32 %v3238_v37, 0.0 }
 0x400   : > { %v4128_v4 = vmax.f32 %v3818_v58, %v3819_v41  ;;  %v3823_v35 = vmax.f32 %v3240_v30, 0.0 }
 0x401   : > { %5384 = vmatmul.mubr.bf16.gmra.mrb[224].mxu0 %v17074_v45 }
 0x402   : > { %v4272_v0 = vmax.f32 %v17084_v6, %v4128_v4  ;;  %v4129_v2 = vmax.f32 %v3822_v34, %v3823_v35  ;;  %v3243_v10 = vpop.f32.mrb[112].mxu1  ;;  %5393 = vmatprep.mubr.bf16.mxu0 %v17085_v42  ;;  %v17087_v6 = vld [vmem:[#allocation46_spill] sm:$0xff] }
 0x403   : > { %v3244_v56 = vadd.f32 %v3243_v10, %v13266_v3  ;;  %v3245_v1 = vpop.f32.mrb[113].mxu1  ;;  %v17088_v42 = vld [vmem:[#allocation58_spill] sm:$0xff] }
 0x404   : > { %v4273_v40 = vmax.f32 %v17086_v5, %v4129_v2  ;;  %v3246_v29 = vadd.f32 %v3245_v1, %v13268_v59  ;;  %v3247_v27 = vpop.f32.mrb[114].mxu1 }
 0x405   : > { %v3826_v49 = vmax.f32 %v3244_v56, 0.0  ;;  %v3248_v58 = vadd.f32 %v3247_v27, %v13266_v3  ;;  %v3249_v37 = vpop.f32.mrb[115].mxu1  ;;  %v17089_v27 = vld [vmem:[#allocation48_spill] sm:$0xff] }
 0x406   : > { %v3827_v41 = vmax.f32 %v3246_v29, 0.0  ;;  %v3250_v45 = vadd.f32 %v3249_v37, %v13268_v59  ;;  %v14388_v30 = vpack.c.bf16 %v4273_v40, %v4272_v0 }
 0x407   : > { %v3830_v34 = vmax.f32 %v3248_v58, 0.0 }
 0x408   : > { %v4130_v4 = vmax.f32 %v3826_v49, %v3827_v41  ;;  %v3831_v35 = vmax.f32 %v3250_v45, 0.0 }
 0x409   : > { %5394 = vmatmul.mubr.bf16.gmra.mrb[228].mxu0 %v17078_v44 }
 0x40a   : > { %v4274_v10 = vmax.f32 %v17087_v6, %v4130_v4  ;;  %v4131_v5 = vmax.f32 %v3830_v34, %v3831_v35  ;;  %v3253_v2 = vpop.f32.mrb[116].mxu1  ;;  %5403 = vmatprep.mubr.bf16.mxu0 %v17088_v42  ;;  %v17090_v6 = vld [vmem:[#allocation50_spill] sm:$0xff] }
 0x40b   : > { %v3254_v56 = vadd.f32 %v3253_v2, %v13266_v3  ;;  %v3255_v1 = vpop.f32.mrb[117].mxu1 }
 0x40c   : > { %v4275_v29 = vmax.f32 %v17089_v27, %v4131_v5  ;;  %v3256_v37 = vadd.f32 %v3255_v1, %v13268_v59  ;;  %v3257_v0 = vpop.f32.mrb[118].mxu1  ;;  %v17091_v27 = vld [vmem:[#allocation52_spill] sm:$0xff] }
 0x40d   : > { %v3834_v40 = vmax.f32 %v3254_v56, 0.0  ;;  %v3258_v49 = vadd.f32 %v3257_v0, %v13266_v3  ;;  %v3259_v58 = vpop.f32.mrb[119].mxu1 }
 0x40e   : > { %v3835_v41 = vmax.f32 %v3256_v37, 0.0  ;;  %v3260_v44 = vadd.f32 %v3259_v58, %v13268_v59  ;;  %v14398_v45 = vpack.c.bf16 %v4275_v29, %v4274_v10 }
 0x40f   : > { %v3838_v34 = vmax.f32 %v3258_v49, 0.0 }
 0x410   : > { %v4132_v4 = vmax.f32 %v3834_v40, %v3835_v41  ;;  %v3839_v35 = vmax.f32 %v3260_v44, 0.0 }
 0x411   : > { %5404 = vmatmul.mubr.bf16.gmra.mrb[232].mxu0 %v17082_v53 }
 0x412   : > { %v4276_v2 = vmax.f32 %v17090_v6, %v4132_v4  ;;  %v4133_v5 = vmax.f32 %v3838_v34, %v3839_v35  ;;  %v3263_v42 = vpop.f32.mrb[120].mxu1  ;;  %5413 = vmatprep.mubr.bf16.mxu0 %v13879_v20  ;;  %v17092_v35 = vld [vmem:[#allocation54_spill] sm:$0xff] }
 0x413   : > { %v3264_v56 = vadd.f32 %v3263_v42, %v13266_v3  ;;  %v3265_v1 = vpop.f32.mrb[121].mxu1  ;;  %v17093_v42 = vld [vmem:[#allocation56_spill] sm:$0xff] }
 0x414   : > { %v4277_v37 = vmax.f32 %v17091_v27, %v4133_v5  ;;  %v3266_v0 = vadd.f32 %v3265_v1, %v13268_v59  ;;  %v3267_v10 = vpop.f32.mrb[122].mxu1 }
 0x415   : > { %v3842_v29 = vmax.f32 %v3264_v56, 0.0  ;;  %v3268_v40 = vadd.f32 %v3267_v10, %v13266_v3  ;;  %v3269_v49 = vpop.f32.mrb[123].mxu1  ;;  %v12014_v3 = vld [vmem:[%s16606_s5 + $0x38] sm:$0xff]  }
 0x416   : > { %v3843_v58 = vmax.f32 %v3266_v0, 0.0  ;;  %v3270_v53 = vadd.f32 %v3269_v49, %v13268_v59  ;;  %v14408_v41 = vpack.c.bf16 %v4277_v37, %v4276_v2  ;;  %10483 = vmatprep.subr.bf16.mxu1 %v12014_v3 }
 0x417   : > { %v3846_v44 = vmax.f32 %v3268_v40, 0.0  ;;  %10484 = vmatpush3.bf16.msra.mxu1 %v12014_v3 }
 0x418   : > { %v4134_v34 = vmax.f32 %v3842_v29, %v3843_v58  ;;  %v3847_v4 = vmax.f32 %v3270_v53, 0.0 }
 0x419   : > { %5414 = vmatmul.mubr.bf16.gmra.mrb[236].mxu0 %v13852_v22 }
 0x41a   : > { %v4278_v6 = vmax.f32 %v17092_v35, %v4134_v34  ;;  %v4135_v5 = vmax.f32 %v3846_v44, %v3847_v4  ;;  %5423 = vmatprep.mubr.bf16.mxu0 %v13898_v16 }
 0x41c   : > { %v4279_v56 = vmax.f32 %v17093_v42, %v4135_v5 }
 0x41e   : > { %v14414_v1 = vpack.c.bf16 %v4279_v56, %v4278_v6 }
 0x421   : > { %5424 = vmatmul.mubr.bf16.gmra.mrb[240].mxu0 %v13868_v36 }
 0x422   : > { %5433 = vmatprep.mubr.bf16.mxu0 %v13911_v62 }
 0x429   : > { %5434 = vmatmul.mubr.bf16.gmra.mrb[244].mxu0 %v13879_v20 }
 0x42a   : > { %5443 = vmatprep.mubr.bf16.mxu0 %v13924_v48 }
 0x431   : > { %5444 = vmatmul.mubr.bf16.gmra.mrb[248].mxu0 %v13898_v16 }
 0x432   : > { %5453 = vmatprep.mubr.bf16.mxu0 %v13943_v19 }
 0x439   : > { %5454 = vmatmul.mubr.bf16.gmra.mrb[252].mxu0 %v13911_v62 }
 0x43a   : > { %5463 = vmatprep.mubr.bf16.mxu0 %v13956_v12 }
 0x441   : > { %5464 = vmatmul.mubr.bf16.gmra.mrb[0].mxu0 %v13924_v48 }
 0x442   : > { %5473 = vmatprep.mubr.bf16.mxu0 %v13969_v51 }
 0x449   : > { %5474 = vmatmul.mubr.bf16.gmra.mrb[4].mxu0 %v13943_v19 }
 0x44a   : > { %5483 = vmatprep.mubr.bf16.mxu0 %v13982_v24 }
 0x451   : > { %5484 = vmatmul.mubr.bf16.gmra.mrb[8].mxu0 %v13956_v12  ;;  %v4416_v12 = vld [vmem:[%s16605_s4] sm:$0x3] }
 0x452   : > { %5493 = vmatprep.mubr.bf16.mxu0 %v14002_v46 }
 0x459   : > { %5494 = vmatmul.mubr.bf16.gmra.mrb[12].mxu0 %v13969_v51  ;;  %v17094_v51 = vld [vmem:[#allocation3_spill] sm:$0xff] }
 0x45a   : > { %5503 = vmatprep.mubr.bf16.mxu0 %v14015_v32 }
 0x461   : > { %5504 = vmatmul.mubr.bf16.gmra.mrb[16].mxu0 %v13982_v24  ;;  %v17095_v24 = vsub.s32 0, %v17094_v51 }
 0x462   : > { %5513 = vmatprep.mubr.bf16.mxu0 %v14058_v7 }
 0x463   : > { %v14462_v46 = vrot.slane %v4416_v12, %v17095_v24 }
 0x469   : > { %5514 = vmatmul.mubr.bf16.gmra.mrb[20].mxu0 %v14027_v11 }
 0x46a   : > { %5523 = vmatprep.mubr.bf16.mxu0 %v14071_v50 }
 0x471   : > { %5524 = vmatmul.mubr.bf16.gmra.mrb[24].mxu0 %v14044_v60 }
 0x472   : > { %5533 = vmatprep.mubr.bf16.mxu0 %v14090_v52 }
 0x479   : > { %5534 = vmatmul.mubr.bf16.gmra.mrb[28].mxu0 %v14058_v7  ;;  %v17096_v7 = vsub.s32 1, %v17094_v51 }
 0x47a   : > { %5543 = vmatprep.mubr.bf16.mxu0 %v14103_v8 }
 0x481   : > { %5544 = vmatmul.mubr.bf16.gmra.mrb[32].mxu0 %v14071_v50  ;;  %v14469_v50 = vrot.slane %v4416_v12, %v17096_v7 }
 0x482   : > { %5553 = vmatprep.mubr.bf16.mxu0 %v14122_v17 }
 0x489   : > { %5554 = vmatmul.mubr.bf16.gmra.mrb[36].mxu0 %v14090_v52 }
 0x48a   : > { %5563 = vmatprep.mubr.bf16.mxu0 %v14135_v25 }
 0x491   : > { %5564 = vmatmul.mubr.bf16.gmra.mrb[40].mxu0 %v14103_v8 }
 0x492   : > { %5573 = vmatprep.mubr.bf16.mxu0 %v14147_v18 }
 0x499   : > { %5574 = vmatmul.mubr.bf16.gmra.mrb[44].mxu0 %v14122_v17 }
 0x49a   : > { %5583 = vmatprep.mubr.bf16.mxu0 %v14157_v43 }
 0x49c   : > { %v5315_v59 = vpop.f32.mrb[196].mxu0 }
 0x49d   : > { %v5317_v22 = vpop.f32.mrb[197].mxu0  ;;  %v14493_v10 = vadd.f32 %v5315_v59, %v14462_v46 }
 0x49e   : > { %v5319_v36 = vpop.f32.mrb[198].mxu0  ;;  %v14545_v24 = vadd.f32 %v5317_v22, %v14469_v50 }
 0x49f   : > { %v5321_v20 = vpop.f32.mrb[199].mxu0  ;;  %v14485_v2 = vadd.f32 %v5319_v36, %v14462_v46  ;;  %v16646_v6 = vmax.f32 %v14493_v10, 0.0 }
 0x4a0   : > { %v14531_v36 = vadd.f32 %v5321_v20, %v14469_v50 }
 0x4a1   : > { %5584 = vmatmul.mubr.bf16.gmra.mrb[48].mxu0 %v14135_v25  ;;  %v16653_v58 = vmax.f32 %v14485_v2, 0.0 }
 0x4a2   : > { %5593 = vmatprep.mubr.bf16.mxu0 %v14168_v63 }
 0x4a3   : > { %v11347_v59 = vpack.i.bf16 %v16653_v58, %v16646_v6 }
 0x4a4   : > { %v5325_v16 = vpop.f32.mrb[200].mxu0 }
 0x4a5   : > { %v14453_v62 = vpop.f32.mrb[201].mxu0  ;;  %v14523_v3 = vadd.f32 %v5325_v16, %v14462_v46  ;;  %v14541_v16 = vld [vmem:[%s16606_s5] sm:$0xff]  }
 0x4a6   : > { %v5329_v48 = vpop.f32.mrb[202].mxu0  ;;  %10489 = vmatprep.subr.bf16.mxu1 %v14541_v16 }
 0x4a7   : > { %v5331_v19 = vpop.f32.mrb[203].mxu0  ;;  %v14509_v4 = vadd.f32 %v5329_v48, %v14462_v46  ;;  %v16640_v7 = vmax.f32 %v14523_v3, 0.0 }
 0x4a8   : > { %v14557_v22 = vadd.f32 %v5331_v19, %v14469_v50  ;;  %v14573_v19 = vadd.f32 %v14453_v62, %v14469_v50 }
 0x4a9   : > { %5594 = vmatmul.mubr.bf16.gmra.mrb[52].mxu0 %v14147_v18  ;;  %v16641_v12 = vmax.f32 %v14509_v4, 0.0 }
 0x4aa   : > { %5603 = vmatprep.mubr.bf16.mxu0 %v14178_v21  ;;  %v16648_v62 = vmax.f32 %v14557_v22, 0.0 }
 0x4ac   : > { %v5335_v32 = vpop.f32.mrb[204].mxu0 }
 0x4ad   : > { %v14465_v11 = vadd.f32 %v5335_v32, %v14462_v46  ;;  %v5337_v60 = vpop.f32.mrb[205].mxu0 }
 0x4ae   : > { %v5339_v52 = vpop.f32.mrb[206].mxu0  ;;  %v14479_v63 = vadd.f32 %v5337_v60, %v14469_v50 }
 0x4af   : > { %v14472_v8 = vadd.f32 %v5339_v52, %v14462_v46  ;;  %v5341_v17 = vpop.f32.mrb[207].mxu0  ;;  %v16670_v18 = vmax.f32 %v14465_v11, 0.0 }
 0x4b0   : > { %v14475_v25 = vadd.f32 %v5341_v17, %v14469_v50  ;;  %v16664_v29 = vmax.f32 %v14479_v63, 0.0  ;;  %v16645_v17 = vmax.f32 %v14531_v36, 0.0 }
 0x4b1   : > { %v16671_v21 = vmax.f32 %v14472_v8, 0.0  ;;  %5604 = vmatmul.mubr.bf16.gmra.mrb[56].mxu0 %v14157_v43 }
 0x4b2   : > { %5613 = vmatprep.mubr.bf16.mxu0 %v14203_v31  ;;  %v16667_v27 = vmax.f32 %v14475_v25, 0.0 }
 0x4b3   : > { %v11327_v37 = vpack.i.bf16 %v16671_v21, %v16670_v18 }
 0x4b4   : > { %v5345_v0 = vpop.f32.mrb[208].mxu0  ;;  %v11332_v53 = vpack.i.bf16 %v16667_v27, %v16664_v29 }
 0x4b5   : > { %v14497_v43 = vadd.f32 %v5345_v0, %v14462_v46  ;;  %v5347_v40 = vpop.f32.mrb[209].mxu0  ;;  %11328 = vrot.lane.b32.xlu0 %v11327_v37, %s12217_s22 }
 0x4b6   : > { %v5349_v49 = vpop.f32.mrb[210].mxu0  ;;  %v14517_v42 = vadd.f32 %v5347_v40, %v14469_v50 }
 0x4b7   : > { %v14506_v44 = vadd.f32 %v5349_v49, %v14462_v46  ;;  %v5351_v34 = vpop.f32.mrb[211].mxu0  ;;  %v16660_v5 = vmax.f32 %v14497_v43, 0.0  ;;  %v11357_v49 = vpack.i.bf16 %v16641_v12, %v16640_v7 }
 0x4b8   : > { %v14512_v35 = vadd.f32 %v5351_v34, %v14469_v50  ;;  %v16654_v20 = vmax.f32 %v14517_v42, 0.0 }
 0x4b9   : > { %v16663_v56 = vmax.f32 %v14506_v44, 0.0  ;;  %5614 = vmatmul.mubr.bf16.gmra.mrb[60].mxu0 %v14187_v55  ;;  %11333 = vrot.lane.b32.xlu0 %v11332_v53, %s12217_s22  ;;  %v16642_v53 = vmax.f32 %v14545_v24, 0.0 }
 0x4ba   : > { %5623 = vmatprep.mubr.bf16.mxu0 %v14213_v33  ;;  %v16657_v48 = vmax.f32 %v14512_v35, 0.0 }
 0x4bb   : > { %v11337_v55 = vpack.i.bf16 %v16663_v56, %v16660_v5 }
 0x4bc   : > { %v5355_v51 = vpop.f32.mrb[212].mxu0  ;;  %v11342_v37 = vpack.i.bf16 %v16657_v48, %v16654_v20 }
 0x4bd   : > { %v14549_v32 = vadd.f32 %v5355_v51, %v14462_v46  ;;  %v5357_v60 = vpop.f32.mrb[213].mxu0  ;;  %11338 = vrot.lane.b32.xlu1 %v11337_v55, %s12217_s22  ;;  %11348 = vrot.lane.b32.xlu0 %v11347_v59, %s12217_s22  ;;  %v11352_v55 = vpack.i.bf16 %v16645_v17, %v16642_v53 }
 0x4be   : > { %v5359_v52 = vpop.f32.mrb[214].mxu0 }
 0x4bf   : > { %v14564_v0 = vadd.f32 %v5359_v52, %v14462_v46  ;;  %v5361_v40 = vpop.f32.mrb[215].mxu0  ;;  %v16643_v34 = vmax.f32 %v14549_v32, 0.0 }
 0x4c1   : > { %v16644_v59 = vmax.f32 %v14564_v0, 0.0  ;;  %5624 = vmatmul.mubr.bf16.gmra.mrb[64].mxu0 %v14195_v13  ;;  %11343 = vrot.lane.b32.xlu1 %v11342_v37, %s12217_s22  ;;  %v14591_v13 = vadd.f32 %v5361_v40, %v14469_v50  ;;  %v16647_v37 = vmax.f32 %v14573_v19, 0.0 }
 0x4c2   : > { %11358 = vrot.lane.b32.xlu0 %v11357_v49, %s12217_s22  ;;  %5633 = vmatprep.mubr.bf16.mxu0 %v14223_v39  ;;  %v14595_v49 = vadd.f32 %v5357_v60, %v14469_v50 }
 0x4c3   : > { %v11367_v51 = vpack.i.bf16 %v16644_v59, %v16643_v34  ;;  %v11362_v40 = vpack.i.bf16 %v16648_v62, %v16647_v37  ;;  %v16650_v34 = vmax.f32 %v14591_v13, 0.0 }
 0x4c4   : > { %v5365_v52 = vpop.f32.mrb[216].mxu0  ;;  %v16649_v17 = vmax.f32 %v14595_v49, 0.0 }
 0x4c5   : > { %v14598_v7 = vadd.f32 %v5365_v52, %v14462_v46  ;;  %v5367_v12 = vpop.f32.mrb[217].mxu0  ;;  %11353 = vrot.lane.b32.xlu1 %v11352_v55, %s12217_s22 }
 0x4c6   : > { %11368 = vrot.lane.b32.xlu0 %v11367_v51, %s12217_s22  ;;  %v5369_v53 = vpop.f32.mrb[218].mxu0  ;;  %v14616_v51 = vadd.f32 %v5367_v12, %v14469_v50 }
 0x4c7   : > { %v14608_v59 = vadd.f32 %v5369_v53, %v14462_v46  ;;  %v5371_v60 = vpop.f32.mrb[219].mxu0  ;;  %v16651_v55 = vmax.f32 %v14598_v7, 0.0  ;;  %v11372_v53 = vpack.i.bf16 %v16650_v34, %v16649_v17 }
 0x4c8   : > { %v14611_v52 = vadd.f32 %v5371_v60, %v14469_v50  ;;  %v16655_v62 = vmax.f32 %v14616_v51, 0.0 }
 0x4c9   : > { %v16652_v6 = vmax.f32 %v14608_v59, 0.0  ;;  %5634 = vmatmul.mubr.bf16.gmra.mrb[68].mxu0 %v14203_v31  ;;  %11363 = vrot.lane.b32.xlu1 %v11362_v40, %s12217_s22 }
 0x4ca   : > { %5643 = vmatprep.mubr.bf16.mxu0 %v14233_v28  ;;  %v16656_v12 = vmax.f32 %v14611_v52, 0.0 }
 0x4cb   : > { %v11377_v60 = vpack.i.bf16 %v16652_v6, %v16651_v55 }
 0x4cc   : > { %v5375_v37 = vpop.f32.mrb[220].mxu0  ;;  %v11382_v55 = vpack.i.bf16 %v16656_v12, %v16655_v62 }
 0x4cd   : > { %v14633_v31 = vadd.f32 %v5375_v37, %v14462_v46  ;;  %v5377_v40 = vpop.f32.mrb[221].mxu0  ;;  %11373 = vrot.lane.b32.xlu1 %v11372_v53, %s12217_s22  ;;  %11378 = vrot.lane.b32.xlu0 %v11377_v60, %s12217_s22 }
 0x4ce   : > { %v14638_v17 = vadd.f32 %v5377_v40, %v14469_v50  ;;  %v5379_v34 = vpop.f32.mrb[222].mxu0 }
 0x4cf   : > { %v14645_v6 = vadd.f32 %v5379_v34, %v14462_v46  ;;  %v5381_v58 = vpop.f32.mrb[223].mxu0  ;;  %v16658_v53 = vmax.f32 %v14633_v31, 0.0 }
 0x4d0   : > { %v14648_v37 = vadd.f32 %v5381_v58, %v14469_v50  ;;  %v16661_v40 = vmax.f32 %v14638_v17, 0.0 }
 0x4d1   : > { %v16659_v60 = vmax.f32 %v14645_v6, 0.0  ;;  %5644 = vmatmul.mubr.bf16.gmra.mrb[72].mxu0 %v14213_v33  ;;  %11383 = vrot.lane.b32.xlu1 %v11382_v55, %s12217_s22 }
 0x4d2   : > { %v16662_v20 = vmax.f32 %v14648_v37, 0.0  ;;  %5653 = vmatprep.mubr.bf16.mxu0 %v14243_v54 }
 0x4d3   : > { %v11387_v58 = vpack.i.bf16 %v16659_v60, %v16658_v53 }
 0x4d4   : > { %v11392_v34 = vpack.i.bf16 %v16662_v20, %v16661_v40  ;;  %v5385_v62 = vpop.f32.mrb[224].mxu0 }
 0x4d5   : > { %v14666_v33 = vadd.f32 %v5385_v62, %v14462_v46  ;;  %v5387_v55 = vpop.f32.mrb[225].mxu0  ;;  %11388 = vrot.lane.b32.xlu0 %v11387_v58, %s12217_s22 }
 0x4d6   : > { %v14670_v12 = vadd.f32 %v5387_v55, %v14469_v50  ;;  %v5389_v48 = vpop.f32.mrb[226].mxu0  ;;  %11393 = vrot.lane.b32.xlu1 %v11392_v34, %s12217_s22 }
 0x4d7   : > { %v14674_v53 = vadd.f32 %v5389_v48, %v14462_v46  ;;  %v5391_v60 = vpop.f32.mrb[227].mxu0  ;;  %v16665_v40 = vmax.f32 %v14666_v33, 0.0 }
 0x4d8   : > { %v14677_v5 = vadd.f32 %v5391_v60, %v14469_v50  ;;  %v16668_v58 = vmax.f32 %v14670_v12, 0.0 }
 0x4d9   : > { %v16666_v62 = vmax.f32 %v14674_v53, 0.0  ;;  %5654 = vmatmul.mubr.bf16.gmra.mrb[76].mxu0 %v14223_v39 }
 0x4da   : > { %v16669_v55 = vmax.f32 %v14677_v5, 0.0  ;;  %5663 = vmatprep.mubr.bf16.mxu0 %v14256_v23 }
 0x4db   : > { %v11397_v48 = vpack.i.bf16 %v16666_v62, %v16665_v40 }
 0x4dc   : > { %v11402_v60 = vpack.i.bf16 %v16669_v55, %v16668_v58  ;;  %v5395_v34 = vpop.f32.mrb[228].mxu0 }
 0x4dd   : > { %v14694_v20 = vadd.f32 %v5395_v34, %v14462_v46  ;;  %v5397_v39 = vpop.f32.mrb[229].mxu0  ;;  %11398 = vrot.lane.b32.xlu0 %v11397_v48, %s12217_s22 }
 0x4de   : > { %v14698_v56 = vadd.f32 %v5397_v39, %v14469_v50  ;;  %v5399_v29 = vpop.f32.mrb[230].mxu0  ;;  %11403 = vrot.lane.b32.xlu1 %v11402_v60, %s12217_s22 }
 0x4df   : > { %17097 = vst [vmem:[#allocation47_spill] sm:$0xff] %v14694_v20  ;;  %v14702_v40 = vadd.f32 %v5399_v29, %v14462_v46  ;;  %v5401_v62 = vpop.f32.mrb[231].mxu0  ;;  %v16672_v58 = vmax.f32 %v14694_v20, 0.0 }
 0x4e0   : > { %17098 = vst [vmem:[#allocation70_spill] sm:$0xff] %v14698_v56  ;;  %v14705_v27 = vadd.f32 %v5401_v62, %v14469_v50  ;;  %v16675_v48 = vmax.f32 %v14698_v56, 0.0 }
 0x4e1   : > { %v16673_v34 = vmax.f32 %v14702_v40, 0.0  ;;  %5664 = vmatmul.mubr.bf16.gmra.mrb[80].mxu0 %v14233_v28 }
 0x4e2   : > { %17099 = vst [vmem:[#allocation51_spill] sm:$0xff] %v14705_v27  ;;  %v16676_v39 = vmax.f32 %v14705_v27, 0.0  ;;  %5673 = vmatprep.mubr.bf16.mxu0 %v14266_v38 }
 0x4e3   : > { %v11407_v29 = vpack.i.bf16 %v16673_v34, %v16672_v58 }
 0x4e4   : > { %v11412_v62 = vpack.i.bf16 %v16676_v39, %v16675_v48  ;;  %v5405_v60 = vpop.f32.mrb[232].mxu0 }
 0x4e5   : > { %v14722_v55 = vadd.f32 %v5405_v60, %v14462_v46  ;;  %v5407_v28 = vpop.f32.mrb[233].mxu0  ;;  %11408 = vrot.lane.b32.xlu0 %v11407_v29, %s12217_s22 }
 0x4e6   : > { %v14726_v18 = vadd.f32 %v5407_v28, %v14469_v50  ;;  %v5409_v21 = vpop.f32.mrb[234].mxu0  ;;  %11413 = vrot.lane.b32.xlu1 %v11412_v62, %s12217_s22 }
 0x4e7   : > { %17100 = vst [vmem:[#allocation71_spill] sm:$0xff] %v14722_v55  ;;  %v14730_v58 = vadd.f32 %v5409_v21, %v14462_v46  ;;  %v5411_v34 = vpop.f32.mrb[235].mxu0  ;;  %v16679_v48 = vmax.f32 %v14722_v55, 0.0 }
 0x4e8   : > { %17101 = vst [vmem:[#allocation55_spill] sm:$0xff] %v14726_v18  ;;  %v14733_v56 = vadd.f32 %v5411_v34, %v14469_v50  ;;  %v16682_v29 = vmax.f32 %v14726_v18, 0.0 }
 0x4e9   : > { %v16680_v60 = vmax.f32 %v14730_v58, 0.0  ;;  %5674 = vmatmul.mubr.bf16.gmra.mrb[84].mxu0 %v14243_v54 }
 0x4ea   : > { %17102 = vst [vmem:[#allocation59_spill] sm:$0xff] %v14733_v56  ;;  %v16683_v28 = vmax.f32 %v14733_v56, 0.0  ;;  %5683 = vmatprep.mubr.bf16.mxu0 %v14276_v47 }
 0x4eb   : > { %v11417_v21 = vpack.i.bf16 %v16680_v60, %v16679_v48 }
 0x4ec   : > { %v11422_v34 = vpack.i.bf16 %v16683_v28, %v16682_v29  ;;  %v5415_v62 = vpop.f32.mrb[236].mxu0 }
 0x4ed   : > { %v14750_v39 = vadd.f32 %v5415_v62, %v14462_v46  ;;  %v5417_v54 = vpop.f32.mrb[237].mxu0  ;;  %11418 = vrot.lane.b32.xlu0 %v11417_v21, %s12217_s22 }
 0x4ee   : > { %v14754_v27 = vadd.f32 %v5417_v54, %v14469_v50  ;;  %v5419_v20 = vpop.f32.mrb[238].mxu0  ;;  %11423 = vrot.lane.b32.xlu1 %v11422_v34, %s12217_s22 }
 0x4ef   : > { %17103 = vst [vmem:[#allocation4_spill] sm:$0xff] %v14750_v39  ;;  %v14758_v48 = vadd.f32 %v5419_v20, %v14462_v46  ;;  %v5421_v60 = vpop.f32.mrb[239].mxu0  ;;  %v16685_v29 = vmax.f32 %v14750_v39, 0.0  ;;  %v17137_v39 = vmax.f32 %v14472_v8, 0.0 }
 0x4f0   : > { %17104 = vst [vmem:[#allocation5_spill] sm:$0xff] %v14754_v27  ;;  %v14761_v18 = vadd.f32 %v5421_v60, %v14469_v50  ;;  %v16688_v21 = vmax.f32 %v14754_v27, 0.0 }
 0x4f1   : > { %17105 = vst [vmem:[#allocation6_spill] sm:$0xff] %v14758_v48  ;;  %v16686_v62 = vmax.f32 %v14758_v48, 0.0  ;;  %5684 = vmatmul.mubr.bf16.gmra.mrb[88].mxu0 %v14256_v23 }
 0x4f2   : > { %17106 = vst [vmem:[#allocation7_spill] sm:$0xff] %v14761_v18  ;;  %v16689_v54 = vmax.f32 %v14761_v18, 0.0  ;;  %5693 = vmatprep.mubr.bf16.mxu0 %v14287_v14 }
 0x4f3   : > { %v11427_v20 = vpack.i.bf16 %v16686_v62, %v16685_v29 }
 0x4f4   : > { %v11432_v60 = vpack.i.bf16 %v16689_v54, %v16688_v21  ;;  %v5425_v34 = vpop.f32.mrb[240].mxu0 }
 0x4f5   : > { %v14778_v28 = vadd.f32 %v5425_v34, %v14462_v46  ;;  %v5427_v23 = vpop.f32.mrb[241].mxu0  ;;  %11428 = vrot.lane.b32.xlu0 %v11427_v20, %s12217_s22 }
 0x4f6   : > { %v14782_v56 = vadd.f32 %v5427_v23, %v14469_v50  ;;  %v5429_v14 = vpop.f32.mrb[242].mxu0  ;;  %11433 = vrot.lane.b32.xlu1 %v11432_v60, %s12217_s22 }
 0x4f7   : > { %17107 = vst [vmem:[#allocation8_spill] sm:$0xff] %v14778_v28  ;;  %v14786_v29 = vadd.f32 %v5429_v14, %v14462_v46  ;;  %v5431_v62 = vpop.f32.mrb[243].mxu0  ;;  %v16691_v21 = vmax.f32 %v14778_v28, 0.0 }
 0x4f8   : > { %17108 = vst [vmem:[#allocation9_spill] sm:$0xff] %v14782_v56  ;;  %v14789_v27 = vadd.f32 %v5431_v62, %v14469_v50  ;;  %v16694_v20 = vmax.f32 %v14782_v56, 0.0 }
 0x4f9   : > { %17109 = vst [vmem:[#allocation10_spill] sm:$0xff] %v14786_v29  ;;  %v16692_v34 = vmax.f32 %v14786_v29, 0.0  ;;  %5694 = vmatmul.mubr.bf16.gmra.mrb[92].mxu0 %v14266_v38 }
 0x4fa   : > { %17110 = vst [vmem:[#allocation11_spill] sm:$0xff] %v14789_v27  ;;  %v16695_v23 = vmax.f32 %v14789_v27, 0.0  ;;  %5703 = vmatprep.mubr.bf16.mxu0 %v14297_v9 }
 0x4fb   : > { %v11437_v60 = vpack.i.bf16 %v16692_v34, %v16691_v21 }
 0x4fc   : > { %v11442_v62 = vpack.i.bf16 %v16695_v23, %v16694_v20  ;;  %v5435_v14 = vpop.f32.mrb[244].mxu0 }
 0x4fd   : > { %v14806_v54 = vadd.f32 %v5435_v14, %v14462_v46  ;;  %v5437_v38 = vpop.f32.mrb[245].mxu0  ;;  %11438 = vrot.lane.b32.xlu0 %v11437_v60, %s12217_s22 }
 0x4fe   : > { %v14810_v18 = vadd.f32 %v5437_v38, %v14469_v50  ;;  %v5439_v9 = vpop.f32.mrb[246].mxu0  ;;  %11443 = vrot.lane.b32.xlu1 %v11442_v62, %s12217_s22 }
 0x4ff   : > { %17111 = vst [vmem:[#allocation12_spill] sm:$0xff] %v14806_v54  ;;  %v14814_v21 = vadd.f32 %v5439_v9, %v14462_v46  ;;  %v5441_v34 = vpop.f32.mrb[247].mxu0  ;;  %v16698_v20 = vmax.f32 %v14806_v54, 0.0 }
 0x500   : > { %17112 = vst [vmem:[#allocation13_spill] sm:$0xff] %v14810_v18  ;;  %v14817_v56 = vadd.f32 %v5441_v34, %v14469_v50  ;;  %v16701_v60 = vmax.f32 %v14810_v18, 0.0 }
 0x501   : > { %17113 = vst [vmem:[#allocation14_spill] sm:$0xff] %v14814_v21  ;;  %v16699_v14 = vmax.f32 %v14814_v21, 0.0  ;;  %5704 = vmatmul.mubr.bf16.gmra.mrb[96].mxu0 %v14276_v47 }
 0x502   : > { %17114 = vst [vmem:[#allocation15_spill] sm:$0xff] %v14817_v56  ;;  %v16702_v38 = vmax.f32 %v14817_v56, 0.0  ;;  %5713 = vmatprep.mubr.bf16.mxu0 %v14328_v57 }
 0x503   : > { %v11447_v62 = vpack.i.bf16 %v16699_v14, %v16698_v20 }
 0x504   : > { %v11452_v34 = vpack.i.bf16 %v16702_v38, %v16701_v60  ;;  %v5445_v9 = vpop.f32.mrb[248].mxu0 }
 0x505   : > { %v14834_v23 = vadd.f32 %v5445_v9, %v14462_v46  ;;  %v5447_v47 = vpop.f32.mrb[249].mxu0  ;;  %11448 = vrot.lane.b32.xlu0 %v11447_v62, %s12217_s22 }
 0x506   : > { %v14838_v27 = vadd.f32 %v5447_v47, %v14469_v50  ;;  %v5449_v28 = vpop.f32.mrb[250].mxu0  ;;  %11453 = vrot.lane.b32.xlu1 %v11452_v34, %s12217_s22 }
 0x507   : > { %17115 = vst [vmem:[#allocation16_spill] sm:$0xff] %v14834_v23  ;;  %v14842_v20 = vadd.f32 %v5449_v28, %v14462_v46  ;;  %v5451_v14 = vpop.f32.mrb[251].mxu0  ;;  %v16705_v60 = vmax.f32 %v14834_v23, 0.0 }
 0x508   : > { %17116 = vst [vmem:[#allocation17_spill] sm:$0xff] %v14838_v27  ;;  %v14845_v18 = vadd.f32 %v5451_v14, %v14469_v50  ;;  %v16708_v62 = vmax.f32 %v14838_v27, 0.0 }
 0x509   : > { %17117 = vst [vmem:[#allocation18_spill] sm:$0xff] %v14842_v20  ;;  %v16706_v9 = vmax.f32 %v14842_v20, 0.0  ;;  %5714 = vmatmul.mubr.bf16.gmra.mrb[100].mxu0 %v14307_v61 }
 0x50a   : > { %17118 = vst [vmem:[#allocation19_spill] sm:$0xff] %v14845_v18  ;;  %v16709_v47 = vmax.f32 %v14845_v18, 0.0  ;;  %5723 = vmatprep.mubr.bf16.mxu0 %v14338_v15  ;;  %v17124_v18 = vld [vmem:[#allocation61_spill] sm:$0xff] }
 0x50b   : > { %v11457_v28 = vpack.i.bf16 %v16706_v9, %v16705_v60 }
 0x50c   : > { %v11462_v14 = vpack.i.bf16 %v16709_v47, %v16708_v62  ;;  %v5455_v34 = vpop.f32.mrb[252].mxu0  ;;  %v17123_v47 = vld [vmem:[#allocation60_spill] sm:$0xff] }
 0x50d   : > { %v14862_v38 = vadd.f32 %v5455_v34, %v14462_v46  ;;  %v5457_v61 = vpop.f32.mrb[253].mxu0  ;;  %11458 = vrot.lane.b32.xlu0 %v11457_v28, %s12217_s22 }
 0x50e   : > { %v14866_v56 = vadd.f32 %v5457_v61, %v14469_v50  ;;  %v5459_v54 = vpop.f32.mrb[254].mxu0  ;;  %11463 = vrot.lane.b32.xlu1 %v11462_v14, %s12217_s22 }
 0x50f   : > { %17119 = vst [vmem:[#allocation20_spill] sm:$0xff] %v14862_v38  ;;  %v14870_v60 = vadd.f32 %v5459_v54, %v14462_v46  ;;  %v5461_v9 = vpop.f32.mrb[255].mxu0  ;;  %v16714_v62 = vmax.f32 %v14862_v38, 0.0 }
 0x510   : > { %17120 = vst [vmem:[#allocation21_spill] sm:$0xff] %v14866_v56  ;;  %v14873_v27 = vadd.f32 %v5461_v9, %v14469_v50  ;;  %v16717_v28 = vmax.f32 %v14866_v56, 0.0 }
 0x511   : > { %17121 = vst [vmem:[#allocation22_spill] sm:$0xff] %v14870_v60  ;;  %v16715_v34 = vmax.f32 %v14870_v60, 0.0  ;;  %5724 = vmatmul.mubr.bf16.gmra.mrb[104].mxu0 %v17123_v47 }
 0x512   : > { %17122 = vst [vmem:[#allocation23_spill] sm:$0xff] %v14873_v27  ;;  %v16718_v61 = vmax.f32 %v14873_v27, 0.0  ;;  %5733 = vmatprep.mubr.bf16.mxu0 %v17124_v18 }
 0x513   : > { %v11467_v54 = vpack.i.bf16 %v16715_v34, %v16714_v62 }
 0x514   : > { %v11472_v9 = vpack.i.bf16 %v16718_v61, %v16717_v28  ;;  %v5465_v14 = vpop.f32.mrb[0].mxu0  ;;  %v17129_v61 = vld [vmem:[#allocation43_spill] sm:$0xff] }
 0x515   : > { %v14890_v23 = vadd.f32 %v5465_v14, %v14462_v46  ;;  %v5467_v47 = vpop.f32.mrb[1].mxu0  ;;  %11468 = vrot.lane.b32.xlu0 %v11467_v54, %s12217_s22 }
 0x516   : > { %v14894_v20 = vadd.f32 %v5467_v47, %v14469_v50  ;;  %v5469_v21 = vpop.f32.mrb[2].mxu0  ;;  %11473 = vrot.lane.b32.xlu1 %v11472_v9, %s12217_s22 }
 0x517   : > { %17125 = vst [vmem:[#allocation24_spill] sm:$0xff] %v14890_v23  ;;  %v14898_v62 = vadd.f32 %v5469_v21, %v14462_v46  ;;  %v5471_v34 = vpop.f32.mrb[3].mxu0  ;;  %v16722_v28 = vmax.f32 %v14890_v23, 0.0 }
 0x518   : > { %17126 = vst [vmem:[#allocation25_spill] sm:$0xff] %v14894_v20  ;;  %v14901_v56 = vadd.f32 %v5471_v34, %v14469_v50  ;;  %v16725_v54 = vmax.f32 %v14894_v20, 0.0 }
 0x519   : > { %17127 = vst [vmem:[#allocation26_spill] sm:$0xff] %v14898_v62  ;;  %v16723_v14 = vmax.f32 %v14898_v62, 0.0  ;;  %5734 = vmatmul.mubr.bf16.gmra.mrb[108].mxu0 %v14328_v57 }
 0x51a   : > { %17128 = vst [vmem:[#allocation64_spill] sm:$0xff] %v14901_v56  ;;  %v16726_v47 = vmax.f32 %v14901_v56, 0.0  ;;  %5743 = vmatprep.mubr.bf16.mxu0 %v17129_v61 }
 0x51b   : > { %v11477_v21 = vpack.i.bf16 %v16723_v14, %v16722_v28 }
 0x51c   : > { %v11482_v34 = vpack.i.bf16 %v16726_v47, %v16725_v54  ;;  %v5475_v9 = vpop.f32.mrb[4].mxu0  ;;  %v17134_v47 = vld [vmem:[#allocation69_spill] sm:$0xff] }
 0x51d   : > { %v14918_v27 = vadd.f32 %v5475_v9, %v14462_v46  ;;  %v5477_v57 = vpop.f32.mrb[5].mxu0  ;;  %11478 = vrot.lane.b32.xlu0 %v11477_v21, %s12217_s22 }
 0x51e   : > { %v14922_v38 = vadd.f32 %v5477_v57, %v14469_v50  ;;  %v5479_v60 = vpop.f32.mrb[6].mxu0  ;;  %11483 = vrot.lane.b32.xlu1 %v11482_v34, %s12217_s22 }
 0x51f   : > { %17130 = vst [vmem:[#allocation27_spill] sm:$0xff] %v14918_v27  ;;  %v14926_v28 = vadd.f32 %v5479_v60, %v14462_v46  ;;  %v5481_v14 = vpop.f32.mrb[7].mxu0  ;;  %v16730_v54 = vmax.f32 %v14918_v27, 0.0 }
 0x520   : > { %17131 = vst [vmem:[#allocation62_spill] sm:$0xff] %v14922_v38  ;;  %v14929_v20 = vadd.f32 %v5481_v14, %v14469_v50  ;;  %v16733_v21 = vmax.f32 %v14922_v38, 0.0 }
 0x521   : > { %17132 = vst [vmem:[#allocation28_spill] sm:$0xff] %v14926_v28  ;;  %v16731_v9 = vmax.f32 %v14926_v28, 0.0  ;;  %5744 = vmatmul.mubr.bf16.gmra.mrb[112].mxu0 %v14338_v15 }
 0x522   : > { %17133 = vst [vmem:[#allocation65_spill] sm:$0xff] %v14929_v20  ;;  %v16734_v57 = vmax.f32 %v14929_v20, 0.0  ;;  %5753 = vmatprep.mubr.bf16.mxu0 %v17134_v47 }
 0x523   : > { %v11487_v60 = vpack.i.bf16 %v16731_v9, %v16730_v54 }
 0x524   : > { %v11492_v14 = vpack.i.bf16 %v16734_v57, %v16733_v21  ;;  %v5485_v34 = vpop.f32.mrb[8].mxu0 }
 0x525   : > { %v14946_v56 = vadd.f32 %v5485_v34, %v14462_v46  ;;  %v5487_v15 = vpop.f32.mrb[9].mxu0  ;;  %11488 = vrot.lane.b32.xlu0 %v11487_v60, %s12217_s22 }
 0x526   : > { %v14950_v23 = vadd.f32 %v5487_v15, %v14469_v50  ;;  %v5489_v62 = vpop.f32.mrb[10].mxu0  ;;  %11493 = vrot.lane.b32.xlu1 %v11492_v14, %s12217_s22 }
 0x527   : > { %17135 = vst [vmem:[#allocation29_spill] sm:$0xff] %v14946_v56  ;;  %v14954_v54 = vadd.f32 %v5489_v62, %v14462_v46  ;;  %v5491_v9 = vpop.f32.mrb[11].mxu0  ;;  %v11329_v38 = vpop.permute.xlu0 %11328  ;;  %v16742_v34 = vmax.f32 %v14946_v56, 0.0 }
 0x528   : > { %17136 = vst [vmem:[#allocation63_spill] sm:$0xff] %v14950_v23  ;;  %v14957_v21 = vadd.f32 %v5491_v9, %v14469_v50  ;;  %v11331_v20 = vunpack.i.h.bf16 %v11329_v38  ;;  %v16746_v60 = vmax.f32 %v14950_v23, 0.0  ;;  %v11330_v14 = vunpack.i.l.bf16 %v11329_v38 }
 0x529   : > { %v16743_v57 = vmax.f32 %v14954_v54, 0.0  ;;  %5754 = vmatmul.mubr.bf16.gmra.mrb[116].mxu0 %v17124_v18  ;;  %v17139_v23 = vmax.f32 %v14475_v25, 0.0 }
 0x52a   : > { %v16747_v15 = vmax.f32 %v14957_v21, 0.0  ;;  %5763 = vmatprep.mubr.bf16.mxu0 %v14378_v26  ;;  %v6419_v48 = vmax.f32 %v17137_v39, %v11331_v20 }
 0x52b   : > { %v11497_v62 = vpack.i.bf16 %v16743_v57, %v16742_v34  ;;  %v11334_v9 = vpop.permute.xlu0 %11333  ;;  %v17138_v34 = vmax.f32 %v14465_v11, 0.0 }
 0x52c   : > { %v11502_v27 = vpack.i.bf16 %v16747_v15, %v16746_v60  ;;  %v11336_v28 = vunpack.i.h.bf16 %v11334_v9  ;;  %v11335_v18 = vunpack.i.l.bf16 %v11334_v9  ;;  %v5495_v29 = vpop.f32.mrb[12].mxu0  ;;  %v17140_v60 = vmax.f32 %v14479_v63, 0.0 }
 0x52d   : > { %v14976_v38 = vadd.f32 %v5495_v29, %v14462_v46  ;;  %v5497_v55 = vpop.f32.mrb[13].mxu0  ;;  %11498 = vrot.lane.b32.xlu0 %v11497_v62, %s12217_s22  ;;  %v6418_v57 = vmax.f32 %v17138_v34, %v11330_v14 }
 0x52e   : > { %v6919_v56 = vmax.f32 %v17139_v23, %v11336_v28  ;;  %v6918_v15 = vmax.f32 %v17140_v60, %v11335_v18  ;;  %v14986_v9 = vadd.f32 %v5497_v55, %v14469_v50  ;;  %v5499_v8 = vpop.f32.mrb[14].mxu0  ;;  %11503 = vrot.lane.b32.xlu1 %v11502_v27, %s12217_s22 }
 0x52f   : > { %v14990_v39 = vadd.f32 %v5499_v8, %v14462_v46  ;;  %v5501_v29 = vpop.f32.mrb[15].mxu0  ;;  %v11339_v20 = vpop.permute.xlu1 %11338  ;;  %v16748_v63 = vmax.f32 %v14976_v38, 0.0  ;;  %v17142_v8 = vmax.f32 %v14506_v44, 0.0 }
 0x530   : > { %17141 = vst [vmem:[#allocation30_spill] sm:$0xff] %v14986_v9  ;;  %v7018_v62 = vmax.f32 %v6418_v57, %v6918_v15  ;;  %v7019_v11 = vmax.f32 %v6419_v48, %v6919_v56  ;;  %v14993_v34 = vadd.f32 %v5501_v29, %v14469_v50  ;;  %v11349_v25 = vpop.permute.xlu0 %11348  ;;  %v11341_v55 = vunpack.i.h.bf16 %v11339_v20 }
 0x531   : > { %v16749_v23 = vmax.f32 %v14990_v39, 0.0  ;;  %5764 = vmatmul.mubr.bf16.gmra.mrb[120].mxu0 %v17129_v61  ;;  %v16750_v27 = vmax.f32 %v14986_v9, 0.0  ;;  %v11340_v60 = vunpack.i.l.bf16 %v11339_v20  ;;  %v11351_v20 = vunpack.i.h.bf16 %v11349_v25 }
 0x532   : > { %v16751_v28 = vmax.f32 %v14993_v34, 0.0  ;;  %5773 = vmatprep.mubr.bf16.mxu0 %v14388_v30  ;;  %v7116_v56 = vpack.c.bf16 %v7019_v11, %v7018_v62  ;;  %v6421_v29 = vmax.f32 %v17142_v8, %v11341_v55 }
 0x533   : > { %v11507_v48 = vpack.i.bf16 %v16749_v23, %v16748_v63  ;;  %v11344_v57 = vpop.permute.xlu1 %11343  ;;  %v17143_v63 = vmax.f32 %v14497_v43, 0.0 }
 0x534   : > { %v11512_v61 = vpack.i.bf16 %v16751_v28, %v16750_v27  ;;  %v11346_v15 = vunpack.i.h.bf16 %v11344_v57  ;;  %v11345_v14 = vunpack.i.l.bf16 %v11344_v57  ;;  %v5505_v18 = vpop.f32.mrb[16].mxu0  ;;  %10485 = vmatprep.mubr.msk.bf16.mxu1 %vm7205_vm2, %v7116_v56  ;;  %v17144_v27 = vmax.f32 %v14512_v35, 0.0  ;;  %v15022_v56 = vpop.permute.xlu0 %11358 }
 0x535   : > { %v15013_v62 = vadd.f32 %v5505_v18, %v14462_v46  ;;  %v5507_v11 = vpop.f32.mrb[17].mxu0  ;;  %11508 = vrot.lane.b32.xlu0 %v11507_v48, %s12217_s22  ;;  %v6420_v23 = vmax.f32 %v17143_v63, %v11340_v60  ;;  %v17145_v57 = vmax.f32 %v14517_v42, 0.0  ;;  %v11350_v18 = vunpack.i.l.bf16 %v11349_v25 }
 0x536   : > { %v6921_v28 = vmax.f32 %v17144_v27, %v11346_v15  ;;  %v15025_v44 = vadd.f32 %v5507_v11, %v14469_v50  ;;  %v5509_v55 = vpop.f32.mrb[18].mxu0  ;;  %11513 = vrot.lane.b32.xlu1 %v11512_v61, %s12217_s22  ;;  %v17146_v25 = vmax.f32 %v14485_v2, 0.0 }
 0x537   : > { %v6920_v9 = vmax.f32 %v17145_v57, %v11345_v14  ;;  %v15029_v48 = vadd.f32 %v5509_v55, %v14462_v46  ;;  %v5511_v43 = vpop.f32.mrb[19].mxu0  ;;  %v11354_v63 = vpop.permute.xlu1 %11353  ;;  %v16755_v42 = vmax.f32 %v15013_v62, 0.0  ;;  %v17149_v55 = vmax.f32 %v14545_v24, 0.0 }
 0x538   : > { %v7021_v35 = vmax.f32 %v6421_v29, %v6921_v28  ;;  %v15032_v27 = vadd.f32 %v5511_v43, %v14469_v50  ;;  %v11356_v14 = vunpack.i.h.bf16 %v11354_v63  ;;  %v11355_v8 = vunpack.i.l.bf16 %v11354_v63 }
 0x539   : > { %v7020_v60 = vmax.f32 %v6420_v23, %v6920_v9  ;;  %v16780_v15 = vmax.f32 %v15029_v48, 0.0  ;;  %5774 = vmatmul.mubr.bf16.gmra.mrb[124].mxu0 %v17134_v47  ;;  %v6415_v61 = vmax.f32 %v17146_v25, %v11351_v20  ;;  %v16753_v57 = vmax.f32 %v15025_v44, 0.0  ;;  %v12016_v23 = vld [vmem:[%s16606_s5 + $0x8] sm:$0xff]   ;;  %v11369_v25 = vpop.permute.xlu0 %11368 }
 0x53a   : > { %v16754_v9 = vmax.f32 %v15032_v27, 0.0  ;;  %5783 = vmatprep.mubr.bf16.mxu0 %v14398_v45  ;;  %v17147_v28 = vmax.f32 %v14493_v10, 0.0  ;;  %v17148_v47 = vmax.f32 %v14531_v36, 0.0  ;;  %v6914_v43 = vmax.f32 %v17149_v55, %v11355_v8 }
 0x53b   : > { %v7117_v11 = vpack.c.bf16 %v7021_v35, %v7020_v60  ;;  %v11517_v2 = vpack.i.bf16 %v16780_v15, %v16755_v42  ;;  %v11364_v63 = vpop.permute.xlu1 %11363  ;;  %v11360_v55 = vunpack.i.l.bf16 %v15022_v56 }
 0x53c   : > { %v6414_v29 = vmax.f32 %v17147_v28, %v11350_v18  ;;  %v6915_v20 = vmax.f32 %v17148_v47, %v11356_v14  ;;  %v11522_v60 = vpack.i.bf16 %v16754_v9, %v16753_v57  ;;  %v5515_v35 = vpop.f32.mrb[20].mxu0  ;;  %v11366_v24 = vunpack.i.h.bf16 %v11364_v63 }
 0x53d   : > { %10486 = vmatmul.mubr.msk.bf16.vlgmr.msra.gmra.mrb[124].mxu1 %vm7205_vm2, %v7117_v11  ;;  %v15061_v28 = vadd.f32 %v5515_v35, %v14462_v46  ;;  %v5517_v36 = vpop.f32.mrb[21].mxu0  ;;  %11518 = vrot.lane.b32.xlu0 %v11517_v2, %s12217_s22  ;;  %v11365_v14 = vunpack.i.l.bf16 %v11364_v63  ;;  %v11361_v11 = vunpack.i.h.bf16 %v15022_v56  ;;  %v11370_v63 = vunpack.i.l.bf16 %v11369_v25 }
 0x53e   : > { %v7014_v10 = vmax.f32 %v6414_v29, %v6914_v43  ;;  %v7015_v18 = vmax.f32 %v6415_v61, %v6915_v20  ;;  %10490 = vmatpush3.bf16.msra.mxu1 %v14541_v16  ;;  %v15066_v8 = vadd.f32 %v5517_v36, %v14469_v50  ;;  %v5519_v47 = vpop.f32.mrb[22].mxu0  ;;  %11523 = vrot.lane.b32.xlu1 %v11522_v60, %s12217_s22  ;;  %v12017_v61 = vld [vmem:[%s16606_s5 + $0x10] sm:$0xff]   ;;  %v11371_v43 = vunpack.i.h.bf16 %v11369_v25 }
 0x53f   : > { %10491 = vmatprep.subr.bf16.mxu1 %v12016_v23  ;;  %v15074_v16 = vadd.f32 %v5519_v47, %v14462_v46  ;;  %v5521_v29 = vpop.f32.mrb[23].mxu0  ;;  %v11374_v2 = vpop.permute.xlu1 %11373  ;;  %v16756_v60 = vmax.f32 %v15061_v28, 0.0  ;;  %v17150_v47 = vmax.f32 %v14557_v22, 0.0 }
 0x540   : > { %v7114_v20 = vpack.c.bf16 %v7015_v18, %v7014_v10  ;;  %v15078_v35 = vadd.f32 %v5521_v29, %v14469_v50  ;;  %v11376_v57 = vunpack.i.h.bf16 %v11374_v2  ;;  %v11375_v9 = vunpack.i.l.bf16 %v11374_v2  ;;  %v12018_v29 = vld [vmem:[%s16606_s5 + $0x18] sm:$0xff]  }
 0x541   : > { %v16779_v36 = vmax.f32 %v15074_v16, 0.0  ;;  %v6917_v42 = vmax.f32 %v17150_v47, %v11366_v24  ;;  %v17151_v10 = vmax.f32 %v14573_v19, 0.0  ;;  %v16777_v18 = vmax.f32 %v15066_v8, 0.0  ;;  %5784 = vmatmul.mubr.bf16.gmra.mrb[128].mxu0 %v14378_v26 }
 0x542   : > { %10492 = vmatpush3.bf16.msra.mxu1 %v12016_v23  ;;  %10497 = vmatprep.mubr.msk.bf16.mxu1 %vm7205_vm2, %v7114_v20  ;;  %v16778_v25 = vmax.f32 %v15078_v35, 0.0  ;;  %v17152_v23 = vmax.f32 %v14591_v13, 0.0  ;;  %v17153_v24 = vmax.f32 %v14595_v49, 0.0  ;;  %v17154_v26 = vmax.f32 %v14509_v4, 0.0 }
 0x543   : > { %v6916_v56 = vmax.f32 %v17151_v10, %v11365_v14  ;;  %10493 = vmatprep.subr.bf16.mxu1 %v12017_v61  ;;  %v11527_v22 = vpack.i.bf16 %v16779_v36, %v16756_v60  ;;  %5793 = vmatprep.mubr.bf16.mxu0 %v14408_v41  ;;  %v17155_v20 = vmax.f32 %v14523_v3, 0.0  ;;  %v17156_v13 = vmax.f32 %v14564_v0, 0.0 }
 0x544   : > { %v6923_v19 = vmax.f32 %v17152_v23, %v11376_v57  ;;  %v6922_v14 = vmax.f32 %v17153_v24, %v11375_v9  ;;  %v6417_v2 = vmax.f32 %v17154_v26, %v11361_v11  ;;  %v11532_v10 = vpack.i.bf16 %v16778_v25, %v16777_v18  ;;  %v5525_v60 = vpop.f32.mrb[24].mxu0 }
 0x545   : > { %v6416_v47 = vmax.f32 %v17155_v20, %v11360_v55  ;;  %v6423_v57 = vmax.f32 %v17156_v13, %v11371_v43  ;;  %v17157_v49 = vmax.f32 %v14549_v32, 0.0  ;;  %v15115_v41 = vadd.f32 %v5525_v60, %v14462_v46  ;;  %v5527_v4 = vpop.f32.mrb[25].mxu0  ;;  %11528 = vrot.lane.b32.xlu0 %v11527_v22, %s12217_s22  ;;  %v11384_v55 = vpop.permute.xlu1 %11383  ;;  %v12019_v32 = vld [vmem:[%s16606_s5 + $0x40] sm:$0xff]  }
 0x546   : > { %10494 = vmatpush3.bf16.msra.mxu1 %v12017_v61  ;;  %v7017_v11 = vmax.f32 %v6417_v2, %v6917_v42  ;;  %v15119_v23 = vadd.f32 %v5527_v4, %v14469_v50  ;;  %v5529_v24 = vpop.f32.mrb[26].mxu0  ;;  %11533 = vrot.lane.b32.xlu1 %v11532_v10, %s12217_s22  ;;  %v11379_v61 = vpop.permute.xlu0 %11378 }
 0x547   : > { %v6422_v9 = vmax.f32 %v17157_v49, %v11370_v63  ;;  %v7016_v3 = vmax.f32 %v6416_v47, %v6916_v56  ;;  %10495 = vmatprep.subr.bf16.mxu1 %v12018_v29  ;;  %v7023_v43 = vmax.f32 %v6423_v57, %v6923_v19  ;;  %v15126_v63 = vadd.f32 %v5529_v24, %v14462_v46  ;;  %v5531_v60 = vpop.f32.mrb[27].mxu0  ;;  %v12021_v24 = vld [vmem:[%s16606_s5 + $0x50] sm:$0xff]  }
 0x548   : > { %v15129_v42 = vadd.f32 %v5531_v60, %v14469_v50  ;;  %v16759_v56 = vmax.f32 %v15115_v41, 0.0  ;;  %v16757_v2 = vmax.f32 %v15119_v23, 0.0  ;;  %v11386_v57 = vunpack.i.h.bf16 %v11384_v55 }
 0x549   : > { %v7022_v0 = vmax.f32 %v6422_v9, %v6922_v14  ;;  %v16776_v22 = vmax.f32 %v15126_v63, 0.0  ;;  %v7115_v26 = vpack.c.bf16 %v7017_v11, %v7016_v3  ;;  %5794 = vmatmul.mubr.bf16.gmra.mrb[132].mxu0 %v14388_v30  ;;  %v11394_v30 = vpop.permute.xlu1 %11393  ;;  %v11385_v9 = vunpack.i.l.bf16 %v11384_v55 }
 0x54a   : > { %10496 = vmatpush3.bf16.msra.mxu1 %v12018_v29  ;;  %v16758_v20 = vmax.f32 %v15129_v42, 0.0  ;;  %v11389_v14 = vpop.permute.xlu0 %11388  ;;  %5803 = vmatprep.mubr.bf16.mxu0 %v14414_v1  ;;  %v12020_v29 = vld [vmem:[%s16606_s5 + $0x48] sm:$0xff]  }
 0x54b   : > { %10501 = vmatprep.subr.bf16.mxu1 %v12019_v32  ;;  %v11537_v19 = vpack.i.bf16 %v16776_v22, %v16759_v56  ;;  %v7118_v47 = vpack.c.bf16 %v7023_v43, %v7022_v0  ;;  %v11391_v4 = vunpack.i.h.bf16 %v11389_v14  ;;  %v11390_v0 = vunpack.i.l.bf16 %v11389_v14  ;;  %v17185_v22 = vld [vmem:[#allocation59_spill] sm:$0xff] }
 0x54c   : > { %v11542_v10 = vpack.i.bf16 %v16758_v20, %v16757_v2  ;;  %v5535_v13 = vpop.f32.mrb[28].mxu0  ;;  %v11396_v43 = vunpack.i.h.bf16 %v11394_v30  ;;  %v17159_v14 = vmax.f32 %v14616_v51, 0.0  ;;  %v17162_v51 = vmax.f32 %v14648_v37, 0.0 }
 0x54d   : > { %10498 = vmatmul.mubr.msk.bf16.vlgmr.msra.gmra.mrb[124].mxu1 %vm7205_vm2, %v7115_v26  ;;  %v15150_v49 = vadd.f32 %v5535_v13, %v14462_v46  ;;  %v5537_v1 = vpop.f32.mrb[29].mxu0  ;;  %11538 = vrot.lane.b32.xlu0 %v11537_v19, %s12217_s22  ;;  %v11381_v26 = vunpack.i.h.bf16 %v11379_v61  ;;  %v17158_v19 = vmax.f32 %v14611_v52, 0.0  ;;  %v12022_v52 = vld [vmem:[%s16606_s5 + $0x58] sm:$0xff]   ;;  %v17186_v18 = vmax.f32 %v17185_v22, 0.0  ;;  %v17191_v22 = vld [vmem:[#allocation4_spill] sm:$0xff] }
 0x54e   : > { %10502 = vmatpush3.bf16.msra.mxu1 %v12019_v32  ;;  %10509 = vmatprep.mubr.msk.bf16.mxu1 %vm7205_vm2, %v7118_v47  ;;  %v15154_v3 = vadd.f32 %v5537_v1, %v14469_v50  ;;  %v5539_v11 = vpop.f32.mrb[30].mxu0  ;;  %v11395_v32 = vunpack.i.l.bf16 %v11394_v30  ;;  %v11380_v47 = vunpack.i.l.bf16 %v11379_v61  ;;  %v6924_v30 = vmax.f32 %v17159_v14, %v11385_v9 }
 0x54f   : > { %11543 = vrot.lane.b32.xlu1 %v11542_v10, %s12217_s22  ;;  %v15162_v60 = vadd.f32 %v5539_v11, %v14462_v46  ;;  %v5541_v55 = vpop.f32.mrb[31].mxu0  ;;  %10503 = vmatprep.subr.bf16.mxu1 %v12020_v29  ;;  %v6925_v10 = vmax.f32 %v17158_v19, %v11386_v57  ;;  %v16766_v1 = vmax.f32 %v15150_v49, 0.0  ;;  %v17160_v11 = vmax.f32 %v14645_v6, 0.0 }
 0x550   : > { %v15165_v13 = vadd.f32 %v5541_v55, %v14469_v50  ;;  %v16764_v56 = vmax.f32 %v15154_v3, 0.0  ;;  %v17161_v57 = vmax.f32 %v14633_v31, 0.0  ;;  %v6927_v9 = vmax.f32 %v17162_v51, %v11396_v43  ;;  %v11399_v51 = vpop.permute.xlu0 %11398 }
 0x551   : > { %v16775_v2 = vmax.f32 %v15162_v60, 0.0  ;;  %v6427_v20 = vmax.f32 %v17160_v11, %v11391_v4  ;;  %5804 = vmatmul.mubr.bf16.gmra.mrb[136].mxu0 %v14398_v45  ;;  %v17163_v6 = vmax.f32 %v14638_v17, 0.0  ;;  %v17164_v45 = vmax.f32 %v14608_v59, 0.0 }
 0x552   : > { %10504 = vmatpush3.bf16.msra.mxu1 %v12020_v29  ;;  %v16765_v61 = vmax.f32 %v15165_v13, 0.0  ;;  %v6426_v29 = vmax.f32 %v17161_v57, %v11390_v0  ;;  %v17165_v14 = vmax.f32 %v14598_v7, 0.0 }
 0x553   : > { %10505 = vmatprep.subr.bf16.mxu1 %v12021_v24  ;;  %v6926_v4 = vmax.f32 %v17163_v6, %v11395_v32  ;;  %v11547_v55 = vpack.i.bf16 %v16775_v2, %v16766_v1  ;;  %v6425_v19 = vmax.f32 %v17164_v45, %v11381_v26  ;;  %v12023_v26 = vld [vmem:[%s16606_s5 + $0x60] sm:$0xff]   ;;  %v7027_v57 = vmax.f32 %v6427_v20, %v6927_v9 }
 0x554   : > { %v6424_v11 = vmax.f32 %v17165_v14, %v11380_v47  ;;  %v11552_v31 = vpack.i.bf16 %v16765_v61, %v16764_v56  ;;  %v5545_v37 = vpop.f32.mrb[32].mxu0  ;;  %v17168_v56 = vmax.f32 %v14677_v5, 0.0  ;;  %v12026_v5 = vld [vmem:[%s16606_s5 + $0x78] sm:$0xff]  }
 0x555   : > { %v15200_v17 = vadd.f32 %v5545_v37, %v14462_v46  ;;  %v5547_v0 = vpop.f32.mrb[33].mxu0  ;;  %11548 = vrot.lane.b32.xlu0 %v11547_v55, %s12217_s22  ;;  %v7025_v32 = vmax.f32 %v6425_v19, %v6925_v10  ;;  %v7026_v47 = vmax.f32 %v6426_v29, %v6926_v4 }
 0x556   : > { %10506 = vmatpush3.bf16.msra.mxu1 %v12021_v24  ;;  %v7024_v43 = vmax.f32 %v6424_v11, %v6924_v30  ;;  %v15204_v59 = vadd.f32 %v5547_v0, %v14469_v50  ;;  %v5549_v7 = vpop.f32.mrb[34].mxu0  ;;  %11553 = vrot.lane.b32.xlu1 %v11552_v31, %s12217_s22  ;;  %v11404_v30 = vpop.permute.xlu1 %11403  ;;  %v12024_v11 = vld [vmem:[%s16606_s5 + $0x68] sm:$0xff]   ;;  %v11401_v31 = vunpack.i.h.bf16 %v11399_v51 }
 0x557   : > { %10507 = vmatprep.subr.bf16.mxu1 %v12022_v52  ;;  %v15211_v24 = vadd.f32 %v5549_v7, %v14462_v46  ;;  %v5551_v6 = vpop.f32.mrb[35].mxu0  ;;  %v16760_v55 = vmax.f32 %v15200_v17, 0.0  ;;  %v11409_v9 = vpop.permute.xlu0 %11408  ;;  %v7120_v4 = vpack.c.bf16 %v7027_v57, %v7026_v47  ;;  %v11405_v57 = vunpack.i.l.bf16 %v11404_v30 }
 0x558   : > { %v15214_v10 = vadd.f32 %v5551_v6, %v14469_v50  ;;  %v7119_v19 = vpack.c.bf16 %v7025_v32, %v7024_v43  ;;  %v16761_v14 = vmax.f32 %v15204_v59, 0.0  ;;  %v11400_v43 = vunpack.i.l.bf16 %v11399_v51  ;;  %v12025_v51 = vld [vmem:[%s16606_s5 + $0x70] sm:$0xff]  }
 0x559   : > { %v16763_v45 = vmax.f32 %v15211_v24, 0.0  ;;  %v11406_v32 = vunpack.i.h.bf16 %v11404_v30  ;;  %v11411_v6 = vunpack.i.h.bf16 %v11409_v9 }
 0x55a   : > { %10508 = vmatpush3.bf16.msra.mxu1 %v12022_v52  ;;  %v16762_v29 = vmax.f32 %v15214_v10, 0.0  ;;  %v11414_v37 = vpop.permute.xlu1 %11413 }
 0x55b   : > { %10513 = vmatprep.subr.bf16.mxu1 %v12023_v26  ;;  %v11557_v20 = vpack.i.bf16 %v16763_v45, %v16760_v55  ;;  %v6929_v61 = vmax.f32 %v17168_v56, %v11406_v32  ;;  %v17173_v32 = vld [vmem:[#allocation51_spill] sm:$0xff] }
 0x55c   : > { %v11562_v52 = vpack.i.bf16 %v16762_v29, %v16761_v14  ;;  %v5555_v0 = vpop.f32.mrb[36].mxu0 }
 0x55d   : > { %10510 = vmatmul.mubr.msk.bf16.vlgmr.msra.gmra.mrb[124].mxu1 %vm7205_vm2, %v7119_v19  ;;  %v15233_v7 = vadd.f32 %v5555_v0, %v14462_v46  ;;  %v5557_v47 = vpop.f32.mrb[37].mxu0  ;;  %11558 = vrot.lane.b32.xlu0 %v11557_v20, %s12217_s22  ;;  %v11410_v19 = vunpack.i.l.bf16 %v11409_v9  ;;  %v11416_v0 = vunpack.i.h.bf16 %v11414_v37 }
 0x55e   : > { %10514 = vmatpush3.bf16.msra.mxu1 %v12023_v26  ;;  %10521 = vmatprep.mubr.msk.bf16.mxu1 %vm7205_vm2, %v7120_v4  ;;  %v15237_v55 = vadd.f32 %v5557_v47, %v14469_v50  ;;  %v5559_v14 = vpop.f32.mrb[38].mxu0  ;;  %v11415_v26 = vunpack.i.l.bf16 %v11414_v37  ;;  %v17166_v47 = vmax.f32 %v14674_v53, 0.0  ;;  %v17170_v53 = vmax.f32 %v14702_v40, 0.0 }
 0x55f   : > { %11563 = vrot.lane.b32.xlu1 %v11562_v52, %s12217_s22  ;;  %v15245_v4 = vadd.f32 %v5559_v14, %v14462_v46  ;;  %v5561_v30 = vpop.f32.mrb[39].mxu0  ;;  %10515 = vmatprep.subr.bf16.mxu1 %v12024_v11  ;;  %v17167_v52 = vmax.f32 %v14666_v33, 0.0  ;;  %v16771_v9 = vmax.f32 %v15233_v7, 0.0  ;;  %v17169_v14 = vmax.f32 %v14670_v12, 0.0  ;;  %v17171_v33 = vld [vmem:[#allocation47_spill] sm:$0xff]  ;;  %v17175_v12 = vld [vmem:[#allocation70_spill] sm:$0xff] }
 0x560   : > { %v6429_v29 = vmax.f32 %v17166_v47, %v11401_v31  ;;  %v15250_v20 = vadd.f32 %v5561_v30, %v14469_v50  ;;  %v6431_v31 = vmax.f32 %v17170_v53, %v11411_v6  ;;  %v16767_v30 = vmax.f32 %v15237_v55, 0.0 }
 0x561   : > { %v6428_v45 = vmax.f32 %v17167_v52, %v11400_v43  ;;  %v16774_v37 = vmax.f32 %v15245_v4, 0.0  ;;  %v6928_v1 = vmax.f32 %v17169_v14, %v11405_v57  ;;  %v17172_v56 = vmax.f32 %v17171_v33, 0.0 }
 0x562   : > { %10516 = vmatpush3.bf16.msra.mxu1 %v12024_v11  ;;  %v16768_v47 = vmax.f32 %v15250_v20, 0.0  ;;  %v17174_v11 = vmax.f32 %v17173_v32, 0.0  ;;  %v17176_v57 = vmax.f32 %v17175_v12, 0.0 }
 0x563   : > { %10517 = vmatprep.subr.bf16.mxu1 %v12025_v51  ;;  %v6430_v43 = vmax.f32 %v17172_v56, %v11410_v19  ;;  %v11567_v40 = vpack.i.bf16 %v16774_v37, %v16771_v9  ;;  %v17183_v37 = vld [vmem:[#allocation71_spill] sm:$0xff] }
 0x564   : > { %v6931_v52 = vmax.f32 %v17174_v11, %v11416_v0  ;;  %v6930_v14 = vmax.f32 %v17176_v57, %v11415_v26  ;;  %v11572_v6 = vpack.i.bf16 %v16768_v47, %v16767_v30  ;;  %v5565_v53 = vpop.f32.mrb[40].mxu0  ;;  %v7028_v0 = vmax.f32 %v6428_v45, %v6928_v1  ;;  %v12027_v11 = vld [vmem:[%s16606_s5 + $0x80] sm:$0xff]   ;;  %v11424_v1 = vpop.permute.xlu1 %11423 }
 0x565   : > { %v15282_v33 = vadd.f32 %v5565_v53, %v14462_v46  ;;  %v5567_v19 = vpop.f32.mrb[41].mxu0  ;;  %11568 = vrot.lane.b32.xlu0 %v11567_v40, %s12217_s22  ;;  %v7029_v26 = vmax.f32 %v6429_v29, %v6929_v61  ;;  %v11419_v53 = vpop.permute.xlu0 %11418  ;;  %v11426_v47 = vunpack.i.h.bf16 %v11424_v1 }
 0x566   : > { %10518 = vmatpush3.bf16.msra.mxu1 %v12025_v51  ;;  %v15286_v56 = vadd.f32 %v5567_v19, %v14469_v50  ;;  %v5569_v32 = vpop.f32.mrb[42].mxu0  ;;  %11573 = vrot.lane.b32.xlu1 %v11572_v6, %s12217_s22  ;;  %v7030_v12 = vmax.f32 %v6430_v43, %v6930_v14  ;;  %v7031_v57 = vmax.f32 %v6431_v31, %v6931_v52  ;;  %v11420_v30 = vunpack.i.l.bf16 %v11419_v53 }
 0x567   : > { %10519 = vmatprep.subr.bf16.mxu1 %v12026_v5  ;;  %v15293_v51 = vadd.f32 %v5569_v32, %v14462_v46  ;;  %v5571_v40 = vpop.f32.mrb[43].mxu0  ;;  %v16769_v45 = vmax.f32 %v15282_v33, 0.0  ;;  %v7121_v6 = vpack.c.bf16 %v7029_v26, %v7028_v0  ;;  %v12028_v32 = vld [vmem:[%s16606_s5 + $0x88] sm:$0xff]   ;;  %v6933_v25 = vmax.f32 %v17186_v18, %v11426_v47  ;;  %v12030_v18 = vld [vmem:[%s16606_s5 + $0x98] sm:$0xff]   ;;  %v17193_v47 = vld [vmem:[#allocation7_spill] sm:$0xff] }
 0x568   : > { %17177 = vst [vmem:[#allocation66_spill] sm:$0xff] %v15286_v56  ;;  %v15296_v61 = vadd.f32 %v5571_v40, %v14469_v50  ;;  %v16772_v19 = vmax.f32 %v15286_v56, 0.0  ;;  %v7122_v14 = vpack.c.bf16 %v7031_v57, %v7030_v12  ;;  %v11421_v40 = vunpack.i.h.bf16 %v11419_v53  ;;  %v11434_v0 = vpop.permute.xlu1 %11433  ;;  %v12029_v53 = vld [vmem:[%s16606_s5 + $0x90] sm:$0xff]   ;;  %v17189_v56 = vld [vmem:[#allocation6_spill] sm:$0xff] }
 0x569   : > { %v16770_v29 = vmax.f32 %v15293_v51, 0.0  ;;  %v11429_v52 = vpop.permute.xlu0 %11428  ;;  %v11425_v57 = vunpack.i.l.bf16 %v11424_v1 }
 0x56a   : > { %10520 = vmatpush3.bf16.msra.mxu1 %v12026_v5  ;;  %v16773_v43 = vmax.f32 %v15296_v61, 0.0 }
 0x56b   : > { %10525 = vmatprep.subr.bf16.mxu1 %v12027_v11  ;;  %v11577_v31 = vpack.i.bf16 %v16770_v29, %v16769_v45  ;;  %v11431_v29 = vunpack.i.h.bf16 %v11429_v52 }
 0x56c   : > { %v11582_v5 = vpack.i.bf16 %v16773_v43, %v16772_v19  ;;  %v5575_v26 = vpop.f32.mrb[44].mxu0 }
 0x56d   : > { %10522 = vmatmul.mubr.msk.bf16.vlgmr.msra.gmra.mrb[124].mxu1 %vm7205_vm2, %v7121_v6  ;;  %v15315_v45 = vadd.f32 %v5575_v26, %v14462_v46  ;;  %v5577_v12 = vpop.f32.mrb[45].mxu0  ;;  %11578 = vrot.lane.b32.xlu0 %v11577_v31, %s12217_s22  ;;  %v11430_v6 = vunpack.i.l.bf16 %v11429_v52  ;;  %v11436_v26 = vunpack.i.h.bf16 %v11434_v0 }
 0x56e   : > { %10526 = vmatpush3.bf16.msra.mxu1 %v12027_v11  ;;  %10533 = vmatprep.mubr.msk.bf16.mxu1 %vm7205_vm2, %v7122_v14  ;;  %v15319_v9 = vadd.f32 %v5577_v12, %v14469_v50  ;;  %v5579_v19 = vpop.f32.mrb[46].mxu0  ;;  %v11435_v11 = vunpack.i.l.bf16 %v11434_v0  ;;  %v17181_v12 = vmax.f32 %v14730_v58, 0.0  ;;  %v17190_v58 = vmax.f32 %v17189_v56, 0.0 }
 0x56f   : > { %17178 = vst [vmem:[#allocation31_spill] sm:$0xff] %v15315_v45  ;;  %11583 = vrot.lane.b32.xlu1 %v11582_v5, %s12217_s22  ;;  %v15327_v14 = vadd.f32 %v5579_v19, %v14462_v46  ;;  %v5581_v1 = vpop.f32.mrb[47].mxu0  ;;  %10527 = vmatprep.subr.bf16.mxu1 %v12028_v32  ;;  %v17184_v5 = vmax.f32 %v17183_v37, 0.0  ;;  %v16786_v52 = vmax.f32 %v15315_v45, 0.0  ;;  %v17187_v19 = vld [vmem:[#allocation55_spill] sm:$0xff]  ;;  %v17192_v37 = vmax.f32 %v17191_v22, 0.0 }
 0x570   : > { %17179 = vst [vmem:[#allocation32_spill] sm:$0xff] %v15319_v9  ;;  %v6433_v43 = vmax.f32 %v17181_v12, %v11421_v40  ;;  %v15332_v31 = vadd.f32 %v5581_v1, %v14469_v50  ;;  %v17188_v36 = vmax.f32 %v17187_v19, 0.0  ;;  %v6435_v40 = vmax.f32 %v17190_v58, %v11431_v29  ;;  %v17195_v19 = vld [vmem:[#allocation5_spill] sm:$0xff] }
 0x571   : > { %17180 = vst [vmem:[#allocation67_spill] sm:$0xff] %v15327_v14  ;;  %v6432_v2 = vmax.f32 %v17184_v5, %v11420_v30  ;;  %v16789_v0 = vmax.f32 %v15327_v14, 0.0  ;;  %v16782_v1 = vmax.f32 %v15319_v9, 0.0  ;;  %v6434_v30 = vmax.f32 %v17192_v37, %v11430_v6  ;;  %v17213_v14 = vld [vmem:[#allocation14_spill] sm:$0xff] }
 0x572   : > { %17182 = vst [vmem:[#allocation33_spill] sm:$0xff] %v15332_v31  ;;  %10528 = vmatpush3.bf16.msra.mxu1 %v12028_v32  ;;  %v6932_v15 = vmax.f32 %v17188_v36, %v11425_v57  ;;  %v16783_v12 = vmax.f32 %v15332_v31, 0.0  ;;  %v17194_v32 = vmax.f32 %v17193_v47, 0.0  ;;  %v17196_v36 = vmax.f32 %v17195_v19, 0.0 }
 0x573   : > { %10529 = vmatprep.subr.bf16.mxu1 %v12029_v53  ;;  %v11587_v56 = vpack.i.bf16 %v16789_v0, %v16786_v52 }
 0x574   : > { %v6935_v5 = vmax.f32 %v17194_v32, %v11436_v26  ;;  %v6934_v57 = vmax.f32 %v17196_v36, %v11435_v11  ;;  %v11592_v29 = vpack.i.bf16 %v16783_v12, %v16782_v1  ;;  %v5585_v58 = vpop.f32.mrb[48].mxu0  ;;  %v7032_v26 = vmax.f32 %v6432_v2, %v6932_v15  ;;  %v12031_v32 = vld [vmem:[%s16606_s5 + $0xa0] sm:$0xff]   ;;  %v11444_v15 = vpop.permute.xlu1 %11443 }
 0x575   : > { %v15364_v22 = vadd.f32 %v5585_v58, %v14462_v46  ;;  %v5587_v6 = vpop.f32.mrb[49].mxu0  ;;  %11588 = vrot.lane.b32.xlu0 %v11587_v56, %s12217_s22  ;;  %v7033_v11 = vmax.f32 %v6433_v43, %v6933_v25  ;;  %v11439_v58 = vpop.permute.xlu0 %11438  ;;  %v11446_v12 = vunpack.i.h.bf16 %v11444_v15 }
 0x576   : > { %10530 = vmatpush3.bf16.msra.mxu1 %v12029_v53  ;;  %v15368_v37 = vadd.f32 %v5587_v6, %v14469_v50  ;;  %v5589_v47 = vpop.f32.mrb[50].mxu0  ;;  %11593 = vrot.lane.b32.xlu1 %v11592_v29, %s12217_s22  ;;  %v7034_v19 = vmax.f32 %v6434_v30, %v6934_v57  ;;  %v7035_v36 = vmax.f32 %v6435_v40, %v6935_v5  ;;  %v11440_v1 = vunpack.i.l.bf16 %v11439_v58 }
 0x577   : > { %17197 = vst [vmem:[#allocation34_spill] sm:$0xff] %v15364_v22  ;;  %10531 = vmatprep.subr.bf16.mxu1 %v12030_v18  ;;  %v15375_v53 = vadd.f32 %v5589_v47, %v14462_v46  ;;  %v5591_v56 = vpop.f32.mrb[51].mxu0  ;;  %v16784_v2 = vmax.f32 %v15364_v22, 0.0  ;;  %v7123_v29 = vpack.c.bf16 %v7033_v11, %v7032_v26  ;;  %v12032_v47 = vld [vmem:[%s16606_s5 + $0xa8] sm:$0xff]   ;;  %v17209_v22 = vld [vmem:[#allocation11_spill] sm:$0xff] }
 0x578   : > { %17198 = vst [vmem:[#allocation68_spill] sm:$0xff] %v15368_v37  ;;  %v15378_v25 = vadd.f32 %v5591_v56, %v14469_v50  ;;  %v16787_v6 = vmax.f32 %v15368_v37, 0.0  ;;  %v7124_v57 = vpack.c.bf16 %v7035_v36, %v7034_v19  ;;  %v11441_v56 = vunpack.i.h.bf16 %v11439_v58  ;;  %v11454_v26 = vpop.permute.xlu1 %11453  ;;  %v12033_v58 = vld [vmem:[%s16606_s5 + $0xb0] sm:$0xff]   ;;  %v17207_v37 = vld [vmem:[#allocation8_spill] sm:$0xff] }
 0x579   : > { %17199 = vst [vmem:[#allocation35_spill] sm:$0xff] %v15375_v53  ;;  %v16785_v43 = vmax.f32 %v15375_v53, 0.0  ;;  %v11449_v5 = vpop.permute.xlu0 %11448  ;;  %v11445_v36 = vunpack.i.l.bf16 %v11444_v15  ;;  %v17210_v53 = vmax.f32 %v17209_v22, 0.0 }
 0x57a   : > { %17200 = vst [vmem:[#allocation36_spill] sm:$0xff] %v15378_v25  ;;  %10532 = vmatpush3.bf16.msra.mxu1 %v12030_v18  ;;  %v16788_v30 = vmax.f32 %v15378_v25, 0.0 }
 0x57b   : > { %10537 = vmatprep.subr.bf16.mxu1 %v12031_v32  ;;  %v11597_v40 = vpack.i.bf16 %v16785_v43, %v16784_v2  ;;  %v11451_v43 = vunpack.i.h.bf16 %v11449_v5  ;;  %v6937_v9 = vmax.f32 %v17210_v53, %v11446_v12  ;;  %v17215_v12 = vld [vmem:[#allocation12_spill] sm:$0xff]  ;;  %v17217_v53 = vld [vmem:[#allocation15_spill] sm:$0xff] }
 0x57c   : > { %v11602_v18 = vpack.i.bf16 %v16788_v30, %v16787_v6  ;;  %v5595_v11 = vpop.f32.mrb[52].mxu0  ;;  %v17204_v30 = vld [vmem:[#allocation10_spill] sm:$0xff]  ;;  %v17216_v22 = vmax.f32 %v17215_v12, 0.0 }
 0x57d   : > { %10534 = vmatmul.mubr.msk.bf16.vlgmr.msra.gmra.mrb[124].mxu1 %vm7205_vm2, %v7123_v29  ;;  %v15397_v2 = vadd.f32 %v5595_v11, %v14462_v46  ;;  %v5597_v19 = vpop.f32.mrb[53].mxu0  ;;  %11598 = vrot.lane.b32.xlu0 %v11597_v40, %s12217_s22  ;;  %v11450_v29 = vunpack.i.l.bf16 %v11449_v5  ;;  %v11456_v11 = vunpack.i.h.bf16 %v11454_v26 }
 0x57e   : > { %10538 = vmatpush3.bf16.msra.mxu1 %v12031_v32  ;;  %10545 = vmatprep.mubr.msk.bf16.mxu1 %vm7205_vm2, %v7124_v57  ;;  %v15401_v52 = vadd.f32 %v5597_v19, %v14469_v50  ;;  %v5599_v6 = vpop.f32.mrb[54].mxu0  ;;  %v11455_v32 = vunpack.i.l.bf16 %v11454_v26  ;;  %v17205_v19 = vmax.f32 %v17204_v30, 0.0  ;;  %v17214_v30 = vmax.f32 %v17213_v14, 0.0 }
 0x57f   : > { %17201 = vst [vmem:[#allocation45_spill] sm:$0xff] %v15397_v2  ;;  %11603 = vrot.lane.b32.xlu1 %v11602_v18, %s12217_s22  ;;  %v15409_v57 = vadd.f32 %v5599_v6, %v14462_v46  ;;  %v5601_v15 = vpop.f32.mrb[55].mxu0  ;;  %10539 = vmatprep.subr.bf16.mxu1 %v12032_v47  ;;  %v17208_v18 = vmax.f32 %v17207_v37, 0.0  ;;  %v16802_v5 = vmax.f32 %v15397_v2, 0.0  ;;  %v17211_v6 = vld [vmem:[#allocation9_spill] sm:$0xff]  ;;  %v6438_v37 = vmax.f32 %v17216_v22, %v11450_v29 }
 0x580   : > { %17202 = vst [vmem:[#allocation37_spill] sm:$0xff] %v15401_v52  ;;  %v6437_v0 = vmax.f32 %v17205_v19, %v11441_v56  ;;  %v15414_v40 = vadd.f32 %v5601_v15, %v14469_v50  ;;  %v17212_v31 = vmax.f32 %v17211_v6, 0.0  ;;  %v6439_v56 = vmax.f32 %v17214_v30, %v11451_v43  ;;  %v17219_v6 = vld [vmem:[#allocation13_spill] sm:$0xff] }
 0x581   : > { %17203 = vst [vmem:[#allocation38_spill] sm:$0xff] %v15409_v57  ;;  %v6436_v25 = vmax.f32 %v17208_v18, %v11440_v1  ;;  %v16805_v26 = vmax.f32 %v15409_v57, 0.0  ;;  %v16798_v15 = vmax.f32 %v15401_v52, 0.0  ;;  %v12034_v1 = vld [vmem:[%s16606_s5 + $0xb8] sm:$0xff]  }
 0x582   : > { %17206 = vst [vmem:[#allocation49_spill] sm:$0xff] %v15414_v40  ;;  %10540 = vmatpush3.bf16.msra.mxu1 %v12032_v47  ;;  %v6936_v45 = vmax.f32 %v17212_v31, %v11445_v36  ;;  %v16799_v19 = vmax.f32 %v15414_v40, 0.0  ;;  %v17218_v47 = vmax.f32 %v17217_v53, 0.0  ;;  %v17220_v31 = vmax.f32 %v17219_v6, 0.0  ;;  %v17237_v57 = vld [vmem:[#allocation22_spill] sm:$0xff] }
 0x583   : > { %10541 = vmatprep.subr.bf16.mxu1 %v12033_v58  ;;  %v11607_v14 = vpack.i.bf16 %v16805_v26, %v16802_v5 }
 0x584   : > { %v6939_v18 = vmax.f32 %v17218_v47, %v11456_v11  ;;  %v6938_v36 = vmax.f32 %v17220_v31, %v11455_v32  ;;  %v11612_v43 = vpack.i.bf16 %v16799_v19, %v16798_v15  ;;  %v5605_v30 = vpop.f32.mrb[56].mxu0  ;;  %v7036_v11 = vmax.f32 %v6436_v25, %v6936_v45  ;;  %v12035_v47 = vld [vmem:[%s16606_s5 + $0xc0] sm:$0xff]   ;;  %v11464_v45 = vpop.permute.xlu1 %11463 }
 0x585   : > { %v15446_v12 = vadd.f32 %v5605_v30, %v14462_v46  ;;  %v5607_v29 = vpop.f32.mrb[57].mxu0  ;;  %11608 = vrot.lane.b32.xlu0 %v11607_v14, %s12217_s22  ;;  %v7037_v32 = vmax.f32 %v6437_v0, %v6937_v9  ;;  %v11459_v30 = vpop.permute.xlu0 %11458  ;;  %v11466_v19 = vunpack.i.h.bf16 %v11464_v45 }
 0x586   : > { %10542 = vmatpush3.bf16.msra.mxu1 %v12033_v58  ;;  %v15450_v22 = vadd.f32 %v5607_v29, %v14469_v50  ;;  %v5609_v53 = vpop.f32.mrb[58].mxu0  ;;  %11613 = vrot.lane.b32.xlu1 %v11612_v43, %s12217_s22  ;;  %v7038_v6 = vmax.f32 %v6438_v37, %v6938_v36  ;;  %v7039_v31 = vmax.f32 %v6439_v56, %v6939_v18  ;;  %v11460_v15 = vunpack.i.l.bf16 %v11459_v30 }
 0x587   : > { %17221 = vst [vmem:[#allocation39_spill] sm:$0xff] %v15446_v12  ;;  %10543 = vmatprep.subr.bf16.mxu1 %v12034_v1  ;;  %v15457_v58 = vadd.f32 %v5609_v53, %v14462_v46  ;;  %v5611_v14 = vpop.f32.mrb[59].mxu0  ;;  %v16800_v0 = vmax.f32 %v15446_v12, 0.0  ;;  %v7125_v43 = vpack.c.bf16 %v7037_v32, %v7036_v11  ;;  %v12036_v53 = vld [vmem:[%s16606_s5 + $0xc8] sm:$0xff]   ;;  %v17233_v12 = vld [vmem:[#allocation19_spill] sm:$0xff] }
 0x588   : > { %17222 = vst [vmem:[#allocation40_spill] sm:$0xff] %v15450_v22  ;;  %v15460_v9 = vadd.f32 %v5611_v14, %v14469_v50  ;;  %v16803_v29 = vmax.f32 %v15450_v22, 0.0  ;;  %v7126_v36 = vpack.c.bf16 %v7039_v31, %v7038_v6  ;;  %v11461_v14 = vunpack.i.h.bf16 %v11459_v30  ;;  %v11474_v11 = vpop.permute.xlu1 %11473  ;;  %v12037_v30 = vld [vmem:[%s16606_s5 + $0xd0] sm:$0xff]   ;;  %v17231_v22 = vld [vmem:[#allocation16_spill] sm:$0xff] }
 0x589   : > { %17223 = vst [vmem:[#allocation53_spill] sm:$0xff] %v15457_v58  ;;  %v16801_v25 = vmax.f32 %v15457_v58, 0.0  ;;  %v11469_v18 = vpop.permute.xlu0 %11468  ;;  %v11465_v31 = vunpack.i.l.bf16 %v11464_v45  ;;  %v17234_v58 = vmax.f32 %v17233_v12, 0.0 }
 0x58a   : > { %17224 = vst [vmem:[#allocation41_spill] sm:$0xff] %v15460_v9  ;;  %10544 = vmatpush3.bf16.msra.mxu1 %v12034_v1  ;;  %v16804_v37 = vmax.f32 %v15460_v9, 0.0 }
 0x58b   : > { %10549 = vmatprep.subr.bf16.mxu1 %v12035_v47  ;;  %v11617_v56 = vpack.i.bf16 %v16801_v25, %v16800_v0  ;;  %v11471_v25 = vunpack.i.h.bf16 %v11469_v18  ;;  %v6941_v52 = vmax.f32 %v17234_v58, %v11466_v19  ;;  %v17239_v19 = vld [vmem:[#allocation20_spill] sm:$0xff]  ;;  %v17241_v58 = vld [vmem:[#allocation23_spill] sm:$0xff] }
 0x58c   : > { %v11622_v1 = vpack.i.bf16 %v16804_v37, %v16803_v29  ;;  %v5615_v32 = vpop.f32.mrb[60].mxu0  ;;  %v17228_v37 = vld [vmem:[#allocation18_spill] sm:$0xff]  ;;  %v17240_v12 = vmax.f32 %v17239_v19, 0.0 }
 0x58d   : > { %10546 = vmatmul.mubr.msk.bf16.vlgmr.msra.gmra.mrb[124].mxu1 %vm7205_vm2, %v7125_v43  ;;  %v15479_v0 = vadd.f32 %v5615_v32, %v14462_v46  ;;  %v5617_v6 = vpop.f32.mrb[61].mxu0  ;;  %11618 = vrot.lane.b32.xlu0 %v11617_v56, %s12217_s22  ;;  %v11470_v43 = vunpack.i.l.bf16 %v11469_v18  ;;  %v11476_v32 = vunpack.i.h.bf16 %v11474_v11 }
 0x58e   : > { %10550 = vmatpush3.bf16.msra.mxu1 %v12035_v47  ;;  %10557 = vmatprep.mubr.msk.bf16.mxu1 %vm7205_vm2, %v7126_v36  ;;  %v15483_v5 = vadd.f32 %v5617_v6, %v14469_v50  ;;  %v5619_v29 = vpop.f32.mrb[62].mxu0  ;;  %v11475_v47 = vunpack.i.l.bf16 %v11474_v11  ;;  %v17229_v6 = vmax.f32 %v17228_v37, 0.0  ;;  %v17238_v37 = vmax.f32 %v17237_v57, 0.0 }
 0x58f   : > { %17225 = vst [vmem:[#allocation42_spill] sm:$0xff] %v15479_v0  ;;  %11623 = vrot.lane.b32.xlu1 %v11622_v1, %s12217_s22  ;;  %v15491_v36 = vadd.f32 %v5619_v29, %v14462_v46  ;;  %v5621_v45 = vpop.f32.mrb[63].mxu0  ;;  %10551 = vmatprep.subr.bf16.mxu1 %v12036_v53  ;;  %v17232_v1 = vmax.f32 %v17231_v22, 0.0  ;;  %v16818_v18 = vmax.f32 %v15479_v0, 0.0  ;;  %v17235_v29 = vld [vmem:[#allocation17_spill] sm:$0xff]  ;;  %v6442_v22 = vmax.f32 %v17240_v12, %v11470_v43 }
 0x590   : > { %17226 = vst [vmem:[#allocation57_spill] sm:$0xff] %v15483_v5  ;;  %v6441_v26 = vmax.f32 %v17229_v6, %v11461_v14  ;;  %v15496_v56 = vadd.f32 %v5621_v45, %v14469_v50  ;;  %v17236_v40 = vmax.f32 %v17235_v29, 0.0  ;;  %v6443_v14 = vmax.f32 %v17238_v37, %v11471_v25  ;;  %v17243_v29 = vld [vmem:[#allocation21_spill] sm:$0xff] }
 0x591   : > { %17227 = vst [vmem:[#allocation44_spill] sm:$0xff] %v15491_v36  ;;  %v6440_v9 = vmax.f32 %v17232_v1, %v11460_v15  ;;  %v16821_v11 = vmax.f32 %v15491_v36, 0.0  ;;  %v16814_v45 = vmax.f32 %v15483_v5, 0.0  ;;  %v12038_v15 = vld [vmem:[%s16606_s5 + $0xd8] sm:$0xff]   ;;  %v17258_v36 = vld [vmem:[#allocation28_spill] sm:$0xff] }
 0x592   : > { %17230 = vst [vmem:[#allocation46_spill] sm:$0xff] %v15496_v56  ;;  %10552 = vmatpush3.bf16.msra.mxu1 %v12036_v53  ;;  %v6940_v2 = vmax.f32 %v17236_v40, %v11465_v31  ;;  %v16815_v6 = vmax.f32 %v15496_v56, 0.0  ;;  %v17242_v53 = vmax.f32 %v17241_v58, 0.0  ;;  %v17244_v40 = vmax.f32 %v17243_v29, 0.0 }
 0x593   : > { %10553 = vmatprep.subr.bf16.mxu1 %v12037_v30  ;;  %v11627_v57 = vpack.i.bf16 %v16821_v11, %v16818_v18 }
 0x594   : > { %v6943_v1 = vmax.f32 %v17242_v53, %v11476_v32  ;;  %v6942_v31 = vmax.f32 %v17244_v40, %v11475_v47  ;;  %v11632_v25 = vpack.i.bf16 %v16815_v6, %v16814_v45  ;;  %v5625_v37 = vpop.f32.mrb[64].mxu0  ;;  %v7040_v32 = vmax.f32 %v6440_v9, %v6940_v2  ;;  %v12039_v53 = vld [vmem:[%s16606_s5 + $0xe0] sm:$0xff]   ;;  %v11484_v2 = vpop.permute.xlu1 %11483 }
 0x595   : > { %v15528_v19 = vadd.f32 %v5625_v37, %v14462_v46  ;;  %v5627_v43 = vpop.f32.mrb[65].mxu0  ;;  %11628 = vrot.lane.b32.xlu0 %v11627_v57, %s12217_s22  ;;  %v7041_v47 = vmax.f32 %v6441_v26, %v6941_v52  ;;  %v11479_v37 = vpop.permute.xlu0 %11478  ;;  %v11486_v6 = vunpack.i.h.bf16 %v11484_v2 }
 0x596   : > { %10554 = vmatpush3.bf16.msra.mxu1 %v12037_v30  ;;  %v15532_v12 = vadd.f32 %v5627_v43, %v14469_v50  ;;  %v5629_v58 = vpop.f32.mrb[66].mxu0  ;;  %11633 = vrot.lane.b32.xlu1 %v11632_v25, %s12217_s22  ;;  %v7042_v29 = vmax.f32 %v6442_v22, %v6942_v31  ;;  %v7043_v40 = vmax.f32 %v6443_v14, %v6943_v1  ;;  %v11480_v45 = vunpack.i.l.bf16 %v11479_v37 }
 0x597   : > { %17245 = vst [vmem:[#allocation58_spill] sm:$0xff] %v15528_v19  ;;  %10555 = vmatprep.subr.bf16.mxu1 %v12038_v15  ;;  %v15539_v30 = vadd.f32 %v5629_v58, %v14462_v46  ;;  %v5631_v57 = vpop.f32.mrb[67].mxu0  ;;  %v16816_v26 = vmax.f32 %v15528_v19, 0.0  ;;  %v7127_v25 = vpack.c.bf16 %v7041_v47, %v7040_v32  ;;  %v12040_v58 = vld [vmem:[%s16606_s5 + $0xe8] sm:$0xff]  }
 0x598   : > { %17246 = vst [vmem:[#allocation48_spill] sm:$0xff] %v15532_v12  ;;  %v15542_v52 = vadd.f32 %v5631_v57, %v14469_v50  ;;  %v16819_v43 = vmax.f32 %v15532_v12, 0.0  ;;  %v7128_v31 = vpack.c.bf16 %v7043_v40, %v7042_v29  ;;  %v11481_v57 = vunpack.i.h.bf16 %v11479_v37  ;;  %v11494_v32 = vpop.permute.xlu1 %11493  ;;  %v12041_v37 = vld [vmem:[%s16606_s5 + $0xf0] sm:$0xff]   ;;  %v17252_v12 = vld [vmem:[#allocation24_spill] sm:$0xff] }
 0x599   : > { %17247 = vst [vmem:[#allocation50_spill] sm:$0xff] %v15539_v30  ;;  %v16817_v9 = vmax.f32 %v15539_v30, 0.0  ;;  %v11489_v1 = vpop.permute.xlu0 %11488  ;;  %v11485_v40 = vunpack.i.l.bf16 %v11484_v2  ;;  %v17254_v19 = vld [vmem:[#allocation64_spill] sm:$0xff] }
 0x59a   : > { %17248 = vst [vmem:[#allocation52_spill] sm:$0xff] %v15542_v52  ;;  %10556 = vmatpush3.bf16.msra.mxu1 %v12038_v15  ;;  %v16820_v22 = vmax.f32 %v15542_v52, 0.0  ;;  %v17255_v30 = vmax.f32 %v17254_v19, 0.0 }
 0x59b   : > { %10561 = vmatprep.subr.bf16.mxu1 %v12039_v53  ;;  %v11637_v14 = vpack.i.bf16 %v16817_v9, %v16816_v26  ;;  %v11491_v9 = vunpack.i.h.bf16 %v11489_v1 }
 0x59c   : > { %v11642_v15 = vpack.i.bf16 %v16820_v22, %v16819_v43  ;;  %v5635_v47 = vpop.f32.mrb[68].mxu0  ;;  %v17250_v22 = vld [vmem:[#allocation26_spill] sm:$0xff]  ;;  %v6945_v5 = vmax.f32 %v17255_v30, %v11486_v6  ;;  %v17260_v6 = vld [vmem:[#allocation27_spill] sm:$0xff]  ;;  %v17262_v30 = vld [vmem:[#allocation65_spill] sm:$0xff] }
 0x59d   : > { %10558 = vmatmul.mubr.msk.bf16.vlgmr.msra.gmra.mrb[124].mxu1 %vm7205_vm2, %v7127_v25  ;;  %v15561_v26 = vadd.f32 %v5635_v47, %v14462_v46  ;;  %v5637_v29 = vpop.f32.mrb[69].mxu0  ;;  %11638 = vrot.lane.b32.xlu0 %v11637_v14, %s12217_s22  ;;  %v11490_v25 = vunpack.i.l.bf16 %v11489_v1  ;;  %v11496_v47 = vunpack.i.h.bf16 %v11494_v32  ;;  %v17261_v19 = vmax.f32 %v17260_v6, 0.0 }
 0x59e   : > { %10562 = vmatpush3.bf16.msra.mxu1 %v12039_v53  ;;  %10569 = vmatprep.mubr.msk.bf16.mxu1 %vm7205_vm2, %v7128_v31  ;;  %v15565_v18 = vadd.f32 %v5637_v29, %v14469_v50  ;;  %v5639_v43 = vpop.f32.mrb[70].mxu0  ;;  %v11495_v53 = vunpack.i.l.bf16 %v11494_v32  ;;  %v17251_v29 = vmax.f32 %v17250_v22, 0.0  ;;  %v17259_v22 = vmax.f32 %v17258_v36, 0.0 }
 0x59f   : > { %11643 = vrot.lane.b32.xlu1 %v11642_v15, %s12217_s22  ;;  %v15573_v31 = vadd.f32 %v5639_v43, %v14462_v46  ;;  %v5641_v2 = vpop.f32.mrb[71].mxu0  ;;  %10563 = vmatprep.subr.bf16.mxu1 %v12040_v58  ;;  %v17253_v15 = vmax.f32 %v17252_v12, 0.0  ;;  %v16834_v1 = vmax.f32 %v15561_v26, 0.0  ;;  %v17256_v43 = vld [vmem:[#allocation25_spill] sm:$0xff]  ;;  %v6446_v12 = vmax.f32 %v17261_v19, %v11490_v25 }
 0x5a0   : > { %17249 = vst [vmem:[#allocation54_spill] sm:$0xff] %v15565_v18  ;;  %v6445_v11 = vmax.f32 %v17251_v29, %v11481_v57  ;;  %v15578_v14 = vadd.f32 %v5641_v2, %v14469_v50  ;;  %v17257_v56 = vmax.f32 %v17256_v43, 0.0  ;;  %v6447_v57 = vmax.f32 %v17259_v22, %v11491_v9  ;;  %v17264_v43 = vld [vmem:[#allocation62_spill] sm:$0xff] }
 0x5a1   : > { %v6444_v52 = vmax.f32 %v17253_v15, %v11480_v45  ;;  %v16837_v32 = vmax.f32 %v15573_v31, 0.0  ;;  %v16830_v2 = vmax.f32 %v15565_v18, 0.0  ;;  %v12042_v45 = vld [vmem:[%s16606_s5 + $0xf8] sm:$0xff]  }
 0x5a2   : > { %10564 = vmatpush3.bf16.msra.mxu1 %v12040_v58  ;;  %v6944_v0 = vmax.f32 %v17257_v56, %v11485_v40  ;;  %v16831_v29 = vmax.f32 %v15578_v14, 0.0  ;;  %v17263_v58 = vmax.f32 %v17262_v30, 0.0  ;;  %v17265_v56 = vmax.f32 %v17264_v43, 0.0 }
 0x5a3   : > { %10565 = vmatprep.subr.bf16.mxu1 %v12041_v37  ;;  %v11647_v36 = vpack.i.bf16 %v16837_v32, %v16834_v1  ;;  %v17271_v32 = vld [vmem:[#allocation29_spill] sm:$0xff] }
 0x5a4   : > { %v6947_v15 = vmax.f32 %v17263_v58, %v11496_v47  ;;  %v6946_v40 = vmax.f32 %v17265_v56, %v11495_v53  ;;  %v11652_v9 = vpack.i.bf16 %v16831_v29, %v16830_v2  ;;  %v5645_v22 = vpop.f32.mrb[72].mxu0  ;;  %v7044_v47 = vmax.f32 %v6444_v52, %v6944_v0  ;;  %v12043_v58 = vld [vmem:[%s16606_s5 + $0x100] sm:$0xff]   ;;  %v11504_v0 = vpop.permute.xlu1 %11503 }
 0x5a5   : > { %v15610_v6 = vadd.f32 %v5645_v22, %v14462_v46  ;;  %v5647_v25 = vpop.f32.mrb[73].mxu0  ;;  %11648 = vrot.lane.b32.xlu0 %v11647_v36, %s12217_s22  ;;  %v7045_v53 = vmax.f32 %v6445_v11, %v6945_v5  ;;  %v11499_v22 = vpop.permute.xlu0 %11498  ;;  %v11506_v29 = vunpack.i.h.bf16 %v11504_v0 }
 0x5a6   : > { %10566 = vmatpush3.bf16.msra.mxu1 %v12041_v37  ;;  %v15614_v19 = vadd.f32 %v5647_v25, %v14469_v50  ;;  %v5649_v30 = vpop.f32.mrb[74].mxu0  ;;  %11653 = vrot.lane.b32.xlu1 %v11652_v9, %s12217_s22  ;;  %v7046_v43 = vmax.f32 %v6446_v12, %v6946_v40  ;;  %v7047_v56 = vmax.f32 %v6447_v57, %v6947_v15  ;;  %v11500_v2 = vunpack.i.l.bf16 %v11499_v22 }
 0x5a7   : > { %17266 = vst [vmem:[#allocation56_spill] sm:$0xff] %v15610_v6  ;;  %10567 = vmatprep.subr.bf16.mxu1 %v12042_v45  ;;  %v15621_v37 = vadd.f32 %v5649_v30, %v14462_v46  ;;  %v5651_v36 = vpop.f32.mrb[75].mxu0  ;;  %v16832_v11 = vmax.f32 %v15610_v6, 0.0  ;;  %v7129_v9 = vpack.c.bf16 %v7045_v53, %v7044_v47  ;;  %v12044_v30 = vld [vmem:[%s16606_s5 + $0x108] sm:$0xff]  }
 0x5a8   : > { %17267 = vst [vmem:[#allocation3_spill] sm:$0xff] %v15614_v19  ;;  %v15624_v5 = vadd.f32 %v5651_v36, %v14469_v50  ;;  %v16835_v25 = vmax.f32 %v15614_v19, 0.0  ;;  %v7130_v40 = vpack.c.bf16 %v7047_v56, %v7046_v43  ;;  %v11501_v36 = vunpack.i.h.bf16 %v11499_v22  ;;  %v11514_v47 = vpop.permute.xlu1 %11513  ;;  %v12045_v22 = vld [vmem:[%s16606_s5 + $0x110] sm:$0xff]  }
 0x5a9   : > { %17268 = vst [vmem:[#allocation60_spill] sm:$0xff] %v15621_v37  ;;  %v16833_v52 = vmax.f32 %v15621_v37, 0.0  ;;  %v11509_v15 = vpop.permute.xlu0 %11508  ;;  %v11505_v56 = vunpack.i.l.bf16 %v11504_v0 }
 0x5aa   : > { %17269 = vst [vmem:[#allocation61_spill] sm:$0xff] %v15624_v5  ;;  %10568 = vmatpush3.bf16.msra.mxu1 %v12042_v45  ;;  %v16836_v12 = vmax.f32 %v15624_v5, 0.0  ;;  %v17273_v5 = vmax.f32 %v14957_v21, 0.0  ;;  %v12046_v21 = vld [vmem:[%s16606_s5 + $0x118] sm:$0xff]  }
 0x5ab   : > { %10573 = vmatprep.subr.bf16.mxu1 %v12043_v58  ;;  %v11657_v57 = vpack.i.bf16 %v16833_v52, %v16832_v11  ;;  %v11511_v52 = vunpack.i.h.bf16 %v11509_v15 }
 0x5ac   : > { %v11662_v45 = vpack.i.bf16 %v16836_v12, %v16835_v25  ;;  %v5655_v53 = vpop.f32.mrb[76].mxu0  ;;  %v6949_v6 = vmax.f32 %v17273_v5, %v11506_v29  ;;  %v17278_v29 = vmax.f32 %v14993_v34, 0.0 }
 0x5ad   : > { %10570 = vmatmul.mubr.msk.bf16.vlgmr.msra.gmra.mrb[124].mxu1 %vm7205_vm2, %v7129_v9  ;;  %v15643_v11 = vadd.f32 %v5655_v53, %v14462_v46  ;;  %v5657_v43 = vpop.f32.mrb[77].mxu0  ;;  %11658 = vrot.lane.b32.xlu0 %v11657_v57, %s12217_s22  ;;  %v11510_v9 = vunpack.i.l.bf16 %v11509_v15  ;;  %v11516_v53 = vunpack.i.h.bf16 %v11514_v47 }
 0x5ae   : > { %10574 = vmatpush3.bf16.msra.mxu1 %v12043_v58  ;;  %10581 = vmatprep.mubr.msk.bf16.mxu1 %vm7205_vm2, %v7130_v40  ;;  %v15647_v1 = vadd.f32 %v5657_v43, %v14469_v50  ;;  %v5659_v25 = vpop.f32.mrb[78].mxu0  ;;  %v11515_v58 = vunpack.i.l.bf16 %v11514_v47  ;;  %v17270_v43 = vmax.f32 %v14954_v54, 0.0  ;;  %v17276_v54 = vmax.f32 %v14990_v39, 0.0 }
 0x5af   : > { %11663 = vrot.lane.b32.xlu1 %v11662_v45, %s12217_s22  ;;  %v15655_v40 = vadd.f32 %v5659_v25, %v14462_v46  ;;  %v5661_v0 = vpop.f32.mrb[79].mxu0  ;;  %10575 = vmatprep.subr.bf16.mxu1 %v12044_v30  ;;  %v17272_v45 = vmax.f32 %v17271_v32, 0.0  ;;  %v16849_v15 = vmax.f32 %v15643_v11, 0.0  ;;  %v17274_v25 = vld [vmem:[#allocation63_spill] sm:$0xff]  ;;  %v17277_v32 = vmax.f32 %v14976_v38, 0.0 }
 0x5b0   : > { %v6449_v12 = vmax.f32 %v17270_v43, %v11501_v36  ;;  %v15660_v57 = vadd.f32 %v5661_v0, %v14469_v50  ;;  %v17275_v37 = vmax.f32 %v17274_v25, 0.0  ;;  %v6451_v36 = vmax.f32 %v17276_v54, %v11511_v52  ;;  %v12047_v54 = vld [vmem:[%s16606_s5 + $0x120] sm:$0xff]  }
 0x5b1   : > { %v6448_v19 = vmax.f32 %v17272_v45, %v11500_v2  ;;  %v16850_v47 = vmax.f32 %v15655_v40, 0.0  ;;  %v16845_v0 = vmax.f32 %v15647_v1, 0.0  ;;  %v6450_v2 = vmax.f32 %v17277_v32, %v11510_v9 }
 0x5b2   : > { %10576 = vmatpush3.bf16.msra.mxu1 %v12044_v30  ;;  %v6948_v18 = vmax.f32 %v17275_v37, %v11505_v56  ;;  %v16848_v43 = vmax.f32 %v15660_v57, 0.0  ;;  %v6951_v5 = vmax.f32 %v17278_v29, %v11516_v53  ;;  %v17279_v30 = vld [vmem:[#allocation30_spill] sm:$0xff]  ;;  %v7049_v53 = vmax.f32 %v6449_v12, %v6949_v6 }
 0x5b3   : > { %10577 = vmatprep.subr.bf16.mxu1 %v12045_v22  ;;  %v17280_v37 = vmax.f32 %v17279_v30, 0.0  ;;  %v11667_v39 = vpack.i.bf16 %v16850_v47, %v16849_v15  ;;  %v11519_v30 = vpop.permute.xlu0 %11518  ;;  %v17284_v15 = vmax.f32 %v15032_v27, 0.0  ;;  %v17287_v27 = vmax.f32 %v15061_v28, 0.0 }
 0x5b4   : > { %v11672_v52 = vpack.i.bf16 %v16848_v43, %v16845_v0  ;;  %v5665_v45 = vpop.f32.mrb[80].mxu0  ;;  %v7048_v9 = vmax.f32 %v6448_v19, %v6948_v18  ;;  %v7051_v29 = vmax.f32 %v6451_v36, %v6951_v5  ;;  %v11524_v18 = vpop.permute.xlu1 %11523 }
 0x5b5   : > { %v6950_v56 = vmax.f32 %v17280_v37, %v11515_v58  ;;  %v15692_v38 = vadd.f32 %v5665_v45, %v14462_v46  ;;  %v5667_v34 = vpop.f32.mrb[81].mxu0  ;;  %11668 = vrot.lane.b32.xlu0 %v11667_v39, %s12217_s22  ;;  %v12048_v45 = vld [vmem:[%s16606_s5 + $0x128] sm:$0xff]  }
 0x5b6   : > { %10578 = vmatpush3.bf16.msra.mxu1 %v12045_v22  ;;  %v15696_v58 = vadd.f32 %v5667_v34, %v14469_v50  ;;  %v5669_v25 = vpop.f32.mrb[82].mxu0  ;;  %11673 = vrot.lane.b32.xlu1 %v11672_v52, %s12217_s22  ;;  %v7131_v39 = vpack.c.bf16 %v7049_v53, %v7048_v9  ;;  %v11521_v34 = vunpack.i.h.bf16 %v11519_v30 }
 0x5b7   : > { %10579 = vmatprep.subr.bf16.mxu1 %v12046_v21  ;;  %v7050_v32 = vmax.f32 %v6450_v2, %v6950_v56  ;;  %v15703_v22 = vadd.f32 %v5669_v25, %v14462_v46  ;;  %v5671_v37 = vpop.f32.mrb[83].mxu0  ;;  %v16843_v19 = vmax.f32 %v15692_v38, 0.0  ;;  %v11529_v5 = vpop.permute.xlu0 %11528  ;;  %v11520_v25 = vunpack.i.l.bf16 %v11519_v30  ;;  %v12049_v30 = vld [vmem:[%s16606_s5 + $0x130] sm:$0xff]  }
 0x5b8   : > { %17281 = vst [vmem:[#allocation43_spill] sm:$0xff] %v15696_v58  ;;  %v15706_v6 = vadd.f32 %v5671_v37, %v14469_v50  ;;  %v16846_v52 = vmax.f32 %v15696_v58, 0.0  ;;  %v11534_v9 = vpop.permute.xlu1 %11533  ;;  %v11526_v37 = vunpack.i.h.bf16 %v11524_v18 }
 0x5b9   : > { %v16844_v12 = vmax.f32 %v15703_v22, 0.0  ;;  %v7132_v56 = vpack.c.bf16 %v7051_v29, %v7050_v32  ;;  %v11525_v29 = vunpack.i.l.bf16 %v11524_v18 }
 0x5ba   : > { %10580 = vmatpush3.bf16.msra.mxu1 %v12046_v21  ;;  %v16847_v2 = vmax.f32 %v15706_v6, 0.0  ;;  %v6953_v47 = vmax.f32 %v17284_v15, %v11526_v37 }
 0x5bb   : > { %10585 = vmatprep.subr.bf16.mxu1 %v12047_v54  ;;  %v11677_v36 = vpack.i.bf16 %v16844_v12, %v16843_v19  ;;  %v11531_v12 = vunpack.i.h.bf16 %v11529_v5 }
 0x5bc   : > { %v11682_v21 = vpack.i.bf16 %v16847_v2, %v16846_v52  ;;  %v5675_v53 = vpop.f32.mrb[84].mxu0 }
 0x5bd   : > { %10582 = vmatmul.mubr.msk.bf16.vlgmr.msra.gmra.mrb[124].mxu1 %vm7205_vm2, %v7131_v39  ;;  %v15725_v19 = vadd.f32 %v5675_v53, %v14462_v46  ;;  %v5677_v32 = vpop.f32.mrb[85].mxu0  ;;  %11678 = vrot.lane.b32.xlu0 %v11677_v36, %s12217_s22  ;;  %v11530_v39 = vunpack.i.l.bf16 %v11529_v5  ;;  %v11536_v53 = vunpack.i.h.bf16 %v11534_v9 }
 0x5be   : > { %10586 = vmatpush3.bf16.msra.mxu1 %v12047_v54  ;;  %10593 = vmatprep.mubr.msk.bf16.mxu1 %vm7205_vm2, %v7132_v56  ;;  %v15729_v0 = vadd.f32 %v5677_v32, %v14469_v50  ;;  %v5679_v52 = vpop.f32.mrb[86].mxu0  ;;  %v11535_v54 = vunpack.i.l.bf16 %v11534_v9  ;;  %v17282_v32 = vmax.f32 %v15029_v48, 0.0  ;;  %v17286_v48 = vmax.f32 %v15074_v16, 0.0 }
 0x5bf   : > { %11683 = vrot.lane.b32.xlu1 %v11682_v21, %s12217_s22  ;;  %v15737_v56 = vadd.f32 %v5679_v52, %v14462_v46  ;;  %v5681_v18 = vpop.f32.mrb[87].mxu0  ;;  %10587 = vmatprep.subr.bf16.mxu1 %v12048_v45  ;;  %v17283_v21 = vmax.f32 %v15013_v62, 0.0  ;;  %v16858_v5 = vmax.f32 %v15725_v19, 0.0  ;;  %v17285_v52 = vmax.f32 %v15025_v44, 0.0  ;;  %v12050_v62 = vld [vmem:[%s16606_s5 + $0x138] sm:$0xff]  }
 0x5c0   : > { %v6453_v2 = vmax.f32 %v17282_v32, %v11521_v34  ;;  %v15742_v36 = vadd.f32 %v5681_v18, %v14469_v50  ;;  %v6455_v34 = vmax.f32 %v17286_v48, %v11531_v12  ;;  %v16856_v18 = vmax.f32 %v15729_v0, 0.0 }
 0x5c1   : > { %v6452_v43 = vmax.f32 %v17283_v21, %v11520_v25  ;;  %v16859_v9 = vmax.f32 %v15737_v56, 0.0  ;;  %v6952_v58 = vmax.f32 %v17285_v52, %v11525_v29  ;;  %v6454_v15 = vmax.f32 %v17287_v27, %v11530_v39  ;;  %v12051_v21 = vld [vmem:[%s16606_s5 + $0x140] sm:$0xff]   ;;  %v11539_v27 = vpop.permute.xlu0 %11538 }
 0x5c2   : > { %10588 = vmatpush3.bf16.msra.mxu1 %v12048_v45  ;;  %v16857_v32 = vmax.f32 %v15742_v36, 0.0  ;;  %v17288_v45 = vmax.f32 %v15078_v35, 0.0  ;;  %v17289_v44 = vmax.f32 %v15066_v8, 0.0  ;;  %v7053_v39 = vmax.f32 %v6453_v2, %v6953_v47 }
 0x5c3   : > { %10589 = vmatprep.subr.bf16.mxu1 %v12049_v30  ;;  %v11687_v16 = vpack.i.bf16 %v16859_v9, %v16858_v5  ;;  %v7052_v8 = vmax.f32 %v6452_v43, %v6952_v58  ;;  %v11544_v43 = vpop.permute.xlu1 %11543 }
 0x5c4   : > { %v6955_v25 = vmax.f32 %v17288_v45, %v11536_v53  ;;  %v6954_v37 = vmax.f32 %v17289_v44, %v11535_v54  ;;  %v11692_v12 = vpack.i.bf16 %v16857_v32, %v16856_v18  ;;  %v5685_v29 = vpop.f32.mrb[88].mxu0  ;;  %v17292_v32 = vmax.f32 %v15129_v42, 0.0 }
 0x5c5   : > { %v15774_v28 = vadd.f32 %v5685_v29, %v14462_v46  ;;  %v5687_v35 = vpop.f32.mrb[89].mxu0  ;;  %11688 = vrot.lane.b32.xlu0 %v11687_v16, %s12217_s22  ;;  %v7133_v44 = vpack.c.bf16 %v7053_v39, %v7052_v8  ;;  %v11541_v29 = vunpack.i.h.bf16 %v11539_v27  ;;  %v11540_v39 = vunpack.i.l.bf16 %v11539_v27  ;;  %v12053_v27 = vld [vmem:[%s16606_s5 + $0x150] sm:$0xff]  }
 0x5c6   : > { %10590 = vmatpush3.bf16.msra.mxu1 %v12049_v30  ;;  %v15778_v53 = vadd.f32 %v5687_v35, %v14469_v50  ;;  %v5689_v54 = vpop.f32.mrb[90].mxu0  ;;  %11693 = vrot.lane.b32.xlu1 %v11692_v12, %s12217_s22  ;;  %v7054_v52 = vmax.f32 %v6454_v15, %v6954_v37  ;;  %v7055_v48 = vmax.f32 %v6455_v34, %v6955_v25  ;;  %v12052_v12 = vld [vmem:[%s16606_s5 + $0x148] sm:$0xff]   ;;  %v17295_v42 = vmax.f32 %v15150_v49, 0.0 }
 0x5c7   : > { %10591 = vmatprep.subr.bf16.mxu1 %v12050_v62  ;;  %v15785_v30 = vadd.f32 %v5689_v54, %v14462_v46  ;;  %v5691_v45 = vpop.f32.mrb[91].mxu0  ;;  %v16852_v58 = vmax.f32 %v15774_v28, 0.0  ;;  %v11549_v25 = vpop.permute.xlu0 %11548  ;;  %v11546_v54 = vunpack.i.h.bf16 %v11544_v43 }
 0x5c8   : > { %v15788_v47 = vadd.f32 %v5691_v45, %v14469_v50  ;;  %v16854_v16 = vmax.f32 %v15778_v53, 0.0  ;;  %v7134_v37 = vpack.c.bf16 %v7055_v48, %v7054_v52  ;;  %v11554_v35 = vpop.permute.xlu1 %11553  ;;  %v11545_v48 = vunpack.i.l.bf16 %v11544_v43 }
 0x5c9   : > { %v16853_v2 = vmax.f32 %v15785_v30, 0.0  ;;  %v6957_v5 = vmax.f32 %v17292_v32, %v11546_v54 }
 0x5ca   : > { %10592 = vmatpush3.bf16.msra.mxu1 %v12050_v62  ;;  %v16855_v15 = vmax.f32 %v15788_v47, 0.0 }
 0x5cb   : > { %10597 = vmatprep.subr.bf16.mxu1 %v12051_v21  ;;  %v11697_v34 = vpack.i.bf16 %v16853_v2, %v16852_v58  ;;  %v11551_v58 = vunpack.i.h.bf16 %v11549_v25 }
 0x5cc   : > { %v11702_v62 = vpack.i.bf16 %v16855_v15, %v16854_v16  ;;  %v5695_v8 = vpop.f32.mrb[92].mxu0 }
 0x5cd   : > { %10594 = vmatmul.mubr.msk.bf16.vlgmr.msra.gmra.mrb[124].mxu1 %vm7205_vm2, %v7133_v44  ;;  %v15807_v45 = vadd.f32 %v5695_v8, %v14462_v46  ;;  %v5697_v52 = vpop.f32.mrb[93].mxu0  ;;  %11698 = vrot.lane.b32.xlu0 %v11697_v34, %s12217_s22  ;;  %v11550_v44 = vunpack.i.l.bf16 %v11549_v25  ;;  %v11556_v8 = vunpack.i.h.bf16 %v11554_v35 }
 0x5ce   : > { %10598 = vmatpush3.bf16.msra.mxu1 %v12051_v21  ;;  %10605 = vmatprep.mubr.msk.bf16.mxu1 %vm7205_vm2, %v7134_v37  ;;  %v15811_v2 = vadd.f32 %v5697_v52, %v14469_v50  ;;  %v5699_v16 = vpop.f32.mrb[94].mxu0  ;;  %v11555_v21 = vunpack.i.l.bf16 %v11554_v35  ;;  %v17290_v52 = vmax.f32 %v15126_v63, 0.0  ;;  %v17294_v63 = vmax.f32 %v15162_v60, 0.0 }
 0x5cf   : > { %11703 = vrot.lane.b32.xlu1 %v11702_v62, %s12217_s22  ;;  %v15819_v37 = vadd.f32 %v5699_v16, %v14462_v46  ;;  %v5701_v43 = vpop.f32.mrb[95].mxu0  ;;  %10599 = vmatprep.subr.bf16.mxu1 %v12052_v12  ;;  %v17291_v62 = vmax.f32 %v15115_v41, 0.0  ;;  %v16866_v25 = vmax.f32 %v15807_v45, 0.0  ;;  %v17293_v16 = vmax.f32 %v15119_v23, 0.0  ;;  %v12054_v41 = vld [vmem:[%s16606_s5 + $0x158] sm:$0xff]  }
 0x5d0   : > { %v6457_v15 = vmax.f32 %v17290_v52, %v11541_v29  ;;  %v15824_v34 = vadd.f32 %v5701_v43, %v14469_v50  ;;  %v6459_v29 = vmax.f32 %v17294_v63, %v11551_v58  ;;  %v16864_v43 = vmax.f32 %v15811_v2, 0.0 }
 0x5d1   : > { %v6456_v18 = vmax.f32 %v17291_v62, %v11540_v39  ;;  %v16867_v35 = vmax.f32 %v15819_v37, 0.0  ;;  %v6956_v9 = vmax.f32 %v17293_v16, %v11545_v48  ;;  %v6458_v32 = vmax.f32 %v17295_v42, %v11550_v44  ;;  %v12055_v62 = vld [vmem:[%s16606_s5 + $0x160] sm:$0xff]   ;;  %v11559_v42 = vpop.permute.xlu0 %11558 }
 0x5d2   : > { %10600 = vmatpush3.bf16.msra.mxu1 %v12052_v12  ;;  %v16865_v52 = vmax.f32 %v15824_v34, 0.0  ;;  %v17296_v12 = vmax.f32 %v15165_v13, 0.0  ;;  %v17297_v23 = vmax.f32 %v15154_v3, 0.0  ;;  %v7057_v44 = vmax.f32 %v6457_v15, %v6957_v5 }
 0x5d3   : > { %10601 = vmatprep.subr.bf16.mxu1 %v12053_v27  ;;  %v11707_v60 = vpack.i.bf16 %v16867_v35, %v16866_v25  ;;  %v7056_v3 = vmax.f32 %v6456_v18, %v6956_v9  ;;  %v11564_v9 = vpop.permute.xlu1 %11563 }
 0x5d4   : > { %v6959_v39 = vmax.f32 %v17296_v12, %v11556_v8  ;;  %v6958_v54 = vmax.f32 %v17297_v23, %v11555_v21  ;;  %v11712_v58 = vpack.i.bf16 %v16865_v52, %v16864_v43  ;;  %v5705_v48 = vpop.f32.mrb[96].mxu0  ;;  %v17300_v52 = vmax.f32 %v15214_v10, 0.0 }
 0x5d5   : > { %v15856_v49 = vadd.f32 %v5705_v48, %v14462_v46  ;;  %v5707_v13 = vpop.f32.mrb[97].mxu0  ;;  %11708 = vrot.lane.b32.xlu0 %v11707_v60, %s12217_s22  ;;  %v7135_v23 = vpack.c.bf16 %v7057_v44, %v7056_v3  ;;  %v11561_v48 = vunpack.i.h.bf16 %v11559_v42  ;;  %v11560_v44 = vunpack.i.l.bf16 %v11559_v42  ;;  %v12057_v42 = vld [vmem:[%s16606_s5 + $0x170] sm:$0xff]  }
 0x5d6   : > { %10602 = vmatpush3.bf16.msra.mxu1 %v12053_v27  ;;  %v15860_v8 = vadd.f32 %v5707_v13, %v14469_v50  ;;  %v5709_v21 = vpop.f32.mrb[98].mxu0  ;;  %11713 = vrot.lane.b32.xlu1 %v11712_v58, %s12217_s22  ;;  %v7058_v16 = vmax.f32 %v6458_v32, %v6958_v54  ;;  %v7059_v63 = vmax.f32 %v6459_v29, %v6959_v39  ;;  %v12056_v58 = vld [vmem:[%s16606_s5 + $0x168] sm:$0xff]   ;;  %v17303_v10 = vmax.f32 %v15233_v7, 0.0 }
 0x5d7   : > { %10603 = vmatprep.subr.bf16.mxu1 %v12054_v41  ;;  %v15867_v27 = vadd.f32 %v5709_v21, %v14462_v46  ;;  %v5711_v12 = vpop.f32.mrb[99].mxu0  ;;  %v16860_v18 = vmax.f32 %v15856_v49, 0.0  ;;  %v11569_v39 = vpop.permute.xlu0 %11568  ;;  %v11566_v21 = vunpack.i.h.bf16 %v11564_v9 }
 0x5d8   : > { %v15870_v5 = vadd.f32 %v5711_v12, %v14469_v50  ;;  %v16862_v60 = vmax.f32 %v15860_v8, 0.0  ;;  %v7136_v54 = vpack.c.bf16 %v7059_v63, %v7058_v16  ;;  %v11574_v13 = vpop.permute.xlu1 %11573  ;;  %v11565_v63 = vunpack.i.l.bf16 %v11564_v9 }
 0x5d9   : > { %v16861_v15 = vmax.f32 %v15867_v27, 0.0  ;;  %v6961_v25 = vmax.f32 %v17300_v52, %v11566_v21 }
 0x5da   : > { %10604 = vmatpush3.bf16.msra.mxu1 %v12054_v41  ;;  %v16863_v32 = vmax.f32 %v15870_v5, 0.0 }
 0x5db   : > { %10609 = vmatprep.subr.bf16.mxu1 %v12055_v62  ;;  %v11717_v29 = vpack.i.bf16 %v16861_v15, %v16860_v18  ;;  %v11571_v18 = vunpack.i.h.bf16 %v11569_v39 }
 0x5dc   : > { %v11722_v41 = vpack.i.bf16 %v16863_v32, %v16862_v60  ;;  %v5715_v3 = vpop.f32.mrb[100].mxu0 }
 0x5dd   : > { %10606 = vmatmul.mubr.msk.bf16.vlgmr.msra.gmra.mrb[124].mxu1 %vm7205_vm2, %v7135_v23  ;;  %v15889_v12 = vadd.f32 %v5715_v3, %v14462_v46  ;;  %v5717_v16 = vpop.f32.mrb[101].mxu0  ;;  %11718 = vrot.lane.b32.xlu0 %v11717_v29, %s12217_s22  ;;  %v11570_v23 = vunpack.i.l.bf16 %v11569_v39  ;;  %v11576_v3 = vunpack.i.h.bf16 %v11574_v13 }
 0x5de   : > { %10610 = vmatpush3.bf16.msra.mxu1 %v12055_v62  ;;  %10617 = vmatprep.mubr.msk.bf16.mxu1 %vm7205_vm2, %v7136_v54  ;;  %v15893_v15 = vadd.f32 %v5717_v16, %v14469_v50  ;;  %v5719_v60 = vpop.f32.mrb[102].mxu0  ;;  %v11575_v62 = vunpack.i.l.bf16 %v11574_v13  ;;  %v17298_v16 = vmax.f32 %v15211_v24, 0.0  ;;  %v17302_v24 = vmax.f32 %v15245_v4, 0.0 }
 0x5df   : > { %11723 = vrot.lane.b32.xlu1 %v11722_v41, %s12217_s22  ;;  %v15901_v54 = vadd.f32 %v5719_v60, %v14462_v46  ;;  %v5721_v9 = vpop.f32.mrb[103].mxu0  ;;  %10611 = vmatprep.subr.bf16.mxu1 %v12056_v58  ;;  %v17299_v41 = vmax.f32 %v15200_v17, 0.0  ;;  %v16874_v39 = vmax.f32 %v15889_v12, 0.0  ;;  %v17301_v60 = vmax.f32 %v15204_v59, 0.0  ;;  %v12058_v17 = vld [vmem:[%s16606_s5 + $0x178] sm:$0xff]  }
 0x5e0   : > { %v6461_v32 = vmax.f32 %v17298_v16, %v11561_v48  ;;  %v15906_v29 = vadd.f32 %v5721_v9, %v14469_v50  ;;  %v6463_v48 = vmax.f32 %v17302_v24, %v11571_v18  ;;  %v16872_v9 = vmax.f32 %v15893_v15, 0.0 }
 0x5e1   : > { %v6460_v43 = vmax.f32 %v17299_v41, %v11560_v44  ;;  %v16875_v13 = vmax.f32 %v15901_v54, 0.0  ;;  %v6960_v35 = vmax.f32 %v17301_v60, %v11565_v63  ;;  %v6462_v52 = vmax.f32 %v17303_v10, %v11570_v23  ;;  %v12059_v41 = vld [vmem:[%s16606_s5 + $0x180] sm:$0xff]   ;;  %v11579_v10 = vpop.permute.xlu0 %11578 }
 0x5e2   : > { %10612 = vmatpush3.bf16.msra.mxu1 %v12056_v58  ;;  %v16873_v16 = vmax.f32 %v15906_v29, 0.0  ;;  %v17304_v58 = vmax.f32 %v15250_v20, 0.0  ;;  %v17305_v59 = vmax.f32 %v15237_v55, 0.0  ;;  %v7061_v23 = vmax.f32 %v6461_v32, %v6961_v25 }
 0x5e3   : > { %10613 = vmatprep.subr.bf16.mxu1 %v12057_v42  ;;  %v11727_v4 = vpack.i.bf16 %v16875_v13, %v16874_v39  ;;  %v7060_v55 = vmax.f32 %v6460_v43, %v6960_v35  ;;  %v11584_v35 = vpop.permute.xlu1 %11583 }
 0x5e4   : > { %v6963_v44 = vmax.f32 %v17304_v58, %v11576_v3  ;;  %v6962_v21 = vmax.f32 %v17305_v59, %v11575_v62  ;;  %v11732_v18 = vpack.i.bf16 %v16873_v16, %v16872_v9  ;;  %v5725_v63 = vpop.f32.mrb[104].mxu0  ;;  %v17314_v16 = vmax.f32 %v15296_v61, 0.0  ;;  %v17319_v61 = vld [vmem:[#allocation31_spill] sm:$0xff] }
 0x5e5   : > { %v15938_v7 = vadd.f32 %v5725_v63, %v14462_v46  ;;  %v5727_v20 = vpop.f32.mrb[105].mxu0  ;;  %11728 = vrot.lane.b32.xlu0 %v11727_v4, %s12217_s22  ;;  %v7137_v59 = vpack.c.bf16 %v7061_v23, %v7060_v55  ;;  %v11581_v63 = vunpack.i.h.bf16 %v11579_v10  ;;  %v11580_v23 = vunpack.i.l.bf16 %v11579_v10  ;;  %v12061_v10 = vld [vmem:[%s16606_s5 + $0x190] sm:$0xff]  }
 0x5e6   : > { %10614 = vmatpush3.bf16.msra.mxu1 %v12057_v42  ;;  %v15942_v3 = vadd.f32 %v5727_v20, %v14469_v50  ;;  %v5729_v62 = vpop.f32.mrb[106].mxu0  ;;  %11733 = vrot.lane.b32.xlu1 %v11732_v18, %s12217_s22  ;;  %v7062_v60 = vmax.f32 %v6462_v52, %v6962_v21  ;;  %v7063_v24 = vmax.f32 %v6463_v48, %v6963_v44  ;;  %v12060_v18 = vld [vmem:[%s16606_s5 + $0x188] sm:$0xff]  }
 0x5e7   : > { %10615 = vmatprep.subr.bf16.mxu1 %v12058_v17  ;;  %v15949_v42 = vadd.f32 %v5729_v62, %v14462_v46  ;;  %v5731_v58 = vpop.f32.mrb[107].mxu0  ;;  %v16868_v43 = vmax.f32 %v15938_v7, 0.0  ;;  %v11589_v44 = vpop.permute.xlu0 %11588  ;;  %v11586_v62 = vunpack.i.h.bf16 %v11584_v35 }
 0x5e8   : > { %17306 = vst [vmem:[#allocation69_spill] sm:$0xff] %v15942_v3  ;;  %v15952_v25 = vadd.f32 %v5731_v58, %v14469_v50  ;;  %v16870_v4 = vmax.f32 %v15942_v3, 0.0  ;;  %v7138_v21 = vpack.c.bf16 %v7063_v24, %v7062_v60  ;;  %v11594_v20 = vpop.permute.xlu1 %11593  ;;  %v11585_v24 = vunpack.i.l.bf16 %v11584_v35 }
 0x5e9   : > { %v16869_v32 = vmax.f32 %v15949_v42, 0.0  ;;  %v6965_v39 = vmax.f32 %v17314_v16, %v11586_v62  ;;  %v17320_v16 = vmax.f32 %v17319_v61, 0.0  ;;  %v17321_v62 = vld [vmem:[#allocation33_spill] sm:$0xff] }
 0x5ea   : > { %17307 = vst [vmem:[#allocation47_spill] sm:$0xff] %v15952_v25  ;;  %10616 = vmatpush3.bf16.msra.mxu1 %v12058_v17  ;;  %v16871_v52 = vmax.f32 %v15952_v25, 0.0  ;;  %v17317_v25 = vld [vmem:[#allocation67_spill] sm:$0xff] }
 0x5eb   : > { %10621 = vmatprep.subr.bf16.mxu1 %v12059_v41  ;;  %v11737_v48 = vpack.i.bf16 %v16869_v32, %v16868_v43  ;;  %v11591_v43 = vunpack.i.h.bf16 %v11589_v44 }
 0x5ec   : > { %v11742_v17 = vpack.i.bf16 %v16871_v52, %v16870_v4  ;;  %v5735_v55 = vpop.f32.mrb[108].mxu0 }
 0x5ed   : > { %10618 = vmatmul.mubr.msk.bf16.vlgmr.msra.gmra.mrb[124].mxu1 %vm7205_vm2, %v7137_v59  ;;  %v15971_v58 = vadd.f32 %v5735_v55, %v14462_v46  ;;  %v5737_v60 = vpop.f32.mrb[109].mxu0  ;;  %11738 = vrot.lane.b32.xlu0 %v11737_v48, %s12217_s22  ;;  %v11590_v59 = vunpack.i.l.bf16 %v11589_v44  ;;  %v11596_v55 = vunpack.i.h.bf16 %v11594_v20 }
 0x5ee   : > { %10622 = vmatpush3.bf16.msra.mxu1 %v12059_v41  ;;  %10629 = vmatprep.mubr.msk.bf16.mxu1 %vm7205_vm2, %v7138_v21  ;;  %v15975_v32 = vadd.f32 %v5737_v60, %v14469_v50  ;;  %v5739_v4 = vpop.f32.mrb[110].mxu0  ;;  %v11595_v41 = vunpack.i.l.bf16 %v11594_v20  ;;  %v17311_v60 = vmax.f32 %v15293_v51, 0.0  ;;  %v17318_v51 = vmax.f32 %v17317_v25, 0.0 }
 0x5ef   : > { %17308 = vst [vmem:[#allocation51_spill] sm:$0xff] %v15971_v58  ;;  %11743 = vrot.lane.b32.xlu1 %v11742_v17, %s12217_s22  ;;  %v15983_v21 = vadd.f32 %v5739_v4, %v14462_v46  ;;  %v5741_v35 = vpop.f32.mrb[111].mxu0  ;;  %10623 = vmatprep.subr.bf16.mxu1 %v12060_v18  ;;  %v17313_v17 = vmax.f32 %v15282_v33, 0.0  ;;  %v16882_v44 = vmax.f32 %v15971_v58, 0.0  ;;  %v17315_v4 = vld [vmem:[#allocation66_spill] sm:$0xff] }
 0x5f0   : > { %17309 = vst [vmem:[#allocation70_spill] sm:$0xff] %v15975_v32  ;;  %v6465_v52 = vmax.f32 %v17311_v60, %v11581_v63  ;;  %v15988_v48 = vadd.f32 %v5741_v35, %v14469_v50  ;;  %v17316_v13 = vmax.f32 %v17315_v4, 0.0  ;;  %v6467_v63 = vmax.f32 %v17318_v51, %v11591_v43  ;;  %v12062_v33 = vld [vmem:[%s16606_s5 + $0x198] sm:$0xff]   ;;  %v17323_v4 = vld [vmem:[#allocation32_spill] sm:$0xff] }
 0x5f1   : > { %17310 = vst [vmem:[#allocation71_spill] sm:$0xff] %v15983_v21  ;;  %v6464_v9 = vmax.f32 %v17313_v17, %v11580_v23  ;;  %v16885_v20 = vmax.f32 %v15983_v21, 0.0  ;;  %v16878_v35 = vmax.f32 %v15975_v32, 0.0  ;;  %v6466_v23 = vmax.f32 %v17320_v16, %v11590_v59  ;;  %v17341_v21 = vld [vmem:[#allocation38_spill] sm:$0xff] }
 0x5f2   : > { %17312 = vst [vmem:[#allocation59_spill] sm:$0xff] %v15988_v48  ;;  %10624 = vmatpush3.bf16.msra.mxu1 %v12060_v18  ;;  %v6964_v3 = vmax.f32 %v17316_v13, %v11585_v24  ;;  %v16879_v60 = vmax.f32 %v15988_v48, 0.0  ;;  %v17322_v18 = vmax.f32 %v17321_v62, 0.0  ;;  %v17324_v13 = vmax.f32 %v17323_v4, 0.0 }
 0x5f3   : > { %10625 = vmatprep.subr.bf16.mxu1 %v12061_v10  ;;  %v11747_v25 = vpack.i.bf16 %v16885_v20, %v16882_v44 }
 0x5f4   : > { %v6967_v17 = vmax.f32 %v17322_v18, %v11596_v55  ;;  %v6966_v24 = vmax.f32 %v17324_v13, %v11595_v41  ;;  %v11752_v43 = vpack.i.bf16 %v16879_v60, %v16878_v35  ;;  %v5745_v51 = vpop.f32.mrb[112].mxu0  ;;  %v7064_v55 = vmax.f32 %v6464_v9, %v6964_v3  ;;  %v12063_v18 = vld [vmem:[%s16606_s5 + $0x1a0] sm:$0xff]   ;;  %v11604_v9 = vpop.permute.xlu1 %11603 }
 0x5f5   : > { %v16020_v61 = vadd.f32 %v5745_v51, %v14462_v46  ;;  %v5747_v59 = vpop.f32.mrb[113].mxu0  ;;  %11748 = vrot.lane.b32.xlu0 %v11747_v25, %s12217_s22  ;;  %v7065_v41 = vmax.f32 %v6465_v52, %v6965_v39  ;;  %v11599_v51 = vpop.permute.xlu0 %11598  ;;  %v11606_v60 = vunpack.i.h.bf16 %v11604_v9 }
 0x5f6   : > { %10626 = vmatpush3.bf16.msra.mxu1 %v12061_v10  ;;  %v16024_v16 = vadd.f32 %v5747_v59, %v14469_v50  ;;  %v5749_v62 = vpop.f32.mrb[114].mxu0  ;;  %11753 = vrot.lane.b32.xlu1 %v11752_v43, %s12217_s22  ;;  %v7066_v4 = vmax.f32 %v6466_v23, %v6966_v24  ;;  %v7067_v13 = vmax.f32 %v6467_v63, %v6967_v17  ;;  %v11600_v35 = vunpack.i.l.bf16 %v11599_v51 }
 0x5f7   : > { %17325 = vst [vmem:[#allocation55_spill] sm:$0xff] %v16020_v61  ;;  %10627 = vmatprep.subr.bf16.mxu1 %v12062_v33  ;;  %v16031_v10 = vadd.f32 %v5749_v62, %v14462_v46  ;;  %v5751_v25 = vpop.f32.mrb[115].mxu0  ;;  %v16880_v3 = vmax.f32 %v16020_v61, 0.0  ;;  %v7139_v43 = vpack.c.bf16 %v7065_v41, %v7064_v55  ;;  %v12064_v62 = vld [vmem:[%s16606_s5 + $0x1a8] sm:$0xff]  }
 0x5f8   : > { %17326 = vst [vmem:[#allocation6_spill] sm:$0xff] %v16024_v16  ;;  %v16034_v39 = vadd.f32 %v5751_v25, %v14469_v50  ;;  %v16883_v59 = vmax.f32 %v16024_v16, 0.0  ;;  %v7140_v24 = vpack.c.bf16 %v7067_v13, %v7066_v4  ;;  %v11601_v25 = vunpack.i.h.bf16 %v11599_v51  ;;  %v11614_v55 = vpop.permute.xlu1 %11613  ;;  %v12065_v51 = vld [vmem:[%s16606_s5 + $0x1b0] sm:$0xff]   ;;  %v17335_v16 = vld [vmem:[#allocation34_spill] sm:$0xff]  ;;  %v17337_v61 = vld [vmem:[#allocation36_spill] sm:$0xff] }
 0x5f9   : > { %17327 = vst [vmem:[#allocation4_spill] sm:$0xff] %v16031_v10  ;;  %v16881_v52 = vmax.f32 %v16031_v10, 0.0  ;;  %v11609_v17 = vpop.permute.xlu0 %11608  ;;  %v11605_v13 = vunpack.i.l.bf16 %v11604_v9  ;;  %v17338_v10 = vmax.f32 %v17337_v61, 0.0 }
 0x5fa   : > { %17328 = vst [vmem:[#allocation7_spill] sm:$0xff] %v16034_v39  ;;  %10628 = vmatpush3.bf16.msra.mxu1 %v12062_v33  ;;  %v16884_v23 = vmax.f32 %v16034_v39, 0.0 }
 0x5fb   : > { %10633 = vmatprep.subr.bf16.mxu1 %v12063_v18  ;;  %v11757_v63 = vpack.i.bf16 %v16881_v52, %v16880_v3  ;;  %v11611_v52 = vunpack.i.h.bf16 %v11609_v17  ;;  %v6969_v32 = vmax.f32 %v17338_v10, %v11606_v60  ;;  %v17343_v60 = vld [vmem:[#allocation45_spill] sm:$0xff] }
 0x5fc   : > { %v11762_v33 = vpack.i.bf16 %v16884_v23, %v16883_v59  ;;  %v5755_v41 = vpop.f32.mrb[116].mxu0  ;;  %v17332_v23 = vld [vmem:[#allocation35_spill] sm:$0xff]  ;;  %v17344_v61 = vmax.f32 %v17343_v60, 0.0  ;;  %v17345_v10 = vld [vmem:[#allocation49_spill] sm:$0xff] }
 0x5fd   : > { %10630 = vmatmul.mubr.msk.bf16.vlgmr.msra.gmra.mrb[124].mxu1 %vm7205_vm2, %v7139_v43  ;;  %v16053_v3 = vadd.f32 %v5755_v41, %v14462_v46  ;;  %v5757_v4 = vpop.f32.mrb[117].mxu0  ;;  %11758 = vrot.lane.b32.xlu0 %v11757_v63, %s12217_s22  ;;  %v11610_v43 = vunpack.i.l.bf16 %v11609_v17  ;;  %v11616_v41 = vunpack.i.h.bf16 %v11614_v55 }
 0x5fe   : > { %10634 = vmatpush3.bf16.msra.mxu1 %v12063_v18  ;;  %10641 = vmatprep.mubr.msk.bf16.mxu1 %vm7205_vm2, %v7140_v24  ;;  %v16057_v44 = vadd.f32 %v5757_v4, %v14469_v50  ;;  %v5759_v59 = vpop.f32.mrb[118].mxu0  ;;  %v11615_v18 = vunpack.i.l.bf16 %v11614_v55  ;;  %v17333_v4 = vmax.f32 %v17332_v23, 0.0  ;;  %v17342_v23 = vmax.f32 %v17341_v21, 0.0 }
 0x5ff   : > { %17329 = vst [vmem:[#allocation5_spill] sm:$0xff] %v16053_v3  ;;  %11763 = vrot.lane.b32.xlu1 %v11762_v33, %s12217_s22  ;;  %v16065_v24 = vadd.f32 %v5759_v59, %v14462_v46  ;;  %v5761_v9 = vpop.f32.mrb[119].mxu0  ;;  %10635 = vmatprep.subr.bf16.mxu1 %v12064_v62  ;;  %v17336_v33 = vmax.f32 %v17335_v16, 0.0  ;;  %v16898_v17 = vmax.f32 %v16053_v3, 0.0  ;;  %v17339_v59 = vld [vmem:[#allocation68_spill] sm:$0xff]  ;;  %v6470_v16 = vmax.f32 %v17344_v61, %v11610_v43 }
 0x600   : > { %17330 = vst [vmem:[#allocation10_spill] sm:$0xff] %v16057_v44  ;;  %v6469_v20 = vmax.f32 %v17333_v4, %v11601_v25  ;;  %v16070_v63 = vadd.f32 %v5761_v9, %v14469_v50  ;;  %v17340_v48 = vmax.f32 %v17339_v59, 0.0  ;;  %v6471_v25 = vmax.f32 %v17342_v23, %v11611_v52  ;;  %v17347_v59 = vld [vmem:[#allocation37_spill] sm:$0xff] }
 0x601   : > { %17331 = vst [vmem:[#allocation8_spill] sm:$0xff] %v16065_v24  ;;  %v6468_v39 = vmax.f32 %v17336_v33, %v11600_v35  ;;  %v16901_v55 = vmax.f32 %v16065_v24, 0.0  ;;  %v16894_v9 = vmax.f32 %v16057_v44, 0.0  ;;  %v12066_v35 = vld [vmem:[%s16606_s5 + $0x1b8] sm:$0xff]   ;;  %v17364_v24 = vld [vmem:[#allocation44_spill] sm:$0xff] }
 0x602   : > { %17334 = vst [vmem:[#allocation11_spill] sm:$0xff] %v16070_v63  ;;  %10636 = vmatpush3.bf16.msra.mxu1 %v12064_v62  ;;  %v6968_v58 = vmax.f32 %v17340_v48, %v11605_v13  ;;  %v16895_v4 = vmax.f32 %v16070_v63, 0.0  ;;  %v17346_v62 = vmax.f32 %v17345_v10, 0.0  ;;  %v17348_v48 = vmax.f32 %v17347_v59, 0.0 }
 0x603   : > { %10637 = vmatprep.subr.bf16.mxu1 %v12065_v51  ;;  %v11767_v21 = vpack.i.bf16 %v16901_v55, %v16898_v17 }
 0x604   : > { %v6971_v33 = vmax.f32 %v17346_v62, %v11616_v41  ;;  %v6970_v13 = vmax.f32 %v17348_v48, %v11615_v18  ;;  %v11772_v52 = vpack.i.bf16 %v16895_v4, %v16894_v9  ;;  %v5765_v23 = vpop.f32.mrb[120].mxu0  ;;  %v7068_v41 = vmax.f32 %v6468_v39, %v6968_v58  ;;  %v12067_v62 = vld [vmem:[%s16606_s5 + $0x1c0] sm:$0xff]   ;;  %v11624_v58 = vpop.permute.xlu1 %11623 }
 0x605   : > { %v16102_v60 = vadd.f32 %v5765_v23, %v14462_v46  ;;  %v5767_v43 = vpop.f32.mrb[121].mxu0  ;;  %11768 = vrot.lane.b32.xlu0 %v11767_v21, %s12217_s22  ;;  %v7069_v18 = vmax.f32 %v6469_v20, %v6969_v32  ;;  %v11619_v23 = vpop.permute.xlu0 %11618  ;;  %v11626_v4 = vunpack.i.h.bf16 %v11624_v58 }
 0x606   : > { %10638 = vmatpush3.bf16.msra.mxu1 %v12065_v51  ;;  %v16106_v61 = vadd.f32 %v5767_v43, %v14469_v50  ;;  %v5769_v10 = vpop.f32.mrb[122].mxu0  ;;  %11773 = vrot.lane.b32.xlu1 %v11772_v52, %s12217_s22  ;;  %v7070_v59 = vmax.f32 %v6470_v16, %v6970_v13  ;;  %v7071_v48 = vmax.f32 %v6471_v25, %v6971_v33  ;;  %v11620_v9 = vunpack.i.l.bf16 %v11619_v23 }
 0x607   : > { %17349 = vst [vmem:[#allocation9_spill] sm:$0xff] %v16102_v60  ;;  %10639 = vmatprep.subr.bf16.mxu1 %v12066_v35  ;;  %v16113_v51 = vadd.f32 %v5769_v10, %v14462_v46  ;;  %v5771_v21 = vpop.f32.mrb[123].mxu0  ;;  %v16896_v20 = vmax.f32 %v16102_v60, 0.0  ;;  %v7141_v52 = vpack.c.bf16 %v7069_v18, %v7068_v41  ;;  %v12068_v10 = vld [vmem:[%s16606_s5 + $0x1c8] sm:$0xff]   ;;  %v17360_v60 = vld [vmem:[#allocation41_spill] sm:$0xff] }
 0x608   : > { %17350 = vst [vmem:[#allocation14_spill] sm:$0xff] %v16106_v61  ;;  %v16116_v32 = vadd.f32 %v5771_v21, %v14469_v50  ;;  %v16899_v43 = vmax.f32 %v16106_v61, 0.0  ;;  %v7142_v13 = vpack.c.bf16 %v7071_v48, %v7070_v59  ;;  %v11621_v21 = vunpack.i.h.bf16 %v11619_v23  ;;  %v11634_v41 = vpop.permute.xlu1 %11633  ;;  %v12069_v23 = vld [vmem:[%s16606_s5 + $0x1d0] sm:$0xff]   ;;  %v17358_v61 = vld [vmem:[#allocation39_spill] sm:$0xff] }
 0x609   : > { %17351 = vst [vmem:[#allocation12_spill] sm:$0xff] %v16113_v51  ;;  %v16897_v39 = vmax.f32 %v16113_v51, 0.0  ;;  %v11629_v33 = vpop.permute.xlu0 %11628  ;;  %v11625_v48 = vunpack.i.l.bf16 %v11624_v58  ;;  %v17361_v51 = vmax.f32 %v17360_v60, 0.0 }
 0x60a   : > { %17352 = vst [vmem:[#allocation15_spill] sm:$0xff] %v16116_v32  ;;  %10640 = vmatpush3.bf16.msra.mxu1 %v12066_v35  ;;  %v16900_v16 = vmax.f32 %v16116_v32, 0.0 }
 0x60b   : > { %10645 = vmatprep.subr.bf16.mxu1 %v12067_v62  ;;  %v11777_v25 = vpack.i.bf16 %v16897_v39, %v16896_v20  ;;  %v11631_v39 = vunpack.i.h.bf16 %v11629_v33  ;;  %v6973_v44 = vmax.f32 %v17361_v51, %v11626_v4  ;;  %v17366_v4 = vld [vmem:[#allocation42_spill] sm:$0xff] }
 0x60c   : > { %v11782_v35 = vpack.i.bf16 %v16900_v16, %v16899_v43  ;;  %v5775_v18 = vpop.f32.mrb[124].mxu0  ;;  %v17355_v16 = vld [vmem:[#allocation53_spill] sm:$0xff]  ;;  %v17367_v60 = vmax.f32 %v17366_v4, 0.0  ;;  %v17368_v51 = vld [vmem:[#allocation46_spill] sm:$0xff] }
 0x60d   : > { %10642 = vmatmul.mubr.msk.bf16.vlgmr.msra.gmra.mrb[124].mxu1 %vm7205_vm2, %v7141_v52  ;;  %v16135_v20 = vadd.f32 %v5775_v18, %v14462_v46  ;;  %v5777_v59 = vpop.f32.mrb[125].mxu0  ;;  %11778 = vrot.lane.b32.xlu0 %v11777_v25, %s12217_s22  ;;  %v11630_v52 = vunpack.i.l.bf16 %v11629_v33  ;;  %v11636_v18 = vunpack.i.h.bf16 %v11634_v41 }
 0x60e   : > { %10646 = vmatpush3.bf16.msra.mxu1 %v12067_v62  ;;  %10653 = vmatprep.mubr.msk.bf16.mxu1 %vm7205_vm2, %v7142_v13  ;;  %v16139_v17 = vadd.f32 %v5777_v59, %v14469_v50  ;;  %v5779_v43 = vpop.f32.mrb[126].mxu0  ;;  %v11635_v62 = vunpack.i.l.bf16 %v11634_v41  ;;  %v17356_v59 = vmax.f32 %v17355_v16, 0.0  ;;  %v17365_v16 = vmax.f32 %v17364_v24, 0.0 }
 0x60f   : > { %17353 = vst [vmem:[#allocation13_spill] sm:$0xff] %v16135_v20  ;;  %11783 = vrot.lane.b32.xlu1 %v11782_v35, %s12217_s22  ;;  %v16147_v13 = vadd.f32 %v5779_v43, %v14462_v46  ;;  %v5781_v58 = vpop.f32.mrb[127].mxu0  ;;  %10647 = vmatprep.subr.bf16.mxu1 %v12068_v10  ;;  %v17359_v35 = vmax.f32 %v17358_v61, 0.0  ;;  %v16912_v33 = vmax.f32 %v16135_v20, 0.0  ;;  %v17362_v43 = vld [vmem:[#allocation40_spill] sm:$0xff]  ;;  %v6474_v61 = vmax.f32 %v17367_v60, %v11630_v52  ;;  %v12071_v60 = vld [vmem:[%s16606_s5 + $0x1e0] sm:$0xff]  }
 0x610   : > { %17354 = vst [vmem:[#allocation18_spill] sm:$0xff] %v16139_v17  ;;  %v6473_v55 = vmax.f32 %v17356_v59, %v11621_v21  ;;  %v16152_v25 = vadd.f32 %v5781_v58, %v14469_v50  ;;  %v17363_v63 = vmax.f32 %v17362_v43, 0.0  ;;  %v6475_v21 = vmax.f32 %v17365_v16, %v11631_v39  ;;  %v17370_v43 = vld [vmem:[#allocation57_spill] sm:$0xff] }
 0x611   : > { %v6472_v32 = vmax.f32 %v17359_v35, %v11620_v9  ;;  %v16913_v41 = vmax.f32 %v16147_v13, 0.0  ;;  %v16910_v58 = vmax.f32 %v16139_v17, 0.0  ;;  %v12070_v9 = vld [vmem:[%s16606_s5 + $0x1d8] sm:$0xff]  }
 0x612   : > { %17357 = vst [vmem:[#allocation16_spill] sm:$0xff] %v16152_v25  ;;  %10648 = vmatpush3.bf16.msra.mxu1 %v12068_v10  ;;  %v6972_v3 = vmax.f32 %v17363_v63, %v11625_v48  ;;  %v16911_v59 = vmax.f32 %v16152_v25, 0.0  ;;  %v17369_v10 = vmax.f32 %v17368_v51, 0.0  ;;  %v17371_v63 = vmax.f32 %v17370_v43, 0.0  ;;  %v11639_v43 = vpop.permute.xlu0 %11638 }
 0x613   : > { %10649 = vmatprep.subr.bf16.mxu1 %v12069_v23  ;;  %v11787_v24 = vpack.i.bf16 %v16913_v41, %v16912_v33  ;;  %v7073_v4 = vmax.f32 %v6473_v55, %v6973_v44 }
 0x614   : > { %v6975_v35 = vmax.f32 %v17369_v10, %v11636_v18  ;;  %v6974_v48 = vmax.f32 %v17371_v63, %v11635_v62  ;;  %v11792_v39 = vpack.i.bf16 %v16911_v59, %v16910_v58  ;;  %v5785_v16 = vpop.f32.mrb[128].mxu0  ;;  %v7072_v52 = vmax.f32 %v6472_v32, %v6972_v3  ;;  %v11644_v3 = vpop.permute.xlu1 %11643 }
 0x615   : > { %11788 = vrot.lane.b32.xlu0 %v11787_v24, %s12217_s22  ;;  %v16185_v18 = vadd.f32 %v5785_v16, %v14462_v46  ;;  %v5787_v62 = vpop.f32.mrb[129].mxu0  ;;  %v11645_v58 = vunpack.i.l.bf16 %v11644_v3 }
 0x616   : > { %10650 = vmatpush3.bf16.msra.mxu1 %v12069_v23  ;;  %11793 = vrot.lane.b32.xlu1 %v11792_v39, %s12217_s22  ;;  %v7074_v51 = vmax.f32 %v6474_v61, %v6974_v48  ;;  %v7075_v10 = vmax.f32 %v6475_v21, %v6975_v35  ;;  %v16192_v23 = vadd.f32 %v5787_v62, %v14469_v50  ;;  %v5789_v63 = vpop.f32.mrb[130].mxu0  ;;  %v12072_v21 = vld [vmem:[%s16606_s5 + $0x1e8] sm:$0xff]  }
 0x617   : > { %17372 = vst [vmem:[#allocation19_spill] sm:$0xff] %v16185_v18  ;;  %10651 = vmatprep.subr.bf16.mxu1 %v12070_v9  ;;  %v16195_v44 = vadd.f32 %v5789_v63, %v14462_v46  ;;  %v5791_v55 = vpop.f32.mrb[131].mxu0  ;;  %v7143_v24 = vpack.c.bf16 %v7073_v4, %v7072_v52  ;;  %v16914_v39 = vmax.f32 %v16185_v18, 0.0  ;;  %v11649_v16 = vpop.permute.xlu0 %11648  ;;  %v11641_v63 = vunpack.i.h.bf16 %v11639_v43  ;;  %v17380_v18 = vld [vmem:[#allocation52_spill] sm:$0xff] }
 0x618   : > { %17373 = vst [vmem:[#allocation17_spill] sm:$0xff] %v16192_v23  ;;  %v16198_v32 = vadd.f32 %v5791_v55, %v14469_v50  ;;  %v16915_v35 = vmax.f32 %v16192_v23, 0.0  ;;  %v7144_v62 = vpack.c.bf16 %v7075_v10, %v7074_v51  ;;  %v11654_v52 = vpop.permute.xlu1 %11653  ;;  %v11640_v4 = vunpack.i.l.bf16 %v11639_v43  ;;  %v12073_v43 = vld [vmem:[%s16606_s5 + $0x1f0] sm:$0xff]  }
 0x619   : > { %17374 = vst [vmem:[#allocation22_spill] sm:$0xff] %v16195_v44  ;;  %v16917_v61 = vmax.f32 %v16195_v44, 0.0  ;;  %v11646_v55 = vunpack.i.h.bf16 %v11644_v3  ;;  %v11651_v51 = vunpack.i.h.bf16 %v11649_v16  ;;  %v11650_v10 = vunpack.i.l.bf16 %v11649_v16  ;;  %v17376_v16 = vld [vmem:[#allocation50_spill] sm:$0xff] }
 0x61a   : > { %17375 = vst [vmem:[#allocation20_spill] sm:$0xff] %v16198_v32  ;;  %10652 = vmatpush3.bf16.msra.mxu1 %v12070_v9  ;;  %v16916_v48 = vmax.f32 %v16198_v32, 0.0  ;;  %v11656_v3 = vunpack.i.h.bf16 %v11654_v52  ;;  %v17381_v44 = vmax.f32 %v17380_v18, 0.0  ;;  %v12074_v18 = vld [vmem:[%s16606_s5 + $0x1f8] sm:$0xff]  }
 0x61b   : > { %10657 = vmatprep.subr.bf16.mxu1 %v12071_v60  ;;  %v11797_v9 = vpack.i.bf16 %v16917_v61, %v16914_v39  ;;  %v17378_v61 = vld [vmem:[#allocation58_spill] sm:$0xff] }
 0x61c   : > { %v11802_v59 = vpack.i.bf16 %v16916_v48, %v16915_v35  ;;  %v5795_v33 = vpop.f32.mrb[132].mxu0  ;;  %v17379_v23 = vmax.f32 %v17378_v61, 0.0  ;;  %v6977_v17 = vmax.f32 %v17381_v44, %v11646_v55  ;;  %v17387_v44 = vld [vmem:[#allocation54_spill] sm:$0xff] }
 0x61d   : > { %10654 = vmatmul.mubr.msk.bf16.vlgmr.msra.gmra.mrb[124].mxu1 %vm7205_vm2, %v7143_v24  ;;  %v16218_v41 = vadd.f32 %v5795_v33, %v14462_v46  ;;  %v5797_v39 = vpop.f32.mrb[133].mxu0  ;;  %11798 = vrot.lane.b32.xlu0 %v11797_v9, %s12217_s22  ;;  %v11655_v24 = vunpack.i.l.bf16 %v11654_v52  ;;  %v17382_v52 = vld [vmem:[#allocation48_spill] sm:$0xff]  ;;  %v17388_v61 = vmax.f32 %v17387_v44, 0.0 }
 0x61e   : > { %10658 = vmatpush3.bf16.msra.mxu1 %v12071_v60  ;;  %10665 = vmatprep.mubr.msk.bf16.mxu1 %vm7205_vm2, %v7144_v62  ;;  %v16225_v35 = vadd.f32 %v5797_v39, %v14469_v50  ;;  %v5799_v60 = vpop.f32.mrb[134].mxu0  ;;  %v17377_v62 = vmax.f32 %v17376_v16, 0.0  ;;  %v6476_v32 = vmax.f32 %v17379_v23, %v11640_v4  ;;  %v17383_v25 = vmax.f32 %v17382_v52, 0.0 }
 0x61f   : > { %10659 = vmatprep.subr.bf16.mxu1 %v12072_v21  ;;  %11803 = vrot.lane.b32.xlu1 %v11802_v59, %s12217_s22  ;;  %v16231_v48 = vadd.f32 %v5799_v60, %v14462_v46  ;;  %v5801_v9 = vpop.f32.mrb[135].mxu0  ;;  %v17384_v59 = vmax.f32 %v15573_v31, 0.0  ;;  %v17385_v60 = vmax.f32 %v15561_v26, 0.0 }
 0x620   : > { %v6477_v33 = vmax.f32 %v17377_v62, %v11641_v63  ;;  %v6976_v39 = vmax.f32 %v17383_v25, %v11645_v58  ;;  %v16240_v20 = vadd.f32 %v5801_v9, %v14469_v50  ;;  %v16931_v62 = vmax.f32 %v16218_v41, 0.0  ;;  %v12075_v9 = vld [vmem:[%s16606_s5 + $0x200] sm:$0xff]  }
 0x621   : > { %v6479_v63 = vmax.f32 %v17384_v59, %v11651_v51  ;;  %v6478_v16 = vmax.f32 %v17385_v60, %v11650_v10  ;;  %v6008_v23 = vmax.f32 %v16231_v48, 0.0  ;;  %v17386_v25 = vmax.f32 %v15578_v14, 0.0  ;;  %v11659_v60 = vpop.permute.xlu0 %11658 }
 0x622   : > { %10660 = vmatpush3.bf16.msra.mxu1 %v12072_v21  ;;  %v6978_v21 = vmax.f32 %v17388_v61, %v11655_v24  ;;  %v16929_v31 = vmax.f32 %v16225_v35, 0.0  ;;  %v16930_v26 = vmax.f32 %v16240_v20, 0.0  ;;  %v7076_v14 = vmax.f32 %v6476_v32, %v6976_v39 }
 0x623   : > { %10661 = vmatprep.subr.bf16.mxu1 %v12073_v43  ;;  %v6979_v58 = vmax.f32 %v17386_v25, %v11656_v3  ;;  %v11807_v4 = vpack.i.bf16 %v6008_v23, %v16931_v62  ;;  %v7077_v10 = vmax.f32 %v6477_v33, %v6977_v17  ;;  %v11664_v17 = vpop.permute.xlu1 %11663 }
 0x624   : > { %v11812_v55 = vpack.i.bf16 %v16930_v26, %v16929_v31  ;;  %v5805_v51 = vpop.f32.mrb[136].mxu0  ;;  %v7078_v52 = vmax.f32 %v6478_v16, %v6978_v21  ;;  %v17395_v31 = vld [vmem:[#allocation3_spill] sm:$0xff] }
 0x625   : > { %v16266_v3 = vadd.f32 %v5805_v51, %v14462_v46  ;;  %v5807_v24 = vpop.f32.mrb[137].mxu0  ;;  %11808 = vrot.lane.b32.xlu0 %v11807_v4, %s12217_s22  ;;  %v7079_v59 = vmax.f32 %v6479_v63, %v6979_v58  ;;  %v7145_v44 = vpack.c.bf16 %v7077_v10, %v7076_v14  ;;  %v12076_v58 = vld [vmem:[%s16606_s5 + $0x208] sm:$0xff]   ;;  %v11661_v51 = vunpack.i.h.bf16 %v11659_v60 }
 0x626   : > { %10662 = vmatpush3.bf16.msra.mxu1 %v12073_v43  ;;  %v16273_v25 = vadd.f32 %v5807_v24, %v14469_v50  ;;  %v5809_v43 = vpop.f32.mrb[138].mxu0  ;;  %11813 = vrot.lane.b32.xlu1 %v11812_v55, %s12217_s22  ;;  %v11660_v14 = vunpack.i.l.bf16 %v11659_v60  ;;  %v11666_v10 = vunpack.i.h.bf16 %v11664_v17  ;;  %v11665_v24 = vunpack.i.l.bf16 %v11664_v17  ;;  %v17391_v60 = vld [vmem:[#allocation56_spill] sm:$0xff] }
 0x627   : > { %10663 = vmatprep.subr.bf16.mxu1 %v12074_v18  ;;  %v16277_v32 = vadd.f32 %v5809_v43, %v14462_v46  ;;  %v5811_v33 = vpop.f32.mrb[139].mxu0  ;;  %v16927_v16 = vmax.f32 %v16266_v3, 0.0  ;;  %v7146_v21 = vpack.c.bf16 %v7079_v59, %v7078_v52  ;;  %v12077_v52 = vld [vmem:[%s16606_s5 + $0x210] sm:$0xff]   ;;  %v17396_v26 = vmax.f32 %v17395_v31, 0.0 }
 0x628   : > { %v16280_v39 = vadd.f32 %v5811_v33, %v14469_v50  ;;  %v16925_v61 = vmax.f32 %v16273_v25, 0.0  ;;  %v11674_v4 = vpop.permute.xlu1 %11673 }
 0x629   : > { %v16928_v63 = vmax.f32 %v16277_v32, 0.0  ;;  %v11676_v33 = vunpack.i.h.bf16 %v11674_v4  ;;  %v6980_v62 = vmax.f32 %v17396_v26, %v11665_v24 }
 0x62a   : > { %10664 = vmatpush3.bf16.msra.mxu1 %v12074_v18  ;;  %v16926_v46 = vmax.f32 %v16280_v39, 0.0  ;;  %v11669_v18 = vpop.permute.xlu0 %11668 }
 0x62b   : > { %10669 = vmatprep.subr.bf16.mxu1 %v12075_v9  ;;  %v11817_v50 = vpack.i.bf16 %v16928_v63, %v16927_v16  ;;  %v11671_v59 = vunpack.i.h.bf16 %v11669_v18  ;;  %v11670_v43 = vunpack.i.l.bf16 %v11669_v18  ;;  %v17393_v16 = vld [vmem:[#allocation61_spill] sm:$0xff]  ;;  %v12078_v18 = vld [vmem:[%s16606_s5 + $0x218] sm:$0xff]  }
 0x62c   : > { %v11822_v55 = vpack.i.bf16 %v16926_v46, %v16925_v61  ;;  %v17392_v46 = vmax.f32 %v17391_v60, 0.0 }
 0x62d   : > { %10666 = vmatmul.mubr.msk.bf16.vlgmr.msra.gmra.mrb[124].mxu1 %vm7205_vm2, %v7145_v44  ;;  %11818 = vrot.lane.b32.xlu0 %v11817_v50, %s12217_s22  ;;  %v11675_v44 = vunpack.i.l.bf16 %v11674_v4  ;;  %v17394_v50 = vmax.f32 %v17393_v16, 0.0  ;;  %v17397_v4 = vmax.f32 %v15655_v40, 0.0  ;;  %v17400_v16 = vmax.f32 %v15647_v1, 0.0  ;;  %v12080_v1 = vld [vmem:[%s16606_s5 + $0x228] sm:$0xff]  }
 0x62e   : > { %10670 = vmatpush3.bf16.msra.mxu1 %v12075_v9  ;;  %10677 = vmatprep.mubr.msk.bf16.mxu1 %vm7205_vm2, %v7146_v21  ;;  %v17389_v9 = vld [vmem:[#allocation60_spill] sm:$0xff]  ;;  %v6480_v17 = vmax.f32 %v17392_v46, %v11660_v14 }
 0x62f   : > { %10671 = vmatprep.subr.bf16.mxu1 %v12076_v58  ;;  %11823 = vrot.lane.b32.xlu1 %v11822_v55, %s12217_s22  ;;  %v17390_v21 = vmax.f32 %v17389_v9, 0.0  ;;  %v6981_v63 = vmax.f32 %v17394_v50, %v11666_v10  ;;  %v17398_v55 = vmax.f32 %v15643_v11, 0.0  ;;  %v17399_v9 = vmax.f32 %v15660_v57, 0.0  ;;  %v12079_v10 = vld [vmem:[%s16606_s5 + $0x220] sm:$0xff]  }
 0x630   : > { %v6982_v14 = vmax.f32 %v17400_v16, %v11675_v44  ;;  %v7080_v31 = vmax.f32 %v6480_v17, %v6980_v62  ;;  %v12081_v44 = vld [vmem:[%s16606_s5 + $0x230] sm:$0xff]   ;;  %v17404_v16 = vld [vmem:[#allocation43_spill] sm:$0xff] }
 0x631   : > { %v6481_v61 = vmax.f32 %v17390_v21, %v11661_v51  ;;  %v6482_v51 = vmax.f32 %v17398_v55, %v11670_v43  ;;  %v6983_v46 = vmax.f32 %v17399_v9, %v11676_v33  ;;  %v11684_v21 = vpop.permute.xlu1 %11683  ;;  %v17402_v55 = vmax.f32 %v15692_v38, 0.0 }
 0x632   : > { %10672 = vmatpush3.bf16.msra.mxu1 %v12076_v58  ;;  %v6483_v58 = vmax.f32 %v17397_v4, %v11671_v59  ;;  %v11679_v59 = vpop.permute.xlu0 %11678  ;;  %v11686_v43 = vunpack.i.h.bf16 %v11684_v21  ;;  %v11685_v33 = vunpack.i.l.bf16 %v11684_v21  ;;  %v17401_v4 = vmax.f32 %v15703_v22, 0.0 }
 0x633   : > { %10673 = vmatprep.subr.bf16.mxu1 %v12077_v52  ;;  %v7081_v26 = vmax.f32 %v6481_v61, %v6981_v63  ;;  %v7082_v24 = vmax.f32 %v6482_v51, %v6982_v14  ;;  %v11681_v63 = vunpack.i.h.bf16 %v11679_v59  ;;  %v11680_v61 = vunpack.i.l.bf16 %v11679_v59 }
 0x634   : > { %v7083_v40 = vmax.f32 %v6483_v58, %v6983_v46  ;;  %v17403_v9 = vmax.f32 %v15706_v6, 0.0  ;;  %v17405_v14 = vmax.f32 %v17404_v16, 0.0  ;;  %v17407_v22 = vmax.f32 %v15725_v19, 0.0 }
 0x635   : > { %v7147_v11 = vpack.c.bf16 %v7081_v26, %v7080_v31  ;;  %v6485_v58 = vmax.f32 %v17401_v4, %v11681_v63  ;;  %v6484_v51 = vmax.f32 %v17402_v55, %v11680_v61  ;;  %v12082_v26 = vld [vmem:[%s16606_s5 + $0x238] sm:$0xff]   ;;  %v17408_v38 = vmax.f32 %v15742_v36, 0.0 }
 0x636   : > { %10674 = vmatpush3.bf16.msra.mxu1 %v12077_v52  ;;  %v7148_v57 = vpack.c.bf16 %v7083_v40, %v7082_v24  ;;  %v6985_v46 = vmax.f32 %v17403_v9, %v11686_v43  ;;  %v6984_v31 = vmax.f32 %v17405_v14, %v11685_v33  ;;  %v17409_v6 = vmax.f32 %v15729_v0, 0.0  ;;  %v12084_v0 = vld [vmem:[%s16606_s5 + $0x248] sm:$0xff]  }
 0x637   : > { %10675 = vmatprep.subr.bf16.mxu1 %v12078_v18  ;;  %v11689_v52 = vpop.permute.xlu0 %11688  ;;  %v17412_v14 = vmax.f32 %v15788_v47, 0.0  ;;  %v17417_v47 = vmax.f32 %v15811_v2, 0.0  ;;  %v12088_v2 = vld [vmem:[%s16606_s5 + $0x268] sm:$0xff]  }
 0x638   : > { %v11694_v62 = vpop.permute.xlu1 %11693  ;;  %v11691_v60 = vunpack.i.h.bf16 %v11689_v52  ;;  %v11690_v17 = vunpack.i.l.bf16 %v11689_v52 }
 0x639   : > { %v11696_v50 = vunpack.i.h.bf16 %v11694_v62 }
 0x63a   : > { %10676 = vmatpush3.bf16.msra.mxu1 %v12078_v18  ;;  %v11695_v18 = vunpack.i.l.bf16 %v11694_v62  ;;  %v6486_v40 = vmax.f32 %v17407_v22, %v11690_v17  ;;  %v17414_v22 = vmax.f32 %v15819_v37, 0.0 }
 0x63b   : > { %10681 = vmatprep.subr.bf16.mxu1 %v12079_v10  ;;  %v6987_v59 = vmax.f32 %v17408_v38, %v11696_v50  ;;  %v12085_v50 = vld [vmem:[%s16606_s5 + $0x250] sm:$0xff]  }
 0x63c   : > { %v6986_v21 = vmax.f32 %v17409_v6, %v11695_v18 }
 0x63d   : > { %10678 = vmatmul.mubr.msk.bf16.vlgmr.msra.gmra.mrb[124].mxu1 %vm7205_vm2, %v7147_v11  ;;  %v7084_v11 = vmax.f32 %v6484_v51, %v6984_v31  ;;  %v17410_v51 = vmax.f32 %v15785_v30, 0.0  ;;  %v17415_v30 = vmax.f32 %v15807_v45, 0.0 }
 0x63e   : > { %10682 = vmatpush3.bf16.msra.mxu1 %v12079_v10  ;;  %10689 = vmatprep.mubr.msk.bf16.mxu1 %vm7205_vm2, %v7148_v57  ;;  %v17406_v10 = vmax.f32 %v15737_v56, 0.0  ;;  %v12083_v57 = vld [vmem:[%s16606_s5 + $0x240] sm:$0xff]   ;;  %v7086_v52 = vmax.f32 %v6486_v40, %v6986_v21 }
 0x63f   : > { %10683 = vmatprep.subr.bf16.mxu1 %v12080_v1  ;;  %v11699_v62 = vpop.permute.xlu0 %11698 }
 0x640   : > { %v6487_v24 = vmax.f32 %v17406_v10, %v11691_v60  ;;  %v11701_v33 = vunpack.i.h.bf16 %v11699_v62 }
 0x641   : > { %v11704_v63 = vpop.permute.xlu1 %11703 }
 0x642   : > { %10684 = vmatpush3.bf16.msra.mxu1 %v12080_v1  ;;  %v7085_v1 = vmax.f32 %v6485_v58, %v6985_v46  ;;  %v7087_v56 = vmax.f32 %v6487_v24, %v6987_v59  ;;  %v11706_v60 = vunpack.i.h.bf16 %v11704_v63  ;;  %v11705_v17 = vunpack.i.l.bf16 %v11704_v63  ;;  %v12086_v24 = vld [vmem:[%s16606_s5 + $0x258] sm:$0xff]  }
 0x643   : > { %10685 = vmatprep.subr.bf16.mxu1 %v12081_v44  ;;  %v6489_v9 = vmax.f32 %v17410_v51, %v11701_v33  ;;  %v17411_v46 = vmax.f32 %v15774_v28, 0.0  ;;  %v17416_v28 = vmax.f32 %v15824_v34, 0.0  ;;  %v17421_v51 = vmax.f32 %v15860_v8, 0.0 }
 0x644   : > { %v7149_v19 = vpack.c.bf16 %v7085_v1, %v7084_v11  ;;  %v7150_v36 = vpack.c.bf16 %v7087_v56, %v7086_v52  ;;  %v6989_v31 = vmax.f32 %v17412_v14, %v11706_v60  ;;  %v12087_v11 = vld [vmem:[%s16606_s5 + $0x260] sm:$0xff]  }
 0x646   : > { %10686 = vmatpush3.bf16.msra.mxu1 %v12081_v44  ;;  %v11700_v44 = vunpack.i.l.bf16 %v11699_v62  ;;  %v7089_v21 = vmax.f32 %v6489_v9, %v6989_v31 }
 0x647   : > { %10687 = vmatprep.subr.bf16.mxu1 %v12082_v26  ;;  %v11709_v61 = vpop.permute.xlu0 %11708 }
 0x648   : > { %v11714_v43 = vpop.permute.xlu1 %11713  ;;  %v11711_v18 = vunpack.i.h.bf16 %v11709_v61  ;;  %v11710_v4 = vunpack.i.l.bf16 %v11709_v61  ;;  %v6488_v16 = vmax.f32 %v17411_v46, %v11700_v44  ;;  %v12089_v61 = vld [vmem:[%s16606_s5 + $0x270] sm:$0xff]   ;;  %v12090_v46 = vld [vmem:[%s16606_s5 + $0x278] sm:$0xff]  }
 0x649   : > { %v11716_v58 = vunpack.i.h.bf16 %v11714_v43  ;;  %v11715_v55 = vunpack.i.l.bf16 %v11714_v43 }
 0x64a   : > { %10688 = vmatpush3.bf16.msra.mxu1 %v12082_v26  ;;  %v17413_v26 = vmax.f32 %v15778_v53, 0.0  ;;  %v6491_v40 = vmax.f32 %v17414_v22, %v11711_v18  ;;  %v6490_v38 = vmax.f32 %v17415_v30, %v11710_v4  ;;  %v17419_v18 = vmax.f32 %v15856_v49, 0.0  ;;  %v12091_v22 = vld [vmem:[%s16606_s5 + $0x280] sm:$0xff]  }
 0x64b   : > { %10693 = vmatprep.subr.bf16.mxu1 %v12083_v57  ;;  %v6991_v59 = vmax.f32 %v17416_v28, %v11716_v58  ;;  %v6990_v6 = vmax.f32 %v17417_v47, %v11715_v55  ;;  %v17420_v58 = vmax.f32 %v15870_v5, 0.0  ;;  %v17424_v49 = vmax.f32 %v15906_v29, 0.0 }
 0x64c   : > { %v6988_v10 = vmax.f32 %v17413_v26, %v11705_v17  ;;  %v17418_v17 = vmax.f32 %v15867_v27, 0.0  ;;  %v17423_v27 = vmax.f32 %v15889_v12, 0.0  ;;  %v17425_v5 = vmax.f32 %v15893_v15, 0.0  ;;  %v12092_v15 = vld [vmem:[%s16606_s5 + $0x288] sm:$0xff]  }
 0x64d   : > { %10690 = vmatmul.mubr.msk.bf16.vlgmr.msra.gmra.mrb[124].mxu1 %vm7205_vm2, %v7149_v19  ;;  %v7090_v1 = vmax.f32 %v6490_v38, %v6990_v6  ;;  %v7091_v37 = vmax.f32 %v6491_v40, %v6991_v59 }
 0x64e   : > { %10694 = vmatpush3.bf16.msra.mxu1 %v12083_v57  ;;  %10701 = vmatprep.mubr.msk.bf16.mxu1 %vm7205_vm2, %v7150_v36  ;;  %v7088_v53 = vmax.f32 %v6488_v16, %v6988_v10  ;;  %v17422_v16 = vmax.f32 %v15901_v54, 0.0 }
 0x64f   : > { %10695 = vmatprep.subr.bf16.mxu1 %v12084_v0  ;;  %v11719_v57 = vpop.permute.xlu0 %11718  ;;  %v7152_v34 = vpack.c.bf16 %v7091_v37, %v7090_v1 }
 0x650   : > { %v7151_v45 = vpack.c.bf16 %v7089_v21, %v7088_v53  ;;  %v11721_v63 = vunpack.i.h.bf16 %v11719_v57  ;;  %v11720_v19 = vunpack.i.l.bf16 %v11719_v57 }
 0x651   : > { %v11724_v52 = vpop.permute.xlu1 %11723 }
 0x652   : > { %10696 = vmatpush3.bf16.msra.mxu1 %v12084_v0  ;;  %v11726_v0 = vunpack.i.h.bf16 %v11724_v52  ;;  %v11725_v36 = vunpack.i.l.bf16 %v11724_v52  ;;  %v6492_v4 = vmax.f32 %v17419_v18, %v11720_v19  ;;  %v17436_v18 = vld [vmem:[#allocation59_spill] sm:$0xff] }
 0x653   : > { %10697 = vmatprep.subr.bf16.mxu1 %v12085_v50 }
 0x654   : > { %v6993_v55 = vmax.f32 %v17420_v58, %v11726_v0  ;;  %v6992_v9 = vmax.f32 %v17421_v51, %v11725_v36  ;;  %v17430_v0 = vld [vmem:[#allocation69_spill] sm:$0xff]  ;;  %v17438_v58 = vld [vmem:[#allocation70_spill] sm:$0xff] }
 0x655   : > { %v17431_v36 = vmax.f32 %v17430_v0, 0.0 }
 0x656   : > { %10698 = vmatpush3.bf16.msra.mxu1 %v12085_v50  ;;  %v6493_v50 = vmax.f32 %v17418_v17, %v11721_v63  ;;  %v7092_v8 = vmax.f32 %v6492_v4, %v6992_v9  ;;  %v17434_v17 = vld [vmem:[#allocation51_spill] sm:$0xff] }
 0x657   : > { %10699 = vmatprep.subr.bf16.mxu1 %v12086_v24  ;;  %v11729_v56 = vpop.permute.xlu0 %11728 }
 0x658   : > { %v11734_v62 = vpop.permute.xlu1 %11733  ;;  %v11731_v43 = vunpack.i.h.bf16 %v11729_v56  ;;  %v11730_v33 = vunpack.i.l.bf16 %v11729_v56 }
 0x659   : > { %v11736_v44 = vunpack.i.h.bf16 %v11734_v62  ;;  %v11735_v60 = vunpack.i.l.bf16 %v11734_v62  ;;  %v17428_v62 = vld [vmem:[#allocation47_spill] sm:$0xff] }
 0x65a   : > { %10700 = vmatpush3.bf16.msra.mxu1 %v12086_v24  ;;  %v6495_v14 = vmax.f32 %v17422_v16, %v11731_v43  ;;  %v6494_v31 = vmax.f32 %v17423_v27, %v11730_v33  ;;  %v7093_v24 = vmax.f32 %v6493_v50, %v6993_v55  ;;  %v17429_v63 = vmax.f32 %v17428_v62, 0.0  ;;  %v12094_v43 = vld [vmem:[%s16606_s5 + $0x298] sm:$0xff]   ;;  %v17432_v33 = vld [vmem:[#allocation71_spill] sm:$0xff] }
 0x65b   : > { %10705 = vmatprep.subr.bf16.mxu1 %v12087_v11  ;;  %v6995_v26 = vmax.f32 %v17424_v49, %v11736_v44  ;;  %v6994_v10 = vmax.f32 %v17425_v5, %v11735_v60  ;;  %v17433_v44 = vmax.f32 %v17432_v33, 0.0  ;;  %v17439_v55 = vmax.f32 %v17438_v58, 0.0  ;;  %v12095_v16 = vld [vmem:[%s16606_s5 + $0x2a0] sm:$0xff]   ;;  %v12096_v5 = vld [vmem:[%s16606_s5 + $0x2a8] sm:$0xff]  }
 0x65c   : > { %v7153_v12 = vpack.c.bf16 %v7093_v24, %v7092_v8 }
 0x65d   : > { %10702 = vmatmul.mubr.msk.bf16.vlgmr.msra.gmra.mrb[124].mxu1 %vm7205_vm2, %v7151_v45  ;;  %v7094_v40 = vmax.f32 %v6494_v31, %v6994_v10  ;;  %v7095_v54 = vmax.f32 %v6495_v14, %v6995_v26  ;;  %v17426_v45 = vmax.f32 %v15949_v42, 0.0  ;;  %v17435_v42 = vmax.f32 %v17434_v17, 0.0 }
 0x65e   : > { %10706 = vmatpush3.bf16.msra.mxu1 %v12087_v11  ;;  %10713 = vmatprep.mubr.msk.bf16.mxu1 %vm7205_vm2, %v7152_v34  ;;  %v12093_v11 = vld [vmem:[%s16606_s5 + $0x290] sm:$0xff]   ;;  %v17427_v34 = vmax.f32 %v15938_v7, 0.0  ;;  %v17437_v7 = vmax.f32 %v17436_v18, 0.0  ;;  %v12099_v18 = vld [vmem:[%s16606_s5 + $0x2c0] sm:$0xff]  }
 0x65f   : > { %10707 = vmatprep.subr.bf16.mxu1 %v12088_v2  ;;  %v11739_v30 = vpop.permute.xlu0 %11738  ;;  %v7154_v29 = vpack.c.bf16 %v7095_v54, %v7094_v40 }
 0x660   : > { %v11741_v47 = vunpack.i.h.bf16 %v11739_v30  ;;  %v11740_v6 = vunpack.i.l.bf16 %v11739_v30 }
 0x661   : > { %v11744_v38 = vpop.permute.xlu1 %11743 }
 0x662   : > { %10708 = vmatpush3.bf16.msra.mxu1 %v12088_v2  ;;  %v11746_v53 = vunpack.i.h.bf16 %v11744_v38  ;;  %v11745_v21 = vunpack.i.l.bf16 %v11744_v38  ;;  %v6497_v2 = vmax.f32 %v17426_v45, %v11741_v47  ;;  %v6496_v56 = vmax.f32 %v17427_v34, %v11740_v6  ;;  %v12097_v38 = vld [vmem:[%s16606_s5 + $0x2b0] sm:$0xff]   ;;  %v12098_v34 = vld [vmem:[%s16606_s5 + $0x2b8] sm:$0xff]  }
 0x663   : > { %10709 = vmatprep.subr.bf16.mxu1 %v12089_v61 }
 0x664   : > { %v6997_v19 = vmax.f32 %v17429_v63, %v11746_v53  ;;  %v17442_v53 = vld [vmem:[#allocation55_spill] sm:$0xff] }
 0x666   : > { %10710 = vmatpush3.bf16.msra.mxu1 %v12089_v61  ;;  %v6996_v61 = vmax.f32 %v17431_v36, %v11745_v21  ;;  %v17443_v21 = vmax.f32 %v17442_v53, 0.0 }
 0x667   : > { %10711 = vmatprep.subr.bf16.mxu1 %v12090_v46  ;;  %v11749_v28 = vpop.permute.xlu0 %11748 }
 0x668   : > { %v11754_v59 = vpop.permute.xlu1 %11753  ;;  %v11751_v1 = vunpack.i.h.bf16 %v11749_v28  ;;  %v11750_v37 = vunpack.i.l.bf16 %v11749_v28  ;;  %v7096_v9 = vmax.f32 %v6496_v56, %v6996_v61  ;;  %v17448_v56 = vld [vmem:[#allocation8_spill] sm:$0xff]  ;;  %v17452_v61 = vld [vmem:[#allocation11_spill] sm:$0xff] }
 0x669   : > { %v11756_v57 = vunpack.i.h.bf16 %v11754_v59  ;;  %v11755_v52 = vunpack.i.l.bf16 %v11754_v59  ;;  %v17440_v59 = vld [vmem:[#allocation4_spill] sm:$0xff]  ;;  %v17449_v62 = vmax.f32 %v17448_v56, 0.0  ;;  %v17469_v56 = vld [vmem:[#allocation18_spill] sm:$0xff] }
 0x66a   : > { %10712 = vmatpush3.bf16.msra.mxu1 %v12090_v46  ;;  %v6499_v60 = vmax.f32 %v17433_v44, %v11751_v1  ;;  %v6498_v50 = vmax.f32 %v17435_v42, %v11750_v37  ;;  %v7097_v46 = vmax.f32 %v6497_v2, %v6997_v19  ;;  %v17441_v47 = vmax.f32 %v17440_v59, 0.0  ;;  %v17444_v1 = vld [vmem:[#allocation7_spill] sm:$0xff]  ;;  %v17450_v19 = vld [vmem:[#allocation5_spill] sm:$0xff]  ;;  %v17454_v44 = vld [vmem:[#allocation10_spill] sm:$0xff] }
 0x66b   : > { %10717 = vmatprep.subr.bf16.mxu1 %v12091_v22  ;;  %v6999_v4 = vmax.f32 %v17437_v7, %v11756_v57  ;;  %v6998_v51 = vmax.f32 %v17439_v55, %v11755_v52  ;;  %v17445_v37 = vmax.f32 %v17444_v1, 0.0  ;;  %v17446_v52 = vld [vmem:[#allocation6_spill] sm:$0xff]  ;;  %v17451_v0 = vmax.f32 %v17450_v19, 0.0 }
 0x66c   : > { %v7155_v26 = vpack.c.bf16 %v7097_v46, %v7096_v9  ;;  %v17447_v45 = vmax.f32 %v17446_v52, 0.0  ;;  %v12100_v9 = vld [vmem:[%s16606_s5 + $0x2c8] sm:$0xff]  }
 0x66d   : > { %10714 = vmatmul.mubr.msk.bf16.vlgmr.msra.gmra.mrb[124].mxu1 %vm7205_vm2, %v7153_v12  ;;  %v7098_v14 = vmax.f32 %v6498_v50, %v6998_v51  ;;  %v7099_v27 = vmax.f32 %v6499_v60, %v6999_v4  ;;  %v17455_v60 = vmax.f32 %v17454_v44, 0.0 }
 0x66e   : > { %10718 = vmatpush3.bf16.msra.mxu1 %v12091_v22  ;;  %10725 = vmatprep.mubr.msk.bf16.mxu1 %vm7205_vm2, %v7154_v29 }
 0x66f   : > { %10719 = vmatprep.subr.bf16.mxu1 %v12092_v15  ;;  %v11759_v31 = vpop.permute.xlu0 %11758  ;;  %v7156_v10 = vpack.c.bf16 %v7099_v27, %v7098_v14 }
 0x670   : > { %v11761_v22 = vunpack.i.h.bf16 %v11759_v31  ;;  %v11760_v40 = vunpack.i.l.bf16 %v11759_v31 }
 0x671   : > { %v11764_v49 = vpop.permute.xlu1 %11763 }
 0x672   : > { %10720 = vmatpush3.bf16.msra.mxu1 %v12092_v15  ;;  %v11766_v54 = vunpack.i.h.bf16 %v11764_v49  ;;  %v11765_v30 = vunpack.i.l.bf16 %v11764_v49  ;;  %v6501_v6 = vmax.f32 %v17441_v47, %v11761_v22  ;;  %v17462_v47 = vld [vmem:[#allocation14_spill] sm:$0xff] }
 0x673   : > { %10721 = vmatprep.subr.bf16.mxu1 %v12093_v11 }
 0x674   : > { %v7001_v57 = vmax.f32 %v17445_v37, %v11766_v54  ;;  %v7000_v2 = vmax.f32 %v17447_v45, %v11765_v30  ;;  %v17465_v37 = vld [vmem:[#allocation13_spill] sm:$0xff]  ;;  %v17467_v45 = vld [vmem:[#allocation16_spill] sm:$0xff] }
 0x676   : > { %10722 = vmatpush3.bf16.msra.mxu1 %v12093_v11  ;;  %v6500_v11 = vmax.f32 %v17443_v21, %v11760_v40  ;;  %v7101_v50 = vmax.f32 %v6501_v6, %v7001_v57  ;;  %v17456_v40 = vld [vmem:[#allocation12_spill] sm:$0xff]  ;;  %v17463_v6 = vmax.f32 %v17462_v47, 0.0  ;;  %v12102_v21 = vld [vmem:[%s16606_s5 + $0x2d8] sm:$0xff]   ;;  %v17466_v57 = vmax.f32 %v17465_v37, 0.0 }
 0x677   : > { %10723 = vmatprep.subr.bf16.mxu1 %v12094_v43  ;;  %v11769_v8 = vpop.permute.xlu0 %11768  ;;  %v17457_v54 = vmax.f32 %v17456_v40, 0.0 }
 0x678   : > { %v11774_v24 = vpop.permute.xlu1 %11773  ;;  %v11771_v12 = vunpack.i.h.bf16 %v11769_v8  ;;  %v11770_v15 = vunpack.i.l.bf16 %v11769_v8  ;;  %v7100_v42 = vmax.f32 %v6500_v11, %v7000_v2  ;;  %v17464_v11 = vmax.f32 %v16147_v13, 0.0 }
 0x679   : > { %v11776_v29 = vunpack.i.h.bf16 %v11774_v24  ;;  %v11775_v28 = vunpack.i.l.bf16 %v11774_v24  ;;  %v17468_v2 = vmax.f32 %v17467_v45, 0.0 }
 0x67a   : > { %10724 = vmatpush3.bf16.msra.mxu1 %v12094_v43  ;;  %v6503_v63 = vmax.f32 %v17449_v62, %v11771_v12  ;;  %v6502_v36 = vmax.f32 %v17451_v0, %v11770_v15  ;;  %v17453_v43 = vmax.f32 %v17452_v61, 0.0  ;;  %v7157_v51 = vpack.c.bf16 %v7101_v50, %v7100_v42 }
 0x67b   : > { %10729 = vmatprep.subr.bf16.mxu1 %v12095_v16  ;;  %v7002_v17 = vmax.f32 %v17455_v60, %v11775_v28  ;;  %v17470_v62 = vmax.f32 %v17469_v56, 0.0  ;;  %v12104_v60 = vld [vmem:[%s16606_s5 + $0x2e8] sm:$0xff]  }
 0x67c   : > { %v7003_v33 = vmax.f32 %v17453_v43, %v11776_v29  ;;  %v17460_v29 = vld [vmem:[#allocation15_spill] sm:$0xff] }
 0x67d   : > { %10726 = vmatmul.mubr.msk.bf16.vlgmr.msra.gmra.mrb[124].mxu1 %vm7205_vm2, %v7155_v26  ;;  %v7102_v7 = vmax.f32 %v6502_v36, %v7002_v17  ;;  %v17461_v28 = vmax.f32 %v17460_v29, 0.0  ;;  %v12103_v36 = vld [vmem:[%s16606_s5 + $0x2e0] sm:$0xff]   ;;  %v17480_v29 = vmax.f32 %v16240_v20, 0.0  ;;  %v12108_v20 = vld [vmem:[%s16606_s5 + $0x308] sm:$0xff]  }
 0x67e   : > { %10730 = vmatpush3.bf16.msra.mxu1 %v12095_v16  ;;  %10737 = vmatprep.mubr.msk.bf16.mxu1 %vm7205_vm2, %v7156_v10  ;;  %v7103_v4 = vmax.f32 %v6503_v63, %v7003_v33 }
 0x67f   : > { %10731 = vmatprep.subr.bf16.mxu1 %v12096_v5  ;;  %v11779_v58 = vpop.permute.xlu0 %11778 }
 0x680   : > { %v7158_v46 = vpack.c.bf16 %v7103_v4, %v7102_v7  ;;  %v11781_v27 = vunpack.i.h.bf16 %v11779_v58  ;;  %v11780_v31 = vunpack.i.l.bf16 %v11779_v58 }
 0x681   : > { %v11784_v55 = vpop.permute.xlu1 %11783 }
 0x682   : > { %10732 = vmatpush3.bf16.msra.mxu1 %v12096_v5  ;;  %v11786_v49 = vunpack.i.h.bf16 %v11784_v55  ;;  %v11785_v26 = vunpack.i.l.bf16 %v11784_v55  ;;  %v12101_v5 = vld [vmem:[%s16606_s5 + $0x2d0] sm:$0xff]   ;;  %v6505_v30 = vmax.f32 %v17457_v54, %v11781_v27 }
 0x683   : > { %10733 = vmatprep.subr.bf16.mxu1 %v12097_v38  ;;  %v12105_v55 = vld [vmem:[%s16606_s5 + $0x2f0] sm:$0xff]  }
 0x684   : > { %v7005_v59 = vmax.f32 %v17461_v28, %v11786_v49  ;;  %v7004_v53 = vmax.f32 %v17463_v6, %v11785_v26  ;;  %v17473_v49 = vld [vmem:[#allocation19_spill] sm:$0xff] }
 0x685   : > { %v17474_v26 = vmax.f32 %v17473_v49, 0.0 }
 0x686   : > { %10734 = vmatpush3.bf16.msra.mxu1 %v12097_v38  ;;  %v17458_v38 = vld [vmem:[#allocation9_spill] sm:$0xff]  ;;  %v7105_v0 = vmax.f32 %v6505_v30, %v7005_v59  ;;  %v12106_v30 = vld [vmem:[%s16606_s5 + $0x2f8] sm:$0xff]   ;;  %v17481_v59 = vmax.f32 %v16225_v35, 0.0 }
 0x687   : > { %10735 = vmatprep.subr.bf16.mxu1 %v12098_v34  ;;  %v11789_v16 = vpop.permute.xlu0 %11788  ;;  %v17459_v12 = vmax.f32 %v17458_v38, 0.0 }
 0x688   : > { %v11794_v14 = vpop.permute.xlu1 %11793  ;;  %v11791_v10 = vunpack.i.h.bf16 %v11789_v16  ;;  %v11790_v8 = vunpack.i.l.bf16 %v11789_v16 }
 0x689   : > { %v11796_v24 = vunpack.i.h.bf16 %v11794_v14  ;;  %v11795_v22 = vunpack.i.l.bf16 %v11794_v14  ;;  %v6504_v15 = vmax.f32 %v17459_v12, %v11780_v31  ;;  %v17471_v14 = vld [vmem:[#allocation22_spill] sm:$0xff]  ;;  %v17479_v12 = vmax.f32 %v16218_v41, 0.0 }
 0x68a   : > { %10736 = vmatpush3.bf16.msra.mxu1 %v12098_v34  ;;  %v6507_v1 = vmax.f32 %v17464_v11, %v11791_v10  ;;  %v6506_v52 = vmax.f32 %v17466_v57, %v11790_v8  ;;  %v17472_v27 = vmax.f32 %v17471_v14, 0.0  ;;  %v17475_v10 = vld [vmem:[#allocation20_spill] sm:$0xff] }
 0x68b   : > { %10741 = vmatprep.subr.bf16.mxu1 %v12099_v18  ;;  %v7007_v34 = vmax.f32 %v17468_v2, %v11796_v24  ;;  %v7006_v63 = vmax.f32 %v17470_v62, %v11795_v22  ;;  %v7104_v19 = vmax.f32 %v6504_v15, %v7004_v53  ;;  %v17476_v8 = vmax.f32 %v17475_v10, 0.0  ;;  %v17477_v22 = vld [vmem:[#allocation17_spill] sm:$0xff]  ;;  %v10305_v10 = vld [vmem:[%s16609_s8] ss:$0 sm:$0xff] }
 0x68c   : > { %v17478_v40 = vmax.f32 %v17477_v22, 0.0  ;;  %v12109_v2 = vld [vmem:[%s16606_s5 + $0x310] sm:$0xff]   ;;  %v17483_v62 = vmax.f32 %v16266_v3, 0.0  ;;  %v12111_v3 = vld [vmem:[%s16608_s7] sm:$0xff]  }
 0x68d   : > { %10738 = vmatmul.mubr.msk.bf16.vlgmr.msra.gmra.mrb[124].mxu1 %vm7205_vm2, %v7157_v51  ;;  %v7106_v61 = vmax.f32 %v6506_v52, %v7006_v63  ;;  %v7107_v13 = vmax.f32 %v6507_v1, %v7007_v34  ;;  %v7159_v44 = vpack.c.bf16 %v7105_v0, %v7104_v19  ;;  %v17482_v34 = vmax.f32 %v16277_v32, 0.0 }
 0x68e   : > { %10742 = vmatpush3.bf16.msra.mxu1 %v12099_v18  ;;  %10749 = vmatprep.mubr.msk.bf16.mxu1 %vm7205_vm2, %v7158_v46  ;;  %v17484_v19 = vmax.f32 %v16280_v39, 0.0  ;;  %v12113_v39 = vld [vmem:[%s16608_s7 + $0x10] sm:$0xff]  }
 0x68f   : > { %10743 = vmatprep.subr.bf16.mxu1 %v12100_v9  ;;  %v11799_v43 = vpop.permute.xlu0 %11798  ;;  %v7160_v17 = vpack.c.bf16 %v7107_v13, %v7106_v61  ;;  %v12110_v13 = vld [vmem:[%s16606_s5 + $0x318] sm:$0xff]  }
 0x690   : > { %v11801_v18 = vunpack.i.h.bf16 %v11799_v43  ;;  %v11800_v7 = vunpack.i.l.bf16 %v11799_v43 }
 0x691   : > { %v11804_v33 = vpop.permute.xlu1 %11803 }
 0x692   : > { %10744 = vmatpush3.bf16.msra.mxu1 %v12100_v9  ;;  %v11806_v4 = vunpack.i.h.bf16 %v11804_v33  ;;  %v11805_v58 = vunpack.i.l.bf16 %v11804_v33  ;;  %v6509_v31 = vmax.f32 %v17472_v27, %v11801_v18  ;;  %v10304_v18 = vld [vmem:[%s16607_s6] ss:$0 sm:$0xff] }
 0x693   : > { %10745 = vmatprep.subr.bf16.mxu1 %v12101_v5 }
 0x694   : > { %v7009_v24 = vmax.f32 %v17476_v8, %v11806_v4  ;;  %v7008_v54 = vmax.f32 %v17478_v40, %v11805_v58 }
 0x696   : > { %10746 = vmatpush3.bf16.msra.mxu1 %v12101_v5  ;;  %v6508_v5 = vmax.f32 %v17474_v26, %v11800_v7  ;;  %v7109_v53 = vmax.f32 %v6509_v31, %v7009_v24 }
 0x697   : > { %10747 = vmatprep.subr.bf16.mxu1 %v12102_v21  ;;  %v11809_v42 = vpop.permute.xlu0 %11808 }
 0x698   : > { %v11814_v50 = vpop.permute.xlu1 %11813  ;;  %v11811_v51 = vunpack.i.h.bf16 %v11809_v42  ;;  %v11810_v9 = vunpack.i.l.bf16 %v11809_v42  ;;  %v7108_v6 = vmax.f32 %v6508_v5, %v7008_v54  ;;  %v12117_v42 = vld [vmem:[%s16608_s7 + $0x30] sm:$0xff]  }
 0x699   : > { %v11816_v46 = vunpack.i.h.bf16 %v11814_v50  ;;  %v11815_v16 = vunpack.i.l.bf16 %v11814_v50  ;;  %v12118_v50 = vld [vmem:[%s16608_s7 + $0x38] sm:$0xff]  }
 0x69a   : > { %10748 = vmatpush3.bf16.msra.mxu1 %v12102_v21  ;;  %v6511_v38 = vmax.f32 %v6008_v23, %v11811_v51  ;;  %v6510_v15 = vmax.f32 %v17479_v12, %v11810_v9  ;;  %v12107_v21 = vld [vmem:[%s16606_s5 + $0x300] sm:$0xff]   ;;  %v7161_v23 = vpack.c.bf16 %v7109_v53, %v7108_v6 }
 0x69b   : > { %10753 = vmatprep.subr.bf16.mxu1 %v12103_v36  ;;  %v7011_v28 = vmax.f32 %v17480_v29, %v11816_v46  ;;  %v7010_v47 = vmax.f32 %v17481_v59, %v11815_v16 }
 0x69d   : > { %10750 = vmatmul.mubr.msk.bf16.vlgmr.msra.gmra.mrb[124].mxu1 %vm7205_vm2, %v7159_v44  ;;  %v7110_v11 = vmax.f32 %v6510_v15, %v7010_v47  ;;  %v7111_v48 = vmax.f32 %v6511_v38, %v7011_v28  ;;  %v12114_v44 = vld [vmem:[%s16608_s7 + $0x18] sm:$0xff]  }
 0x69e   : > { %10754 = vmatpush3.bf16.msra.mxu1 %v12103_v36  ;;  %10761 = vmatprep.mubr.msk.bf16.mxu1 %vm7205_vm2, %v7160_v17  ;;  %v17485_v36 = vmax.f32 %v16273_v25, 0.0  ;;  %v12112_v25 = vld [vmem:[%s16608_s7 + $0x8] sm:$0xff]  }
 0x69f   : > { %10755 = vmatprep.subr.bf16.mxu1 %v12104_v60  ;;  %v11819_v41 = vpop.permute.xlu0 %11818  ;;  %v7162_v1 = vpack.c.bf16 %v7111_v48, %v7110_v11  ;;  %v12116_v17 = vld [vmem:[%s16608_s7 + $0x28] sm:$0xff]  }
 0x6a0   : > { %v11821_v37 = vunpack.i.h.bf16 %v11819_v41  ;;  %v11820_v57 = vunpack.i.l.bf16 %v11819_v41 }
 0x6a1   : > { %v11824_v35 = vpop.permute.xlu1 %11823 }
 0x6a2   : > { %10756 = vmatpush3.bf16.msra.mxu1 %v12104_v60  ;;  %v11826_v52 = vunpack.i.h.bf16 %v11824_v35  ;;  %v11825_v45 = vunpack.i.l.bf16 %v11824_v35  ;;  %v6513_v56 = vmax.f32 %v17482_v34, %v11821_v37  ;;  %v6512_v63 = vmax.f32 %v17483_v62, %v11820_v57  ;;  %v12115_v60 = vld [vmem:[%s16608_s7 + $0x20] sm:$0xff]  }
 0x6a3   : > { %10757 = vmatprep.subr.bf16.mxu1 %v12105_v55 }
 0x6a4   : > { %v7013_v0 = vmax.f32 %v17484_v19, %v11826_v52  ;;  %v7012_v61 = vmax.f32 %v17485_v36, %v11825_v45 }
 0x6a6   : > { %10758 = vmatpush3.bf16.msra.mxu1 %v12105_v55  ;;  %v7112_v43 = vmax.f32 %v6512_v63, %v7012_v61  ;;  %v7113_v33 = vmax.f32 %v6513_v56, %v7013_v0 }
 0x6a7   : > { %10759 = vmatprep.subr.bf16.mxu1 %v12106_v30 }
 0x6a8   : > { %v7163_v32 = vpack.c.bf16 %v7113_v33, %v7112_v43 }
 0x6aa   : > { %10760 = vmatpush3.bf16.msra.mxu1 %v12106_v30 }
 0x6ab   : > { %10765 = vmatprep.subr.bf16.mxu1 %v12107_v21 }
 0x6ad   : > { %10762 = vmatmul.mubr.msk.bf16.vlgmr.msra.gmra.mrb[124].mxu1 %vm7205_vm2, %v7161_v23 }
 0x6ae   : > { %10766 = vmatpush3.bf16.msra.mxu1 %v12107_v21  ;;  %10773 = vmatprep.mubr.msk.bf16.mxu1 %vm7205_vm2, %v7162_v1 }
 0x6af   : > { %10767 = vmatprep.subr.bf16.mxu1 %v12108_v20 }
 0x6b2   : > { %10768 = vmatpush3.bf16.msra.mxu1 %v12108_v20 }
 0x6b3   : > { %10769 = vmatprep.subr.bf16.mxu1 %v12109_v2 }
 0x6b6   : > { %10770 = vmatpush3.bf16.msra.mxu1 %v12109_v2 }
 0x6b7   : > { %10771 = vmatprep.subr.bf16.mxu1 %v12110_v13 }
 0x6ba   : > { %10772 = vmatpush3.bf16.msra.mxu1 %v12110_v13 }
 0x6bb   : > { %10777 = vmatprep.subr.bf16.mxu1 %v12111_v3 }
 0x6bd   : > { %10774 = vmatmul.mubr.msk.bf16.vlgmr.msra.gmra.mrb[124].mxu1 %vm7205_vm2, %v7163_v32 }
 0x6be   : > { %10778 = vmatpush3.bf16.msra.mxu1 %v12111_v3 }
 0x6bf   : > { %10779 = vmatprep.subr.bf16.mxu1 %v12112_v25 }
 0x6c2   : > { %10780 = vmatpush3.bf16.msra.mxu1 %v12112_v25 }
 0x6c3   : > { %10781 = vmatprep.subr.bf16.mxu1 %v12113_v39 }
 0x6c6   : > { %10782 = vmatpush3.bf16.msra.mxu1 %v12113_v39 }
 0x6c7   : > { %10783 = vmatprep.subr.bf16.mxu1 %v12114_v44 }
 0x6ca   : > { %10784 = vmatpush3.bf16.msra.mxu1 %v12114_v44 }
 0x6cb   : > { %10785 = vmatprep.subr.bf16.mxu1 %v12115_v60 }
 0x6ce   : > { %10786 = vmatpush3.bf16.msra.mxu1 %v12115_v60 }
 0x6cf   : > { %10787 = vmatprep.subr.bf16.mxu1 %v12116_v17 }
 0x6d2   : > { %10788 = vmatpush3.bf16.msra.mxu1 %v12116_v17 }
 0x6d3   : > { %10789 = vmatprep.subr.bf16.mxu1 %v12117_v42 }
 0x6d6   : > { %10790 = vmatpush3.bf16.msra.mxu1 %v12117_v42 }
 0x6d7   : > { %10791 = vmatprep.subr.bf16.mxu1 %v12118_v50 }
 0x6da   : > { %10792 = vmatpush3.bf16.msra.mxu1 %v12118_v50 }
 0x790   : > { %v10775_v7 = vpop.f32.mrb[124].mxu1 }
 0x791   : > { %v9465_v4 = vadd.f32 %v10775_v7, %v10304_v18  ;;  %v9437_v58 = vpop.f32.mrb[125].mxu1 }
 0x792   : > { %v9463_v55 = vadd.f32 %v10304_v18, %v9437_v58  ;;  %v10776_v51 = vpop.f32.mrb[126].mxu1 }
 0x793   : > { %v9466_v9 = vadd.f32 %v10776_v51, %v10304_v18  ;;  %v9440_v46 = vpop.f32.mrb[127].mxu1  ;;  %v9469_v14 = vmax.f32 %v9465_v4, 0.0 }
 0x794   : > { %v9464_v16 = vadd.f32 %v10304_v18, %v9440_v46  ;;  %v9467_v31 = vmax.f32 %v9463_v55, 0.0 }
 0x795   : > { %v9470_v27 = vmax.f32 %v9466_v9, 0.0 }
 0x796   : > { %v9468_v49 = vmax.f32 %v9464_v16, 0.0 }
 0x797   : > { %v9472_v26 = vpack.c.bf16 %v9470_v27, %v9469_v14 }
 0x798   : > { %v9471_v5 = vpack.c.bf16 %v9468_v49, %v9467_v31 }
 0x79a   : > { %10793 = vmatprep.mubr.bf16.mxu1 %v9471_v5 }
 0x79b   : > { %10794 = vmatmul.mubr.bf16.vlgmr.msra.gmra.mrb[128].mxu1 %v9472_v26 }
 0x86e   : > { %v10795_v8 = vpop.f32.mrb[128].mxu1 }
 0x86f   : > { %v9578_v24 = vpop.f32.mrb[129].mxu1  ;;  %v9587_v38 = vadd.f32 %v10795_v8, %v10305_v10 }
 0x870   : > { %v9579_v22 = vadd.f32 %v10305_v10, %v9578_v24  ;;  %v10796_v40 = vpop.f32.mrb[130].mxu1 }
 0x871   : > { %v9581_v54 = vpop.f32.mrb[131].mxu1  ;;  %v9590_v12 = vadd.f32 %v10796_v40, %v10305_v10  ;;  %9595 = vst [vmem:[%s947_s23 + $0x10] sm:$0xff] %v9587_v38 }
 0x872   : > { %9593 = vst [vmem:[%s947_s23] sm:$0xff] %v9579_v22  ;;  %v9582_v30 = vadd.f32 %v10305_v10, %v9581_v54 }
 0x873   : > { %9596 = vst [vmem:[%s947_s23 + $0x18] sm:$0xff] %v9590_v12 }
 0x874   : > { %9594 = vst [vmem:[%s947_s23 + $0x8] sm:$0xff] %v9582_v30 }
 0x875 PF: > { %p16_p9 = scmp.ge.s32.totalorder %s12285_s13, 4   ;;  %s17486_s30 = smov %s12210_s10 }
 0x876   : > { %s17487_s10 = smov %s12294_s16  ;;  %s17488_s11 = smov %s12285_s13 }
 0x877   :  { %18 = sbr.rel (!%p16_p9) target bundleno = 2 (0x2), region = 156 }

</bundles_post_ra>
